<compile_context>
chip_gen: v7x
topology: tpu7x:2x2x1
jax: 0.10.0
libtpu: 0.0.40
codegen_flags: <defaults>
</compile_context>

<pallas_src>
import functools

import numpy as np
import jax
import jax.numpy as jnp
from jax.experimental import pallas as pl
from jax.experimental.pallas import tpu as pltpu


# ----------------------------------------------------------------------------
# TripletFeatures index set, index_type='FWM'
# ----------------------------------------------------------------------------
def get_fwm_index(M: int, rho: float):
    """FWM perturbation index set.

    Terms with m*n == 0 (SPM / IXPM) are handled multiplicatively by the
    conv/phase branch of EqAMPBC, so the FWM feature set keeps only m*n != 0,
    with the n >= m reduction (coefficient symmetry C_{m,n} == C_{n,m}) and the
    window constraint |m+n| <= M//2 so E_{k+m+n} stays inside the window.
    """
    N = M // 2
    S = []
    for m in range(-N, N + 1):
        for n in range(m, N + 1):
            if m == 0 or n == 0:
                continue
            if abs(m * n) > rho * N:
                continue
            if abs(m + n) > N:
                continue
            S.append((m, n))
    return S


# ----------------------------------------------------------------------------
# Pallas kernel: one grid step = 8x128 = 1024 independent windows.
# Refs:
#   xr/xi : (Nmodes, M, 8, 128)  real/imag planes of the unscaled signal
#   p     : (8, 128)             per-window power P0 (mW per mode)
#   wr/wi : (Nmodes, hdim)       fwm_nn ComplexLinear weights      (SMEM)
#   h1/h2 : (M,)                 xpm_conv1 / xpm_conv2 taps        (SMEM)
#   c00   : (1,)                 C00                               (SMEM)
#   or/oi : (Nmodes, 8, 128)     real/imag output planes
# ----------------------------------------------------------------------------
def _ampbc_kernel(xr_ref, xi_ref, p_ref, wr_ref, wi_ref, h1_ref, h2_ref,
                  c00_ref, or_ref, oi_ref, *, index, M, Nmodes):
    N = M // 2
    P = p_ref[...]                                   # (8, 128)
    zeros = jnp.zeros_like(P)

    def ld(mode, t):                                 # (8,128) real & imag of x[:, t, mode]
        return xr_ref[mode, t], xi_ref[mode, t]

    # center-tap values (reused by phi / IXIXPM / output)
    cr = [None] * Nmodes
    ci = [None] * Nmodes
    for i in range(Nmodes):
        cr[i], ci[i] = ld(i, N)

    # ------------------------------------------------------------------
    # FWM branch.  A(m,n) = sum_p E_{N+n,p} conj(E_{N+m+n,p}) is identical for
    # every output mode -> computed once per pair.  For the symmetrized (n,m)
    # term, A(n,m) shares conj(E_{N+m+n,p}), so both are built in one pol pass.
    # ------------------------------------------------------------------
    fwm_r = [zeros] * Nmodes
    fwm_i = [zeros] * Nmodes
    for j, (m, n) in enumerate(index):
        sym = m != n
        ar, ai = zeros, zeros
        br, bi = zeros, zeros
        for p in range(Nmodes):
            enr, eni = ld(p, N + n)
            fr, fi = ld(p, N + m + n)                # shared conjugated factor
            ar = ar + (enr * fr + eni * fi)          # Re(E_n conj(E_{m+n}))
            ai = ai + (eni * fr - enr * fi)          # Im(E_n conj(E_{m+n}))
            if sym:
                emr, emi = ld(p, N + m)
                br = br + (emr * fr + emi * fi)
                bi = bi + (emi * fr - emr * fi)
        for i in range(Nmodes):
            gmr, gmi = ld(i, N + m)
            tr = ar * gmr - ai * gmi
            ti = ar * gmi + ai * gmr
            if sym:
                gnr, gni = ld(i, N + n)
                tr = tr + (br * gnr - bi * gni)
                ti = ti + (br * gni + bi * gnr)
            wr = wr_ref[i, j]
            wi = wi_ref[i, j]
            fwm_r[i] = fwm_r[i] + (wr * tr - wi * ti)
            fwm_i[i] = fwm_i[i] + (wr * ti + wi * tr)

    # ------------------------------------------------------------------
    # XPM branch (zero-center convolutions over the window) + IXIXPM.
    # ------------------------------------------------------------------
    phi_acc = [zeros] * Nmodes        # sum_{t != N} h1[t] * ps[t, i]
    v_r = [zeros] * Nmodes            # sum_{t != N} h2[t] * Re(u[t, i])
    v_i = [zeros] * Nmodes            # sum_{t != N} h2[t] * Im(u[t, i])
    for t in range(M):
        if t == N:                    # zero-center filter: center tap is ignored
            continue
        h1t = h1_ref[t]
        h2t = h2_ref[t]
        xt_r = [None] * Nmodes
        xt_i = [None] * Nmodes
        pw = [None] * Nmodes
        for i in range(Nmodes):
            xt_r[i], xt_i[i] = ld(i, t)
            pw[i] = xt_r[i] * xt_r[i] + xt_i[i] * xt_i[i]
        for i in range(Nmodes):
            o = (i - 1) % Nmodes                      # torch.roll(+1) source mode
            phi_acc[i] = phi_acc[i] + h1t * (2.0 * pw[i] + pw[o])
            # u[t, i] = x[t, i] * conj(x[t, o])
            ur = xt_r[i] * xt_r[o] + xt_i[i] * xt_i[o]
            ui = xt_i[i] * xt_r[o] - xt_r[i] * xt_i[o]
            v_r[i] = v_r[i] + h2t * ur
            v_i[i] = v_i[i] + h2t * ui

    # C00 * sum_i |x[N, i]|^2
    pw_c = zeros
    for i in range(Nmodes):
        pw_c = pw_c + (cr[i] * cr[i] + ci[i] * ci[i])
    c00 = c00_ref[0]

    for i in range(Nmodes):
        o = (i - 1) % Nmodes
        phi = P * (c00 * pw_c + 2.0 * phi_acc[i])     # scaled power == P * unscaled
        cph = jnp.cos(phi)
        sph = jnp.sin(phi)
        # IXIXPM (power-factored): 1j * x[N, o] * v_i
        ix_r = -(cr[o] * v_i[i] + ci[o] * v_r[i])
        ix_i = cr[o] * v_r[i] - ci[o] * v_i[i]
        or_ref[i] = cr[i] * cph - ci[i] * sph + P * (fwm_r[i] + ix_r)
        oi_ref[i] = cr[i] * sph + ci[i] * cph + P * (fwm_i[i] + ix_i)


# ----------------------------------------------------------------------------
# Wrapper: layout (batch -> 8x128 vreg tiles), power computation, weight expand.
# ----------------------------------------------------------------------------
def eq_ampbc(x, task_info, w_r, w_i, h1, h2, c00, *, M, rho=1.0):
    """Pallas forward of EqAMPBC.

    x         : [batch, M, Nmodes] complex64
    task_info : [batch, 4] float32 ([P_dBm, Fi, Fs, Nch])
    w_r, w_i  : [fwm_modes, hdim] float32  (fwm_nn ComplexLinear weights)
    h1, h2    : [M] float32  (xpm_conv1 / xpm_conv2 weight[0, 0, :])
    c00       : scalar float32
    returns   : [batch, Nmodes] complex64
    """
    batch, L, Nmodes = x.shape
    assert L == M, "EqAMPBC consumes one M-sample window per example"
    index = get_fwm_index(M, rho)
    hdim = len(index)
    fwm_modes = w_r.shape[0]
    assert w_r.shape == (fwm_modes, hdim) and w_i.shape == (fwm_modes, hdim)

    sel = jnp.asarray([min(i, fwm_modes - 1) for i in range(Nmodes)])
    wr_full = jnp.asarray(w_r, jnp.float32)[sel]          # [Nmodes, hdim]
    wi_full = jnp.asarray(w_i, jnp.float32)[sel]
    h1 = jnp.asarray(h1, jnp.float32)
    h2 = jnp.asarray(h2, jnp.float32)
    c00 = jnp.asarray(c00, jnp.float32).reshape(1)

    # batch tiling: 8 sublanes x 128 lanes of independent windows per grid step
    SUB, LANE = 8, 128
    TB = SUB * LANE
    b_pad = max(TB, ((batch + TB - 1) // TB) * TB)
    rows = b_pad // LANE
    grid = rows // SUB

    xr = jnp.transpose(jnp.real(x).astype(jnp.float32), (2, 1, 0))   # [Nmodes, M, B]
    xi = jnp.transpose(jnp.imag(x).astype(jnp.float32), (2, 1, 0))
    pad = ((0, 0), (0, 0), (0, b_pad - batch))
    xr = jnp.pad(xr, pad).reshape(Nmodes, M, rows, LANE)
    xi = jnp.pad(xi, pad).reshape(Nmodes, M, rows, LANE)

    # get_power: launch power dBm -> mW per mode
    P = (10.0 ** (task_info[:, 0].astype(jnp.float32) / 10.0)) / Nmodes
    P = jnp.pad(P, (0, b_pad - batch)).reshape(rows, LANE)

    kernel = functools.partial(_ampbc_kernel, index=tuple(index), M=M, Nmodes=Nmodes)
    smem = pl.BlockSpec(memory_space=pltpu.MemorySpace.SMEM)

    out_r, out_i = pl.pallas_call(
        kernel,
        out_shape=(jax.ShapeDtypeStruct((Nmodes, rows, LANE), jnp.float32),
                   jax.ShapeDtypeStruct((Nmodes, rows, LANE), jnp.float32)),
        grid=(grid,),
        in_specs=[
            pl.BlockSpec((Nmodes, M, SUB, LANE), lambda g: (0, 0, g, 0)),
            pl.BlockSpec((Nmodes, M, SUB, LANE), lambda g: (0, 0, g, 0)),
            pl.BlockSpec((SUB, LANE), lambda g: (g, 0)),
            smem,   # wr  [Nmodes, hdim]
            smem,   # wi  [Nmodes, hdim]
            smem,   # h1  [M]
            smem,   # h2  [M]
            smem,   # c00 [1]
        ],
        out_specs=(
            pl.BlockSpec((Nmodes, SUB, LANE), lambda g: (0, g, 0)),
            pl.BlockSpec((Nmodes, SUB, LANE), lambda g: (0, g, 0)),
        ),
        compiler_params=pltpu.CompilerParams(dimension_semantics=("parallel",)),
    )(xr, xi, P, wr_full, wi_full, h1, h2, c00)

    out = jax.lax.complex(out_r, out_i).reshape(Nmodes, b_pad)
    return jnp.transpose(out, (1, 0))[:batch]


# ----------------------------------------------------------------------------
# Pure-JAX reference mirroring the PyTorch forward literally (for validation)
# ----------------------------------------------------------------------------
def eq_ampbc_ref(x, task_info, w_r, w_i, h1, h2, c00, *, M, rho=1.0):
    batch, L, Nmodes = x.shape
    N = M // 2
    index = get_fwm_index(M, rho)
    fwm_modes = w_r.shape[0]
    C = w_r.astype(jnp.float32) + 1j * w_i.astype(jnp.float32)       # [fwm_modes, hdim]
    h1 = jnp.asarray(h1, jnp.float32)
    h2 = jnp.asarray(h2, jnp.float32)

    P = (10.0 ** (task_info[:, 0].astype(jnp.float32) / 10.0)) / Nmodes
    E = x.astype(jnp.complex64) * jnp.sqrt(P)[:, None, None]

    def zcv(h, z_real):                        # zero-center conv, window == output 0
        full = jnp.einsum("t,btn->bn", h, z_real)
        return full - h[N] * z_real[:, N, :]

    def trip(m, n):
        pr = E[:, N + n, :] * jnp.conj(E[:, N + m + n, :])
        if Nmodes > 1:
            pr = pr + jnp.roll(pr, 1, axis=-1)
        return pr * E[:, N + m, :]

    if len(index) > 0:
        feats = []
        for (m, n) in index:
            f = trip(m, n)
            if m != n:
                f = f + trip(n, m)
            feats.append(f)
        F = jnp.stack(feats, axis=-1)                                  # [B, Nmodes, hdim]
        ifwm = jnp.stack(
            [F[:, i, :] @ C[min(fwm_modes - 1, i)] for i in range(Nmodes)], axis=-1)
    else:
        ifwm = jnp.zeros((batch, Nmodes), jnp.complex64)

    power = jnp.abs(E) ** 2
    ps = 2.0 * power + jnp.roll(power, 1, axis=-1)
    phi = c00 * jnp.sum(power[:, N, :], axis=-1, keepdims=True) + 2.0 * zcv(h1, ps)

    u = E * jnp.roll(jnp.conj(E), 1, axis=-1)
    v = zcv(h2, jnp.real(u)) + 1j * zcv(h2, jnp.imag(u))
    ix = 1j * jnp.roll(E[:, N, :], 1, axis=-1) * v

    out = ifwm + ix + E[:, N, :] * jnp.exp(1j * phi)
    return out / jnp.sqrt(P)[:, None]


if __name__ == "__main__":
    key = jax.random.PRNGKey(0)
    M, rho = 9, 1.0                 # module default is M=41; M=9 keeps the demo small
    batch, Nmodes = 200, 2
    fwm_share = False
    fwm_modes = 1 if fwm_share else 2

    index = get_fwm_index(M, rho)
    hdim = len(index)

    k = jax.random.split(key, 8)
    # NOTE: EqAMPBC.initialize_weights() zeroes all parameters (which would make
    # the forward trivially x[:, M//2, :]); random values are used here so the
    # test exercises every branch of the forward pass.
    bound = 1.0 / float(np.sqrt(max(hdim, 1)))
    w_r = jax.random.uniform(k[0], (fwm_modes, hdim), jnp.float32, -bound, bound)
    w_i = jax.random.uniform(k[1], (fwm_modes, hdim), jnp.float32, -bound, bound)
    h1 = jax.random.uniform(k[2], (M,), jnp.float32, -0.2, 0.2)
    h2 = jax.random.uniform(k[3], (M,), jnp.float32, -0.2, 0.2)
    c00 = jax.random.uniform(k[4], (), jnp.float32, -0.2, 0.2)

    xr = jax.random.normal(k[5], (batch, M, Nmodes), jnp.float32)
    xi = jax.random.normal(k[6], (batch, M, Nmodes), jnp.float32)
    x = jax.lax.complex(xr, xi)                                       # [batch, M, Nmodes]

    task_info = jnp.stack([
        jax.random.uniform(k[7], (batch,), jnp.float32, -2.0, 2.0),   # launch power [dBm]
        jnp.full((batch,), 193.1e12, jnp.float32),                    # Fi
        jnp.full((batch,), 80e9, jnp.float32),                        # Fs
        jnp.full((batch,), 1.0, jnp.float32),                         # Nch
    ], axis=1)                                                        # [batch, 4]

    out = eq_ampbc(x, task_info, w_r, w_i, h1, h2, c00, M=M, rho=rho)
    out = jax.block_until_ready(out)
    assert out.shape == (batch, Nmodes) and out.dtype == jnp.complex64

    ref = eq_ampbc_ref(x, task_info, w_r, w_i, h1, h2, c00, M=M, rho=rho)
    np.testing.assert_allclose(np.asarray(out), np.asarray(ref), rtol=2e-3, atol=2e-3)

    # TODO(synk): `decision=True` branch of TripletFeatures (symbol decision) not implemented.
    print("KERNEL_OK")
</pallas_src>

<mosaic_0001>
module attributes {stable_mosaic.version = 11 : i64} {
  func.func @_ampbc_kernel(%arg0: i32, %arg1: memref<2x9x8x128xf32, #tpu.memory_space<vmem>>, %arg2: memref<2x9x8x128xf32, #tpu.memory_space<vmem>>, %arg3: memref<8x128xf32, #tpu.memory_space<vmem>>, %arg4: memref<2x16xf32, #tpu.memory_space<smem>>, %arg5: memref<2x16xf32, #tpu.memory_space<smem>>, %arg6: memref<9xf32, #tpu.memory_space<smem>>, %arg7: memref<9xf32, #tpu.memory_space<smem>>, %arg8: memref<1xf32, #tpu.memory_space<smem>>, %arg9: memref<2x8x128xf32, #tpu.memory_space<vmem>>, %arg10: memref<2x8x128xf32, #tpu.memory_space<vmem>>) attributes {dimension_semantics = [#tpu.dimension_semantics<parallel>], iteration_bounds = array<i64: 1>, scalar_prefetch = 0 : i64, scratch_operands = 0 : i64, tpu.core_type = #tpu.core_type<tc>, window_params = [{transform_indices = @transform_0, window_bounds = array<i64: 2, 9, 8, 128>}, {transform_indices = @transform_1, window_bounds = array<i64: 2, 9, 8, 128>}, {transform_indices = @transform_2, window_bounds = array<i64: 8, 128>}, {transform_indices = @transform_3, window_bounds = array<i64: 2, 16>}, {transform_indices = @transform_4, window_bounds = array<i64: 2, 16>}, {transform_indices = @transform_5, window_bounds = array<i64: 9>}, {transform_indices = @transform_6, window_bounds = array<i64: 9>}, {transform_indices = @transform_7, window_bounds = array<i64: 1>}, {transform_indices = @transform_8, window_bounds = array<i64: 2, 8, 128>}, {transform_indices = @transform_9, window_bounds = array<i64: 2, 8, 128>}]} {
    %c0 = arith.constant 0 : index
    %c0_0 = arith.constant 0 : index
    %0 = vector.load %arg3[%c0, %c0_0] : memref<8x128xf32, #tpu.memory_space<vmem>>, vector<8x128xf32>
    %cst = arith.constant 0.000000e+00 : f32
    %1 = vector.broadcast %cst : f32 to vector<8x128xf32>
    %c0_1 = arith.constant 0 : index
    %c4 = arith.constant 4 : index
    %c0_2 = arith.constant 0 : index
    %c0_3 = arith.constant 0 : index
    %2 = vector.load %arg1[%c0_1, %c4, %c0_2, %c0_3] : memref<2x9x8x128xf32, #tpu.memory_space<vmem>>, vector<1x1x8x128xf32>
    %3 = vector.shape_cast %2 : vector<1x1x8x128xf32> to vector<8x128xf32>
    %c0_4 = arith.constant 0 : index
    %c4_5 = arith.constant 4 : index
    %c0_6 = arith.constant 0 : index
    %c0_7 = arith.constant 0 : index
    %4 = vector.load %arg2[%c0_4, %c4_5, %c0_6, %c0_7] : memref<2x9x8x128xf32, #tpu.memory_space<vmem>>, vector<1x1x8x128xf32>
    %5 = vector.shape_cast %4 : vector<1x1x8x128xf32> to vector<8x128xf32>
    %c1 = arith.constant 1 : index
    %c4_8 = arith.constant 4 : index
    %c0_9 = arith.constant 0 : index
    %c0_10 = arith.constant 0 : index
    %6 = vector.load %arg1[%c1, %c4_8, %c0_9, %c0_10] : memref<2x9x8x128xf32, #tpu.memory_space<vmem>>, vector<1x1x8x128xf32>
    %7 = vector.shape_cast %6 : vector<1x1x8x128xf32> to vector<8x128xf32>
    %c1_11 = arith.constant 1 : index
    %c4_12 = arith.constant 4 : index
    %c0_13 = arith.constant 0 : index
    %c0_14 = arith.constant 0 : index
    %8 = vector.load %arg2[%c1_11, %c4_12, %c0_13, %c0_14] : memref<2x9x8x128xf32, #tpu.memory_space<vmem>>, vector<1x1x8x128xf32>
    %9 = vector.shape_cast %8 : vector<1x1x8x128xf32> to vector<8x128xf32>
    %c0_15 = arith.constant 0 : index
    %c5 = arith.constant 5 : index
    %c0_16 = arith.constant 0 : index
    %c0_17 = arith.constant 0 : index
    %10 = vector.load %arg1[%c0_15, %c5, %c0_16, %c0_17] : memref<2x9x8x128xf32, #tpu.memory_space<vmem>>, vector<1x1x8x128xf32>
    %11 = vector.shape_cast %10 : vector<1x1x8x128xf32> to vector<8x128xf32>
    %c0_18 = arith.constant 0 : index
    %c5_19 = arith.constant 5 : index
    %c0_20 = arith.constant 0 : index
    %c0_21 = arith.constant 0 : index
    %12 = vector.load %arg2[%c0_18, %c5_19, %c0_20, %c0_21] : memref<2x9x8x128xf32, #tpu.memory_space<vmem>>, vector<1x1x8x128xf32>
    %13 = vector.shape_cast %12 : vector<1x1x8x128xf32> to vector<8x128xf32>
    %c0_22 = arith.constant 0 : index
    %c1_23 = arith.constant 1 : index
    %c0_24 = arith.constant 0 : index
    %c0_25 = arith.constant 0 : index
    %14 = vector.load %arg1[%c0_22, %c1_23, %c0_24, %c0_25] : memref<2x9x8x128xf32, #tpu.memory_space<vmem>>, vector<1x1x8x128xf32>
    %15 = vector.shape_cast %14 : vector<1x1x8x128xf32> to vector<8x128xf32>
    %c0_26 = arith.constant 0 : index
    %c1_27 = arith.constant 1 : index
    %c0_28 = arith.constant 0 : index
    %c0_29 = arith.constant 0 : index
    %16 = vector.load %arg2[%c0_26, %c1_27, %c0_28, %c0_29] : memref<2x9x8x128xf32, #tpu.memory_space<vmem>>, vector<1x1x8x128xf32>
    %17 = vector.shape_cast %16 : vector<1x1x8x128xf32> to vector<8x128xf32>
    %18 = arith.mulf %11, %15 : vector<8x128xf32>
    %19 = arith.mulf %13, %17 : vector<8x128xf32>
    %20 = arith.addf %18, %19 : vector<8x128xf32>
    %21 = arith.addf %1, %20 : vector<8x128xf32>
    %22 = arith.mulf %13, %15 : vector<8x128xf32>
    %23 = arith.mulf %11, %17 : vector<8x128xf32>
    %24 = arith.subf %22, %23 : vector<8x128xf32>
    %25 = arith.addf %1, %24 : vector<8x128xf32>
    %c0_30 = arith.constant 0 : index
    %c0_31 = arith.constant 0 : index
    %c0_32 = arith.constant 0 : index
    %c0_33 = arith.constant 0 : index
    %26 = vector.load %arg1[%c0_30, %c0_31, %c0_32, %c0_33] : memref<2x9x8x128xf32, #tpu.memory_space<vmem>>, vector<1x1x8x128xf32>
    %27 = vector.shape_cast %26 : vector<1x1x8x128xf32> to vector<8x128xf32>
    %c0_34 = arith.constant 0 : index
    %c0_35 = arith.constant 0 : index
    %c0_36 = arith.constant 0 : index
    %c0_37 = arith.constant 0 : index
    %28 = vector.load %arg2[%c0_34, %c0_35, %c0_36, %c0_37] : memref<2x9x8x128xf32, #tpu.memory_space<vmem>>, vector<1x1x8x128xf32>
    %29 = vector.shape_cast %28 : vector<1x1x8x128xf32> to vector<8x128xf32>
    %30 = arith.mulf %27, %15 : vector<8x128xf32>
    %31 = arith.mulf %29, %17 : vector<8x128xf32>
    %32 = arith.addf %30, %31 : vector<8x128xf32>
    %33 = arith.addf %1, %32 : vector<8x128xf32>
    %34 = arith.mulf %29, %15 : vector<8x128xf32>
    %35 = arith.mulf %27, %17 : vector<8x128xf32>
    %36 = arith.subf %34, %35 : vector<8x128xf32>
    %37 = arith.addf %1, %36 : vector<8x128xf32>
    %c1_38 = arith.constant 1 : index
    %c5_39 = arith.constant 5 : index
    %c0_40 = arith.constant 0 : index
    %c0_41 = arith.constant 0 : index
    %38 = vector.load %arg1[%c1_38, %c5_39, %c0_40, %c0_41] : memref<2x9x8x128xf32, #tpu.memory_space<vmem>>, vector<1x1x8x128xf32>
    %39 = vector.shape_cast %38 : vector<1x1x8x128xf32> to vector<8x128xf32>
    %c1_42 = arith.constant 1 : index
    %c5_43 = arith.constant 5 : index
    %c0_44 = arith.constant 0 : index
    %c0_45 = arith.constant 0 : index
    %40 = vector.load %arg2[%c1_42, %c5_43, %c0_44, %c0_45] : memref<2x9x8x128xf32, #tpu.memory_space<vmem>>, vector<1x1x8x128xf32>
    %41 = vector.shape_cast %40 : vector<1x1x8x128xf32> to vector<8x128xf32>
    %c1_46 = arith.constant 1 : index
    %c1_47 = arith.constant 1 : index
    %c0_48 = arith.constant 0 : index
    %c0_49 = arith.constant 0 : index
    %42 = vector.load %arg1[%c1_46, %c1_47, %c0_48, %c0_49] : memref<2x9x8x128xf32, #tpu.memory_space<vmem>>, vector<1x1x8x128xf32>
    %43 = vector.shape_cast %42 : vector<1x1x8x128xf32> to vector<8x128xf32>
    %c1_50 = arith.constant 1 : index
    %c1_51 = arith.constant 1 : index
    %c0_52 = arith.constant 0 : index
    %c0_53 = arith.constant 0 : index
    %44 = vector.load %arg2[%c1_50, %c1_51, %c0_52, %c0_53] : memref<2x9x8x128xf32, #tpu.memory_space<vmem>>, vector<1x1x8x128xf32>
    %45 = vector.shape_cast %44 : vector<1x1x8x128xf32> to vector<8x128xf32>
    %46 = arith.mulf %39, %43 : vector<8x128xf32>
    %47 = arith.mulf %41, %45 : vector<8x128xf32>
    %48 = arith.addf %46, %47 : vector<8x128xf32>
    %49 = arith.addf %21, %48 : vector<8x128xf32>
    %50 = arith.mulf %41, %43 : vector<8x128xf32>
    %51 = arith.mulf %39, %45 : vector<8x128xf32>
    %52 = arith.subf %50, %51 : vector<8x128xf32>
    %53 = arith.addf %25, %52 : vector<8x128xf32>
    %c1_54 = arith.constant 1 : index
    %c0_55 = arith.constant 0 : index
    %c0_56 = arith.constant 0 : index
    %c0_57 = arith.constant 0 : index
    %54 = vector.load %arg1[%c1_54, %c0_55, %c0_56, %c0_57] : memref<2x9x8x128xf32, #tpu.memory_space<vmem>>, vector<1x1x8x128xf32>
    %55 = vector.shape_cast %54 : vector<1x1x8x128xf32> to vector<8x128xf32>
    %c1_58 = arith.constant 1 : index
    %c0_59 = arith.constant 0 : index
    %c0_60 = arith.constant 0 : index
    %c0_61 = arith.constant 0 : index
    %56 = vector.load %arg2[%c1_58, %c0_59, %c0_60, %c0_61] : memref<2x9x8x128xf32, #tpu.memory_space<vmem>>, vector<1x1x8x128xf32>
    %57 = vector.shape_cast %56 : vector<1x1x8x128xf32> to vector<8x128xf32>
    %58 = arith.mulf %55, %43 : vector<8x128xf32>
    %59 = arith.mulf %57, %45 : vector<8x128xf32>
    %60 = arith.addf %58, %59 : vector<8x128xf32>
    %61 = arith.addf %33, %60 : vector<8x128xf32>
    %62 = arith.mulf %57, %43 : vector<8x128xf32>
    %63 = arith.mulf %55, %45 : vector<8x128xf32>
    %64 = arith.subf %62, %63 : vector<8x128xf32>
    %65 = arith.addf %37, %64 : vector<8x128xf32>
    %c0_62 = arith.constant 0 : index
    %c0_63 = arith.constant 0 : index
    %c0_64 = arith.constant 0 : index
    %c0_65 = arith.constant 0 : index
    %66 = vector.load %arg1[%c0_62, %c0_63, %c0_64, %c0_65] : memref<2x9x8x128xf32, #tpu.memory_space<vmem>>, vector<1x1x8x128xf32>
    %67 = vector.shape_cast %66 : vector<1x1x8x128xf32> to vector<8x128xf32>
    %c0_66 = arith.constant 0 : index
    %c0_67 = arith.constant 0 : index
    %c0_68 = arith.constant 0 : index
    %c0_69 = arith.constant 0 : index
    %68 = vector.load %arg2[%c0_66, %c0_67, %c0_68, %c0_69] : memref<2x9x8x128xf32, #tpu.memory_space<vmem>>, vector<1x1x8x128xf32>
    %69 = vector.shape_cast %68 : vector<1x1x8x128xf32> to vector<8x128xf32>
    %70 = arith.mulf %49, %67 : vector<8x128xf32>
    %71 = arith.mulf %53, %69 : vector<8x128xf32>
    %72 = arith.subf %70, %71 : vector<8x128xf32>
    %73 = arith.mulf %49, %69 : vector<8x128xf32>
    %74 = arith.mulf %53, %67 : vector<8x128xf32>
    %75 = arith.addf %73, %74 : vector<8x128xf32>
    %c0_70 = arith.constant 0 : index
    %c5_71 = arith.constant 5 : index
    %c0_72 = arith.constant 0 : index
    %c0_73 = arith.constant 0 : index
    %76 = vector.load %arg1[%c0_70, %c5_71, %c0_72, %c0_73] : memref<2x9x8x128xf32, #tpu.memory_space<vmem>>, vector<1x1x8x128xf32>
    %77 = vector.shape_cast %76 : vector<1x1x8x128xf32> to vector<8x128xf32>
    %c0_74 = arith.constant 0 : index
    %c5_75 = arith.constant 5 : index
    %c0_76 = arith.constant 0 : index
    %c0_77 = arith.constant 0 : index
    %78 = vector.load %arg2[%c0_74, %c5_75, %c0_76, %c0_77] : memref<2x9x8x128xf32, #tpu.memory_space<vmem>>, vector<1x1x8x128xf32>
    %79 = vector.shape_cast %78 : vector<1x1x8x128xf32> to vector<8x128xf32>
    %80 = arith.mulf %61, %77 : vector<8x128xf32>
    %81 = arith.mulf %65, %79 : vector<8x128xf32>
    %82 = arith.subf %80, %81 : vector<8x128xf32>
    %83 = arith.addf %72, %82 : vector<8x128xf32>
    %84 = arith.mulf %61, %79 : vector<8x128xf32>
    %85 = arith.mulf %65, %77 : vector<8x128xf32>
    %86 = arith.addf %84, %85 : vector<8x128xf32>
    %87 = arith.addf %75, %86 : vector<8x128xf32>
    %c0_78 = arith.constant 0 : index
    %c0_79 = arith.constant 0 : index
    %88 = memref.load %arg4[%c0_78, %c0_79] : memref<2x16xf32, #tpu.memory_space<smem>>
    %c0_80 = arith.constant 0 : index
    %c0_81 = arith.constant 0 : index
    %89 = memref.load %arg5[%c0_80, %c0_81] : memref<2x16xf32, #tpu.memory_space<smem>>
    %90 = vector.broadcast %88 : f32 to vector<8x128xf32>
    %91 = arith.mulf %90, %83 : vector<8x128xf32>
    %92 = vector.broadcast %89 : f32 to vector<8x128xf32>
    %93 = arith.mulf %92, %87 : vector<8x128xf32>
    %94 = arith.subf %91, %93 : vector<8x128xf32>
    %95 = arith.addf %1, %94 : vector<8x128xf32>
    %96 = vector.broadcast %88 : f32 to vector<8x128xf32>
    %97 = arith.mulf %96, %87 : vector<8x128xf32>
    %98 = vector.broadcast %89 : f32 to vector<8x128xf32>
    %99 = arith.mulf %98, %83 : vector<8x128xf32>
    %100 = arith.addf %97, %99 : vector<8x128xf32>
    %101 = arith.addf %1, %100 : vector<8x128xf32>
    %c1_82 = arith.constant 1 : index
    %c0_83 = arith.constant 0 : index
    %c0_84 = arith.constant 0 : index
    %c0_85 = arith.constant 0 : index
    %102 = vector.load %arg1[%c1_82, %c0_83, %c0_84, %c0_85] : memref<2x9x8x128xf32, #tpu.memory_space<vmem>>, vector<1x1x8x128xf32>
    %103 = vector.shape_cast %102 : vector<1x1x8x128xf32> to vector<8x128xf32>
    %c1_86 = arith.constant 1 : index
    %c0_87 = arith.constant 0 : index
    %c0_88 = arith.constant 0 : index
    %c0_89 = arith.constant 0 : index
    %104 = vector.load %arg2[%c1_86, %c0_87, %c0_88, %c0_89] : memref<2x9x8x128xf32, #tpu.memory_space<vmem>>, vector<1x1x8x128xf32>
    %105 = vector.shape_cast %104 : vector<1x1x8x128xf32> to vector<8x128xf32>
    %106 = arith.mulf %49, %103 : vector<8x128xf32>
    %107 = arith.mulf %53, %105 : vector<8x128xf32>
    %108 = arith.subf %106, %107 : vector<8x128xf32>
    %109 = arith.mulf %49, %105 : vector<8x128xf32>
    %110 = arith.mulf %53, %103 : vector<8x128xf32>
    %111 = arith.addf %109, %110 : vector<8x128xf32>
    %c1_90 = arith.constant 1 : index
    %c5_91 = arith.constant 5 : index
    %c0_92 = arith.constant 0 : index
    %c0_93 = arith.constant 0 : index
    %112 = vector.load %arg1[%c1_90, %c5_91, %c0_92, %c0_93] : memref<2x9x8x128xf32, #tpu.memory_space<vmem>>, vector<1x1x8x128xf32>
    %113 = vector.shape_cast %112 : vector<1x1x8x128xf32> to vector<8x128xf32>
    %c1_94 = arith.constant 1 : index
    %c5_95 = arith.constant 5 : index
    %c0_96 = arith.constant 0 : index
    %c0_97 = arith.constant 0 : index
    %114 = vector.load %arg2[%c1_94, %c5_95, %c0_96, %c0_97] : memref<2x9x8x128xf32, #tpu.memory_space<vmem>>, vector<1x1x8x128xf32>
    %115 = vector.shape_cast %114 : vector<1x1x8x128xf32> to vector<8x128xf32>
    %116 = arith.mulf %61, %113 : vector<8x128xf32>
    %117 = arith.mulf %65, %115 : vector<8x128xf32>
    %118 = arith.subf %116, %117 : vector<8x128xf32>
    %119 = arith.addf %108, %118 : vector<8x128xf32>
    %120 = arith.mulf %61, %115 : vector<8x128xf32>
    %121 = arith.mulf %65, %113 : vector<8x128xf32>
    %122 = arith.addf %120, %121 : vector<8x128xf32>
    %123 = arith.addf %111, %122 : vector<8x128xf32>
    %c1_98 = arith.constant 1 : index
    %c0_99 = arith.constant 0 : index
    %124 = memref.load %arg4[%c1_98, %c0_99] : memref<2x16xf32, #tpu.memory_space<smem>>
    %c1_100 = arith.constant 1 : index
    %c0_101 = arith.constant 0 : index
    %125 = memref.load %arg5[%c1_100, %c0_101] : memref<2x16xf32, #tpu.memory_space<smem>>
    %126 = vector.broadcast %124 : f32 to vector<8x128xf32>
    %127 = arith.mulf %126, %119 : vector<8x128xf32>
    %128 = vector.broadcast %125 : f32 to vector<8x128xf32>
    %129 = arith.mulf %128, %123 : vector<8x128xf32>
    %130 = arith.subf %127, %129 : vector<8x128xf32>
    %131 = arith.addf %1, %130 : vector<8x128xf32>
    %132 = vector.broadcast %124 : f32 to vector<8x128xf32>
    %133 = arith.mulf %132, %123 : vector<8x128xf32>
    %134 = vector.broadcast %125 : f32 to vector<8x128xf32>
    %135 = arith.mulf %134, %119 : vector<8x128xf32>
    %136 = arith.addf %133, %135 : vector<8x128xf32>
    %137 = arith.addf %1, %136 : vector<8x128xf32>
    %c0_102 = arith.constant 0 : index
    %c3 = arith.constant 3 : index
    %c0_103 = arith.constant 0 : index
    %c0_104 = arith.constant 0 : index
    %138 = vector.load %arg1[%c0_102, %c3, %c0_103, %c0_104] : memref<2x9x8x128xf32, #tpu.memory_space<vmem>>, vector<1x1x8x128xf32>
    %139 = vector.shape_cast %138 : vector<1x1x8x128xf32> to vector<8x128xf32>
    %c0_105 = arith.constant 0 : index
    %c3_106 = arith.constant 3 : index
    %c0_107 = arith.constant 0 : index
    %c0_108 = arith.constant 0 : index
    %140 = vector.load %arg2[%c0_105, %c3_106, %c0_107, %c0_108] : memref<2x9x8x128xf32, #tpu.memory_space<vmem>>, vector<1x1x8x128xf32>
    %141 = vector.shape_cast %140 : vector<1x1x8x128xf32> to vector<8x128xf32>
    %c0_109 = arith.constant 0 : index
    %c0_110 = arith.constant 0 : index
    %c0_111 = arith.constant 0 : index
    %c0_112 = arith.constant 0 : index
    %142 = vector.load %arg1[%c0_109, %c0_110, %c0_111, %c0_112] : memref<2x9x8x128xf32, #tpu.memory_space<vmem>>, vector<1x1x8x128xf32>
    %143 = vector.shape_cast %142 : vector<1x1x8x128xf32> to vector<8x128xf32>
    %c0_113 = arith.constant 0 : index
    %c0_114 = arith.constant 0 : index
    %c0_115 = arith.constant 0 : index
    %c0_116 = arith.constant 0 : index
    %144 = vector.load %arg2[%c0_113, %c0_114, %c0_115, %c0_116] : memref<2x9x8x128xf32, #tpu.memory_space<vmem>>, vector<1x1x8x128xf32>
    %145 = vector.shape_cast %144 : vector<1x1x8x128xf32> to vector<8x128xf32>
    %146 = arith.mulf %139, %143 : vector<8x128xf32>
    %147 = arith.mulf %141, %145 : vector<8x128xf32>
    %148 = arith.addf %146, %147 : vector<8x128xf32>
    %149 = arith.addf %1, %148 : vector<8x128xf32>
    %150 = arith.mulf %141, %143 : vector<8x128xf32>
    %151 = arith.mulf %139, %145 : vector<8x128xf32>
    %152 = arith.subf %150, %151 : vector<8x128xf32>
    %153 = arith.addf %1, %152 : vector<8x128xf32>
    %c0_117 = arith.constant 0 : index
    %c1_118 = arith.constant 1 : index
    %c0_119 = arith.constant 0 : index
    %c0_120 = arith.constant 0 : index
    %154 = vector.load %arg1[%c0_117, %c1_118, %c0_119, %c0_120] : memref<2x9x8x128xf32, #tpu.memory_space<vmem>>, vector<1x1x8x128xf32>
    %155 = vector.shape_cast %154 : vector<1x1x8x128xf32> to vector<8x128xf32>
    %c0_121 = arith.constant 0 : index
    %c1_122 = arith.constant 1 : index
    %c0_123 = arith.constant 0 : index
    %c0_124 = arith.constant 0 : index
    %156 = vector.load %arg2[%c0_121, %c1_122, %c0_123, %c0_124] : memref<2x9x8x128xf32, #tpu.memory_space<vmem>>, vector<1x1x8x128xf32>
    %157 = vector.shape_cast %156 : vector<1x1x8x128xf32> to vector<8x128xf32>
    %158 = arith.mulf %155, %143 : vector<8x128xf32>
    %159 = arith.mulf %157, %145 : vector<8x128xf32>
    %160 = arith.addf %158, %159 : vector<8x128xf32>
    %161 = arith.addf %1, %160 : vector<8x128xf32>
    %162 = arith.mulf %157, %143 : vector<8x128xf32>
    %163 = arith.mulf %155, %145 : vector<8x128xf32>
    %164 = arith.subf %162, %163 : vector<8x128xf32>
    %165 = arith.addf %1, %164 : vector<8x128xf32>
    %c1_125 = arith.constant 1 : index
    %c3_126 = arith.constant 3 : index
    %c0_127 = arith.constant 0 : index
    %c0_128 = arith.constant 0 : index
    %166 = vector.load %arg1[%c1_125, %c3_126, %c0_127, %c0_128] : memref<2x9x8x128xf32, #tpu.memory_space<vmem>>, vector<1x1x8x128xf32>
    %167 = vector.shape_cast %166 : vector<1x1x8x128xf32> to vector<8x128xf32>
    %c1_129 = arith.constant 1 : index
    %c3_130 = arith.constant 3 : index
    %c0_131 = arith.constant 0 : index
    %c0_132 = arith.constant 0 : index
    %168 = vector.load %arg2[%c1_129, %c3_130, %c0_131, %c0_132] : memref<2x9x8x128xf32, #tpu.memory_space<vmem>>, vector<1x1x8x128xf32>
    %169 = vector.shape_cast %168 : vector<1x1x8x128xf32> to vector<8x128xf32>
    %c1_133 = arith.constant 1 : index
    %c0_134 = arith.constant 0 : index
    %c0_135 = arith.constant 0 : index
    %c0_136 = arith.constant 0 : index
    %170 = vector.load %arg1[%c1_133, %c0_134, %c0_135, %c0_136] : memref<2x9x8x128xf32, #tpu.memory_space<vmem>>, vector<1x1x8x128xf32>
    %171 = vector.shape_cast %170 : vector<1x1x8x128xf32> to vector<8x128xf32>
    %c1_137 = arith.constant 1 : index
    %c0_138 = arith.constant 0 : index
    %c0_139 = arith.constant 0 : index
    %c0_140 = arith.constant 0 : index
    %172 = vector.load %arg2[%c1_137, %c0_138, %c0_139, %c0_140] : memref<2x9x8x128xf32, #tpu.memory_space<vmem>>, vector<1x1x8x128xf32>
    %173 = vector.shape_cast %172 : vector<1x1x8x128xf32> to vector<8x128xf32>
    %174 = arith.mulf %167, %171 : vector<8x128xf32>
    %175 = arith.mulf %169, %173 : vector<8x128xf32>
    %176 = arith.addf %174, %175 : vector<8x128xf32>
    %177 = arith.addf %149, %176 : vector<8x128xf32>
    %178 = arith.mulf %169, %171 : vector<8x128xf32>
    %179 = arith.mulf %167, %173 : vector<8x128xf32>
    %180 = arith.subf %178, %179 : vector<8x128xf32>
    %181 = arith.addf %153, %180 : vector<8x128xf32>
    %c1_141 = arith.constant 1 : index
    %c1_142 = arith.constant 1 : index
    %c0_143 = arith.constant 0 : index
    %c0_144 = arith.constant 0 : index
    %182 = vector.load %arg1[%c1_141, %c1_142, %c0_143, %c0_144] : memref<2x9x8x128xf32, #tpu.memory_space<vmem>>, vector<1x1x8x128xf32>
    %183 = vector.shape_cast %182 : vector<1x1x8x128xf32> to vector<8x128xf32>
    %c1_145 = arith.constant 1 : index
    %c1_146 = arith.constant 1 : index
    %c0_147 = arith.constant 0 : index
    %c0_148 = arith.constant 0 : index
    %184 = vector.load %arg2[%c1_145, %c1_146, %c0_147, %c0_148] : memref<2x9x8x128xf32, #tpu.memory_space<vmem>>, vector<1x1x8x128xf32>
    %185 = vector.shape_cast %184 : vector<1x1x8x128xf32> to vector<8x128xf32>
    %186 = arith.mulf %183, %171 : vector<8x128xf32>
    %187 = arith.mulf %185, %173 : vector<8x128xf32>
    %188 = arith.addf %186, %187 : vector<8x128xf32>
    %189 = arith.addf %161, %188 : vector<8x128xf32>
    %190 = arith.mulf %185, %171 : vector<8x128xf32>
    %191 = arith.mulf %183, %173 : vector<8x128xf32>
    %192 = arith.subf %190, %191 : vector<8x128xf32>
    %193 = arith.addf %165, %192 : vector<8x128xf32>
    %c0_149 = arith.constant 0 : index
    %c1_150 = arith.constant 1 : index
    %c0_151 = arith.constant 0 : index
    %c0_152 = arith.constant 0 : index
    %194 = vector.load %arg1[%c0_149, %c1_150, %c0_151, %c0_152] : memref<2x9x8x128xf32, #tpu.memory_space<vmem>>, vector<1x1x8x128xf32>
    %195 = vector.shape_cast %194 : vector<1x1x8x128xf32> to vector<8x128xf32>
    %c0_153 = arith.constant 0 : index
    %c1_154 = arith.constant 1 : index
    %c0_155 = arith.constant 0 : index
    %c0_156 = arith.constant 0 : index
    %196 = vector.load %arg2[%c0_153, %c1_154, %c0_155, %c0_156] : memref<2x9x8x128xf32, #tpu.memory_space<vmem>>, vector<1x1x8x128xf32>
    %197 = vector.shape_cast %196 : vector<1x1x8x128xf32> to vector<8x128xf32>
    %198 = arith.mulf %177, %195 : vector<8x128xf32>
    %199 = arith.mulf %181, %197 : vector<8x128xf32>
    %200 = arith.subf %198, %199 : vector<8x128xf32>
    %201 = arith.mulf %177, %197 : vector<8x128xf32>
    %202 = arith.mulf %181, %195 : vector<8x128xf32>
    %203 = arith.addf %201, %202 : vector<8x128xf32>
    %c0_157 = arith.constant 0 : index
    %c3_158 = arith.constant 3 : index
    %c0_159 = arith.constant 0 : index
    %c0_160 = arith.constant 0 : index
    %204 = vector.load %arg1[%c0_157, %c3_158, %c0_159, %c0_160] : memref<2x9x8x128xf32, #tpu.memory_space<vmem>>, vector<1x1x8x128xf32>
    %205 = vector.shape_cast %204 : vector<1x1x8x128xf32> to vector<8x128xf32>
    %c0_161 = arith.constant 0 : index
    %c3_162 = arith.constant 3 : index
    %c0_163 = arith.constant 0 : index
    %c0_164 = arith.constant 0 : index
    %206 = vector.load %arg2[%c0_161, %c3_162, %c0_163, %c0_164] : memref<2x9x8x128xf32, #tpu.memory_space<vmem>>, vector<1x1x8x128xf32>
    %207 = vector.shape_cast %206 : vector<1x1x8x128xf32> to vector<8x128xf32>
    %208 = arith.mulf %189, %205 : vector<8x128xf32>
    %209 = arith.mulf %193, %207 : vector<8x128xf32>
    %210 = arith.subf %208, %209 : vector<8x128xf32>
    %211 = arith.addf %200, %210 : vector<8x128xf32>
    %212 = arith.mulf %189, %207 : vector<8x128xf32>
    %213 = arith.mulf %193, %205 : vector<8x128xf32>
    %214 = arith.addf %212, %213 : vector<8x128xf32>
    %215 = arith.addf %203, %214 : vector<8x128xf32>
    %c0_165 = arith.constant 0 : index
    %c1_166 = arith.constant 1 : index
    %216 = memref.load %arg4[%c0_165, %c1_166] : memref<2x16xf32, #tpu.memory_space<smem>>
    %c0_167 = arith.constant 0 : index
    %c1_168 = arith.constant 1 : index
    %217 = memref.load %arg5[%c0_167, %c1_168] : memref<2x16xf32, #tpu.memory_space<smem>>
    %218 = vector.broadcast %216 : f32 to vector<8x128xf32>
    %219 = arith.mulf %218, %211 : vector<8x128xf32>
    %220 = vector.broadcast %217 : f32 to vector<8x128xf32>
    %221 = arith.mulf %220, %215 : vector<8x128xf32>
    %222 = arith.subf %219, %221 : vector<8x128xf32>
    %223 = arith.addf %95, %222 : vector<8x128xf32>
    %224 = vector.broadcast %216 : f32 to vector<8x128xf32>
    %225 = arith.mulf %224, %215 : vector<8x128xf32>
    %226 = vector.broadcast %217 : f32 to vector<8x128xf32>
    %227 = arith.mulf %226, %211 : vector<8x128xf32>
    %228 = arith.addf %225, %227 : vector<8x128xf32>
    %229 = arith.addf %101, %228 : vector<8x128xf32>
    %c1_169 = arith.constant 1 : index
    %c1_170 = arith.constant 1 : index
    %c0_171 = arith.constant 0 : index
    %c0_172 = arith.constant 0 : index
    %230 = vector.load %arg1[%c1_169, %c1_170, %c0_171, %c0_172] : memref<2x9x8x128xf32, #tpu.memory_space<vmem>>, vector<1x1x8x128xf32>
    %231 = vector.shape_cast %230 : vector<1x1x8x128xf32> to vector<8x128xf32>
    %c1_173 = arith.constant 1 : index
    %c1_174 = arith.constant 1 : index
    %c0_175 = arith.constant 0 : index
    %c0_176 = arith.constant 0 : index
    %232 = vector.load %arg2[%c1_173, %c1_174, %c0_175, %c0_176] : memref<2x9x8x128xf32, #tpu.memory_space<vmem>>, vector<1x1x8x128xf32>
    %233 = vector.shape_cast %232 : vector<1x1x8x128xf32> to vector<8x128xf32>
    %234 = arith.mulf %177, %231 : vector<8x128xf32>
    %235 = arith.mulf %181, %233 : vector<8x128xf32>
    %236 = arith.subf %234, %235 : vector<8x128xf32>
    %237 = arith.mulf %177, %233 : vector<8x128xf32>
    %238 = arith.mulf %181, %231 : vector<8x128xf32>
    %239 = arith.addf %237, %238 : vector<8x128xf32>
    %c1_177 = arith.constant 1 : index
    %c3_178 = arith.constant 3 : index
    %c0_179 = arith.constant 0 : index
    %c0_180 = arith.constant 0 : index
    %240 = vector.load %arg1[%c1_177, %c3_178, %c0_179, %c0_180] : memref<2x9x8x128xf32, #tpu.memory_space<vmem>>, vector<1x1x8x128xf32>
    %241 = vector.shape_cast %240 : vector<1x1x8x128xf32> to vector<8x128xf32>
    %c1_181 = arith.constant 1 : index
    %c3_182 = arith.constant 3 : index
    %c0_183 = arith.constant 0 : index
    %c0_184 = arith.constant 0 : index
    %242 = vector.load %arg2[%c1_181, %c3_182, %c0_183, %c0_184] : memref<2x9x8x128xf32, #tpu.memory_space<vmem>>, vector<1x1x8x128xf32>
    %243 = vector.shape_cast %242 : vector<1x1x8x128xf32> to vector<8x128xf32>
    %244 = arith.mulf %189, %241 : vector<8x128xf32>
    %245 = arith.mulf %193, %243 : vector<8x128xf32>
    %246 = arith.subf %244, %245 : vector<8x128xf32>
    %247 = arith.addf %236, %246 : vector<8x128xf32>
    %248 = arith.mulf %189, %243 : vector<8x128xf32>
    %249 = arith.mulf %193, %241 : vector<8x128xf32>
    %250 = arith.addf %248, %249 : vector<8x128xf32>
    %251 = arith.addf %239, %250 : vector<8x128xf32>
    %c1_185 = arith.constant 1 : index
    %c1_186 = arith.constant 1 : index
    %252 = memref.load %arg4[%c1_185, %c1_186] : memref<2x16xf32, #tpu.memory_space<smem>>
    %c1_187 = arith.constant 1 : index
    %c1_188 = arith.constant 1 : index
    %253 = memref.load %arg5[%c1_187, %c1_188] : memref<2x16xf32, #tpu.memory_space<smem>>
    %254 = vector.broadcast %252 : f32 to vector<8x128xf32>
    %255 = arith.mulf %254, %247 : vector<8x128xf32>
    %256 = vector.broadcast %253 : f32 to vector<8x128xf32>
    %257 = arith.mulf %256, %251 : vector<8x128xf32>
    %258 = arith.subf %255, %257 : vector<8x128xf32>
    %259 = arith.addf %131, %258 : vector<8x128xf32>
    %260 = vector.broadcast %252 : f32 to vector<8x128xf32>
    %261 = arith.mulf %260, %251 : vector<8x128xf32>
    %262 = vector.broadcast %253 : f32 to vector<8x128xf32>
    %263 = arith.mulf %262, %247 : vector<8x128xf32>
    %264 = arith.addf %261, %263 : vector<8x128xf32>
    %265 = arith.addf %137, %264 : vector<8x128xf32>
    %c0_189 = arith.constant 0 : index
    %c5_190 = arith.constant 5 : index
    %c0_191 = arith.constant 0 : index
    %c0_192 = arith.constant 0 : index
    %266 = vector.load %arg1[%c0_189, %c5_190, %c0_191, %c0_192] : memref<2x9x8x128xf32, #tpu.memory_space<vmem>>, vector<1x1x8x128xf32>
    %267 = vector.shape_cast %266 : vector<1x1x8x128xf32> to vector<8x128xf32>
    %c0_193 = arith.constant 0 : index
    %c5_194 = arith.constant 5 : index
    %c0_195 = arith.constant 0 : index
    %c0_196 = arith.constant 0 : index
    %268 = vector.load %arg2[%c0_193, %c5_194, %c0_195, %c0_196] : memref<2x9x8x128xf32, #tpu.memory_space<vmem>>, vector<1x1x8x128xf32>
    %269 = vector.shape_cast %268 : vector<1x1x8x128xf32> to vector<8x128xf32>
    %c0_197 = arith.constant 0 : index
    %c2 = arith.constant 2 : index
    %c0_198 = arith.constant 0 : index
    %c0_199 = arith.constant 0 : index
    %270 = vector.load %arg1[%c0_197, %c2, %c0_198, %c0_199] : memref<2x9x8x128xf32, #tpu.memory_space<vmem>>, vector<1x1x8x128xf32>
    %271 = vector.shape_cast %270 : vector<1x1x8x128xf32> to vector<8x128xf32>
    %c0_200 = arith.constant 0 : index
    %c2_201 = arith.constant 2 : index
    %c0_202 = arith.constant 0 : index
    %c0_203 = arith.constant 0 : index
    %272 = vector.load %arg2[%c0_200, %c2_201, %c0_202, %c0_203] : memref<2x9x8x128xf32, #tpu.memory_space<vmem>>, vector<1x1x8x128xf32>
    %273 = vector.shape_cast %272 : vector<1x1x8x128xf32> to vector<8x128xf32>
    %274 = arith.mulf %267, %271 : vector<8x128xf32>
    %275 = arith.mulf %269, %273 : vector<8x128xf32>
    %276 = arith.addf %274, %275 : vector<8x128xf32>
    %277 = arith.addf %1, %276 : vector<8x128xf32>
    %278 = arith.mulf %269, %271 : vector<8x128xf32>
    %279 = arith.mulf %267, %273 : vector<8x128xf32>
    %280 = arith.subf %278, %279 : vector<8x128xf32>
    %281 = arith.addf %1, %280 : vector<8x128xf32>
    %c0_204 = arith.constant 0 : index
    %c1_205 = arith.constant 1 : index
    %c0_206 = arith.constant 0 : index
    %c0_207 = arith.constant 0 : index
    %282 = vector.load %arg1[%c0_204, %c1_205, %c0_206, %c0_207] : memref<2x9x8x128xf32, #tpu.memory_space<vmem>>, vector<1x1x8x128xf32>
    %283 = vector.shape_cast %282 : vector<1x1x8x128xf32> to vector<8x128xf32>
    %c0_208 = arith.constant 0 : index
    %c1_209 = arith.constant 1 : index
    %c0_210 = arith.constant 0 : index
    %c0_211 = arith.constant 0 : index
    %284 = vector.load %arg2[%c0_208, %c1_209, %c0_210, %c0_211] : memref<2x9x8x128xf32, #tpu.memory_space<vmem>>, vector<1x1x8x128xf32>
    %285 = vector.shape_cast %284 : vector<1x1x8x128xf32> to vector<8x128xf32>
    %286 = arith.mulf %283, %271 : vector<8x128xf32>
    %287 = arith.mulf %285, %273 : vector<8x128xf32>
    %288 = arith.addf %286, %287 : vector<8x128xf32>
    %289 = arith.addf %1, %288 : vector<8x128xf32>
    %290 = arith.mulf %285, %271 : vector<8x128xf32>
    %291 = arith.mulf %283, %273 : vector<8x128xf32>
    %292 = arith.subf %290, %291 : vector<8x128xf32>
    %293 = arith.addf %1, %292 : vector<8x128xf32>
    %c1_212 = arith.constant 1 : index
    %c5_213 = arith.constant 5 : index
    %c0_214 = arith.constant 0 : index
    %c0_215 = arith.constant 0 : index
    %294 = vector.load %arg1[%c1_212, %c5_213, %c0_214, %c0_215] : memref<2x9x8x128xf32, #tpu.memory_space<vmem>>, vector<1x1x8x128xf32>
    %295 = vector.shape_cast %294 : vector<1x1x8x128xf32> to vector<8x128xf32>
    %c1_216 = arith.constant 1 : index
    %c5_217 = arith.constant 5 : index
    %c0_218 = arith.constant 0 : index
    %c0_219 = arith.constant 0 : index
    %296 = vector.load %arg2[%c1_216, %c5_217, %c0_218, %c0_219] : memref<2x9x8x128xf32, #tpu.memory_space<vmem>>, vector<1x1x8x128xf32>
    %297 = vector.shape_cast %296 : vector<1x1x8x128xf32> to vector<8x128xf32>
    %c1_220 = arith.constant 1 : index
    %c2_221 = arith.constant 2 : index
    %c0_222 = arith.constant 0 : index
    %c0_223 = arith.constant 0 : index
    %298 = vector.load %arg1[%c1_220, %c2_221, %c0_222, %c0_223] : memref<2x9x8x128xf32, #tpu.memory_space<vmem>>, vector<1x1x8x128xf32>
    %299 = vector.shape_cast %298 : vector<1x1x8x128xf32> to vector<8x128xf32>
    %c1_224 = arith.constant 1 : index
    %c2_225 = arith.constant 2 : index
    %c0_226 = arith.constant 0 : index
    %c0_227 = arith.constant 0 : index
    %300 = vector.load %arg2[%c1_224, %c2_225, %c0_226, %c0_227] : memref<2x9x8x128xf32, #tpu.memory_space<vmem>>, vector<1x1x8x128xf32>
    %301 = vector.shape_cast %300 : vector<1x1x8x128xf32> to vector<8x128xf32>
    %302 = arith.mulf %295, %299 : vector<8x128xf32>
    %303 = arith.mulf %297, %301 : vector<8x128xf32>
    %304 = arith.addf %302, %303 : vector<8x128xf32>
    %305 = arith.addf %277, %304 : vector<8x128xf32>
    %306 = arith.mulf %297, %299 : vector<8x128xf32>
    %307 = arith.mulf %295, %301 : vector<8x128xf32>
    %308 = arith.subf %306, %307 : vector<8x128xf32>
    %309 = arith.addf %281, %308 : vector<8x128xf32>
    %c1_228 = arith.constant 1 : index
    %c1_229 = arith.constant 1 : index
    %c0_230 = arith.constant 0 : index
    %c0_231 = arith.constant 0 : index
    %310 = vector.load %arg1[%c1_228, %c1_229, %c0_230, %c0_231] : memref<2x9x8x128xf32, #tpu.memory_space<vmem>>, vector<1x1x8x128xf32>
    %311 = vector.shape_cast %310 : vector<1x1x8x128xf32> to vector<8x128xf32>
    %c1_232 = arith.constant 1 : index
    %c1_233 = arith.constant 1 : index
    %c0_234 = arith.constant 0 : index
    %c0_235 = arith.constant 0 : index
    %312 = vector.load %arg2[%c1_232, %c1_233, %c0_234, %c0_235] : memref<2x9x8x128xf32, #tpu.memory_space<vmem>>, vector<1x1x8x128xf32>
    %313 = vector.shape_cast %312 : vector<1x1x8x128xf32> to vector<8x128xf32>
    %314 = arith.mulf %311, %299 : vector<8x128xf32>
    %315 = arith.mulf %313, %301 : vector<8x128xf32>
    %316 = arith.addf %314, %315 : vector<8x128xf32>
    %317 = arith.addf %289, %316 : vector<8x128xf32>
    %318 = arith.mulf %313, %299 : vector<8x128xf32>
    %319 = arith.mulf %311, %301 : vector<8x128xf32>
    %320 = arith.subf %318, %319 : vector<8x128xf32>
    %321 = arith.addf %293, %320 : vector<8x128xf32>
    %c0_236 = arith.constant 0 : index
    %c1_237 = arith.constant 1 : index
    %c0_238 = arith.constant 0 : index
    %c0_239 = arith.constant 0 : index
    %322 = vector.load %arg1[%c0_236, %c1_237, %c0_238, %c0_239] : memref<2x9x8x128xf32, #tpu.memory_space<vmem>>, vector<1x1x8x128xf32>
    %323 = vector.shape_cast %322 : vector<1x1x8x128xf32> to vector<8x128xf32>
    %c0_240 = arith.constant 0 : index
    %c1_241 = arith.constant 1 : index
    %c0_242 = arith.constant 0 : index
    %c0_243 = arith.constant 0 : index
    %324 = vector.load %arg2[%c0_240, %c1_241, %c0_242, %c0_243] : memref<2x9x8x128xf32, #tpu.memory_space<vmem>>, vector<1x1x8x128xf32>
    %325 = vector.shape_cast %324 : vector<1x1x8x128xf32> to vector<8x128xf32>
    %326 = arith.mulf %305, %323 : vector<8x128xf32>
    %327 = arith.mulf %309, %325 : vector<8x128xf32>
    %328 = arith.subf %326, %327 : vector<8x128xf32>
    %329 = arith.mulf %305, %325 : vector<8x128xf32>
    %330 = arith.mulf %309, %323 : vector<8x128xf32>
    %331 = arith.addf %329, %330 : vector<8x128xf32>
    %c0_244 = arith.constant 0 : index
    %c5_245 = arith.constant 5 : index
    %c0_246 = arith.constant 0 : index
    %c0_247 = arith.constant 0 : index
    %332 = vector.load %arg1[%c0_244, %c5_245, %c0_246, %c0_247] : memref<2x9x8x128xf32, #tpu.memory_space<vmem>>, vector<1x1x8x128xf32>
    %333 = vector.shape_cast %332 : vector<1x1x8x128xf32> to vector<8x128xf32>
    %c0_248 = arith.constant 0 : index
    %c5_249 = arith.constant 5 : index
    %c0_250 = arith.constant 0 : index
    %c0_251 = arith.constant 0 : index
    %334 = vector.load %arg2[%c0_248, %c5_249, %c0_250, %c0_251] : memref<2x9x8x128xf32, #tpu.memory_space<vmem>>, vector<1x1x8x128xf32>
    %335 = vector.shape_cast %334 : vector<1x1x8x128xf32> to vector<8x128xf32>
    %336 = arith.mulf %317, %333 : vector<8x128xf32>
    %337 = arith.mulf %321, %335 : vector<8x128xf32>
    %338 = arith.subf %336, %337 : vector<8x128xf32>
    %339 = arith.addf %328, %338 : vector<8x128xf32>
    %340 = arith.mulf %317, %335 : vector<8x128xf32>
    %341 = arith.mulf %321, %333 : vector<8x128xf32>
    %342 = arith.addf %340, %341 : vector<8x128xf32>
    %343 = arith.addf %331, %342 : vector<8x128xf32>
    %c0_252 = arith.constant 0 : index
    %c2_253 = arith.constant 2 : index
    %344 = memref.load %arg4[%c0_252, %c2_253] : memref<2x16xf32, #tpu.memory_space<smem>>
    %c0_254 = arith.constant 0 : index
    %c2_255 = arith.constant 2 : index
    %345 = memref.load %arg5[%c0_254, %c2_255] : memref<2x16xf32, #tpu.memory_space<smem>>
    %346 = vector.broadcast %344 : f32 to vector<8x128xf32>
    %347 = arith.mulf %346, %339 : vector<8x128xf32>
    %348 = vector.broadcast %345 : f32 to vector<8x128xf32>
    %349 = arith.mulf %348, %343 : vector<8x128xf32>
    %350 = arith.subf %347, %349 : vector<8x128xf32>
    %351 = arith.addf %223, %350 : vector<8x128xf32>
    %352 = vector.broadcast %344 : f32 to vector<8x128xf32>
    %353 = arith.mulf %352, %343 : vector<8x128xf32>
    %354 = vector.broadcast %345 : f32 to vector<8x128xf32>
    %355 = arith.mulf %354, %339 : vector<8x128xf32>
    %356 = arith.addf %353, %355 : vector<8x128xf32>
    %357 = arith.addf %229, %356 : vector<8x128xf32>
    %c1_256 = arith.constant 1 : index
    %c1_257 = arith.constant 1 : index
    %c0_258 = arith.constant 0 : index
    %c0_259 = arith.constant 0 : index
    %358 = vector.load %arg1[%c1_256, %c1_257, %c0_258, %c0_259] : memref<2x9x8x128xf32, #tpu.memory_space<vmem>>, vector<1x1x8x128xf32>
    %359 = vector.shape_cast %358 : vector<1x1x8x128xf32> to vector<8x128xf32>
    %c1_260 = arith.constant 1 : index
    %c1_261 = arith.constant 1 : index
    %c0_262 = arith.constant 0 : index
    %c0_263 = arith.constant 0 : index
    %360 = vector.load %arg2[%c1_260, %c1_261, %c0_262, %c0_263] : memref<2x9x8x128xf32, #tpu.memory_space<vmem>>, vector<1x1x8x128xf32>
    %361 = vector.shape_cast %360 : vector<1x1x8x128xf32> to vector<8x128xf32>
    %362 = arith.mulf %305, %359 : vector<8x128xf32>
    %363 = arith.mulf %309, %361 : vector<8x128xf32>
    %364 = arith.subf %362, %363 : vector<8x128xf32>
    %365 = arith.mulf %305, %361 : vector<8x128xf32>
    %366 = arith.mulf %309, %359 : vector<8x128xf32>
    %367 = arith.addf %365, %366 : vector<8x128xf32>
    %c1_264 = arith.constant 1 : index
    %c5_265 = arith.constant 5 : index
    %c0_266 = arith.constant 0 : index
    %c0_267 = arith.constant 0 : index
    %368 = vector.load %arg1[%c1_264, %c5_265, %c0_266, %c0_267] : memref<2x9x8x128xf32, #tpu.memory_space<vmem>>, vector<1x1x8x128xf32>
    %369 = vector.shape_cast %368 : vector<1x1x8x128xf32> to vector<8x128xf32>
    %c1_268 = arith.constant 1 : index
    %c5_269 = arith.constant 5 : index
    %c0_270 = arith.constant 0 : index
    %c0_271 = arith.constant 0 : index
    %370 = vector.load %arg2[%c1_268, %c5_269, %c0_270, %c0_271] : memref<2x9x8x128xf32, #tpu.memory_space<vmem>>, vector<1x1x8x128xf32>
    %371 = vector.shape_cast %370 : vector<1x1x8x128xf32> to vector<8x128xf32>
    %372 = arith.mulf %317, %369 : vector<8x128xf32>
    %373 = arith.mulf %321, %371 : vector<8x128xf32>
    %374 = arith.subf %372, %373 : vector<8x128xf32>
    %375 = arith.addf %364, %374 : vector<8x128xf32>
    %376 = arith.mulf %317, %371 : vector<8x128xf32>
    %377 = arith.mulf %321, %369 : vector<8x128xf32>
    %378 = arith.addf %376, %377 : vector<8x128xf32>
    %379 = arith.addf %367, %378 : vector<8x128xf32>
    %c1_272 = arith.constant 1 : index
    %c2_273 = arith.constant 2 : index
    %380 = memref.load %arg4[%c1_272, %c2_273] : memref<2x16xf32, #tpu.memory_space<smem>>
    %c1_274 = arith.constant 1 : index
    %c2_275 = arith.constant 2 : index
    %381 = memref.load %arg5[%c1_274, %c2_275] : memref<2x16xf32, #tpu.memory_space<smem>>
    %382 = vector.broadcast %380 : f32 to vector<8x128xf32>
    %383 = arith.mulf %382, %375 : vector<8x128xf32>
    %384 = vector.broadcast %381 : f32 to vector<8x128xf32>
    %385 = arith.mulf %384, %379 : vector<8x128xf32>
    %386 = arith.subf %383, %385 : vector<8x128xf32>
    %387 = arith.addf %259, %386 : vector<8x128xf32>
    %388 = vector.broadcast %380 : f32 to vector<8x128xf32>
    %389 = arith.mulf %388, %379 : vector<8x128xf32>
    %390 = vector.broadcast %381 : f32 to vector<8x128xf32>
    %391 = arith.mulf %390, %375 : vector<8x128xf32>
    %392 = arith.addf %389, %391 : vector<8x128xf32>
    %393 = arith.addf %265, %392 : vector<8x128xf32>
    %c0_276 = arith.constant 0 : index
    %c2_277 = arith.constant 2 : index
    %c0_278 = arith.constant 0 : index
    %c0_279 = arith.constant 0 : index
    %394 = vector.load %arg1[%c0_276, %c2_277, %c0_278, %c0_279] : memref<2x9x8x128xf32, #tpu.memory_space<vmem>>, vector<1x1x8x128xf32>
    %395 = vector.shape_cast %394 : vector<1x1x8x128xf32> to vector<8x128xf32>
    %c0_280 = arith.constant 0 : index
    %c2_281 = arith.constant 2 : index
    %c0_282 = arith.constant 0 : index
    %c0_283 = arith.constant 0 : index
    %396 = vector.load %arg2[%c0_280, %c2_281, %c0_282, %c0_283] : memref<2x9x8x128xf32, #tpu.memory_space<vmem>>, vector<1x1x8x128xf32>
    %397 = vector.shape_cast %396 : vector<1x1x8x128xf32> to vector<8x128xf32>
    %c0_284 = arith.constant 0 : index
    %c0_285 = arith.constant 0 : index
    %c0_286 = arith.constant 0 : index
    %c0_287 = arith.constant 0 : index
    %398 = vector.load %arg1[%c0_284, %c0_285, %c0_286, %c0_287] : memref<2x9x8x128xf32, #tpu.memory_space<vmem>>, vector<1x1x8x128xf32>
    %399 = vector.shape_cast %398 : vector<1x1x8x128xf32> to vector<8x128xf32>
    %c0_288 = arith.constant 0 : index
    %c0_289 = arith.constant 0 : index
    %c0_290 = arith.constant 0 : index
    %c0_291 = arith.constant 0 : index
    %400 = vector.load %arg2[%c0_288, %c0_289, %c0_290, %c0_291] : memref<2x9x8x128xf32, #tpu.memory_space<vmem>>, vector<1x1x8x128xf32>
    %401 = vector.shape_cast %400 : vector<1x1x8x128xf32> to vector<8x128xf32>
    %402 = arith.mulf %395, %399 : vector<8x128xf32>
    %403 = arith.mulf %397, %401 : vector<8x128xf32>
    %404 = arith.addf %402, %403 : vector<8x128xf32>
    %405 = arith.addf %1, %404 : vector<8x128xf32>
    %406 = arith.mulf %397, %399 : vector<8x128xf32>
    %407 = arith.mulf %395, %401 : vector<8x128xf32>
    %408 = arith.subf %406, %407 : vector<8x128xf32>
    %409 = arith.addf %1, %408 : vector<8x128xf32>
    %c1_292 = arith.constant 1 : index
    %c2_293 = arith.constant 2 : index
    %c0_294 = arith.constant 0 : index
    %c0_295 = arith.constant 0 : index
    %410 = vector.load %arg1[%c1_292, %c2_293, %c0_294, %c0_295] : memref<2x9x8x128xf32, #tpu.memory_space<vmem>>, vector<1x1x8x128xf32>
    %411 = vector.shape_cast %410 : vector<1x1x8x128xf32> to vector<8x128xf32>
    %c1_296 = arith.constant 1 : index
    %c2_297 = arith.constant 2 : index
    %c0_298 = arith.constant 0 : index
    %c0_299 = arith.constant 0 : index
    %412 = vector.load %arg2[%c1_296, %c2_297, %c0_298, %c0_299] : memref<2x9x8x128xf32, #tpu.memory_space<vmem>>, vector<1x1x8x128xf32>
    %413 = vector.shape_cast %412 : vector<1x1x8x128xf32> to vector<8x128xf32>
    %c1_300 = arith.constant 1 : index
    %c0_301 = arith.constant 0 : index
    %c0_302 = arith.constant 0 : index
    %c0_303 = arith.constant 0 : index
    %414 = vector.load %arg1[%c1_300, %c0_301, %c0_302, %c0_303] : memref<2x9x8x128xf32, #tpu.memory_space<vmem>>, vector<1x1x8x128xf32>
    %415 = vector.shape_cast %414 : vector<1x1x8x128xf32> to vector<8x128xf32>
    %c1_304 = arith.constant 1 : index
    %c0_305 = arith.constant 0 : index
    %c0_306 = arith.constant 0 : index
    %c0_307 = arith.constant 0 : index
    %416 = vector.load %arg2[%c1_304, %c0_305, %c0_306, %c0_307] : memref<2x9x8x128xf32, #tpu.memory_space<vmem>>, vector<1x1x8x128xf32>
    %417 = vector.shape_cast %416 : vector<1x1x8x128xf32> to vector<8x128xf32>
    %418 = arith.mulf %411, %415 : vector<8x128xf32>
    %419 = arith.mulf %413, %417 : vector<8x128xf32>
    %420 = arith.addf %418, %419 : vector<8x128xf32>
    %421 = arith.addf %405, %420 : vector<8x128xf32>
    %422 = arith.mulf %413, %415 : vector<8x128xf32>
    %423 = arith.mulf %411, %417 : vector<8x128xf32>
    %424 = arith.subf %422, %423 : vector<8x128xf32>
    %425 = arith.addf %409, %424 : vector<8x128xf32>
    %c0_308 = arith.constant 0 : index
    %c2_309 = arith.constant 2 : index
    %c0_310 = arith.constant 0 : index
    %c0_311 = arith.constant 0 : index
    %426 = vector.load %arg1[%c0_308, %c2_309, %c0_310, %c0_311] : memref<2x9x8x128xf32, #tpu.memory_space<vmem>>, vector<1x1x8x128xf32>
    %427 = vector.shape_cast %426 : vector<1x1x8x128xf32> to vector<8x128xf32>
    %c0_312 = arith.constant 0 : index
    %c2_313 = arith.constant 2 : index
    %c0_314 = arith.constant 0 : index
    %c0_315 = arith.constant 0 : index
    %428 = vector.load %arg2[%c0_312, %c2_313, %c0_314, %c0_315] : memref<2x9x8x128xf32, #tpu.memory_space<vmem>>, vector<1x1x8x128xf32>
    %429 = vector.shape_cast %428 : vector<1x1x8x128xf32> to vector<8x128xf32>
    %430 = arith.mulf %421, %427 : vector<8x128xf32>
    %431 = arith.mulf %425, %429 : vector<8x128xf32>
    %432 = arith.subf %430, %431 : vector<8x128xf32>
    %433 = arith.mulf %421, %429 : vector<8x128xf32>
    %434 = arith.mulf %425, %427 : vector<8x128xf32>
    %435 = arith.addf %433, %434 : vector<8x128xf32>
    %c0_316 = arith.constant 0 : index
    %c3_317 = arith.constant 3 : index
    %436 = memref.load %arg4[%c0_316, %c3_317] : memref<2x16xf32, #tpu.memory_space<smem>>
    %c0_318 = arith.constant 0 : index
    %c3_319 = arith.constant 3 : index
    %437 = memref.load %arg5[%c0_318, %c3_319] : memref<2x16xf32, #tpu.memory_space<smem>>
    %438 = vector.broadcast %436 : f32 to vector<8x128xf32>
    %439 = arith.mulf %438, %432 : vector<8x128xf32>
    %440 = vector.broadcast %437 : f32 to vector<8x128xf32>
    %441 = arith.mulf %440, %435 : vector<8x128xf32>
    %442 = arith.subf %439, %441 : vector<8x128xf32>
    %443 = arith.addf %351, %442 : vector<8x128xf32>
    %444 = vector.broadcast %436 : f32 to vector<8x128xf32>
    %445 = arith.mulf %444, %435 : vector<8x128xf32>
    %446 = vector.broadcast %437 : f32 to vector<8x128xf32>
    %447 = arith.mulf %446, %432 : vector<8x128xf32>
    %448 = arith.addf %445, %447 : vector<8x128xf32>
    %449 = arith.addf %357, %448 : vector<8x128xf32>
    %c1_320 = arith.constant 1 : index
    %c2_321 = arith.constant 2 : index
    %c0_322 = arith.constant 0 : index
    %c0_323 = arith.constant 0 : index
    %450 = vector.load %arg1[%c1_320, %c2_321, %c0_322, %c0_323] : memref<2x9x8x128xf32, #tpu.memory_space<vmem>>, vector<1x1x8x128xf32>
    %451 = vector.shape_cast %450 : vector<1x1x8x128xf32> to vector<8x128xf32>
    %c1_324 = arith.constant 1 : index
    %c2_325 = arith.constant 2 : index
    %c0_326 = arith.constant 0 : index
    %c0_327 = arith.constant 0 : index
    %452 = vector.load %arg2[%c1_324, %c2_325, %c0_326, %c0_327] : memref<2x9x8x128xf32, #tpu.memory_space<vmem>>, vector<1x1x8x128xf32>
    %453 = vector.shape_cast %452 : vector<1x1x8x128xf32> to vector<8x128xf32>
    %454 = arith.mulf %421, %451 : vector<8x128xf32>
    %455 = arith.mulf %425, %453 : vector<8x128xf32>
    %456 = arith.subf %454, %455 : vector<8x128xf32>
    %457 = arith.mulf %421, %453 : vector<8x128xf32>
    %458 = arith.mulf %425, %451 : vector<8x128xf32>
    %459 = arith.addf %457, %458 : vector<8x128xf32>
    %c1_328 = arith.constant 1 : index
    %c3_329 = arith.constant 3 : index
    %460 = memref.load %arg4[%c1_328, %c3_329] : memref<2x16xf32, #tpu.memory_space<smem>>
    %c1_330 = arith.constant 1 : index
    %c3_331 = arith.constant 3 : index
    %461 = memref.load %arg5[%c1_330, %c3_331] : memref<2x16xf32, #tpu.memory_space<smem>>
    %462 = vector.broadcast %460 : f32 to vector<8x128xf32>
    %463 = arith.mulf %462, %456 : vector<8x128xf32>
    %464 = vector.broadcast %461 : f32 to vector<8x128xf32>
    %465 = arith.mulf %464, %459 : vector<8x128xf32>
    %466 = arith.subf %463, %465 : vector<8x128xf32>
    %467 = arith.addf %387, %466 : vector<8x128xf32>
    %468 = vector.broadcast %460 : f32 to vector<8x128xf32>
    %469 = arith.mulf %468, %459 : vector<8x128xf32>
    %470 = vector.broadcast %461 : f32 to vector<8x128xf32>
    %471 = arith.mulf %470, %456 : vector<8x128xf32>
    %472 = arith.addf %469, %471 : vector<8x128xf32>
    %473 = arith.addf %393, %472 : vector<8x128xf32>
    %c0_332 = arith.constant 0 : index
    %c3_333 = arith.constant 3 : index
    %c0_334 = arith.constant 0 : index
    %c0_335 = arith.constant 0 : index
    %474 = vector.load %arg1[%c0_332, %c3_333, %c0_334, %c0_335] : memref<2x9x8x128xf32, #tpu.memory_space<vmem>>, vector<1x1x8x128xf32>
    %475 = vector.shape_cast %474 : vector<1x1x8x128xf32> to vector<8x128xf32>
    %c0_336 = arith.constant 0 : index
    %c3_337 = arith.constant 3 : index
    %c0_338 = arith.constant 0 : index
    %c0_339 = arith.constant 0 : index
    %476 = vector.load %arg2[%c0_336, %c3_337, %c0_338, %c0_339] : memref<2x9x8x128xf32, #tpu.memory_space<vmem>>, vector<1x1x8x128xf32>
    %477 = vector.shape_cast %476 : vector<1x1x8x128xf32> to vector<8x128xf32>
    %c0_340 = arith.constant 0 : index
    %c1_341 = arith.constant 1 : index
    %c0_342 = arith.constant 0 : index
    %c0_343 = arith.constant 0 : index
    %478 = vector.load %arg1[%c0_340, %c1_341, %c0_342, %c0_343] : memref<2x9x8x128xf32, #tpu.memory_space<vmem>>, vector<1x1x8x128xf32>
    %479 = vector.shape_cast %478 : vector<1x1x8x128xf32> to vector<8x128xf32>
    %c0_344 = arith.constant 0 : index
    %c1_345 = arith.constant 1 : index
    %c0_346 = arith.constant 0 : index
    %c0_347 = arith.constant 0 : index
    %480 = vector.load %arg2[%c0_344, %c1_345, %c0_346, %c0_347] : memref<2x9x8x128xf32, #tpu.memory_space<vmem>>, vector<1x1x8x128xf32>
    %481 = vector.shape_cast %480 : vector<1x1x8x128xf32> to vector<8x128xf32>
    %482 = arith.mulf %475, %479 : vector<8x128xf32>
    %483 = arith.mulf %477, %481 : vector<8x128xf32>
    %484 = arith.addf %482, %483 : vector<8x128xf32>
    %485 = arith.addf %1, %484 : vector<8x128xf32>
    %486 = arith.mulf %477, %479 : vector<8x128xf32>
    %487 = arith.mulf %475, %481 : vector<8x128xf32>
    %488 = arith.subf %486, %487 : vector<8x128xf32>
    %489 = arith.addf %1, %488 : vector<8x128xf32>
    %c0_348 = arith.constant 0 : index
    %c2_349 = arith.constant 2 : index
    %c0_350 = arith.constant 0 : index
    %c0_351 = arith.constant 0 : index
    %490 = vector.load %arg1[%c0_348, %c2_349, %c0_350, %c0_351] : memref<2x9x8x128xf32, #tpu.memory_space<vmem>>, vector<1x1x8x128xf32>
    %491 = vector.shape_cast %490 : vector<1x1x8x128xf32> to vector<8x128xf32>
    %c0_352 = arith.constant 0 : index
    %c2_353 = arith.constant 2 : index
    %c0_354 = arith.constant 0 : index
    %c0_355 = arith.constant 0 : index
    %492 = vector.load %arg2[%c0_352, %c2_353, %c0_354, %c0_355] : memref<2x9x8x128xf32, #tpu.memory_space<vmem>>, vector<1x1x8x128xf32>
    %493 = vector.shape_cast %492 : vector<1x1x8x128xf32> to vector<8x128xf32>
    %494 = arith.mulf %491, %479 : vector<8x128xf32>
    %495 = arith.mulf %493, %481 : vector<8x128xf32>
    %496 = arith.addf %494, %495 : vector<8x128xf32>
    %497 = arith.addf %1, %496 : vector<8x128xf32>
    %498 = arith.mulf %493, %479 : vector<8x128xf32>
    %499 = arith.mulf %491, %481 : vector<8x128xf32>
    %500 = arith.subf %498, %499 : vector<8x128xf32>
    %501 = arith.addf %1, %500 : vector<8x128xf32>
    %c1_356 = arith.constant 1 : index
    %c3_357 = arith.constant 3 : index
    %c0_358 = arith.constant 0 : index
    %c0_359 = arith.constant 0 : index
    %502 = vector.load %arg1[%c1_356, %c3_357, %c0_358, %c0_359] : memref<2x9x8x128xf32, #tpu.memory_space<vmem>>, vector<1x1x8x128xf32>
    %503 = vector.shape_cast %502 : vector<1x1x8x128xf32> to vector<8x128xf32>
    %c1_360 = arith.constant 1 : index
    %c3_361 = arith.constant 3 : index
    %c0_362 = arith.constant 0 : index
    %c0_363 = arith.constant 0 : index
    %504 = vector.load %arg2[%c1_360, %c3_361, %c0_362, %c0_363] : memref<2x9x8x128xf32, #tpu.memory_space<vmem>>, vector<1x1x8x128xf32>
    %505 = vector.shape_cast %504 : vector<1x1x8x128xf32> to vector<8x128xf32>
    %c1_364 = arith.constant 1 : index
    %c1_365 = arith.constant 1 : index
    %c0_366 = arith.constant 0 : index
    %c0_367 = arith.constant 0 : index
    %506 = vector.load %arg1[%c1_364, %c1_365, %c0_366, %c0_367] : memref<2x9x8x128xf32, #tpu.memory_space<vmem>>, vector<1x1x8x128xf32>
    %507 = vector.shape_cast %506 : vector<1x1x8x128xf32> to vector<8x128xf32>
    %c1_368 = arith.constant 1 : index
    %c1_369 = arith.constant 1 : index
    %c0_370 = arith.constant 0 : index
    %c0_371 = arith.constant 0 : index
    %508 = vector.load %arg2[%c1_368, %c1_369, %c0_370, %c0_371] : memref<2x9x8x128xf32, #tpu.memory_space<vmem>>, vector<1x1x8x128xf32>
    %509 = vector.shape_cast %508 : vector<1x1x8x128xf32> to vector<8x128xf32>
    %510 = arith.mulf %503, %507 : vector<8x128xf32>
    %511 = arith.mulf %505, %509 : vector<8x128xf32>
    %512 = arith.addf %510, %511 : vector<8x128xf32>
    %513 = arith.addf %485, %512 : vector<8x128xf32>
    %514 = arith.mulf %505, %507 : vector<8x128xf32>
    %515 = arith.mulf %503, %509 : vector<8x128xf32>
    %516 = arith.subf %514, %515 : vector<8x128xf32>
    %517 = arith.addf %489, %516 : vector<8x128xf32>
    %c1_372 = arith.constant 1 : index
    %c2_373 = arith.constant 2 : index
    %c0_374 = arith.constant 0 : index
    %c0_375 = arith.constant 0 : index
    %518 = vector.load %arg1[%c1_372, %c2_373, %c0_374, %c0_375] : memref<2x9x8x128xf32, #tpu.memory_space<vmem>>, vector<1x1x8x128xf32>
    %519 = vector.shape_cast %518 : vector<1x1x8x128xf32> to vector<8x128xf32>
    %c1_376 = arith.constant 1 : index
    %c2_377 = arith.constant 2 : index
    %c0_378 = arith.constant 0 : index
    %c0_379 = arith.constant 0 : index
    %520 = vector.load %arg2[%c1_376, %c2_377, %c0_378, %c0_379] : memref<2x9x8x128xf32, #tpu.memory_space<vmem>>, vector<1x1x8x128xf32>
    %521 = vector.shape_cast %520 : vector<1x1x8x128xf32> to vector<8x128xf32>
    %522 = arith.mulf %519, %507 : vector<8x128xf32>
    %523 = arith.mulf %521, %509 : vector<8x128xf32>
    %524 = arith.addf %522, %523 : vector<8x128xf32>
    %525 = arith.addf %497, %524 : vector<8x128xf32>
    %526 = arith.mulf %521, %507 : vector<8x128xf32>
    %527 = arith.mulf %519, %509 : vector<8x128xf32>
    %528 = arith.subf %526, %527 : vector<8x128xf32>
    %529 = arith.addf %501, %528 : vector<8x128xf32>
    %c0_380 = arith.constant 0 : index
    %c2_381 = arith.constant 2 : index
    %c0_382 = arith.constant 0 : index
    %c0_383 = arith.constant 0 : index
    %530 = vector.load %arg1[%c0_380, %c2_381, %c0_382, %c0_383] : memref<2x9x8x128xf32, #tpu.memory_space<vmem>>, vector<1x1x8x128xf32>
    %531 = vector.shape_cast %530 : vector<1x1x8x128xf32> to vector<8x128xf32>
    %c0_384 = arith.constant 0 : index
    %c2_385 = arith.constant 2 : index
    %c0_386 = arith.constant 0 : index
    %c0_387 = arith.constant 0 : index
    %532 = vector.load %arg2[%c0_384, %c2_385, %c0_386, %c0_387] : memref<2x9x8x128xf32, #tpu.memory_space<vmem>>, vector<1x1x8x128xf32>
    %533 = vector.shape_cast %532 : vector<1x1x8x128xf32> to vector<8x128xf32>
    %534 = arith.mulf %513, %531 : vector<8x128xf32>
    %535 = arith.mulf %517, %533 : vector<8x128xf32>
    %536 = arith.subf %534, %535 : vector<8x128xf32>
    %537 = arith.mulf %513, %533 : vector<8x128xf32>
    %538 = arith.mulf %517, %531 : vector<8x128xf32>
    %539 = arith.addf %537, %538 : vector<8x128xf32>
    %c0_388 = arith.constant 0 : index
    %c3_389 = arith.constant 3 : index
    %c0_390 = arith.constant 0 : index
    %c0_391 = arith.constant 0 : index
    %540 = vector.load %arg1[%c0_388, %c3_389, %c0_390, %c0_391] : memref<2x9x8x128xf32, #tpu.memory_space<vmem>>, vector<1x1x8x128xf32>
    %541 = vector.shape_cast %540 : vector<1x1x8x128xf32> to vector<8x128xf32>
    %c0_392 = arith.constant 0 : index
    %c3_393 = arith.constant 3 : index
    %c0_394 = arith.constant 0 : index
    %c0_395 = arith.constant 0 : index
    %542 = vector.load %arg2[%c0_392, %c3_393, %c0_394, %c0_395] : memref<2x9x8x128xf32, #tpu.memory_space<vmem>>, vector<1x1x8x128xf32>
    %543 = vector.shape_cast %542 : vector<1x1x8x128xf32> to vector<8x128xf32>
    %544 = arith.mulf %525, %541 : vector<8x128xf32>
    %545 = arith.mulf %529, %543 : vector<8x128xf32>
    %546 = arith.subf %544, %545 : vector<8x128xf32>
    %547 = arith.addf %536, %546 : vector<8x128xf32>
    %548 = arith.mulf %525, %543 : vector<8x128xf32>
    %549 = arith.mulf %529, %541 : vector<8x128xf32>
    %550 = arith.addf %548, %549 : vector<8x128xf32>
    %551 = arith.addf %539, %550 : vector<8x128xf32>
    %c0_396 = arith.constant 0 : index
    %c4_397 = arith.constant 4 : index
    %552 = memref.load %arg4[%c0_396, %c4_397] : memref<2x16xf32, #tpu.memory_space<smem>>
    %c0_398 = arith.constant 0 : index
    %c4_399 = arith.constant 4 : index
    %553 = memref.load %arg5[%c0_398, %c4_399] : memref<2x16xf32, #tpu.memory_space<smem>>
    %554 = vector.broadcast %552 : f32 to vector<8x128xf32>
    %555 = arith.mulf %554, %547 : vector<8x128xf32>
    %556 = vector.broadcast %553 : f32 to vector<8x128xf32>
    %557 = arith.mulf %556, %551 : vector<8x128xf32>
    %558 = arith.subf %555, %557 : vector<8x128xf32>
    %559 = arith.addf %443, %558 : vector<8x128xf32>
    %560 = vector.broadcast %552 : f32 to vector<8x128xf32>
    %561 = arith.mulf %560, %551 : vector<8x128xf32>
    %562 = vector.broadcast %553 : f32 to vector<8x128xf32>
    %563 = arith.mulf %562, %547 : vector<8x128xf32>
    %564 = arith.addf %561, %563 : vector<8x128xf32>
    %565 = arith.addf %449, %564 : vector<8x128xf32>
    %c1_400 = arith.constant 1 : index
    %c2_401 = arith.constant 2 : index
    %c0_402 = arith.constant 0 : index
    %c0_403 = arith.constant 0 : index
    %566 = vector.load %arg1[%c1_400, %c2_401, %c0_402, %c0_403] : memref<2x9x8x128xf32, #tpu.memory_space<vmem>>, vector<1x1x8x128xf32>
    %567 = vector.shape_cast %566 : vector<1x1x8x128xf32> to vector<8x128xf32>
    %c1_404 = arith.constant 1 : index
    %c2_405 = arith.constant 2 : index
    %c0_406 = arith.constant 0 : index
    %c0_407 = arith.constant 0 : index
    %568 = vector.load %arg2[%c1_404, %c2_405, %c0_406, %c0_407] : memref<2x9x8x128xf32, #tpu.memory_space<vmem>>, vector<1x1x8x128xf32>
    %569 = vector.shape_cast %568 : vector<1x1x8x128xf32> to vector<8x128xf32>
    %570 = arith.mulf %513, %567 : vector<8x128xf32>
    %571 = arith.mulf %517, %569 : vector<8x128xf32>
    %572 = arith.subf %570, %571 : vector<8x128xf32>
    %573 = arith.mulf %513, %569 : vector<8x128xf32>
    %574 = arith.mulf %517, %567 : vector<8x128xf32>
    %575 = arith.addf %573, %574 : vector<8x128xf32>
    %c1_408 = arith.constant 1 : index
    %c3_409 = arith.constant 3 : index
    %c0_410 = arith.constant 0 : index
    %c0_411 = arith.constant 0 : index
    %576 = vector.load %arg1[%c1_408, %c3_409, %c0_410, %c0_411] : memref<2x9x8x128xf32, #tpu.memory_space<vmem>>, vector<1x1x8x128xf32>
    %577 = vector.shape_cast %576 : vector<1x1x8x128xf32> to vector<8x128xf32>
    %c1_412 = arith.constant 1 : index
    %c3_413 = arith.constant 3 : index
    %c0_414 = arith.constant 0 : index
    %c0_415 = arith.constant 0 : index
    %578 = vector.load %arg2[%c1_412, %c3_413, %c0_414, %c0_415] : memref<2x9x8x128xf32, #tpu.memory_space<vmem>>, vector<1x1x8x128xf32>
    %579 = vector.shape_cast %578 : vector<1x1x8x128xf32> to vector<8x128xf32>
    %580 = arith.mulf %525, %577 : vector<8x128xf32>
    %581 = arith.mulf %529, %579 : vector<8x128xf32>
    %582 = arith.subf %580, %581 : vector<8x128xf32>
    %583 = arith.addf %572, %582 : vector<8x128xf32>
    %584 = arith.mulf %525, %579 : vector<8x128xf32>
    %585 = arith.mulf %529, %577 : vector<8x128xf32>
    %586 = arith.addf %584, %585 : vector<8x128xf32>
    %587 = arith.addf %575, %586 : vector<8x128xf32>
    %c1_416 = arith.constant 1 : index
    %c4_417 = arith.constant 4 : index
    %588 = memref.load %arg4[%c1_416, %c4_417] : memref<2x16xf32, #tpu.memory_space<smem>>
    %c1_418 = arith.constant 1 : index
    %c4_419 = arith.constant 4 : index
    %589 = memref.load %arg5[%c1_418, %c4_419] : memref<2x16xf32, #tpu.memory_space<smem>>
    %590 = vector.broadcast %588 : f32 to vector<8x128xf32>
    %591 = arith.mulf %590, %583 : vector<8x128xf32>
    %592 = vector.broadcast %589 : f32 to vector<8x128xf32>
    %593 = arith.mulf %592, %587 : vector<8x128xf32>
    %594 = arith.subf %591, %593 : vector<8x128xf32>
    %595 = arith.addf %467, %594 : vector<8x128xf32>
    %596 = vector.broadcast %588 : f32 to vector<8x128xf32>
    %597 = arith.mulf %596, %587 : vector<8x128xf32>
    %598 = vector.broadcast %589 : f32 to vector<8x128xf32>
    %599 = arith.mulf %598, %583 : vector<8x128xf32>
    %600 = arith.addf %597, %599 : vector<8x128xf32>
    %601 = arith.addf %473, %600 : vector<8x128xf32>
    %c0_420 = arith.constant 0 : index
    %c5_421 = arith.constant 5 : index
    %c0_422 = arith.constant 0 : index
    %c0_423 = arith.constant 0 : index
    %602 = vector.load %arg1[%c0_420, %c5_421, %c0_422, %c0_423] : memref<2x9x8x128xf32, #tpu.memory_space<vmem>>, vector<1x1x8x128xf32>
    %603 = vector.shape_cast %602 : vector<1x1x8x128xf32> to vector<8x128xf32>
    %c0_424 = arith.constant 0 : index
    %c5_425 = arith.constant 5 : index
    %c0_426 = arith.constant 0 : index
    %c0_427 = arith.constant 0 : index
    %604 = vector.load %arg2[%c0_424, %c5_425, %c0_426, %c0_427] : memref<2x9x8x128xf32, #tpu.memory_space<vmem>>, vector<1x1x8x128xf32>
    %605 = vector.shape_cast %604 : vector<1x1x8x128xf32> to vector<8x128xf32>
    %c0_428 = arith.constant 0 : index
    %c3_429 = arith.constant 3 : index
    %c0_430 = arith.constant 0 : index
    %c0_431 = arith.constant 0 : index
    %606 = vector.load %arg1[%c0_428, %c3_429, %c0_430, %c0_431] : memref<2x9x8x128xf32, #tpu.memory_space<vmem>>, vector<1x1x8x128xf32>
    %607 = vector.shape_cast %606 : vector<1x1x8x128xf32> to vector<8x128xf32>
    %c0_432 = arith.constant 0 : index
    %c3_433 = arith.constant 3 : index
    %c0_434 = arith.constant 0 : index
    %c0_435 = arith.constant 0 : index
    %608 = vector.load %arg2[%c0_432, %c3_433, %c0_434, %c0_435] : memref<2x9x8x128xf32, #tpu.memory_space<vmem>>, vector<1x1x8x128xf32>
    %609 = vector.shape_cast %608 : vector<1x1x8x128xf32> to vector<8x128xf32>
    %610 = arith.mulf %603, %607 : vector<8x128xf32>
    %611 = arith.mulf %605, %609 : vector<8x128xf32>
    %612 = arith.addf %610, %611 : vector<8x128xf32>
    %613 = arith.addf %1, %612 : vector<8x128xf32>
    %614 = arith.mulf %605, %607 : vector<8x128xf32>
    %615 = arith.mulf %603, %609 : vector<8x128xf32>
    %616 = arith.subf %614, %615 : vector<8x128xf32>
    %617 = arith.addf %1, %616 : vector<8x128xf32>
    %c0_436 = arith.constant 0 : index
    %c2_437 = arith.constant 2 : index
    %c0_438 = arith.constant 0 : index
    %c0_439 = arith.constant 0 : index
    %618 = vector.load %arg1[%c0_436, %c2_437, %c0_438, %c0_439] : memref<2x9x8x128xf32, #tpu.memory_space<vmem>>, vector<1x1x8x128xf32>
    %619 = vector.shape_cast %618 : vector<1x1x8x128xf32> to vector<8x128xf32>
    %c0_440 = arith.constant 0 : index
    %c2_441 = arith.constant 2 : index
    %c0_442 = arith.constant 0 : index
    %c0_443 = arith.constant 0 : index
    %620 = vector.load %arg2[%c0_440, %c2_441, %c0_442, %c0_443] : memref<2x9x8x128xf32, #tpu.memory_space<vmem>>, vector<1x1x8x128xf32>
    %621 = vector.shape_cast %620 : vector<1x1x8x128xf32> to vector<8x128xf32>
    %622 = arith.mulf %619, %607 : vector<8x128xf32>
    %623 = arith.mulf %621, %609 : vector<8x128xf32>
    %624 = arith.addf %622, %623 : vector<8x128xf32>
    %625 = arith.addf %1, %624 : vector<8x128xf32>
    %626 = arith.mulf %621, %607 : vector<8x128xf32>
    %627 = arith.mulf %619, %609 : vector<8x128xf32>
    %628 = arith.subf %626, %627 : vector<8x128xf32>
    %629 = arith.addf %1, %628 : vector<8x128xf32>
    %c1_444 = arith.constant 1 : index
    %c5_445 = arith.constant 5 : index
    %c0_446 = arith.constant 0 : index
    %c0_447 = arith.constant 0 : index
    %630 = vector.load %arg1[%c1_444, %c5_445, %c0_446, %c0_447] : memref<2x9x8x128xf32, #tpu.memory_space<vmem>>, vector<1x1x8x128xf32>
    %631 = vector.shape_cast %630 : vector<1x1x8x128xf32> to vector<8x128xf32>
    %c1_448 = arith.constant 1 : index
    %c5_449 = arith.constant 5 : index
    %c0_450 = arith.constant 0 : index
    %c0_451 = arith.constant 0 : index
    %632 = vector.load %arg2[%c1_448, %c5_449, %c0_450, %c0_451] : memref<2x9x8x128xf32, #tpu.memory_space<vmem>>, vector<1x1x8x128xf32>
    %633 = vector.shape_cast %632 : vector<1x1x8x128xf32> to vector<8x128xf32>
    %c1_452 = arith.constant 1 : index
    %c3_453 = arith.constant 3 : index
    %c0_454 = arith.constant 0 : index
    %c0_455 = arith.constant 0 : index
    %634 = vector.load %arg1[%c1_452, %c3_453, %c0_454, %c0_455] : memref<2x9x8x128xf32, #tpu.memory_space<vmem>>, vector<1x1x8x128xf32>
    %635 = vector.shape_cast %634 : vector<1x1x8x128xf32> to vector<8x128xf32>
    %c1_456 = arith.constant 1 : index
    %c3_457 = arith.constant 3 : index
    %c0_458 = arith.constant 0 : index
    %c0_459 = arith.constant 0 : index
    %636 = vector.load %arg2[%c1_456, %c3_457, %c0_458, %c0_459] : memref<2x9x8x128xf32, #tpu.memory_space<vmem>>, vector<1x1x8x128xf32>
    %637 = vector.shape_cast %636 : vector<1x1x8x128xf32> to vector<8x128xf32>
    %638 = arith.mulf %631, %635 : vector<8x128xf32>
    %639 = arith.mulf %633, %637 : vector<8x128xf32>
    %640 = arith.addf %638, %639 : vector<8x128xf32>
    %641 = arith.addf %613, %640 : vector<8x128xf32>
    %642 = arith.mulf %633, %635 : vector<8x128xf32>
    %643 = arith.mulf %631, %637 : vector<8x128xf32>
    %644 = arith.subf %642, %643 : vector<8x128xf32>
    %645 = arith.addf %617, %644 : vector<8x128xf32>
    %c1_460 = arith.constant 1 : index
    %c2_461 = arith.constant 2 : index
    %c0_462 = arith.constant 0 : index
    %c0_463 = arith.constant 0 : index
    %646 = vector.load %arg1[%c1_460, %c2_461, %c0_462, %c0_463] : memref<2x9x8x128xf32, #tpu.memory_space<vmem>>, vector<1x1x8x128xf32>
    %647 = vector.shape_cast %646 : vector<1x1x8x128xf32> to vector<8x128xf32>
    %c1_464 = arith.constant 1 : index
    %c2_465 = arith.constant 2 : index
    %c0_466 = arith.constant 0 : index
    %c0_467 = arith.constant 0 : index
    %648 = vector.load %arg2[%c1_464, %c2_465, %c0_466, %c0_467] : memref<2x9x8x128xf32, #tpu.memory_space<vmem>>, vector<1x1x8x128xf32>
    %649 = vector.shape_cast %648 : vector<1x1x8x128xf32> to vector<8x128xf32>
    %650 = arith.mulf %647, %635 : vector<8x128xf32>
    %651 = arith.mulf %649, %637 : vector<8x128xf32>
    %652 = arith.addf %650, %651 : vector<8x128xf32>
    %653 = arith.addf %625, %652 : vector<8x128xf32>
    %654 = arith.mulf %649, %635 : vector<8x128xf32>
    %655 = arith.mulf %647, %637 : vector<8x128xf32>
    %656 = arith.subf %654, %655 : vector<8x128xf32>
    %657 = arith.addf %629, %656 : vector<8x128xf32>
    %c0_468 = arith.constant 0 : index
    %c2_469 = arith.constant 2 : index
    %c0_470 = arith.constant 0 : index
    %c0_471 = arith.constant 0 : index
    %658 = vector.load %arg1[%c0_468, %c2_469, %c0_470, %c0_471] : memref<2x9x8x128xf32, #tpu.memory_space<vmem>>, vector<1x1x8x128xf32>
    %659 = vector.shape_cast %658 : vector<1x1x8x128xf32> to vector<8x128xf32>
    %c0_472 = arith.constant 0 : index
    %c2_473 = arith.constant 2 : index
    %c0_474 = arith.constant 0 : index
    %c0_475 = arith.constant 0 : index
    %660 = vector.load %arg2[%c0_472, %c2_473, %c0_474, %c0_475] : memref<2x9x8x128xf32, #tpu.memory_space<vmem>>, vector<1x1x8x128xf32>
    %661 = vector.shape_cast %660 : vector<1x1x8x128xf32> to vector<8x128xf32>
    %662 = arith.mulf %641, %659 : vector<8x128xf32>
    %663 = arith.mulf %645, %661 : vector<8x128xf32>
    %664 = arith.subf %662, %663 : vector<8x128xf32>
    %665 = arith.mulf %641, %661 : vector<8x128xf32>
    %666 = arith.mulf %645, %659 : vector<8x128xf32>
    %667 = arith.addf %665, %666 : vector<8x128xf32>
    %c0_476 = arith.constant 0 : index
    %c5_477 = arith.constant 5 : index
    %c0_478 = arith.constant 0 : index
    %c0_479 = arith.constant 0 : index
    %668 = vector.load %arg1[%c0_476, %c5_477, %c0_478, %c0_479] : memref<2x9x8x128xf32, #tpu.memory_space<vmem>>, vector<1x1x8x128xf32>
    %669 = vector.shape_cast %668 : vector<1x1x8x128xf32> to vector<8x128xf32>
    %c0_480 = arith.constant 0 : index
    %c5_481 = arith.constant 5 : index
    %c0_482 = arith.constant 0 : index
    %c0_483 = arith.constant 0 : index
    %670 = vector.load %arg2[%c0_480, %c5_481, %c0_482, %c0_483] : memref<2x9x8x128xf32, #tpu.memory_space<vmem>>, vector<1x1x8x128xf32>
    %671 = vector.shape_cast %670 : vector<1x1x8x128xf32> to vector<8x128xf32>
    %672 = arith.mulf %653, %669 : vector<8x128xf32>
    %673 = arith.mulf %657, %671 : vector<8x128xf32>
    %674 = arith.subf %672, %673 : vector<8x128xf32>
    %675 = arith.addf %664, %674 : vector<8x128xf32>
    %676 = arith.mulf %653, %671 : vector<8x128xf32>
    %677 = arith.mulf %657, %669 : vector<8x128xf32>
    %678 = arith.addf %676, %677 : vector<8x128xf32>
    %679 = arith.addf %667, %678 : vector<8x128xf32>
    %c0_484 = arith.constant 0 : index
    %c5_485 = arith.constant 5 : index
    %680 = memref.load %arg4[%c0_484, %c5_485] : memref<2x16xf32, #tpu.memory_space<smem>>
    %c0_486 = arith.constant 0 : index
    %c5_487 = arith.constant 5 : index
    %681 = memref.load %arg5[%c0_486, %c5_487] : memref<2x16xf32, #tpu.memory_space<smem>>
    %682 = vector.broadcast %680 : f32 to vector<8x128xf32>
    %683 = arith.mulf %682, %675 : vector<8x128xf32>
    %684 = vector.broadcast %681 : f32 to vector<8x128xf32>
    %685 = arith.mulf %684, %679 : vector<8x128xf32>
    %686 = arith.subf %683, %685 : vector<8x128xf32>
    %687 = arith.addf %559, %686 : vector<8x128xf32>
    %688 = vector.broadcast %680 : f32 to vector<8x128xf32>
    %689 = arith.mulf %688, %679 : vector<8x128xf32>
    %690 = vector.broadcast %681 : f32 to vector<8x128xf32>
    %691 = arith.mulf %690, %675 : vector<8x128xf32>
    %692 = arith.addf %689, %691 : vector<8x128xf32>
    %693 = arith.addf %565, %692 : vector<8x128xf32>
    %c1_488 = arith.constant 1 : index
    %c2_489 = arith.constant 2 : index
    %c0_490 = arith.constant 0 : index
    %c0_491 = arith.constant 0 : index
    %694 = vector.load %arg1[%c1_488, %c2_489, %c0_490, %c0_491] : memref<2x9x8x128xf32, #tpu.memory_space<vmem>>, vector<1x1x8x128xf32>
    %695 = vector.shape_cast %694 : vector<1x1x8x128xf32> to vector<8x128xf32>
    %c1_492 = arith.constant 1 : index
    %c2_493 = arith.constant 2 : index
    %c0_494 = arith.constant 0 : index
    %c0_495 = arith.constant 0 : index
    %696 = vector.load %arg2[%c1_492, %c2_493, %c0_494, %c0_495] : memref<2x9x8x128xf32, #tpu.memory_space<vmem>>, vector<1x1x8x128xf32>
    %697 = vector.shape_cast %696 : vector<1x1x8x128xf32> to vector<8x128xf32>
    %698 = arith.mulf %641, %695 : vector<8x128xf32>
    %699 = arith.mulf %645, %697 : vector<8x128xf32>
    %700 = arith.subf %698, %699 : vector<8x128xf32>
    %701 = arith.mulf %641, %697 : vector<8x128xf32>
    %702 = arith.mulf %645, %695 : vector<8x128xf32>
    %703 = arith.addf %701, %702 : vector<8x128xf32>
    %c1_496 = arith.constant 1 : index
    %c5_497 = arith.constant 5 : index
    %c0_498 = arith.constant 0 : index
    %c0_499 = arith.constant 0 : index
    %704 = vector.load %arg1[%c1_496, %c5_497, %c0_498, %c0_499] : memref<2x9x8x128xf32, #tpu.memory_space<vmem>>, vector<1x1x8x128xf32>
    %705 = vector.shape_cast %704 : vector<1x1x8x128xf32> to vector<8x128xf32>
    %c1_500 = arith.constant 1 : index
    %c5_501 = arith.constant 5 : index
    %c0_502 = arith.constant 0 : index
    %c0_503 = arith.constant 0 : index
    %706 = vector.load %arg2[%c1_500, %c5_501, %c0_502, %c0_503] : memref<2x9x8x128xf32, #tpu.memory_space<vmem>>, vector<1x1x8x128xf32>
    %707 = vector.shape_cast %706 : vector<1x1x8x128xf32> to vector<8x128xf32>
    %708 = arith.mulf %653, %705 : vector<8x128xf32>
    %709 = arith.mulf %657, %707 : vector<8x128xf32>
    %710 = arith.subf %708, %709 : vector<8x128xf32>
    %711 = arith.addf %700, %710 : vector<8x128xf32>
    %712 = arith.mulf %653, %707 : vector<8x128xf32>
    %713 = arith.mulf %657, %705 : vector<8x128xf32>
    %714 = arith.addf %712, %713 : vector<8x128xf32>
    %715 = arith.addf %703, %714 : vector<8x128xf32>
    %c1_504 = arith.constant 1 : index
    %c5_505 = arith.constant 5 : index
    %716 = memref.load %arg4[%c1_504, %c5_505] : memref<2x16xf32, #tpu.memory_space<smem>>
    %c1_506 = arith.constant 1 : index
    %c5_507 = arith.constant 5 : index
    %717 = memref.load %arg5[%c1_506, %c5_507] : memref<2x16xf32, #tpu.memory_space<smem>>
    %718 = vector.broadcast %716 : f32 to vector<8x128xf32>
    %719 = arith.mulf %718, %711 : vector<8x128xf32>
    %720 = vector.broadcast %717 : f32 to vector<8x128xf32>
    %721 = arith.mulf %720, %715 : vector<8x128xf32>
    %722 = arith.subf %719, %721 : vector<8x128xf32>
    %723 = arith.addf %595, %722 : vector<8x128xf32>
    %724 = vector.broadcast %716 : f32 to vector<8x128xf32>
    %725 = arith.mulf %724, %715 : vector<8x128xf32>
    %726 = vector.broadcast %717 : f32 to vector<8x128xf32>
    %727 = arith.mulf %726, %711 : vector<8x128xf32>
    %728 = arith.addf %725, %727 : vector<8x128xf32>
    %729 = arith.addf %601, %728 : vector<8x128xf32>
    %c0_508 = arith.constant 0 : index
    %c6 = arith.constant 6 : index
    %c0_509 = arith.constant 0 : index
    %c0_510 = arith.constant 0 : index
    %730 = vector.load %arg1[%c0_508, %c6, %c0_509, %c0_510] : memref<2x9x8x128xf32, #tpu.memory_space<vmem>>, vector<1x1x8x128xf32>
    %731 = vector.shape_cast %730 : vector<1x1x8x128xf32> to vector<8x128xf32>
    %c0_511 = arith.constant 0 : index
    %c6_512 = arith.constant 6 : index
    %c0_513 = arith.constant 0 : index
    %c0_514 = arith.constant 0 : index
    %732 = vector.load %arg2[%c0_511, %c6_512, %c0_513, %c0_514] : memref<2x9x8x128xf32, #tpu.memory_space<vmem>>, vector<1x1x8x128xf32>
    %733 = vector.shape_cast %732 : vector<1x1x8x128xf32> to vector<8x128xf32>
    %c0_515 = arith.constant 0 : index
    %c4_516 = arith.constant 4 : index
    %c0_517 = arith.constant 0 : index
    %c0_518 = arith.constant 0 : index
    %734 = vector.load %arg1[%c0_515, %c4_516, %c0_517, %c0_518] : memref<2x9x8x128xf32, #tpu.memory_space<vmem>>, vector<1x1x8x128xf32>
    %735 = vector.shape_cast %734 : vector<1x1x8x128xf32> to vector<8x128xf32>
    %c0_519 = arith.constant 0 : index
    %c4_520 = arith.constant 4 : index
    %c0_521 = arith.constant 0 : index
    %c0_522 = arith.constant 0 : index
    %736 = vector.load %arg2[%c0_519, %c4_520, %c0_521, %c0_522] : memref<2x9x8x128xf32, #tpu.memory_space<vmem>>, vector<1x1x8x128xf32>
    %737 = vector.shape_cast %736 : vector<1x1x8x128xf32> to vector<8x128xf32>
    %738 = arith.mulf %731, %735 : vector<8x128xf32>
    %739 = arith.mulf %733, %737 : vector<8x128xf32>
    %740 = arith.addf %738, %739 : vector<8x128xf32>
    %741 = arith.addf %1, %740 : vector<8x128xf32>
    %742 = arith.mulf %733, %735 : vector<8x128xf32>
    %743 = arith.mulf %731, %737 : vector<8x128xf32>
    %744 = arith.subf %742, %743 : vector<8x128xf32>
    %745 = arith.addf %1, %744 : vector<8x128xf32>
    %c0_523 = arith.constant 0 : index
    %c2_524 = arith.constant 2 : index
    %c0_525 = arith.constant 0 : index
    %c0_526 = arith.constant 0 : index
    %746 = vector.load %arg1[%c0_523, %c2_524, %c0_525, %c0_526] : memref<2x9x8x128xf32, #tpu.memory_space<vmem>>, vector<1x1x8x128xf32>
    %747 = vector.shape_cast %746 : vector<1x1x8x128xf32> to vector<8x128xf32>
    %c0_527 = arith.constant 0 : index
    %c2_528 = arith.constant 2 : index
    %c0_529 = arith.constant 0 : index
    %c0_530 = arith.constant 0 : index
    %748 = vector.load %arg2[%c0_527, %c2_528, %c0_529, %c0_530] : memref<2x9x8x128xf32, #tpu.memory_space<vmem>>, vector<1x1x8x128xf32>
    %749 = vector.shape_cast %748 : vector<1x1x8x128xf32> to vector<8x128xf32>
    %750 = arith.mulf %747, %735 : vector<8x128xf32>
    %751 = arith.mulf %749, %737 : vector<8x128xf32>
    %752 = arith.addf %750, %751 : vector<8x128xf32>
    %753 = arith.addf %1, %752 : vector<8x128xf32>
    %754 = arith.mulf %749, %735 : vector<8x128xf32>
    %755 = arith.mulf %747, %737 : vector<8x128xf32>
    %756 = arith.subf %754, %755 : vector<8x128xf32>
    %757 = arith.addf %1, %756 : vector<8x128xf32>
    %c1_531 = arith.constant 1 : index
    %c6_532 = arith.constant 6 : index
    %c0_533 = arith.constant 0 : index
    %c0_534 = arith.constant 0 : index
    %758 = vector.load %arg1[%c1_531, %c6_532, %c0_533, %c0_534] : memref<2x9x8x128xf32, #tpu.memory_space<vmem>>, vector<1x1x8x128xf32>
    %759 = vector.shape_cast %758 : vector<1x1x8x128xf32> to vector<8x128xf32>
    %c1_535 = arith.constant 1 : index
    %c6_536 = arith.constant 6 : index
    %c0_537 = arith.constant 0 : index
    %c0_538 = arith.constant 0 : index
    %760 = vector.load %arg2[%c1_535, %c6_536, %c0_537, %c0_538] : memref<2x9x8x128xf32, #tpu.memory_space<vmem>>, vector<1x1x8x128xf32>
    %761 = vector.shape_cast %760 : vector<1x1x8x128xf32> to vector<8x128xf32>
    %c1_539 = arith.constant 1 : index
    %c4_540 = arith.constant 4 : index
    %c0_541 = arith.constant 0 : index
    %c0_542 = arith.constant 0 : index
    %762 = vector.load %arg1[%c1_539, %c4_540, %c0_541, %c0_542] : memref<2x9x8x128xf32, #tpu.memory_space<vmem>>, vector<1x1x8x128xf32>
    %763 = vector.shape_cast %762 : vector<1x1x8x128xf32> to vector<8x128xf32>
    %c1_543 = arith.constant 1 : index
    %c4_544 = arith.constant 4 : index
    %c0_545 = arith.constant 0 : index
    %c0_546 = arith.constant 0 : index
    %764 = vector.load %arg2[%c1_543, %c4_544, %c0_545, %c0_546] : memref<2x9x8x128xf32, #tpu.memory_space<vmem>>, vector<1x1x8x128xf32>
    %765 = vector.shape_cast %764 : vector<1x1x8x128xf32> to vector<8x128xf32>
    %766 = arith.mulf %759, %763 : vector<8x128xf32>
    %767 = arith.mulf %761, %765 : vector<8x128xf32>
    %768 = arith.addf %766, %767 : vector<8x128xf32>
    %769 = arith.addf %741, %768 : vector<8x128xf32>
    %770 = arith.mulf %761, %763 : vector<8x128xf32>
    %771 = arith.mulf %759, %765 : vector<8x128xf32>
    %772 = arith.subf %770, %771 : vector<8x128xf32>
    %773 = arith.addf %745, %772 : vector<8x128xf32>
    %c1_547 = arith.constant 1 : index
    %c2_548 = arith.constant 2 : index
    %c0_549 = arith.constant 0 : index
    %c0_550 = arith.constant 0 : index
    %774 = vector.load %arg1[%c1_547, %c2_548, %c0_549, %c0_550] : memref<2x9x8x128xf32, #tpu.memory_space<vmem>>, vector<1x1x8x128xf32>
    %775 = vector.shape_cast %774 : vector<1x1x8x128xf32> to vector<8x128xf32>
    %c1_551 = arith.constant 1 : index
    %c2_552 = arith.constant 2 : index
    %c0_553 = arith.constant 0 : index
    %c0_554 = arith.constant 0 : index
    %776 = vector.load %arg2[%c1_551, %c2_552, %c0_553, %c0_554] : memref<2x9x8x128xf32, #tpu.memory_space<vmem>>, vector<1x1x8x128xf32>
    %777 = vector.shape_cast %776 : vector<1x1x8x128xf32> to vector<8x128xf32>
    %778 = arith.mulf %775, %763 : vector<8x128xf32>
    %779 = arith.mulf %777, %765 : vector<8x128xf32>
    %780 = arith.addf %778, %779 : vector<8x128xf32>
    %781 = arith.addf %753, %780 : vector<8x128xf32>
    %782 = arith.mulf %777, %763 : vector<8x128xf32>
    %783 = arith.mulf %775, %765 : vector<8x128xf32>
    %784 = arith.subf %782, %783 : vector<8x128xf32>
    %785 = arith.addf %757, %784 : vector<8x128xf32>
    %c0_555 = arith.constant 0 : index
    %c2_556 = arith.constant 2 : index
    %c0_557 = arith.constant 0 : index
    %c0_558 = arith.constant 0 : index
    %786 = vector.load %arg1[%c0_555, %c2_556, %c0_557, %c0_558] : memref<2x9x8x128xf32, #tpu.memory_space<vmem>>, vector<1x1x8x128xf32>
    %787 = vector.shape_cast %786 : vector<1x1x8x128xf32> to vector<8x128xf32>
    %c0_559 = arith.constant 0 : index
    %c2_560 = arith.constant 2 : index
    %c0_561 = arith.constant 0 : index
    %c0_562 = arith.constant 0 : index
    %788 = vector.load %arg2[%c0_559, %c2_560, %c0_561, %c0_562] : memref<2x9x8x128xf32, #tpu.memory_space<vmem>>, vector<1x1x8x128xf32>
    %789 = vector.shape_cast %788 : vector<1x1x8x128xf32> to vector<8x128xf32>
    %790 = arith.mulf %769, %787 : vector<8x128xf32>
    %791 = arith.mulf %773, %789 : vector<8x128xf32>
    %792 = arith.subf %790, %791 : vector<8x128xf32>
    %793 = arith.mulf %769, %789 : vector<8x128xf32>
    %794 = arith.mulf %773, %787 : vector<8x128xf32>
    %795 = arith.addf %793, %794 : vector<8x128xf32>
    %c0_563 = arith.constant 0 : index
    %c6_564 = arith.constant 6 : index
    %c0_565 = arith.constant 0 : index
    %c0_566 = arith.constant 0 : index
    %796 = vector.load %arg1[%c0_563, %c6_564, %c0_565, %c0_566] : memref<2x9x8x128xf32, #tpu.memory_space<vmem>>, vector<1x1x8x128xf32>
    %797 = vector.shape_cast %796 : vector<1x1x8x128xf32> to vector<8x128xf32>
    %c0_567 = arith.constant 0 : index
    %c6_568 = arith.constant 6 : index
    %c0_569 = arith.constant 0 : index
    %c0_570 = arith.constant 0 : index
    %798 = vector.load %arg2[%c0_567, %c6_568, %c0_569, %c0_570] : memref<2x9x8x128xf32, #tpu.memory_space<vmem>>, vector<1x1x8x128xf32>
    %799 = vector.shape_cast %798 : vector<1x1x8x128xf32> to vector<8x128xf32>
    %800 = arith.mulf %781, %797 : vector<8x128xf32>
    %801 = arith.mulf %785, %799 : vector<8x128xf32>
    %802 = arith.subf %800, %801 : vector<8x128xf32>
    %803 = arith.addf %792, %802 : vector<8x128xf32>
    %804 = arith.mulf %781, %799 : vector<8x128xf32>
    %805 = arith.mulf %785, %797 : vector<8x128xf32>
    %806 = arith.addf %804, %805 : vector<8x128xf32>
    %807 = arith.addf %795, %806 : vector<8x128xf32>
    %c0_571 = arith.constant 0 : index
    %c6_572 = arith.constant 6 : index
    %808 = memref.load %arg4[%c0_571, %c6_572] : memref<2x16xf32, #tpu.memory_space<smem>>
    %c0_573 = arith.constant 0 : index
    %c6_574 = arith.constant 6 : index
    %809 = memref.load %arg5[%c0_573, %c6_574] : memref<2x16xf32, #tpu.memory_space<smem>>
    %810 = vector.broadcast %808 : f32 to vector<8x128xf32>
    %811 = arith.mulf %810, %803 : vector<8x128xf32>
    %812 = vector.broadcast %809 : f32 to vector<8x128xf32>
    %813 = arith.mulf %812, %807 : vector<8x128xf32>
    %814 = arith.subf %811, %813 : vector<8x128xf32>
    %815 = arith.addf %687, %814 : vector<8x128xf32>
    %816 = vector.broadcast %808 : f32 to vector<8x128xf32>
    %817 = arith.mulf %816, %807 : vector<8x128xf32>
    %818 = vector.broadcast %809 : f32 to vector<8x128xf32>
    %819 = arith.mulf %818, %803 : vector<8x128xf32>
    %820 = arith.addf %817, %819 : vector<8x128xf32>
    %821 = arith.addf %693, %820 : vector<8x128xf32>
    %c1_575 = arith.constant 1 : index
    %c2_576 = arith.constant 2 : index
    %c0_577 = arith.constant 0 : index
    %c0_578 = arith.constant 0 : index
    %822 = vector.load %arg1[%c1_575, %c2_576, %c0_577, %c0_578] : memref<2x9x8x128xf32, #tpu.memory_space<vmem>>, vector<1x1x8x128xf32>
    %823 = vector.shape_cast %822 : vector<1x1x8x128xf32> to vector<8x128xf32>
    %c1_579 = arith.constant 1 : index
    %c2_580 = arith.constant 2 : index
    %c0_581 = arith.constant 0 : index
    %c0_582 = arith.constant 0 : index
    %824 = vector.load %arg2[%c1_579, %c2_580, %c0_581, %c0_582] : memref<2x9x8x128xf32, #tpu.memory_space<vmem>>, vector<1x1x8x128xf32>
    %825 = vector.shape_cast %824 : vector<1x1x8x128xf32> to vector<8x128xf32>
    %826 = arith.mulf %769, %823 : vector<8x128xf32>
    %827 = arith.mulf %773, %825 : vector<8x128xf32>
    %828 = arith.subf %826, %827 : vector<8x128xf32>
    %829 = arith.mulf %769, %825 : vector<8x128xf32>
    %830 = arith.mulf %773, %823 : vector<8x128xf32>
    %831 = arith.addf %829, %830 : vector<8x128xf32>
    %c1_583 = arith.constant 1 : index
    %c6_584 = arith.constant 6 : index
    %c0_585 = arith.constant 0 : index
    %c0_586 = arith.constant 0 : index
    %832 = vector.load %arg1[%c1_583, %c6_584, %c0_585, %c0_586] : memref<2x9x8x128xf32, #tpu.memory_space<vmem>>, vector<1x1x8x128xf32>
    %833 = vector.shape_cast %832 : vector<1x1x8x128xf32> to vector<8x128xf32>
    %c1_587 = arith.constant 1 : index
    %c6_588 = arith.constant 6 : index
    %c0_589 = arith.constant 0 : index
    %c0_590 = arith.constant 0 : index
    %834 = vector.load %arg2[%c1_587, %c6_588, %c0_589, %c0_590] : memref<2x9x8x128xf32, #tpu.memory_space<vmem>>, vector<1x1x8x128xf32>
    %835 = vector.shape_cast %834 : vector<1x1x8x128xf32> to vector<8x128xf32>
    %836 = arith.mulf %781, %833 : vector<8x128xf32>
    %837 = arith.mulf %785, %835 : vector<8x128xf32>
    %838 = arith.subf %836, %837 : vector<8x128xf32>
    %839 = arith.addf %828, %838 : vector<8x128xf32>
    %840 = arith.mulf %781, %835 : vector<8x128xf32>
    %841 = arith.mulf %785, %833 : vector<8x128xf32>
    %842 = arith.addf %840, %841 : vector<8x128xf32>
    %843 = arith.addf %831, %842 : vector<8x128xf32>
    %c1_591 = arith.constant 1 : index
    %c6_592 = arith.constant 6 : index
    %844 = memref.load %arg4[%c1_591, %c6_592] : memref<2x16xf32, #tpu.memory_space<smem>>
    %c1_593 = arith.constant 1 : index
    %c6_594 = arith.constant 6 : index
    %845 = memref.load %arg5[%c1_593, %c6_594] : memref<2x16xf32, #tpu.memory_space<smem>>
    %846 = vector.broadcast %844 : f32 to vector<8x128xf32>
    %847 = arith.mulf %846, %839 : vector<8x128xf32>
    %848 = vector.broadcast %845 : f32 to vector<8x128xf32>
    %849 = arith.mulf %848, %843 : vector<8x128xf32>
    %850 = arith.subf %847, %849 : vector<8x128xf32>
    %851 = arith.addf %723, %850 : vector<8x128xf32>
    %852 = vector.broadcast %844 : f32 to vector<8x128xf32>
    %853 = arith.mulf %852, %843 : vector<8x128xf32>
    %854 = vector.broadcast %845 : f32 to vector<8x128xf32>
    %855 = arith.mulf %854, %839 : vector<8x128xf32>
    %856 = arith.addf %853, %855 : vector<8x128xf32>
    %857 = arith.addf %729, %856 : vector<8x128xf32>
    %c0_595 = arith.constant 0 : index
    %c3_596 = arith.constant 3 : index
    %c0_597 = arith.constant 0 : index
    %c0_598 = arith.constant 0 : index
    %858 = vector.load %arg1[%c0_595, %c3_596, %c0_597, %c0_598] : memref<2x9x8x128xf32, #tpu.memory_space<vmem>>, vector<1x1x8x128xf32>
    %859 = vector.shape_cast %858 : vector<1x1x8x128xf32> to vector<8x128xf32>
    %c0_599 = arith.constant 0 : index
    %c3_600 = arith.constant 3 : index
    %c0_601 = arith.constant 0 : index
    %c0_602 = arith.constant 0 : index
    %860 = vector.load %arg2[%c0_599, %c3_600, %c0_601, %c0_602] : memref<2x9x8x128xf32, #tpu.memory_space<vmem>>, vector<1x1x8x128xf32>
    %861 = vector.shape_cast %860 : vector<1x1x8x128xf32> to vector<8x128xf32>
    %c0_603 = arith.constant 0 : index
    %c2_604 = arith.constant 2 : index
    %c0_605 = arith.constant 0 : index
    %c0_606 = arith.constant 0 : index
    %862 = vector.load %arg1[%c0_603, %c2_604, %c0_605, %c0_606] : memref<2x9x8x128xf32, #tpu.memory_space<vmem>>, vector<1x1x8x128xf32>
    %863 = vector.shape_cast %862 : vector<1x1x8x128xf32> to vector<8x128xf32>
    %c0_607 = arith.constant 0 : index
    %c2_608 = arith.constant 2 : index
    %c0_609 = arith.constant 0 : index
    %c0_610 = arith.constant 0 : index
    %864 = vector.load %arg2[%c0_607, %c2_608, %c0_609, %c0_610] : memref<2x9x8x128xf32, #tpu.memory_space<vmem>>, vector<1x1x8x128xf32>
    %865 = vector.shape_cast %864 : vector<1x1x8x128xf32> to vector<8x128xf32>
    %866 = arith.mulf %859, %863 : vector<8x128xf32>
    %867 = arith.mulf %861, %865 : vector<8x128xf32>
    %868 = arith.addf %866, %867 : vector<8x128xf32>
    %869 = arith.addf %1, %868 : vector<8x128xf32>
    %870 = arith.mulf %861, %863 : vector<8x128xf32>
    %871 = arith.mulf %859, %865 : vector<8x128xf32>
    %872 = arith.subf %870, %871 : vector<8x128xf32>
    %873 = arith.addf %1, %872 : vector<8x128xf32>
    %c1_611 = arith.constant 1 : index
    %c3_612 = arith.constant 3 : index
    %c0_613 = arith.constant 0 : index
    %c0_614 = arith.constant 0 : index
    %874 = vector.load %arg1[%c1_611, %c3_612, %c0_613, %c0_614] : memref<2x9x8x128xf32, #tpu.memory_space<vmem>>, vector<1x1x8x128xf32>
    %875 = vector.shape_cast %874 : vector<1x1x8x128xf32> to vector<8x128xf32>
    %c1_615 = arith.constant 1 : index
    %c3_616 = arith.constant 3 : index
    %c0_617 = arith.constant 0 : index
    %c0_618 = arith.constant 0 : index
    %876 = vector.load %arg2[%c1_615, %c3_616, %c0_617, %c0_618] : memref<2x9x8x128xf32, #tpu.memory_space<vmem>>, vector<1x1x8x128xf32>
    %877 = vector.shape_cast %876 : vector<1x1x8x128xf32> to vector<8x128xf32>
    %c1_619 = arith.constant 1 : index
    %c2_620 = arith.constant 2 : index
    %c0_621 = arith.constant 0 : index
    %c0_622 = arith.constant 0 : index
    %878 = vector.load %arg1[%c1_619, %c2_620, %c0_621, %c0_622] : memref<2x9x8x128xf32, #tpu.memory_space<vmem>>, vector<1x1x8x128xf32>
    %879 = vector.shape_cast %878 : vector<1x1x8x128xf32> to vector<8x128xf32>
    %c1_623 = arith.constant 1 : index
    %c2_624 = arith.constant 2 : index
    %c0_625 = arith.constant 0 : index
    %c0_626 = arith.constant 0 : index
    %880 = vector.load %arg2[%c1_623, %c2_624, %c0_625, %c0_626] : memref<2x9x8x128xf32, #tpu.memory_space<vmem>>, vector<1x1x8x128xf32>
    %881 = vector.shape_cast %880 : vector<1x1x8x128xf32> to vector<8x128xf32>
    %882 = arith.mulf %875, %879 : vector<8x128xf32>
    %883 = arith.mulf %877, %881 : vector<8x128xf32>
    %884 = arith.addf %882, %883 : vector<8x128xf32>
    %885 = arith.addf %869, %884 : vector<8x128xf32>
    %886 = arith.mulf %877, %879 : vector<8x128xf32>
    %887 = arith.mulf %875, %881 : vector<8x128xf32>
    %888 = arith.subf %886, %887 : vector<8x128xf32>
    %889 = arith.addf %873, %888 : vector<8x128xf32>
    %c0_627 = arith.constant 0 : index
    %c3_628 = arith.constant 3 : index
    %c0_629 = arith.constant 0 : index
    %c0_630 = arith.constant 0 : index
    %890 = vector.load %arg1[%c0_627, %c3_628, %c0_629, %c0_630] : memref<2x9x8x128xf32, #tpu.memory_space<vmem>>, vector<1x1x8x128xf32>
    %891 = vector.shape_cast %890 : vector<1x1x8x128xf32> to vector<8x128xf32>
    %c0_631 = arith.constant 0 : index
    %c3_632 = arith.constant 3 : index
    %c0_633 = arith.constant 0 : index
    %c0_634 = arith.constant 0 : index
    %892 = vector.load %arg2[%c0_631, %c3_632, %c0_633, %c0_634] : memref<2x9x8x128xf32, #tpu.memory_space<vmem>>, vector<1x1x8x128xf32>
    %893 = vector.shape_cast %892 : vector<1x1x8x128xf32> to vector<8x128xf32>
    %894 = arith.mulf %885, %891 : vector<8x128xf32>
    %895 = arith.mulf %889, %893 : vector<8x128xf32>
    %896 = arith.subf %894, %895 : vector<8x128xf32>
    %897 = arith.mulf %885, %893 : vector<8x128xf32>
    %898 = arith.mulf %889, %891 : vector<8x128xf32>
    %899 = arith.addf %897, %898 : vector<8x128xf32>
    %c0_635 = arith.constant 0 : index
    %c7 = arith.constant 7 : index
    %900 = memref.load %arg4[%c0_635, %c7] : memref<2x16xf32, #tpu.memory_space<smem>>
    %c0_636 = arith.constant 0 : index
    %c7_637 = arith.constant 7 : index
    %901 = memref.load %arg5[%c0_636, %c7_637] : memref<2x16xf32, #tpu.memory_space<smem>>
    %902 = vector.broadcast %900 : f32 to vector<8x128xf32>
    %903 = arith.mulf %902, %896 : vector<8x128xf32>
    %904 = vector.broadcast %901 : f32 to vector<8x128xf32>
    %905 = arith.mulf %904, %899 : vector<8x128xf32>
    %906 = arith.subf %903, %905 : vector<8x128xf32>
    %907 = arith.addf %815, %906 : vector<8x128xf32>
    %908 = vector.broadcast %900 : f32 to vector<8x128xf32>
    %909 = arith.mulf %908, %899 : vector<8x128xf32>
    %910 = vector.broadcast %901 : f32 to vector<8x128xf32>
    %911 = arith.mulf %910, %896 : vector<8x128xf32>
    %912 = arith.addf %909, %911 : vector<8x128xf32>
    %913 = arith.addf %821, %912 : vector<8x128xf32>
    %c1_638 = arith.constant 1 : index
    %c3_639 = arith.constant 3 : index
    %c0_640 = arith.constant 0 : index
    %c0_641 = arith.constant 0 : index
    %914 = vector.load %arg1[%c1_638, %c3_639, %c0_640, %c0_641] : memref<2x9x8x128xf32, #tpu.memory_space<vmem>>, vector<1x1x8x128xf32>
    %915 = vector.shape_cast %914 : vector<1x1x8x128xf32> to vector<8x128xf32>
    %c1_642 = arith.constant 1 : index
    %c3_643 = arith.constant 3 : index
    %c0_644 = arith.constant 0 : index
    %c0_645 = arith.constant 0 : index
    %916 = vector.load %arg2[%c1_642, %c3_643, %c0_644, %c0_645] : memref<2x9x8x128xf32, #tpu.memory_space<vmem>>, vector<1x1x8x128xf32>
    %917 = vector.shape_cast %916 : vector<1x1x8x128xf32> to vector<8x128xf32>
    %918 = arith.mulf %885, %915 : vector<8x128xf32>
    %919 = arith.mulf %889, %917 : vector<8x128xf32>
    %920 = arith.subf %918, %919 : vector<8x128xf32>
    %921 = arith.mulf %885, %917 : vector<8x128xf32>
    %922 = arith.mulf %889, %915 : vector<8x128xf32>
    %923 = arith.addf %921, %922 : vector<8x128xf32>
    %c1_646 = arith.constant 1 : index
    %c7_647 = arith.constant 7 : index
    %924 = memref.load %arg4[%c1_646, %c7_647] : memref<2x16xf32, #tpu.memory_space<smem>>
    %c1_648 = arith.constant 1 : index
    %c7_649 = arith.constant 7 : index
    %925 = memref.load %arg5[%c1_648, %c7_649] : memref<2x16xf32, #tpu.memory_space<smem>>
    %926 = vector.broadcast %924 : f32 to vector<8x128xf32>
    %927 = arith.mulf %926, %920 : vector<8x128xf32>
    %928 = vector.broadcast %925 : f32 to vector<8x128xf32>
    %929 = arith.mulf %928, %923 : vector<8x128xf32>
    %930 = arith.subf %927, %929 : vector<8x128xf32>
    %931 = arith.addf %851, %930 : vector<8x128xf32>
    %932 = vector.broadcast %924 : f32 to vector<8x128xf32>
    %933 = arith.mulf %932, %923 : vector<8x128xf32>
    %934 = vector.broadcast %925 : f32 to vector<8x128xf32>
    %935 = arith.mulf %934, %920 : vector<8x128xf32>
    %936 = arith.addf %933, %935 : vector<8x128xf32>
    %937 = arith.addf %857, %936 : vector<8x128xf32>
    %c0_650 = arith.constant 0 : index
    %c5_651 = arith.constant 5 : index
    %c0_652 = arith.constant 0 : index
    %c0_653 = arith.constant 0 : index
    %938 = vector.load %arg1[%c0_650, %c5_651, %c0_652, %c0_653] : memref<2x9x8x128xf32, #tpu.memory_space<vmem>>, vector<1x1x8x128xf32>
    %939 = vector.shape_cast %938 : vector<1x1x8x128xf32> to vector<8x128xf32>
    %c0_654 = arith.constant 0 : index
    %c5_655 = arith.constant 5 : index
    %c0_656 = arith.constant 0 : index
    %c0_657 = arith.constant 0 : index
    %940 = vector.load %arg2[%c0_654, %c5_655, %c0_656, %c0_657] : memref<2x9x8x128xf32, #tpu.memory_space<vmem>>, vector<1x1x8x128xf32>
    %941 = vector.shape_cast %940 : vector<1x1x8x128xf32> to vector<8x128xf32>
    %c0_658 = arith.constant 0 : index
    %c4_659 = arith.constant 4 : index
    %c0_660 = arith.constant 0 : index
    %c0_661 = arith.constant 0 : index
    %942 = vector.load %arg1[%c0_658, %c4_659, %c0_660, %c0_661] : memref<2x9x8x128xf32, #tpu.memory_space<vmem>>, vector<1x1x8x128xf32>
    %943 = vector.shape_cast %942 : vector<1x1x8x128xf32> to vector<8x128xf32>
    %c0_662 = arith.constant 0 : index
    %c4_663 = arith.constant 4 : index
    %c0_664 = arith.constant 0 : index
    %c0_665 = arith.constant 0 : index
    %944 = vector.load %arg2[%c0_662, %c4_663, %c0_664, %c0_665] : memref<2x9x8x128xf32, #tpu.memory_space<vmem>>, vector<1x1x8x128xf32>
    %945 = vector.shape_cast %944 : vector<1x1x8x128xf32> to vector<8x128xf32>
    %946 = arith.mulf %939, %943 : vector<8x128xf32>
    %947 = arith.mulf %941, %945 : vector<8x128xf32>
    %948 = arith.addf %946, %947 : vector<8x128xf32>
    %949 = arith.addf %1, %948 : vector<8x128xf32>
    %950 = arith.mulf %941, %943 : vector<8x128xf32>
    %951 = arith.mulf %939, %945 : vector<8x128xf32>
    %952 = arith.subf %950, %951 : vector<8x128xf32>
    %953 = arith.addf %1, %952 : vector<8x128xf32>
    %c0_666 = arith.constant 0 : index
    %c3_667 = arith.constant 3 : index
    %c0_668 = arith.constant 0 : index
    %c0_669 = arith.constant 0 : index
    %954 = vector.load %arg1[%c0_666, %c3_667, %c0_668, %c0_669] : memref<2x9x8x128xf32, #tpu.memory_space<vmem>>, vector<1x1x8x128xf32>
    %955 = vector.shape_cast %954 : vector<1x1x8x128xf32> to vector<8x128xf32>
    %c0_670 = arith.constant 0 : index
    %c3_671 = arith.constant 3 : index
    %c0_672 = arith.constant 0 : index
    %c0_673 = arith.constant 0 : index
    %956 = vector.load %arg2[%c0_670, %c3_671, %c0_672, %c0_673] : memref<2x9x8x128xf32, #tpu.memory_space<vmem>>, vector<1x1x8x128xf32>
    %957 = vector.shape_cast %956 : vector<1x1x8x128xf32> to vector<8x128xf32>
    %958 = arith.mulf %955, %943 : vector<8x128xf32>
    %959 = arith.mulf %957, %945 : vector<8x128xf32>
    %960 = arith.addf %958, %959 : vector<8x128xf32>
    %961 = arith.addf %1, %960 : vector<8x128xf32>
    %962 = arith.mulf %957, %943 : vector<8x128xf32>
    %963 = arith.mulf %955, %945 : vector<8x128xf32>
    %964 = arith.subf %962, %963 : vector<8x128xf32>
    %965 = arith.addf %1, %964 : vector<8x128xf32>
    %c1_674 = arith.constant 1 : index
    %c5_675 = arith.constant 5 : index
    %c0_676 = arith.constant 0 : index
    %c0_677 = arith.constant 0 : index
    %966 = vector.load %arg1[%c1_674, %c5_675, %c0_676, %c0_677] : memref<2x9x8x128xf32, #tpu.memory_space<vmem>>, vector<1x1x8x128xf32>
    %967 = vector.shape_cast %966 : vector<1x1x8x128xf32> to vector<8x128xf32>
    %c1_678 = arith.constant 1 : index
    %c5_679 = arith.constant 5 : index
    %c0_680 = arith.constant 0 : index
    %c0_681 = arith.constant 0 : index
    %968 = vector.load %arg2[%c1_678, %c5_679, %c0_680, %c0_681] : memref<2x9x8x128xf32, #tpu.memory_space<vmem>>, vector<1x1x8x128xf32>
    %969 = vector.shape_cast %968 : vector<1x1x8x128xf32> to vector<8x128xf32>
    %c1_682 = arith.constant 1 : index
    %c4_683 = arith.constant 4 : index
    %c0_684 = arith.constant 0 : index
    %c0_685 = arith.constant 0 : index
    %970 = vector.load %arg1[%c1_682, %c4_683, %c0_684, %c0_685] : memref<2x9x8x128xf32, #tpu.memory_space<vmem>>, vector<1x1x8x128xf32>
    %971 = vector.shape_cast %970 : vector<1x1x8x128xf32> to vector<8x128xf32>
    %c1_686 = arith.constant 1 : index
    %c4_687 = arith.constant 4 : index
    %c0_688 = arith.constant 0 : index
    %c0_689 = arith.constant 0 : index
    %972 = vector.load %arg2[%c1_686, %c4_687, %c0_688, %c0_689] : memref<2x9x8x128xf32, #tpu.memory_space<vmem>>, vector<1x1x8x128xf32>
    %973 = vector.shape_cast %972 : vector<1x1x8x128xf32> to vector<8x128xf32>
    %974 = arith.mulf %967, %971 : vector<8x128xf32>
    %975 = arith.mulf %969, %973 : vector<8x128xf32>
    %976 = arith.addf %974, %975 : vector<8x128xf32>
    %977 = arith.addf %949, %976 : vector<8x128xf32>
    %978 = arith.mulf %969, %971 : vector<8x128xf32>
    %979 = arith.mulf %967, %973 : vector<8x128xf32>
    %980 = arith.subf %978, %979 : vector<8x128xf32>
    %981 = arith.addf %953, %980 : vector<8x128xf32>
    %c1_690 = arith.constant 1 : index
    %c3_691 = arith.constant 3 : index
    %c0_692 = arith.constant 0 : index
    %c0_693 = arith.constant 0 : index
    %982 = vector.load %arg1[%c1_690, %c3_691, %c0_692, %c0_693] : memref<2x9x8x128xf32, #tpu.memory_space<vmem>>, vector<1x1x8x128xf32>
    %983 = vector.shape_cast %982 : vector<1x1x8x128xf32> to vector<8x128xf32>
    %c1_694 = arith.constant 1 : index
    %c3_695 = arith.constant 3 : index
    %c0_696 = arith.constant 0 : index
    %c0_697 = arith.constant 0 : index
    %984 = vector.load %arg2[%c1_694, %c3_695, %c0_696, %c0_697] : memref<2x9x8x128xf32, #tpu.memory_space<vmem>>, vector<1x1x8x128xf32>
    %985 = vector.shape_cast %984 : vector<1x1x8x128xf32> to vector<8x128xf32>
    %986 = arith.mulf %983, %971 : vector<8x128xf32>
    %987 = arith.mulf %985, %973 : vector<8x128xf32>
    %988 = arith.addf %986, %987 : vector<8x128xf32>
    %989 = arith.addf %961, %988 : vector<8x128xf32>
    %990 = arith.mulf %985, %971 : vector<8x128xf32>
    %991 = arith.mulf %983, %973 : vector<8x128xf32>
    %992 = arith.subf %990, %991 : vector<8x128xf32>
    %993 = arith.addf %965, %992 : vector<8x128xf32>
    %c0_698 = arith.constant 0 : index
    %c3_699 = arith.constant 3 : index
    %c0_700 = arith.constant 0 : index
    %c0_701 = arith.constant 0 : index
    %994 = vector.load %arg1[%c0_698, %c3_699, %c0_700, %c0_701] : memref<2x9x8x128xf32, #tpu.memory_space<vmem>>, vector<1x1x8x128xf32>
    %995 = vector.shape_cast %994 : vector<1x1x8x128xf32> to vector<8x128xf32>
    %c0_702 = arith.constant 0 : index
    %c3_703 = arith.constant 3 : index
    %c0_704 = arith.constant 0 : index
    %c0_705 = arith.constant 0 : index
    %996 = vector.load %arg2[%c0_702, %c3_703, %c0_704, %c0_705] : memref<2x9x8x128xf32, #tpu.memory_space<vmem>>, vector<1x1x8x128xf32>
    %997 = vector.shape_cast %996 : vector<1x1x8x128xf32> to vector<8x128xf32>
    %998 = arith.mulf %977, %995 : vector<8x128xf32>
    %999 = arith.mulf %981, %997 : vector<8x128xf32>
    %1000 = arith.subf %998, %999 : vector<8x128xf32>
    %1001 = arith.mulf %977, %997 : vector<8x128xf32>
    %1002 = arith.mulf %981, %995 : vector<8x128xf32>
    %1003 = arith.addf %1001, %1002 : vector<8x128xf32>
    %c0_706 = arith.constant 0 : index
    %c5_707 = arith.constant 5 : index
    %c0_708 = arith.constant 0 : index
    %c0_709 = arith.constant 0 : index
    %1004 = vector.load %arg1[%c0_706, %c5_707, %c0_708, %c0_709] : memref<2x9x8x128xf32, #tpu.memory_space<vmem>>, vector<1x1x8x128xf32>
    %1005 = vector.shape_cast %1004 : vector<1x1x8x128xf32> to vector<8x128xf32>
    %c0_710 = arith.constant 0 : index
    %c5_711 = arith.constant 5 : index
    %c0_712 = arith.constant 0 : index
    %c0_713 = arith.constant 0 : index
    %1006 = vector.load %arg2[%c0_710, %c5_711, %c0_712, %c0_713] : memref<2x9x8x128xf32, #tpu.memory_space<vmem>>, vector<1x1x8x128xf32>
    %1007 = vector.shape_cast %1006 : vector<1x1x8x128xf32> to vector<8x128xf32>
    %1008 = arith.mulf %989, %1005 : vector<8x128xf32>
    %1009 = arith.mulf %993, %1007 : vector<8x128xf32>
    %1010 = arith.subf %1008, %1009 : vector<8x128xf32>
    %1011 = arith.addf %1000, %1010 : vector<8x128xf32>
    %1012 = arith.mulf %989, %1007 : vector<8x128xf32>
    %1013 = arith.mulf %993, %1005 : vector<8x128xf32>
    %1014 = arith.addf %1012, %1013 : vector<8x128xf32>
    %1015 = arith.addf %1003, %1014 : vector<8x128xf32>
    %c0_714 = arith.constant 0 : index
    %c8 = arith.constant 8 : index
    %1016 = memref.load %arg4[%c0_714, %c8] : memref<2x16xf32, #tpu.memory_space<smem>>
    %c0_715 = arith.constant 0 : index
    %c8_716 = arith.constant 8 : index
    %1017 = memref.load %arg5[%c0_715, %c8_716] : memref<2x16xf32, #tpu.memory_space<smem>>
    %1018 = vector.broadcast %1016 : f32 to vector<8x128xf32>
    %1019 = arith.mulf %1018, %1011 : vector<8x128xf32>
    %1020 = vector.broadcast %1017 : f32 to vector<8x128xf32>
    %1021 = arith.mulf %1020, %1015 : vector<8x128xf32>
    %1022 = arith.subf %1019, %1021 : vector<8x128xf32>
    %1023 = arith.addf %907, %1022 : vector<8x128xf32>
    %1024 = vector.broadcast %1016 : f32 to vector<8x128xf32>
    %1025 = arith.mulf %1024, %1015 : vector<8x128xf32>
    %1026 = vector.broadcast %1017 : f32 to vector<8x128xf32>
    %1027 = arith.mulf %1026, %1011 : vector<8x128xf32>
    %1028 = arith.addf %1025, %1027 : vector<8x128xf32>
    %1029 = arith.addf %913, %1028 : vector<8x128xf32>
    %c1_717 = arith.constant 1 : index
    %c3_718 = arith.constant 3 : index
    %c0_719 = arith.constant 0 : index
    %c0_720 = arith.constant 0 : index
    %1030 = vector.load %arg1[%c1_717, %c3_718, %c0_719, %c0_720] : memref<2x9x8x128xf32, #tpu.memory_space<vmem>>, vector<1x1x8x128xf32>
    %1031 = vector.shape_cast %1030 : vector<1x1x8x128xf32> to vector<8x128xf32>
    %c1_721 = arith.constant 1 : index
    %c3_722 = arith.constant 3 : index
    %c0_723 = arith.constant 0 : index
    %c0_724 = arith.constant 0 : index
    %1032 = vector.load %arg2[%c1_721, %c3_722, %c0_723, %c0_724] : memref<2x9x8x128xf32, #tpu.memory_space<vmem>>, vector<1x1x8x128xf32>
    %1033 = vector.shape_cast %1032 : vector<1x1x8x128xf32> to vector<8x128xf32>
    %1034 = arith.mulf %977, %1031 : vector<8x128xf32>
    %1035 = arith.mulf %981, %1033 : vector<8x128xf32>
    %1036 = arith.subf %1034, %1035 : vector<8x128xf32>
    %1037 = arith.mulf %977, %1033 : vector<8x128xf32>
    %1038 = arith.mulf %981, %1031 : vector<8x128xf32>
    %1039 = arith.addf %1037, %1038 : vector<8x128xf32>
    %c1_725 = arith.constant 1 : index
    %c5_726 = arith.constant 5 : index
    %c0_727 = arith.constant 0 : index
    %c0_728 = arith.constant 0 : index
    %1040 = vector.load %arg1[%c1_725, %c5_726, %c0_727, %c0_728] : memref<2x9x8x128xf32, #tpu.memory_space<vmem>>, vector<1x1x8x128xf32>
    %1041 = vector.shape_cast %1040 : vector<1x1x8x128xf32> to vector<8x128xf32>
    %c1_729 = arith.constant 1 : index
    %c5_730 = arith.constant 5 : index
    %c0_731 = arith.constant 0 : index
    %c0_732 = arith.constant 0 : index
    %1042 = vector.load %arg2[%c1_729, %c5_730, %c0_731, %c0_732] : memref<2x9x8x128xf32, #tpu.memory_space<vmem>>, vector<1x1x8x128xf32>
    %1043 = vector.shape_cast %1042 : vector<1x1x8x128xf32> to vector<8x128xf32>
    %1044 = arith.mulf %989, %1041 : vector<8x128xf32>
    %1045 = arith.mulf %993, %1043 : vector<8x128xf32>
    %1046 = arith.subf %1044, %1045 : vector<8x128xf32>
    %1047 = arith.addf %1036, %1046 : vector<8x128xf32>
    %1048 = arith.mulf %989, %1043 : vector<8x128xf32>
    %1049 = arith.mulf %993, %1041 : vector<8x128xf32>
    %1050 = arith.addf %1048, %1049 : vector<8x128xf32>
    %1051 = arith.addf %1039, %1050 : vector<8x128xf32>
    %c1_733 = arith.constant 1 : index
    %c8_734 = arith.constant 8 : index
    %1052 = memref.load %arg4[%c1_733, %c8_734] : memref<2x16xf32, #tpu.memory_space<smem>>
    %c1_735 = arith.constant 1 : index
    %c8_736 = arith.constant 8 : index
    %1053 = memref.load %arg5[%c1_735, %c8_736] : memref<2x16xf32, #tpu.memory_space<smem>>
    %1054 = vector.broadcast %1052 : f32 to vector<8x128xf32>
    %1055 = arith.mulf %1054, %1047 : vector<8x128xf32>
    %1056 = vector.broadcast %1053 : f32 to vector<8x128xf32>
    %1057 = arith.mulf %1056, %1051 : vector<8x128xf32>
    %1058 = arith.subf %1055, %1057 : vector<8x128xf32>
    %1059 = arith.addf %931, %1058 : vector<8x128xf32>
    %1060 = vector.broadcast %1052 : f32 to vector<8x128xf32>
    %1061 = arith.mulf %1060, %1051 : vector<8x128xf32>
    %1062 = vector.broadcast %1053 : f32 to vector<8x128xf32>
    %1063 = arith.mulf %1062, %1047 : vector<8x128xf32>
    %1064 = arith.addf %1061, %1063 : vector<8x128xf32>
    %1065 = arith.addf %937, %1064 : vector<8x128xf32>
    %c0_737 = arith.constant 0 : index
    %c6_738 = arith.constant 6 : index
    %c0_739 = arith.constant 0 : index
    %c0_740 = arith.constant 0 : index
    %1066 = vector.load %arg1[%c0_737, %c6_738, %c0_739, %c0_740] : memref<2x9x8x128xf32, #tpu.memory_space<vmem>>, vector<1x1x8x128xf32>
    %1067 = vector.shape_cast %1066 : vector<1x1x8x128xf32> to vector<8x128xf32>
    %c0_741 = arith.constant 0 : index
    %c6_742 = arith.constant 6 : index
    %c0_743 = arith.constant 0 : index
    %c0_744 = arith.constant 0 : index
    %1068 = vector.load %arg2[%c0_741, %c6_742, %c0_743, %c0_744] : memref<2x9x8x128xf32, #tpu.memory_space<vmem>>, vector<1x1x8x128xf32>
    %1069 = vector.shape_cast %1068 : vector<1x1x8x128xf32> to vector<8x128xf32>
    %c0_745 = arith.constant 0 : index
    %c5_746 = arith.constant 5 : index
    %c0_747 = arith.constant 0 : index
    %c0_748 = arith.constant 0 : index
    %1070 = vector.load %arg1[%c0_745, %c5_746, %c0_747, %c0_748] : memref<2x9x8x128xf32, #tpu.memory_space<vmem>>, vector<1x1x8x128xf32>
    %1071 = vector.shape_cast %1070 : vector<1x1x8x128xf32> to vector<8x128xf32>
    %c0_749 = arith.constant 0 : index
    %c5_750 = arith.constant 5 : index
    %c0_751 = arith.constant 0 : index
    %c0_752 = arith.constant 0 : index
    %1072 = vector.load %arg2[%c0_749, %c5_750, %c0_751, %c0_752] : memref<2x9x8x128xf32, #tpu.memory_space<vmem>>, vector<1x1x8x128xf32>
    %1073 = vector.shape_cast %1072 : vector<1x1x8x128xf32> to vector<8x128xf32>
    %1074 = arith.mulf %1067, %1071 : vector<8x128xf32>
    %1075 = arith.mulf %1069, %1073 : vector<8x128xf32>
    %1076 = arith.addf %1074, %1075 : vector<8x128xf32>
    %1077 = arith.addf %1, %1076 : vector<8x128xf32>
    %1078 = arith.mulf %1069, %1071 : vector<8x128xf32>
    %1079 = arith.mulf %1067, %1073 : vector<8x128xf32>
    %1080 = arith.subf %1078, %1079 : vector<8x128xf32>
    %1081 = arith.addf %1, %1080 : vector<8x128xf32>
    %c0_753 = arith.constant 0 : index
    %c3_754 = arith.constant 3 : index
    %c0_755 = arith.constant 0 : index
    %c0_756 = arith.constant 0 : index
    %1082 = vector.load %arg1[%c0_753, %c3_754, %c0_755, %c0_756] : memref<2x9x8x128xf32, #tpu.memory_space<vmem>>, vector<1x1x8x128xf32>
    %1083 = vector.shape_cast %1082 : vector<1x1x8x128xf32> to vector<8x128xf32>
    %c0_757 = arith.constant 0 : index
    %c3_758 = arith.constant 3 : index
    %c0_759 = arith.constant 0 : index
    %c0_760 = arith.constant 0 : index
    %1084 = vector.load %arg2[%c0_757, %c3_758, %c0_759, %c0_760] : memref<2x9x8x128xf32, #tpu.memory_space<vmem>>, vector<1x1x8x128xf32>
    %1085 = vector.shape_cast %1084 : vector<1x1x8x128xf32> to vector<8x128xf32>
    %1086 = arith.mulf %1083, %1071 : vector<8x128xf32>
    %1087 = arith.mulf %1085, %1073 : vector<8x128xf32>
    %1088 = arith.addf %1086, %1087 : vector<8x128xf32>
    %1089 = arith.addf %1, %1088 : vector<8x128xf32>
    %1090 = arith.mulf %1085, %1071 : vector<8x128xf32>
    %1091 = arith.mulf %1083, %1073 : vector<8x128xf32>
    %1092 = arith.subf %1090, %1091 : vector<8x128xf32>
    %1093 = arith.addf %1, %1092 : vector<8x128xf32>
    %c1_761 = arith.constant 1 : index
    %c6_762 = arith.constant 6 : index
    %c0_763 = arith.constant 0 : index
    %c0_764 = arith.constant 0 : index
    %1094 = vector.load %arg1[%c1_761, %c6_762, %c0_763, %c0_764] : memref<2x9x8x128xf32, #tpu.memory_space<vmem>>, vector<1x1x8x128xf32>
    %1095 = vector.shape_cast %1094 : vector<1x1x8x128xf32> to vector<8x128xf32>
    %c1_765 = arith.constant 1 : index
    %c6_766 = arith.constant 6 : index
    %c0_767 = arith.constant 0 : index
    %c0_768 = arith.constant 0 : index
    %1096 = vector.load %arg2[%c1_765, %c6_766, %c0_767, %c0_768] : memref<2x9x8x128xf32, #tpu.memory_space<vmem>>, vector<1x1x8x128xf32>
    %1097 = vector.shape_cast %1096 : vector<1x1x8x128xf32> to vector<8x128xf32>
    %c1_769 = arith.constant 1 : index
    %c5_770 = arith.constant 5 : index
    %c0_771 = arith.constant 0 : index
    %c0_772 = arith.constant 0 : index
    %1098 = vector.load %arg1[%c1_769, %c5_770, %c0_771, %c0_772] : memref<2x9x8x128xf32, #tpu.memory_space<vmem>>, vector<1x1x8x128xf32>
    %1099 = vector.shape_cast %1098 : vector<1x1x8x128xf32> to vector<8x128xf32>
    %c1_773 = arith.constant 1 : index
    %c5_774 = arith.constant 5 : index
    %c0_775 = arith.constant 0 : index
    %c0_776 = arith.constant 0 : index
    %1100 = vector.load %arg2[%c1_773, %c5_774, %c0_775, %c0_776] : memref<2x9x8x128xf32, #tpu.memory_space<vmem>>, vector<1x1x8x128xf32>
    %1101 = vector.shape_cast %1100 : vector<1x1x8x128xf32> to vector<8x128xf32>
    %1102 = arith.mulf %1095, %1099 : vector<8x128xf32>
    %1103 = arith.mulf %1097, %1101 : vector<8x128xf32>
    %1104 = arith.addf %1102, %1103 : vector<8x128xf32>
    %1105 = arith.addf %1077, %1104 : vector<8x128xf32>
    %1106 = arith.mulf %1097, %1099 : vector<8x128xf32>
    %1107 = arith.mulf %1095, %1101 : vector<8x128xf32>
    %1108 = arith.subf %1106, %1107 : vector<8x128xf32>
    %1109 = arith.addf %1081, %1108 : vector<8x128xf32>
    %c1_777 = arith.constant 1 : index
    %c3_778 = arith.constant 3 : index
    %c0_779 = arith.constant 0 : index
    %c0_780 = arith.constant 0 : index
    %1110 = vector.load %arg1[%c1_777, %c3_778, %c0_779, %c0_780] : memref<2x9x8x128xf32, #tpu.memory_space<vmem>>, vector<1x1x8x128xf32>
    %1111 = vector.shape_cast %1110 : vector<1x1x8x128xf32> to vector<8x128xf32>
    %c1_781 = arith.constant 1 : index
    %c3_782 = arith.constant 3 : index
    %c0_783 = arith.constant 0 : index
    %c0_784 = arith.constant 0 : index
    %1112 = vector.load %arg2[%c1_781, %c3_782, %c0_783, %c0_784] : memref<2x9x8x128xf32, #tpu.memory_space<vmem>>, vector<1x1x8x128xf32>
    %1113 = vector.shape_cast %1112 : vector<1x1x8x128xf32> to vector<8x128xf32>
    %1114 = arith.mulf %1111, %1099 : vector<8x128xf32>
    %1115 = arith.mulf %1113, %1101 : vector<8x128xf32>
    %1116 = arith.addf %1114, %1115 : vector<8x128xf32>
    %1117 = arith.addf %1089, %1116 : vector<8x128xf32>
    %1118 = arith.mulf %1113, %1099 : vector<8x128xf32>
    %1119 = arith.mulf %1111, %1101 : vector<8x128xf32>
    %1120 = arith.subf %1118, %1119 : vector<8x128xf32>
    %1121 = arith.addf %1093, %1120 : vector<8x128xf32>
    %c0_785 = arith.constant 0 : index
    %c3_786 = arith.constant 3 : index
    %c0_787 = arith.constant 0 : index
    %c0_788 = arith.constant 0 : index
    %1122 = vector.load %arg1[%c0_785, %c3_786, %c0_787, %c0_788] : memref<2x9x8x128xf32, #tpu.memory_space<vmem>>, vector<1x1x8x128xf32>
    %1123 = vector.shape_cast %1122 : vector<1x1x8x128xf32> to vector<8x128xf32>
    %c0_789 = arith.constant 0 : index
    %c3_790 = arith.constant 3 : index
    %c0_791 = arith.constant 0 : index
    %c0_792 = arith.constant 0 : index
    %1124 = vector.load %arg2[%c0_789, %c3_790, %c0_791, %c0_792] : memref<2x9x8x128xf32, #tpu.memory_space<vmem>>, vector<1x1x8x128xf32>
    %1125 = vector.shape_cast %1124 : vector<1x1x8x128xf32> to vector<8x128xf32>
    %1126 = arith.mulf %1105, %1123 : vector<8x128xf32>
    %1127 = arith.mulf %1109, %1125 : vector<8x128xf32>
    %1128 = arith.subf %1126, %1127 : vector<8x128xf32>
    %1129 = arith.mulf %1105, %1125 : vector<8x128xf32>
    %1130 = arith.mulf %1109, %1123 : vector<8x128xf32>
    %1131 = arith.addf %1129, %1130 : vector<8x128xf32>
    %c0_793 = arith.constant 0 : index
    %c6_794 = arith.constant 6 : index
    %c0_795 = arith.constant 0 : index
    %c0_796 = arith.constant 0 : index
    %1132 = vector.load %arg1[%c0_793, %c6_794, %c0_795, %c0_796] : memref<2x9x8x128xf32, #tpu.memory_space<vmem>>, vector<1x1x8x128xf32>
    %1133 = vector.shape_cast %1132 : vector<1x1x8x128xf32> to vector<8x128xf32>
    %c0_797 = arith.constant 0 : index
    %c6_798 = arith.constant 6 : index
    %c0_799 = arith.constant 0 : index
    %c0_800 = arith.constant 0 : index
    %1134 = vector.load %arg2[%c0_797, %c6_798, %c0_799, %c0_800] : memref<2x9x8x128xf32, #tpu.memory_space<vmem>>, vector<1x1x8x128xf32>
    %1135 = vector.shape_cast %1134 : vector<1x1x8x128xf32> to vector<8x128xf32>
    %1136 = arith.mulf %1117, %1133 : vector<8x128xf32>
    %1137 = arith.mulf %1121, %1135 : vector<8x128xf32>
    %1138 = arith.subf %1136, %1137 : vector<8x128xf32>
    %1139 = arith.addf %1128, %1138 : vector<8x128xf32>
    %1140 = arith.mulf %1117, %1135 : vector<8x128xf32>
    %1141 = arith.mulf %1121, %1133 : vector<8x128xf32>
    %1142 = arith.addf %1140, %1141 : vector<8x128xf32>
    %1143 = arith.addf %1131, %1142 : vector<8x128xf32>
    %c0_801 = arith.constant 0 : index
    %c9 = arith.constant 9 : index
    %1144 = memref.load %arg4[%c0_801, %c9] : memref<2x16xf32, #tpu.memory_space<smem>>
    %c0_802 = arith.constant 0 : index
    %c9_803 = arith.constant 9 : index
    %1145 = memref.load %arg5[%c0_802, %c9_803] : memref<2x16xf32, #tpu.memory_space<smem>>
    %1146 = vector.broadcast %1144 : f32 to vector<8x128xf32>
    %1147 = arith.mulf %1146, %1139 : vector<8x128xf32>
    %1148 = vector.broadcast %1145 : f32 to vector<8x128xf32>
    %1149 = arith.mulf %1148, %1143 : vector<8x128xf32>
    %1150 = arith.subf %1147, %1149 : vector<8x128xf32>
    %1151 = arith.addf %1023, %1150 : vector<8x128xf32>
    %1152 = vector.broadcast %1144 : f32 to vector<8x128xf32>
    %1153 = arith.mulf %1152, %1143 : vector<8x128xf32>
    %1154 = vector.broadcast %1145 : f32 to vector<8x128xf32>
    %1155 = arith.mulf %1154, %1139 : vector<8x128xf32>
    %1156 = arith.addf %1153, %1155 : vector<8x128xf32>
    %1157 = arith.addf %1029, %1156 : vector<8x128xf32>
    %c1_804 = arith.constant 1 : index
    %c3_805 = arith.constant 3 : index
    %c0_806 = arith.constant 0 : index
    %c0_807 = arith.constant 0 : index
    %1158 = vector.load %arg1[%c1_804, %c3_805, %c0_806, %c0_807] : memref<2x9x8x128xf32, #tpu.memory_space<vmem>>, vector<1x1x8x128xf32>
    %1159 = vector.shape_cast %1158 : vector<1x1x8x128xf32> to vector<8x128xf32>
    %c1_808 = arith.constant 1 : index
    %c3_809 = arith.constant 3 : index
    %c0_810 = arith.constant 0 : index
    %c0_811 = arith.constant 0 : index
    %1160 = vector.load %arg2[%c1_808, %c3_809, %c0_810, %c0_811] : memref<2x9x8x128xf32, #tpu.memory_space<vmem>>, vector<1x1x8x128xf32>
    %1161 = vector.shape_cast %1160 : vector<1x1x8x128xf32> to vector<8x128xf32>
    %1162 = arith.mulf %1105, %1159 : vector<8x128xf32>
    %1163 = arith.mulf %1109, %1161 : vector<8x128xf32>
    %1164 = arith.subf %1162, %1163 : vector<8x128xf32>
    %1165 = arith.mulf %1105, %1161 : vector<8x128xf32>
    %1166 = arith.mulf %1109, %1159 : vector<8x128xf32>
    %1167 = arith.addf %1165, %1166 : vector<8x128xf32>
    %c1_812 = arith.constant 1 : index
    %c6_813 = arith.constant 6 : index
    %c0_814 = arith.constant 0 : index
    %c0_815 = arith.constant 0 : index
    %1168 = vector.load %arg1[%c1_812, %c6_813, %c0_814, %c0_815] : memref<2x9x8x128xf32, #tpu.memory_space<vmem>>, vector<1x1x8x128xf32>
    %1169 = vector.shape_cast %1168 : vector<1x1x8x128xf32> to vector<8x128xf32>
    %c1_816 = arith.constant 1 : index
    %c6_817 = arith.constant 6 : index
    %c0_818 = arith.constant 0 : index
    %c0_819 = arith.constant 0 : index
    %1170 = vector.load %arg2[%c1_816, %c6_817, %c0_818, %c0_819] : memref<2x9x8x128xf32, #tpu.memory_space<vmem>>, vector<1x1x8x128xf32>
    %1171 = vector.shape_cast %1170 : vector<1x1x8x128xf32> to vector<8x128xf32>
    %1172 = arith.mulf %1117, %1169 : vector<8x128xf32>
    %1173 = arith.mulf %1121, %1171 : vector<8x128xf32>
    %1174 = arith.subf %1172, %1173 : vector<8x128xf32>
    %1175 = arith.addf %1164, %1174 : vector<8x128xf32>
    %1176 = arith.mulf %1117, %1171 : vector<8x128xf32>
    %1177 = arith.mulf %1121, %1169 : vector<8x128xf32>
    %1178 = arith.addf %1176, %1177 : vector<8x128xf32>
    %1179 = arith.addf %1167, %1178 : vector<8x128xf32>
    %c1_820 = arith.constant 1 : index
    %c9_821 = arith.constant 9 : index
    %1180 = memref.load %arg4[%c1_820, %c9_821] : memref<2x16xf32, #tpu.memory_space<smem>>
    %c1_822 = arith.constant 1 : index
    %c9_823 = arith.constant 9 : index
    %1181 = memref.load %arg5[%c1_822, %c9_823] : memref<2x16xf32, #tpu.memory_space<smem>>
    %1182 = vector.broadcast %1180 : f32 to vector<8x128xf32>
    %1183 = arith.mulf %1182, %1175 : vector<8x128xf32>
    %1184 = vector.broadcast %1181 : f32 to vector<8x128xf32>
    %1185 = arith.mulf %1184, %1179 : vector<8x128xf32>
    %1186 = arith.subf %1183, %1185 : vector<8x128xf32>
    %1187 = arith.addf %1059, %1186 : vector<8x128xf32>
    %1188 = vector.broadcast %1180 : f32 to vector<8x128xf32>
    %1189 = arith.mulf %1188, %1179 : vector<8x128xf32>
    %1190 = vector.broadcast %1181 : f32 to vector<8x128xf32>
    %1191 = arith.mulf %1190, %1175 : vector<8x128xf32>
    %1192 = arith.addf %1189, %1191 : vector<8x128xf32>
    %1193 = arith.addf %1065, %1192 : vector<8x128xf32>
    %c0_824 = arith.constant 0 : index
    %c7_825 = arith.constant 7 : index
    %c0_826 = arith.constant 0 : index
    %c0_827 = arith.constant 0 : index
    %1194 = vector.load %arg1[%c0_824, %c7_825, %c0_826, %c0_827] : memref<2x9x8x128xf32, #tpu.memory_space<vmem>>, vector<1x1x8x128xf32>
    %1195 = vector.shape_cast %1194 : vector<1x1x8x128xf32> to vector<8x128xf32>
    %c0_828 = arith.constant 0 : index
    %c7_829 = arith.constant 7 : index
    %c0_830 = arith.constant 0 : index
    %c0_831 = arith.constant 0 : index
    %1196 = vector.load %arg2[%c0_828, %c7_829, %c0_830, %c0_831] : memref<2x9x8x128xf32, #tpu.memory_space<vmem>>, vector<1x1x8x128xf32>
    %1197 = vector.shape_cast %1196 : vector<1x1x8x128xf32> to vector<8x128xf32>
    %c0_832 = arith.constant 0 : index
    %c6_833 = arith.constant 6 : index
    %c0_834 = arith.constant 0 : index
    %c0_835 = arith.constant 0 : index
    %1198 = vector.load %arg1[%c0_832, %c6_833, %c0_834, %c0_835] : memref<2x9x8x128xf32, #tpu.memory_space<vmem>>, vector<1x1x8x128xf32>
    %1199 = vector.shape_cast %1198 : vector<1x1x8x128xf32> to vector<8x128xf32>
    %c0_836 = arith.constant 0 : index
    %c6_837 = arith.constant 6 : index
    %c0_838 = arith.constant 0 : index
    %c0_839 = arith.constant 0 : index
    %1200 = vector.load %arg2[%c0_836, %c6_837, %c0_838, %c0_839] : memref<2x9x8x128xf32, #tpu.memory_space<vmem>>, vector<1x1x8x128xf32>
    %1201 = vector.shape_cast %1200 : vector<1x1x8x128xf32> to vector<8x128xf32>
    %1202 = arith.mulf %1195, %1199 : vector<8x128xf32>
    %1203 = arith.mulf %1197, %1201 : vector<8x128xf32>
    %1204 = arith.addf %1202, %1203 : vector<8x128xf32>
    %1205 = arith.addf %1, %1204 : vector<8x128xf32>
    %1206 = arith.mulf %1197, %1199 : vector<8x128xf32>
    %1207 = arith.mulf %1195, %1201 : vector<8x128xf32>
    %1208 = arith.subf %1206, %1207 : vector<8x128xf32>
    %1209 = arith.addf %1, %1208 : vector<8x128xf32>
    %c0_840 = arith.constant 0 : index
    %c3_841 = arith.constant 3 : index
    %c0_842 = arith.constant 0 : index
    %c0_843 = arith.constant 0 : index
    %1210 = vector.load %arg1[%c0_840, %c3_841, %c0_842, %c0_843] : memref<2x9x8x128xf32, #tpu.memory_space<vmem>>, vector<1x1x8x128xf32>
    %1211 = vector.shape_cast %1210 : vector<1x1x8x128xf32> to vector<8x128xf32>
    %c0_844 = arith.constant 0 : index
    %c3_845 = arith.constant 3 : index
    %c0_846 = arith.constant 0 : index
    %c0_847 = arith.constant 0 : index
    %1212 = vector.load %arg2[%c0_844, %c3_845, %c0_846, %c0_847] : memref<2x9x8x128xf32, #tpu.memory_space<vmem>>, vector<1x1x8x128xf32>
    %1213 = vector.shape_cast %1212 : vector<1x1x8x128xf32> to vector<8x128xf32>
    %1214 = arith.mulf %1211, %1199 : vector<8x128xf32>
    %1215 = arith.mulf %1213, %1201 : vector<8x128xf32>
    %1216 = arith.addf %1214, %1215 : vector<8x128xf32>
    %1217 = arith.addf %1, %1216 : vector<8x128xf32>
    %1218 = arith.mulf %1213, %1199 : vector<8x128xf32>
    %1219 = arith.mulf %1211, %1201 : vector<8x128xf32>
    %1220 = arith.subf %1218, %1219 : vector<8x128xf32>
    %1221 = arith.addf %1, %1220 : vector<8x128xf32>
    %c1_848 = arith.constant 1 : index
    %c7_849 = arith.constant 7 : index
    %c0_850 = arith.constant 0 : index
    %c0_851 = arith.constant 0 : index
    %1222 = vector.load %arg1[%c1_848, %c7_849, %c0_850, %c0_851] : memref<2x9x8x128xf32, #tpu.memory_space<vmem>>, vector<1x1x8x128xf32>
    %1223 = vector.shape_cast %1222 : vector<1x1x8x128xf32> to vector<8x128xf32>
    %c1_852 = arith.constant 1 : index
    %c7_853 = arith.constant 7 : index
    %c0_854 = arith.constant 0 : index
    %c0_855 = arith.constant 0 : index
    %1224 = vector.load %arg2[%c1_852, %c7_853, %c0_854, %c0_855] : memref<2x9x8x128xf32, #tpu.memory_space<vmem>>, vector<1x1x8x128xf32>
    %1225 = vector.shape_cast %1224 : vector<1x1x8x128xf32> to vector<8x128xf32>
    %c1_856 = arith.constant 1 : index
    %c6_857 = arith.constant 6 : index
    %c0_858 = arith.constant 0 : index
    %c0_859 = arith.constant 0 : index
    %1226 = vector.load %arg1[%c1_856, %c6_857, %c0_858, %c0_859] : memref<2x9x8x128xf32, #tpu.memory_space<vmem>>, vector<1x1x8x128xf32>
    %1227 = vector.shape_cast %1226 : vector<1x1x8x128xf32> to vector<8x128xf32>
    %c1_860 = arith.constant 1 : index
    %c6_861 = arith.constant 6 : index
    %c0_862 = arith.constant 0 : index
    %c0_863 = arith.constant 0 : index
    %1228 = vector.load %arg2[%c1_860, %c6_861, %c0_862, %c0_863] : memref<2x9x8x128xf32, #tpu.memory_space<vmem>>, vector<1x1x8x128xf32>
    %1229 = vector.shape_cast %1228 : vector<1x1x8x128xf32> to vector<8x128xf32>
    %1230 = arith.mulf %1223, %1227 : vector<8x128xf32>
    %1231 = arith.mulf %1225, %1229 : vector<8x128xf32>
    %1232 = arith.addf %1230, %1231 : vector<8x128xf32>
    %1233 = arith.addf %1205, %1232 : vector<8x128xf32>
    %1234 = arith.mulf %1225, %1227 : vector<8x128xf32>
    %1235 = arith.mulf %1223, %1229 : vector<8x128xf32>
    %1236 = arith.subf %1234, %1235 : vector<8x128xf32>
    %1237 = arith.addf %1209, %1236 : vector<8x128xf32>
    %c1_864 = arith.constant 1 : index
    %c3_865 = arith.constant 3 : index
    %c0_866 = arith.constant 0 : index
    %c0_867 = arith.constant 0 : index
    %1238 = vector.load %arg1[%c1_864, %c3_865, %c0_866, %c0_867] : memref<2x9x8x128xf32, #tpu.memory_space<vmem>>, vector<1x1x8x128xf32>
    %1239 = vector.shape_cast %1238 : vector<1x1x8x128xf32> to vector<8x128xf32>
    %c1_868 = arith.constant 1 : index
    %c3_869 = arith.constant 3 : index
    %c0_870 = arith.constant 0 : index
    %c0_871 = arith.constant 0 : index
    %1240 = vector.load %arg2[%c1_868, %c3_869, %c0_870, %c0_871] : memref<2x9x8x128xf32, #tpu.memory_space<vmem>>, vector<1x1x8x128xf32>
    %1241 = vector.shape_cast %1240 : vector<1x1x8x128xf32> to vector<8x128xf32>
    %1242 = arith.mulf %1239, %1227 : vector<8x128xf32>
    %1243 = arith.mulf %1241, %1229 : vector<8x128xf32>
    %1244 = arith.addf %1242, %1243 : vector<8x128xf32>
    %1245 = arith.addf %1217, %1244 : vector<8x128xf32>
    %1246 = arith.mulf %1241, %1227 : vector<8x128xf32>
    %1247 = arith.mulf %1239, %1229 : vector<8x128xf32>
    %1248 = arith.subf %1246, %1247 : vector<8x128xf32>
    %1249 = arith.addf %1221, %1248 : vector<8x128xf32>
    %c0_872 = arith.constant 0 : index
    %c3_873 = arith.constant 3 : index
    %c0_874 = arith.constant 0 : index
    %c0_875 = arith.constant 0 : index
    %1250 = vector.load %arg1[%c0_872, %c3_873, %c0_874, %c0_875] : memref<2x9x8x128xf32, #tpu.memory_space<vmem>>, vector<1x1x8x128xf32>
    %1251 = vector.shape_cast %1250 : vector<1x1x8x128xf32> to vector<8x128xf32>
    %c0_876 = arith.constant 0 : index
    %c3_877 = arith.constant 3 : index
    %c0_878 = arith.constant 0 : index
    %c0_879 = arith.constant 0 : index
    %1252 = vector.load %arg2[%c0_876, %c3_877, %c0_878, %c0_879] : memref<2x9x8x128xf32, #tpu.memory_space<vmem>>, vector<1x1x8x128xf32>
    %1253 = vector.shape_cast %1252 : vector<1x1x8x128xf32> to vector<8x128xf32>
    %1254 = arith.mulf %1233, %1251 : vector<8x128xf32>
    %1255 = arith.mulf %1237, %1253 : vector<8x128xf32>
    %1256 = arith.subf %1254, %1255 : vector<8x128xf32>
    %1257 = arith.mulf %1233, %1253 : vector<8x128xf32>
    %1258 = arith.mulf %1237, %1251 : vector<8x128xf32>
    %1259 = arith.addf %1257, %1258 : vector<8x128xf32>
    %c0_880 = arith.constant 0 : index
    %c7_881 = arith.constant 7 : index
    %c0_882 = arith.constant 0 : index
    %c0_883 = arith.constant 0 : index
    %1260 = vector.load %arg1[%c0_880, %c7_881, %c0_882, %c0_883] : memref<2x9x8x128xf32, #tpu.memory_space<vmem>>, vector<1x1x8x128xf32>
    %1261 = vector.shape_cast %1260 : vector<1x1x8x128xf32> to vector<8x128xf32>
    %c0_884 = arith.constant 0 : index
    %c7_885 = arith.constant 7 : index
    %c0_886 = arith.constant 0 : index
    %c0_887 = arith.constant 0 : index
    %1262 = vector.load %arg2[%c0_884, %c7_885, %c0_886, %c0_887] : memref<2x9x8x128xf32, #tpu.memory_space<vmem>>, vector<1x1x8x128xf32>
    %1263 = vector.shape_cast %1262 : vector<1x1x8x128xf32> to vector<8x128xf32>
    %1264 = arith.mulf %1245, %1261 : vector<8x128xf32>
    %1265 = arith.mulf %1249, %1263 : vector<8x128xf32>
    %1266 = arith.subf %1264, %1265 : vector<8x128xf32>
    %1267 = arith.addf %1256, %1266 : vector<8x128xf32>
    %1268 = arith.mulf %1245, %1263 : vector<8x128xf32>
    %1269 = arith.mulf %1249, %1261 : vector<8x128xf32>
    %1270 = arith.addf %1268, %1269 : vector<8x128xf32>
    %1271 = arith.addf %1259, %1270 : vector<8x128xf32>
    %c0_888 = arith.constant 0 : index
    %c10 = arith.constant 10 : index
    %1272 = memref.load %arg4[%c0_888, %c10] : memref<2x16xf32, #tpu.memory_space<smem>>
    %c0_889 = arith.constant 0 : index
    %c10_890 = arith.constant 10 : index
    %1273 = memref.load %arg5[%c0_889, %c10_890] : memref<2x16xf32, #tpu.memory_space<smem>>
    %1274 = vector.broadcast %1272 : f32 to vector<8x128xf32>
    %1275 = arith.mulf %1274, %1267 : vector<8x128xf32>
    %1276 = vector.broadcast %1273 : f32 to vector<8x128xf32>
    %1277 = arith.mulf %1276, %1271 : vector<8x128xf32>
    %1278 = arith.subf %1275, %1277 : vector<8x128xf32>
    %1279 = arith.addf %1151, %1278 : vector<8x128xf32>
    %1280 = vector.broadcast %1272 : f32 to vector<8x128xf32>
    %1281 = arith.mulf %1280, %1271 : vector<8x128xf32>
    %1282 = vector.broadcast %1273 : f32 to vector<8x128xf32>
    %1283 = arith.mulf %1282, %1267 : vector<8x128xf32>
    %1284 = arith.addf %1281, %1283 : vector<8x128xf32>
    %1285 = arith.addf %1157, %1284 : vector<8x128xf32>
    %c1_891 = arith.constant 1 : index
    %c3_892 = arith.constant 3 : index
    %c0_893 = arith.constant 0 : index
    %c0_894 = arith.constant 0 : index
    %1286 = vector.load %arg1[%c1_891, %c3_892, %c0_893, %c0_894] : memref<2x9x8x128xf32, #tpu.memory_space<vmem>>, vector<1x1x8x128xf32>
    %1287 = vector.shape_cast %1286 : vector<1x1x8x128xf32> to vector<8x128xf32>
    %c1_895 = arith.constant 1 : index
    %c3_896 = arith.constant 3 : index
    %c0_897 = arith.constant 0 : index
    %c0_898 = arith.constant 0 : index
    %1288 = vector.load %arg2[%c1_895, %c3_896, %c0_897, %c0_898] : memref<2x9x8x128xf32, #tpu.memory_space<vmem>>, vector<1x1x8x128xf32>
    %1289 = vector.shape_cast %1288 : vector<1x1x8x128xf32> to vector<8x128xf32>
    %1290 = arith.mulf %1233, %1287 : vector<8x128xf32>
    %1291 = arith.mulf %1237, %1289 : vector<8x128xf32>
    %1292 = arith.subf %1290, %1291 : vector<8x128xf32>
    %1293 = arith.mulf %1233, %1289 : vector<8x128xf32>
    %1294 = arith.mulf %1237, %1287 : vector<8x128xf32>
    %1295 = arith.addf %1293, %1294 : vector<8x128xf32>
    %c1_899 = arith.constant 1 : index
    %c7_900 = arith.constant 7 : index
    %c0_901 = arith.constant 0 : index
    %c0_902 = arith.constant 0 : index
    %1296 = vector.load %arg1[%c1_899, %c7_900, %c0_901, %c0_902] : memref<2x9x8x128xf32, #tpu.memory_space<vmem>>, vector<1x1x8x128xf32>
    %1297 = vector.shape_cast %1296 : vector<1x1x8x128xf32> to vector<8x128xf32>
    %c1_903 = arith.constant 1 : index
    %c7_904 = arith.constant 7 : index
    %c0_905 = arith.constant 0 : index
    %c0_906 = arith.constant 0 : index
    %1298 = vector.load %arg2[%c1_903, %c7_904, %c0_905, %c0_906] : memref<2x9x8x128xf32, #tpu.memory_space<vmem>>, vector<1x1x8x128xf32>
    %1299 = vector.shape_cast %1298 : vector<1x1x8x128xf32> to vector<8x128xf32>
    %1300 = arith.mulf %1245, %1297 : vector<8x128xf32>
    %1301 = arith.mulf %1249, %1299 : vector<8x128xf32>
    %1302 = arith.subf %1300, %1301 : vector<8x128xf32>
    %1303 = arith.addf %1292, %1302 : vector<8x128xf32>
    %1304 = arith.mulf %1245, %1299 : vector<8x128xf32>
    %1305 = arith.mulf %1249, %1297 : vector<8x128xf32>
    %1306 = arith.addf %1304, %1305 : vector<8x128xf32>
    %1307 = arith.addf %1295, %1306 : vector<8x128xf32>
    %c1_907 = arith.constant 1 : index
    %c10_908 = arith.constant 10 : index
    %1308 = memref.load %arg4[%c1_907, %c10_908] : memref<2x16xf32, #tpu.memory_space<smem>>
    %c1_909 = arith.constant 1 : index
    %c10_910 = arith.constant 10 : index
    %1309 = memref.load %arg5[%c1_909, %c10_910] : memref<2x16xf32, #tpu.memory_space<smem>>
    %1310 = vector.broadcast %1308 : f32 to vector<8x128xf32>
    %1311 = arith.mulf %1310, %1303 : vector<8x128xf32>
    %1312 = vector.broadcast %1309 : f32 to vector<8x128xf32>
    %1313 = arith.mulf %1312, %1307 : vector<8x128xf32>
    %1314 = arith.subf %1311, %1313 : vector<8x128xf32>
    %1315 = arith.addf %1187, %1314 : vector<8x128xf32>
    %1316 = vector.broadcast %1308 : f32 to vector<8x128xf32>
    %1317 = arith.mulf %1316, %1307 : vector<8x128xf32>
    %1318 = vector.broadcast %1309 : f32 to vector<8x128xf32>
    %1319 = arith.mulf %1318, %1303 : vector<8x128xf32>
    %1320 = arith.addf %1317, %1319 : vector<8x128xf32>
    %1321 = arith.addf %1193, %1320 : vector<8x128xf32>
    %c0_911 = arith.constant 0 : index
    %c8_912 = arith.constant 8 : index
    %c0_913 = arith.constant 0 : index
    %c0_914 = arith.constant 0 : index
    %1322 = vector.load %arg1[%c0_911, %c8_912, %c0_913, %c0_914] : memref<2x9x8x128xf32, #tpu.memory_space<vmem>>, vector<1x1x8x128xf32>
    %1323 = vector.shape_cast %1322 : vector<1x1x8x128xf32> to vector<8x128xf32>
    %c0_915 = arith.constant 0 : index
    %c8_916 = arith.constant 8 : index
    %c0_917 = arith.constant 0 : index
    %c0_918 = arith.constant 0 : index
    %1324 = vector.load %arg2[%c0_915, %c8_916, %c0_917, %c0_918] : memref<2x9x8x128xf32, #tpu.memory_space<vmem>>, vector<1x1x8x128xf32>
    %1325 = vector.shape_cast %1324 : vector<1x1x8x128xf32> to vector<8x128xf32>
    %c0_919 = arith.constant 0 : index
    %c7_920 = arith.constant 7 : index
    %c0_921 = arith.constant 0 : index
    %c0_922 = arith.constant 0 : index
    %1326 = vector.load %arg1[%c0_919, %c7_920, %c0_921, %c0_922] : memref<2x9x8x128xf32, #tpu.memory_space<vmem>>, vector<1x1x8x128xf32>
    %1327 = vector.shape_cast %1326 : vector<1x1x8x128xf32> to vector<8x128xf32>
    %c0_923 = arith.constant 0 : index
    %c7_924 = arith.constant 7 : index
    %c0_925 = arith.constant 0 : index
    %c0_926 = arith.constant 0 : index
    %1328 = vector.load %arg2[%c0_923, %c7_924, %c0_925, %c0_926] : memref<2x9x8x128xf32, #tpu.memory_space<vmem>>, vector<1x1x8x128xf32>
    %1329 = vector.shape_cast %1328 : vector<1x1x8x128xf32> to vector<8x128xf32>
    %1330 = arith.mulf %1323, %1327 : vector<8x128xf32>
    %1331 = arith.mulf %1325, %1329 : vector<8x128xf32>
    %1332 = arith.addf %1330, %1331 : vector<8x128xf32>
    %1333 = arith.addf %1, %1332 : vector<8x128xf32>
    %1334 = arith.mulf %1325, %1327 : vector<8x128xf32>
    %1335 = arith.mulf %1323, %1329 : vector<8x128xf32>
    %1336 = arith.subf %1334, %1335 : vector<8x128xf32>
    %1337 = arith.addf %1, %1336 : vector<8x128xf32>
    %c0_927 = arith.constant 0 : index
    %c3_928 = arith.constant 3 : index
    %c0_929 = arith.constant 0 : index
    %c0_930 = arith.constant 0 : index
    %1338 = vector.load %arg1[%c0_927, %c3_928, %c0_929, %c0_930] : memref<2x9x8x128xf32, #tpu.memory_space<vmem>>, vector<1x1x8x128xf32>
    %1339 = vector.shape_cast %1338 : vector<1x1x8x128xf32> to vector<8x128xf32>
    %c0_931 = arith.constant 0 : index
    %c3_932 = arith.constant 3 : index
    %c0_933 = arith.constant 0 : index
    %c0_934 = arith.constant 0 : index
    %1340 = vector.load %arg2[%c0_931, %c3_932, %c0_933, %c0_934] : memref<2x9x8x128xf32, #tpu.memory_space<vmem>>, vector<1x1x8x128xf32>
    %1341 = vector.shape_cast %1340 : vector<1x1x8x128xf32> to vector<8x128xf32>
    %1342 = arith.mulf %1339, %1327 : vector<8x128xf32>
    %1343 = arith.mulf %1341, %1329 : vector<8x128xf32>
    %1344 = arith.addf %1342, %1343 : vector<8x128xf32>
    %1345 = arith.addf %1, %1344 : vector<8x128xf32>
    %1346 = arith.mulf %1341, %1327 : vector<8x128xf32>
    %1347 = arith.mulf %1339, %1329 : vector<8x128xf32>
    %1348 = arith.subf %1346, %1347 : vector<8x128xf32>
    %1349 = arith.addf %1, %1348 : vector<8x128xf32>
    %c1_935 = arith.constant 1 : index
    %c8_936 = arith.constant 8 : index
    %c0_937 = arith.constant 0 : index
    %c0_938 = arith.constant 0 : index
    %1350 = vector.load %arg1[%c1_935, %c8_936, %c0_937, %c0_938] : memref<2x9x8x128xf32, #tpu.memory_space<vmem>>, vector<1x1x8x128xf32>
    %1351 = vector.shape_cast %1350 : vector<1x1x8x128xf32> to vector<8x128xf32>
    %c1_939 = arith.constant 1 : index
    %c8_940 = arith.constant 8 : index
    %c0_941 = arith.constant 0 : index
    %c0_942 = arith.constant 0 : index
    %1352 = vector.load %arg2[%c1_939, %c8_940, %c0_941, %c0_942] : memref<2x9x8x128xf32, #tpu.memory_space<vmem>>, vector<1x1x8x128xf32>
    %1353 = vector.shape_cast %1352 : vector<1x1x8x128xf32> to vector<8x128xf32>
    %c1_943 = arith.constant 1 : index
    %c7_944 = arith.constant 7 : index
    %c0_945 = arith.constant 0 : index
    %c0_946 = arith.constant 0 : index
    %1354 = vector.load %arg1[%c1_943, %c7_944, %c0_945, %c0_946] : memref<2x9x8x128xf32, #tpu.memory_space<vmem>>, vector<1x1x8x128xf32>
    %1355 = vector.shape_cast %1354 : vector<1x1x8x128xf32> to vector<8x128xf32>
    %c1_947 = arith.constant 1 : index
    %c7_948 = arith.constant 7 : index
    %c0_949 = arith.constant 0 : index
    %c0_950 = arith.constant 0 : index
    %1356 = vector.load %arg2[%c1_947, %c7_948, %c0_949, %c0_950] : memref<2x9x8x128xf32, #tpu.memory_space<vmem>>, vector<1x1x8x128xf32>
    %1357 = vector.shape_cast %1356 : vector<1x1x8x128xf32> to vector<8x128xf32>
    %1358 = arith.mulf %1351, %1355 : vector<8x128xf32>
    %1359 = arith.mulf %1353, %1357 : vector<8x128xf32>
    %1360 = arith.addf %1358, %1359 : vector<8x128xf32>
    %1361 = arith.addf %1333, %1360 : vector<8x128xf32>
    %1362 = arith.mulf %1353, %1355 : vector<8x128xf32>
    %1363 = arith.mulf %1351, %1357 : vector<8x128xf32>
    %1364 = arith.subf %1362, %1363 : vector<8x128xf32>
    %1365 = arith.addf %1337, %1364 : vector<8x128xf32>
    %c1_951 = arith.constant 1 : index
    %c3_952 = arith.constant 3 : index
    %c0_953 = arith.constant 0 : index
    %c0_954 = arith.constant 0 : index
    %1366 = vector.load %arg1[%c1_951, %c3_952, %c0_953, %c0_954] : memref<2x9x8x128xf32, #tpu.memory_space<vmem>>, vector<1x1x8x128xf32>
    %1367 = vector.shape_cast %1366 : vector<1x1x8x128xf32> to vector<8x128xf32>
    %c1_955 = arith.constant 1 : index
    %c3_956 = arith.constant 3 : index
    %c0_957 = arith.constant 0 : index
    %c0_958 = arith.constant 0 : index
    %1368 = vector.load %arg2[%c1_955, %c3_956, %c0_957, %c0_958] : memref<2x9x8x128xf32, #tpu.memory_space<vmem>>, vector<1x1x8x128xf32>
    %1369 = vector.shape_cast %1368 : vector<1x1x8x128xf32> to vector<8x128xf32>
    %1370 = arith.mulf %1367, %1355 : vector<8x128xf32>
    %1371 = arith.mulf %1369, %1357 : vector<8x128xf32>
    %1372 = arith.addf %1370, %1371 : vector<8x128xf32>
    %1373 = arith.addf %1345, %1372 : vector<8x128xf32>
    %1374 = arith.mulf %1369, %1355 : vector<8x128xf32>
    %1375 = arith.mulf %1367, %1357 : vector<8x128xf32>
    %1376 = arith.subf %1374, %1375 : vector<8x128xf32>
    %1377 = arith.addf %1349, %1376 : vector<8x128xf32>
    %c0_959 = arith.constant 0 : index
    %c3_960 = arith.constant 3 : index
    %c0_961 = arith.constant 0 : index
    %c0_962 = arith.constant 0 : index
    %1378 = vector.load %arg1[%c0_959, %c3_960, %c0_961, %c0_962] : memref<2x9x8x128xf32, #tpu.memory_space<vmem>>, vector<1x1x8x128xf32>
    %1379 = vector.shape_cast %1378 : vector<1x1x8x128xf32> to vector<8x128xf32>
    %c0_963 = arith.constant 0 : index
    %c3_964 = arith.constant 3 : index
    %c0_965 = arith.constant 0 : index
    %c0_966 = arith.constant 0 : index
    %1380 = vector.load %arg2[%c0_963, %c3_964, %c0_965, %c0_966] : memref<2x9x8x128xf32, #tpu.memory_space<vmem>>, vector<1x1x8x128xf32>
    %1381 = vector.shape_cast %1380 : vector<1x1x8x128xf32> to vector<8x128xf32>
    %1382 = arith.mulf %1361, %1379 : vector<8x128xf32>
    %1383 = arith.mulf %1365, %1381 : vector<8x128xf32>
    %1384 = arith.subf %1382, %1383 : vector<8x128xf32>
    %1385 = arith.mulf %1361, %1381 : vector<8x128xf32>
    %1386 = arith.mulf %1365, %1379 : vector<8x128xf32>
    %1387 = arith.addf %1385, %1386 : vector<8x128xf32>
    %c0_967 = arith.constant 0 : index
    %c8_968 = arith.constant 8 : index
    %c0_969 = arith.constant 0 : index
    %c0_970 = arith.constant 0 : index
    %1388 = vector.load %arg1[%c0_967, %c8_968, %c0_969, %c0_970] : memref<2x9x8x128xf32, #tpu.memory_space<vmem>>, vector<1x1x8x128xf32>
    %1389 = vector.shape_cast %1388 : vector<1x1x8x128xf32> to vector<8x128xf32>
    %c0_971 = arith.constant 0 : index
    %c8_972 = arith.constant 8 : index
    %c0_973 = arith.constant 0 : index
    %c0_974 = arith.constant 0 : index
    %1390 = vector.load %arg2[%c0_971, %c8_972, %c0_973, %c0_974] : memref<2x9x8x128xf32, #tpu.memory_space<vmem>>, vector<1x1x8x128xf32>
    %1391 = vector.shape_cast %1390 : vector<1x1x8x128xf32> to vector<8x128xf32>
    %1392 = arith.mulf %1373, %1389 : vector<8x128xf32>
    %1393 = arith.mulf %1377, %1391 : vector<8x128xf32>
    %1394 = arith.subf %1392, %1393 : vector<8x128xf32>
    %1395 = arith.addf %1384, %1394 : vector<8x128xf32>
    %1396 = arith.mulf %1373, %1391 : vector<8x128xf32>
    %1397 = arith.mulf %1377, %1389 : vector<8x128xf32>
    %1398 = arith.addf %1396, %1397 : vector<8x128xf32>
    %1399 = arith.addf %1387, %1398 : vector<8x128xf32>
    %c0_975 = arith.constant 0 : index
    %c11 = arith.constant 11 : index
    %1400 = memref.load %arg4[%c0_975, %c11] : memref<2x16xf32, #tpu.memory_space<smem>>
    %c0_976 = arith.constant 0 : index
    %c11_977 = arith.constant 11 : index
    %1401 = memref.load %arg5[%c0_976, %c11_977] : memref<2x16xf32, #tpu.memory_space<smem>>
    %1402 = vector.broadcast %1400 : f32 to vector<8x128xf32>
    %1403 = arith.mulf %1402, %1395 : vector<8x128xf32>
    %1404 = vector.broadcast %1401 : f32 to vector<8x128xf32>
    %1405 = arith.mulf %1404, %1399 : vector<8x128xf32>
    %1406 = arith.subf %1403, %1405 : vector<8x128xf32>
    %1407 = arith.addf %1279, %1406 : vector<8x128xf32>
    %1408 = vector.broadcast %1400 : f32 to vector<8x128xf32>
    %1409 = arith.mulf %1408, %1399 : vector<8x128xf32>
    %1410 = vector.broadcast %1401 : f32 to vector<8x128xf32>
    %1411 = arith.mulf %1410, %1395 : vector<8x128xf32>
    %1412 = arith.addf %1409, %1411 : vector<8x128xf32>
    %1413 = arith.addf %1285, %1412 : vector<8x128xf32>
    %c1_978 = arith.constant 1 : index
    %c3_979 = arith.constant 3 : index
    %c0_980 = arith.constant 0 : index
    %c0_981 = arith.constant 0 : index
    %1414 = vector.load %arg1[%c1_978, %c3_979, %c0_980, %c0_981] : memref<2x9x8x128xf32, #tpu.memory_space<vmem>>, vector<1x1x8x128xf32>
    %1415 = vector.shape_cast %1414 : vector<1x1x8x128xf32> to vector<8x128xf32>
    %c1_982 = arith.constant 1 : index
    %c3_983 = arith.constant 3 : index
    %c0_984 = arith.constant 0 : index
    %c0_985 = arith.constant 0 : index
    %1416 = vector.load %arg2[%c1_982, %c3_983, %c0_984, %c0_985] : memref<2x9x8x128xf32, #tpu.memory_space<vmem>>, vector<1x1x8x128xf32>
    %1417 = vector.shape_cast %1416 : vector<1x1x8x128xf32> to vector<8x128xf32>
    %1418 = arith.mulf %1361, %1415 : vector<8x128xf32>
    %1419 = arith.mulf %1365, %1417 : vector<8x128xf32>
    %1420 = arith.subf %1418, %1419 : vector<8x128xf32>
    %1421 = arith.mulf %1361, %1417 : vector<8x128xf32>
    %1422 = arith.mulf %1365, %1415 : vector<8x128xf32>
    %1423 = arith.addf %1421, %1422 : vector<8x128xf32>
    %c1_986 = arith.constant 1 : index
    %c8_987 = arith.constant 8 : index
    %c0_988 = arith.constant 0 : index
    %c0_989 = arith.constant 0 : index
    %1424 = vector.load %arg1[%c1_986, %c8_987, %c0_988, %c0_989] : memref<2x9x8x128xf32, #tpu.memory_space<vmem>>, vector<1x1x8x128xf32>
    %1425 = vector.shape_cast %1424 : vector<1x1x8x128xf32> to vector<8x128xf32>
    %c1_990 = arith.constant 1 : index
    %c8_991 = arith.constant 8 : index
    %c0_992 = arith.constant 0 : index
    %c0_993 = arith.constant 0 : index
    %1426 = vector.load %arg2[%c1_990, %c8_991, %c0_992, %c0_993] : memref<2x9x8x128xf32, #tpu.memory_space<vmem>>, vector<1x1x8x128xf32>
    %1427 = vector.shape_cast %1426 : vector<1x1x8x128xf32> to vector<8x128xf32>
    %1428 = arith.mulf %1373, %1425 : vector<8x128xf32>
    %1429 = arith.mulf %1377, %1427 : vector<8x128xf32>
    %1430 = arith.subf %1428, %1429 : vector<8x128xf32>
    %1431 = arith.addf %1420, %1430 : vector<8x128xf32>
    %1432 = arith.mulf %1373, %1427 : vector<8x128xf32>
    %1433 = arith.mulf %1377, %1425 : vector<8x128xf32>
    %1434 = arith.addf %1432, %1433 : vector<8x128xf32>
    %1435 = arith.addf %1423, %1434 : vector<8x128xf32>
    %c1_994 = arith.constant 1 : index
    %c11_995 = arith.constant 11 : index
    %1436 = memref.load %arg4[%c1_994, %c11_995] : memref<2x16xf32, #tpu.memory_space<smem>>
    %c1_996 = arith.constant 1 : index
    %c11_997 = arith.constant 11 : index
    %1437 = memref.load %arg5[%c1_996, %c11_997] : memref<2x16xf32, #tpu.memory_space<smem>>
    %1438 = vector.broadcast %1436 : f32 to vector<8x128xf32>
    %1439 = arith.mulf %1438, %1431 : vector<8x128xf32>
    %1440 = vector.broadcast %1437 : f32 to vector<8x128xf32>
    %1441 = arith.mulf %1440, %1435 : vector<8x128xf32>
    %1442 = arith.subf %1439, %1441 : vector<8x128xf32>
    %1443 = arith.addf %1315, %1442 : vector<8x128xf32>
    %1444 = vector.broadcast %1436 : f32 to vector<8x128xf32>
    %1445 = arith.mulf %1444, %1435 : vector<8x128xf32>
    %1446 = vector.broadcast %1437 : f32 to vector<8x128xf32>
    %1447 = arith.mulf %1446, %1431 : vector<8x128xf32>
    %1448 = arith.addf %1445, %1447 : vector<8x128xf32>
    %1449 = arith.addf %1321, %1448 : vector<8x128xf32>
    %c0_998 = arith.constant 0 : index
    %c5_999 = arith.constant 5 : index
    %c0_1000 = arith.constant 0 : index
    %c0_1001 = arith.constant 0 : index
    %1450 = vector.load %arg1[%c0_998, %c5_999, %c0_1000, %c0_1001] : memref<2x9x8x128xf32, #tpu.memory_space<vmem>>, vector<1x1x8x128xf32>
    %1451 = vector.shape_cast %1450 : vector<1x1x8x128xf32> to vector<8x128xf32>
    %c0_1002 = arith.constant 0 : index
    %c5_1003 = arith.constant 5 : index
    %c0_1004 = arith.constant 0 : index
    %c0_1005 = arith.constant 0 : index
    %1452 = vector.load %arg2[%c0_1002, %c5_1003, %c0_1004, %c0_1005] : memref<2x9x8x128xf32, #tpu.memory_space<vmem>>, vector<1x1x8x128xf32>
    %1453 = vector.shape_cast %1452 : vector<1x1x8x128xf32> to vector<8x128xf32>
    %c0_1006 = arith.constant 0 : index
    %c6_1007 = arith.constant 6 : index
    %c0_1008 = arith.constant 0 : index
    %c0_1009 = arith.constant 0 : index
    %1454 = vector.load %arg1[%c0_1006, %c6_1007, %c0_1008, %c0_1009] : memref<2x9x8x128xf32, #tpu.memory_space<vmem>>, vector<1x1x8x128xf32>
    %1455 = vector.shape_cast %1454 : vector<1x1x8x128xf32> to vector<8x128xf32>
    %c0_1010 = arith.constant 0 : index
    %c6_1011 = arith.constant 6 : index
    %c0_1012 = arith.constant 0 : index
    %c0_1013 = arith.constant 0 : index
    %1456 = vector.load %arg2[%c0_1010, %c6_1011, %c0_1012, %c0_1013] : memref<2x9x8x128xf32, #tpu.memory_space<vmem>>, vector<1x1x8x128xf32>
    %1457 = vector.shape_cast %1456 : vector<1x1x8x128xf32> to vector<8x128xf32>
    %1458 = arith.mulf %1451, %1455 : vector<8x128xf32>
    %1459 = arith.mulf %1453, %1457 : vector<8x128xf32>
    %1460 = arith.addf %1458, %1459 : vector<8x128xf32>
    %1461 = arith.addf %1, %1460 : vector<8x128xf32>
    %1462 = arith.mulf %1453, %1455 : vector<8x128xf32>
    %1463 = arith.mulf %1451, %1457 : vector<8x128xf32>
    %1464 = arith.subf %1462, %1463 : vector<8x128xf32>
    %1465 = arith.addf %1, %1464 : vector<8x128xf32>
    %c1_1014 = arith.constant 1 : index
    %c5_1015 = arith.constant 5 : index
    %c0_1016 = arith.constant 0 : index
    %c0_1017 = arith.constant 0 : index
    %1466 = vector.load %arg1[%c1_1014, %c5_1015, %c0_1016, %c0_1017] : memref<2x9x8x128xf32, #tpu.memory_space<vmem>>, vector<1x1x8x128xf32>
    %1467 = vector.shape_cast %1466 : vector<1x1x8x128xf32> to vector<8x128xf32>
    %c1_1018 = arith.constant 1 : index
    %c5_1019 = arith.constant 5 : index
    %c0_1020 = arith.constant 0 : index
    %c0_1021 = arith.constant 0 : index
    %1468 = vector.load %arg2[%c1_1018, %c5_1019, %c0_1020, %c0_1021] : memref<2x9x8x128xf32, #tpu.memory_space<vmem>>, vector<1x1x8x128xf32>
    %1469 = vector.shape_cast %1468 : vector<1x1x8x128xf32> to vector<8x128xf32>
    %c1_1022 = arith.constant 1 : index
    %c6_1023 = arith.constant 6 : index
    %c0_1024 = arith.constant 0 : index
    %c0_1025 = arith.constant 0 : index
    %1470 = vector.load %arg1[%c1_1022, %c6_1023, %c0_1024, %c0_1025] : memref<2x9x8x128xf32, #tpu.memory_space<vmem>>, vector<1x1x8x128xf32>
    %1471 = vector.shape_cast %1470 : vector<1x1x8x128xf32> to vector<8x128xf32>
    %c1_1026 = arith.constant 1 : index
    %c6_1027 = arith.constant 6 : index
    %c0_1028 = arith.constant 0 : index
    %c0_1029 = arith.constant 0 : index
    %1472 = vector.load %arg2[%c1_1026, %c6_1027, %c0_1028, %c0_1029] : memref<2x9x8x128xf32, #tpu.memory_space<vmem>>, vector<1x1x8x128xf32>
    %1473 = vector.shape_cast %1472 : vector<1x1x8x128xf32> to vector<8x128xf32>
    %1474 = arith.mulf %1467, %1471 : vector<8x128xf32>
    %1475 = arith.mulf %1469, %1473 : vector<8x128xf32>
    %1476 = arith.addf %1474, %1475 : vector<8x128xf32>
    %1477 = arith.addf %1461, %1476 : vector<8x128xf32>
    %1478 = arith.mulf %1469, %1471 : vector<8x128xf32>
    %1479 = arith.mulf %1467, %1473 : vector<8x128xf32>
    %1480 = arith.subf %1478, %1479 : vector<8x128xf32>
    %1481 = arith.addf %1465, %1480 : vector<8x128xf32>
    %c0_1030 = arith.constant 0 : index
    %c5_1031 = arith.constant 5 : index
    %c0_1032 = arith.constant 0 : index
    %c0_1033 = arith.constant 0 : index
    %1482 = vector.load %arg1[%c0_1030, %c5_1031, %c0_1032, %c0_1033] : memref<2x9x8x128xf32, #tpu.memory_space<vmem>>, vector<1x1x8x128xf32>
    %1483 = vector.shape_cast %1482 : vector<1x1x8x128xf32> to vector<8x128xf32>
    %c0_1034 = arith.constant 0 : index
    %c5_1035 = arith.constant 5 : index
    %c0_1036 = arith.constant 0 : index
    %c0_1037 = arith.constant 0 : index
    %1484 = vector.load %arg2[%c0_1034, %c5_1035, %c0_1036, %c0_1037] : memref<2x9x8x128xf32, #tpu.memory_space<vmem>>, vector<1x1x8x128xf32>
    %1485 = vector.shape_cast %1484 : vector<1x1x8x128xf32> to vector<8x128xf32>
    %1486 = arith.mulf %1477, %1483 : vector<8x128xf32>
    %1487 = arith.mulf %1481, %1485 : vector<8x128xf32>
    %1488 = arith.subf %1486, %1487 : vector<8x128xf32>
    %1489 = arith.mulf %1477, %1485 : vector<8x128xf32>
    %1490 = arith.mulf %1481, %1483 : vector<8x128xf32>
    %1491 = arith.addf %1489, %1490 : vector<8x128xf32>
    %c0_1038 = arith.constant 0 : index
    %c12 = arith.constant 12 : index
    %1492 = memref.load %arg4[%c0_1038, %c12] : memref<2x16xf32, #tpu.memory_space<smem>>
    %c0_1039 = arith.constant 0 : index
    %c12_1040 = arith.constant 12 : index
    %1493 = memref.load %arg5[%c0_1039, %c12_1040] : memref<2x16xf32, #tpu.memory_space<smem>>
    %1494 = vector.broadcast %1492 : f32 to vector<8x128xf32>
    %1495 = arith.mulf %1494, %1488 : vector<8x128xf32>
    %1496 = vector.broadcast %1493 : f32 to vector<8x128xf32>
    %1497 = arith.mulf %1496, %1491 : vector<8x128xf32>
    %1498 = arith.subf %1495, %1497 : vector<8x128xf32>
    %1499 = arith.addf %1407, %1498 : vector<8x128xf32>
    %1500 = vector.broadcast %1492 : f32 to vector<8x128xf32>
    %1501 = arith.mulf %1500, %1491 : vector<8x128xf32>
    %1502 = vector.broadcast %1493 : f32 to vector<8x128xf32>
    %1503 = arith.mulf %1502, %1488 : vector<8x128xf32>
    %1504 = arith.addf %1501, %1503 : vector<8x128xf32>
    %1505 = arith.addf %1413, %1504 : vector<8x128xf32>
    %c1_1041 = arith.constant 1 : index
    %c5_1042 = arith.constant 5 : index
    %c0_1043 = arith.constant 0 : index
    %c0_1044 = arith.constant 0 : index
    %1506 = vector.load %arg1[%c1_1041, %c5_1042, %c0_1043, %c0_1044] : memref<2x9x8x128xf32, #tpu.memory_space<vmem>>, vector<1x1x8x128xf32>
    %1507 = vector.shape_cast %1506 : vector<1x1x8x128xf32> to vector<8x128xf32>
    %c1_1045 = arith.constant 1 : index
    %c5_1046 = arith.constant 5 : index
    %c0_1047 = arith.constant 0 : index
    %c0_1048 = arith.constant 0 : index
    %1508 = vector.load %arg2[%c1_1045, %c5_1046, %c0_1047, %c0_1048] : memref<2x9x8x128xf32, #tpu.memory_space<vmem>>, vector<1x1x8x128xf32>
    %1509 = vector.shape_cast %1508 : vector<1x1x8x128xf32> to vector<8x128xf32>
    %1510 = arith.mulf %1477, %1507 : vector<8x128xf32>
    %1511 = arith.mulf %1481, %1509 : vector<8x128xf32>
    %1512 = arith.subf %1510, %1511 : vector<8x128xf32>
    %1513 = arith.mulf %1477, %1509 : vector<8x128xf32>
    %1514 = arith.mulf %1481, %1507 : vector<8x128xf32>
    %1515 = arith.addf %1513, %1514 : vector<8x128xf32>
    %c1_1049 = arith.constant 1 : index
    %c12_1050 = arith.constant 12 : index
    %1516 = memref.load %arg4[%c1_1049, %c12_1050] : memref<2x16xf32, #tpu.memory_space<smem>>
    %c1_1051 = arith.constant 1 : index
    %c12_1052 = arith.constant 12 : index
    %1517 = memref.load %arg5[%c1_1051, %c12_1052] : memref<2x16xf32, #tpu.memory_space<smem>>
    %1518 = vector.broadcast %1516 : f32 to vector<8x128xf32>
    %1519 = arith.mulf %1518, %1512 : vector<8x128xf32>
    %1520 = vector.broadcast %1517 : f32 to vector<8x128xf32>
    %1521 = arith.mulf %1520, %1515 : vector<8x128xf32>
    %1522 = arith.subf %1519, %1521 : vector<8x128xf32>
    %1523 = arith.addf %1443, %1522 : vector<8x128xf32>
    %1524 = vector.broadcast %1516 : f32 to vector<8x128xf32>
    %1525 = arith.mulf %1524, %1515 : vector<8x128xf32>
    %1526 = vector.broadcast %1517 : f32 to vector<8x128xf32>
    %1527 = arith.mulf %1526, %1512 : vector<8x128xf32>
    %1528 = arith.addf %1525, %1527 : vector<8x128xf32>
    %1529 = arith.addf %1449, %1528 : vector<8x128xf32>
    %c0_1053 = arith.constant 0 : index
    %c6_1054 = arith.constant 6 : index
    %c0_1055 = arith.constant 0 : index
    %c0_1056 = arith.constant 0 : index
    %1530 = vector.load %arg1[%c0_1053, %c6_1054, %c0_1055, %c0_1056] : memref<2x9x8x128xf32, #tpu.memory_space<vmem>>, vector<1x1x8x128xf32>
    %1531 = vector.shape_cast %1530 : vector<1x1x8x128xf32> to vector<8x128xf32>
    %c0_1057 = arith.constant 0 : index
    %c6_1058 = arith.constant 6 : index
    %c0_1059 = arith.constant 0 : index
    %c0_1060 = arith.constant 0 : index
    %1532 = vector.load %arg2[%c0_1057, %c6_1058, %c0_1059, %c0_1060] : memref<2x9x8x128xf32, #tpu.memory_space<vmem>>, vector<1x1x8x128xf32>
    %1533 = vector.shape_cast %1532 : vector<1x1x8x128xf32> to vector<8x128xf32>
    %c0_1061 = arith.constant 0 : index
    %c7_1062 = arith.constant 7 : index
    %c0_1063 = arith.constant 0 : index
    %c0_1064 = arith.constant 0 : index
    %1534 = vector.load %arg1[%c0_1061, %c7_1062, %c0_1063, %c0_1064] : memref<2x9x8x128xf32, #tpu.memory_space<vmem>>, vector<1x1x8x128xf32>
    %1535 = vector.shape_cast %1534 : vector<1x1x8x128xf32> to vector<8x128xf32>
    %c0_1065 = arith.constant 0 : index
    %c7_1066 = arith.constant 7 : index
    %c0_1067 = arith.constant 0 : index
    %c0_1068 = arith.constant 0 : index
    %1536 = vector.load %arg2[%c0_1065, %c7_1066, %c0_1067, %c0_1068] : memref<2x9x8x128xf32, #tpu.memory_space<vmem>>, vector<1x1x8x128xf32>
    %1537 = vector.shape_cast %1536 : vector<1x1x8x128xf32> to vector<8x128xf32>
    %1538 = arith.mulf %1531, %1535 : vector<8x128xf32>
    %1539 = arith.mulf %1533, %1537 : vector<8x128xf32>
    %1540 = arith.addf %1538, %1539 : vector<8x128xf32>
    %1541 = arith.addf %1, %1540 : vector<8x128xf32>
    %1542 = arith.mulf %1533, %1535 : vector<8x128xf32>
    %1543 = arith.mulf %1531, %1537 : vector<8x128xf32>
    %1544 = arith.subf %1542, %1543 : vector<8x128xf32>
    %1545 = arith.addf %1, %1544 : vector<8x128xf32>
    %c0_1069 = arith.constant 0 : index
    %c5_1070 = arith.constant 5 : index
    %c0_1071 = arith.constant 0 : index
    %c0_1072 = arith.constant 0 : index
    %1546 = vector.load %arg1[%c0_1069, %c5_1070, %c0_1071, %c0_1072] : memref<2x9x8x128xf32, #tpu.memory_space<vmem>>, vector<1x1x8x128xf32>
    %1547 = vector.shape_cast %1546 : vector<1x1x8x128xf32> to vector<8x128xf32>
    %c0_1073 = arith.constant 0 : index
    %c5_1074 = arith.constant 5 : index
    %c0_1075 = arith.constant 0 : index
    %c0_1076 = arith.constant 0 : index
    %1548 = vector.load %arg2[%c0_1073, %c5_1074, %c0_1075, %c0_1076] : memref<2x9x8x128xf32, #tpu.memory_space<vmem>>, vector<1x1x8x128xf32>
    %1549 = vector.shape_cast %1548 : vector<1x1x8x128xf32> to vector<8x128xf32>
    %1550 = arith.mulf %1547, %1535 : vector<8x128xf32>
    %1551 = arith.mulf %1549, %1537 : vector<8x128xf32>
    %1552 = arith.addf %1550, %1551 : vector<8x128xf32>
    %1553 = arith.addf %1, %1552 : vector<8x128xf32>
    %1554 = arith.mulf %1549, %1535 : vector<8x128xf32>
    %1555 = arith.mulf %1547, %1537 : vector<8x128xf32>
    %1556 = arith.subf %1554, %1555 : vector<8x128xf32>
    %1557 = arith.addf %1, %1556 : vector<8x128xf32>
    %c1_1077 = arith.constant 1 : index
    %c6_1078 = arith.constant 6 : index
    %c0_1079 = arith.constant 0 : index
    %c0_1080 = arith.constant 0 : index
    %1558 = vector.load %arg1[%c1_1077, %c6_1078, %c0_1079, %c0_1080] : memref<2x9x8x128xf32, #tpu.memory_space<vmem>>, vector<1x1x8x128xf32>
    %1559 = vector.shape_cast %1558 : vector<1x1x8x128xf32> to vector<8x128xf32>
    %c1_1081 = arith.constant 1 : index
    %c6_1082 = arith.constant 6 : index
    %c0_1083 = arith.constant 0 : index
    %c0_1084 = arith.constant 0 : index
    %1560 = vector.load %arg2[%c1_1081, %c6_1082, %c0_1083, %c0_1084] : memref<2x9x8x128xf32, #tpu.memory_space<vmem>>, vector<1x1x8x128xf32>
    %1561 = vector.shape_cast %1560 : vector<1x1x8x128xf32> to vector<8x128xf32>
    %c1_1085 = arith.constant 1 : index
    %c7_1086 = arith.constant 7 : index
    %c0_1087 = arith.constant 0 : index
    %c0_1088 = arith.constant 0 : index
    %1562 = vector.load %arg1[%c1_1085, %c7_1086, %c0_1087, %c0_1088] : memref<2x9x8x128xf32, #tpu.memory_space<vmem>>, vector<1x1x8x128xf32>
    %1563 = vector.shape_cast %1562 : vector<1x1x8x128xf32> to vector<8x128xf32>
    %c1_1089 = arith.constant 1 : index
    %c7_1090 = arith.constant 7 : index
    %c0_1091 = arith.constant 0 : index
    %c0_1092 = arith.constant 0 : index
    %1564 = vector.load %arg2[%c1_1089, %c7_1090, %c0_1091, %c0_1092] : memref<2x9x8x128xf32, #tpu.memory_space<vmem>>, vector<1x1x8x128xf32>
    %1565 = vector.shape_cast %1564 : vector<1x1x8x128xf32> to vector<8x128xf32>
    %1566 = arith.mulf %1559, %1563 : vector<8x128xf32>
    %1567 = arith.mulf %1561, %1565 : vector<8x128xf32>
    %1568 = arith.addf %1566, %1567 : vector<8x128xf32>
    %1569 = arith.addf %1541, %1568 : vector<8x128xf32>
    %1570 = arith.mulf %1561, %1563 : vector<8x128xf32>
    %1571 = arith.mulf %1559, %1565 : vector<8x128xf32>
    %1572 = arith.subf %1570, %1571 : vector<8x128xf32>
    %1573 = arith.addf %1545, %1572 : vector<8x128xf32>
    %c1_1093 = arith.constant 1 : index
    %c5_1094 = arith.constant 5 : index
    %c0_1095 = arith.constant 0 : index
    %c0_1096 = arith.constant 0 : index
    %1574 = vector.load %arg1[%c1_1093, %c5_1094, %c0_1095, %c0_1096] : memref<2x9x8x128xf32, #tpu.memory_space<vmem>>, vector<1x1x8x128xf32>
    %1575 = vector.shape_cast %1574 : vector<1x1x8x128xf32> to vector<8x128xf32>
    %c1_1097 = arith.constant 1 : index
    %c5_1098 = arith.constant 5 : index
    %c0_1099 = arith.constant 0 : index
    %c0_1100 = arith.constant 0 : index
    %1576 = vector.load %arg2[%c1_1097, %c5_1098, %c0_1099, %c0_1100] : memref<2x9x8x128xf32, #tpu.memory_space<vmem>>, vector<1x1x8x128xf32>
    %1577 = vector.shape_cast %1576 : vector<1x1x8x128xf32> to vector<8x128xf32>
    %1578 = arith.mulf %1575, %1563 : vector<8x128xf32>
    %1579 = arith.mulf %1577, %1565 : vector<8x128xf32>
    %1580 = arith.addf %1578, %1579 : vector<8x128xf32>
    %1581 = arith.addf %1553, %1580 : vector<8x128xf32>
    %1582 = arith.mulf %1577, %1563 : vector<8x128xf32>
    %1583 = arith.mulf %1575, %1565 : vector<8x128xf32>
    %1584 = arith.subf %1582, %1583 : vector<8x128xf32>
    %1585 = arith.addf %1557, %1584 : vector<8x128xf32>
    %c0_1101 = arith.constant 0 : index
    %c5_1102 = arith.constant 5 : index
    %c0_1103 = arith.constant 0 : index
    %c0_1104 = arith.constant 0 : index
    %1586 = vector.load %arg1[%c0_1101, %c5_1102, %c0_1103, %c0_1104] : memref<2x9x8x128xf32, #tpu.memory_space<vmem>>, vector<1x1x8x128xf32>
    %1587 = vector.shape_cast %1586 : vector<1x1x8x128xf32> to vector<8x128xf32>
    %c0_1105 = arith.constant 0 : index
    %c5_1106 = arith.constant 5 : index
    %c0_1107 = arith.constant 0 : index
    %c0_1108 = arith.constant 0 : index
    %1588 = vector.load %arg2[%c0_1105, %c5_1106, %c0_1107, %c0_1108] : memref<2x9x8x128xf32, #tpu.memory_space<vmem>>, vector<1x1x8x128xf32>
    %1589 = vector.shape_cast %1588 : vector<1x1x8x128xf32> to vector<8x128xf32>
    %1590 = arith.mulf %1569, %1587 : vector<8x128xf32>
    %1591 = arith.mulf %1573, %1589 : vector<8x128xf32>
    %1592 = arith.subf %1590, %1591 : vector<8x128xf32>
    %1593 = arith.mulf %1569, %1589 : vector<8x128xf32>
    %1594 = arith.mulf %1573, %1587 : vector<8x128xf32>
    %1595 = arith.addf %1593, %1594 : vector<8x128xf32>
    %c0_1109 = arith.constant 0 : index
    %c6_1110 = arith.constant 6 : index
    %c0_1111 = arith.constant 0 : index
    %c0_1112 = arith.constant 0 : index
    %1596 = vector.load %arg1[%c0_1109, %c6_1110, %c0_1111, %c0_1112] : memref<2x9x8x128xf32, #tpu.memory_space<vmem>>, vector<1x1x8x128xf32>
    %1597 = vector.shape_cast %1596 : vector<1x1x8x128xf32> to vector<8x128xf32>
    %c0_1113 = arith.constant 0 : index
    %c6_1114 = arith.constant 6 : index
    %c0_1115 = arith.constant 0 : index
    %c0_1116 = arith.constant 0 : index
    %1598 = vector.load %arg2[%c0_1113, %c6_1114, %c0_1115, %c0_1116] : memref<2x9x8x128xf32, #tpu.memory_space<vmem>>, vector<1x1x8x128xf32>
    %1599 = vector.shape_cast %1598 : vector<1x1x8x128xf32> to vector<8x128xf32>
    %1600 = arith.mulf %1581, %1597 : vector<8x128xf32>
    %1601 = arith.mulf %1585, %1599 : vector<8x128xf32>
    %1602 = arith.subf %1600, %1601 : vector<8x128xf32>
    %1603 = arith.addf %1592, %1602 : vector<8x128xf32>
    %1604 = arith.mulf %1581, %1599 : vector<8x128xf32>
    %1605 = arith.mulf %1585, %1597 : vector<8x128xf32>
    %1606 = arith.addf %1604, %1605 : vector<8x128xf32>
    %1607 = arith.addf %1595, %1606 : vector<8x128xf32>
    %c0_1117 = arith.constant 0 : index
    %c13 = arith.constant 13 : index
    %1608 = memref.load %arg4[%c0_1117, %c13] : memref<2x16xf32, #tpu.memory_space<smem>>
    %c0_1118 = arith.constant 0 : index
    %c13_1119 = arith.constant 13 : index
    %1609 = memref.load %arg5[%c0_1118, %c13_1119] : memref<2x16xf32, #tpu.memory_space<smem>>
    %1610 = vector.broadcast %1608 : f32 to vector<8x128xf32>
    %1611 = arith.mulf %1610, %1603 : vector<8x128xf32>
    %1612 = vector.broadcast %1609 : f32 to vector<8x128xf32>
    %1613 = arith.mulf %1612, %1607 : vector<8x128xf32>
    %1614 = arith.subf %1611, %1613 : vector<8x128xf32>
    %1615 = arith.addf %1499, %1614 : vector<8x128xf32>
    %1616 = vector.broadcast %1608 : f32 to vector<8x128xf32>
    %1617 = arith.mulf %1616, %1607 : vector<8x128xf32>
    %1618 = vector.broadcast %1609 : f32 to vector<8x128xf32>
    %1619 = arith.mulf %1618, %1603 : vector<8x128xf32>
    %1620 = arith.addf %1617, %1619 : vector<8x128xf32>
    %1621 = arith.addf %1505, %1620 : vector<8x128xf32>
    %c1_1120 = arith.constant 1 : index
    %c5_1121 = arith.constant 5 : index
    %c0_1122 = arith.constant 0 : index
    %c0_1123 = arith.constant 0 : index
    %1622 = vector.load %arg1[%c1_1120, %c5_1121, %c0_1122, %c0_1123] : memref<2x9x8x128xf32, #tpu.memory_space<vmem>>, vector<1x1x8x128xf32>
    %1623 = vector.shape_cast %1622 : vector<1x1x8x128xf32> to vector<8x128xf32>
    %c1_1124 = arith.constant 1 : index
    %c5_1125 = arith.constant 5 : index
    %c0_1126 = arith.constant 0 : index
    %c0_1127 = arith.constant 0 : index
    %1624 = vector.load %arg2[%c1_1124, %c5_1125, %c0_1126, %c0_1127] : memref<2x9x8x128xf32, #tpu.memory_space<vmem>>, vector<1x1x8x128xf32>
    %1625 = vector.shape_cast %1624 : vector<1x1x8x128xf32> to vector<8x128xf32>
    %1626 = arith.mulf %1569, %1623 : vector<8x128xf32>
    %1627 = arith.mulf %1573, %1625 : vector<8x128xf32>
    %1628 = arith.subf %1626, %1627 : vector<8x128xf32>
    %1629 = arith.mulf %1569, %1625 : vector<8x128xf32>
    %1630 = arith.mulf %1573, %1623 : vector<8x128xf32>
    %1631 = arith.addf %1629, %1630 : vector<8x128xf32>
    %c1_1128 = arith.constant 1 : index
    %c6_1129 = arith.constant 6 : index
    %c0_1130 = arith.constant 0 : index
    %c0_1131 = arith.constant 0 : index
    %1632 = vector.load %arg1[%c1_1128, %c6_1129, %c0_1130, %c0_1131] : memref<2x9x8x128xf32, #tpu.memory_space<vmem>>, vector<1x1x8x128xf32>
    %1633 = vector.shape_cast %1632 : vector<1x1x8x128xf32> to vector<8x128xf32>
    %c1_1132 = arith.constant 1 : index
    %c6_1133 = arith.constant 6 : index
    %c0_1134 = arith.constant 0 : index
    %c0_1135 = arith.constant 0 : index
    %1634 = vector.load %arg2[%c1_1132, %c6_1133, %c0_1134, %c0_1135] : memref<2x9x8x128xf32, #tpu.memory_space<vmem>>, vector<1x1x8x128xf32>
    %1635 = vector.shape_cast %1634 : vector<1x1x8x128xf32> to vector<8x128xf32>
    %1636 = arith.mulf %1581, %1633 : vector<8x128xf32>
    %1637 = arith.mulf %1585, %1635 : vector<8x128xf32>
    %1638 = arith.subf %1636, %1637 : vector<8x128xf32>
    %1639 = arith.addf %1628, %1638 : vector<8x128xf32>
    %1640 = arith.mulf %1581, %1635 : vector<8x128xf32>
    %1641 = arith.mulf %1585, %1633 : vector<8x128xf32>
    %1642 = arith.addf %1640, %1641 : vector<8x128xf32>
    %1643 = arith.addf %1631, %1642 : vector<8x128xf32>
    %c1_1136 = arith.constant 1 : index
    %c13_1137 = arith.constant 13 : index
    %1644 = memref.load %arg4[%c1_1136, %c13_1137] : memref<2x16xf32, #tpu.memory_space<smem>>
    %c1_1138 = arith.constant 1 : index
    %c13_1139 = arith.constant 13 : index
    %1645 = memref.load %arg5[%c1_1138, %c13_1139] : memref<2x16xf32, #tpu.memory_space<smem>>
    %1646 = vector.broadcast %1644 : f32 to vector<8x128xf32>
    %1647 = arith.mulf %1646, %1639 : vector<8x128xf32>
    %1648 = vector.broadcast %1645 : f32 to vector<8x128xf32>
    %1649 = arith.mulf %1648, %1643 : vector<8x128xf32>
    %1650 = arith.subf %1647, %1649 : vector<8x128xf32>
    %1651 = arith.addf %1523, %1650 : vector<8x128xf32>
    %1652 = vector.broadcast %1644 : f32 to vector<8x128xf32>
    %1653 = arith.mulf %1652, %1643 : vector<8x128xf32>
    %1654 = vector.broadcast %1645 : f32 to vector<8x128xf32>
    %1655 = arith.mulf %1654, %1639 : vector<8x128xf32>
    %1656 = arith.addf %1653, %1655 : vector<8x128xf32>
    %1657 = arith.addf %1529, %1656 : vector<8x128xf32>
    %c0_1140 = arith.constant 0 : index
    %c7_1141 = arith.constant 7 : index
    %c0_1142 = arith.constant 0 : index
    %c0_1143 = arith.constant 0 : index
    %1658 = vector.load %arg1[%c0_1140, %c7_1141, %c0_1142, %c0_1143] : memref<2x9x8x128xf32, #tpu.memory_space<vmem>>, vector<1x1x8x128xf32>
    %1659 = vector.shape_cast %1658 : vector<1x1x8x128xf32> to vector<8x128xf32>
    %c0_1144 = arith.constant 0 : index
    %c7_1145 = arith.constant 7 : index
    %c0_1146 = arith.constant 0 : index
    %c0_1147 = arith.constant 0 : index
    %1660 = vector.load %arg2[%c0_1144, %c7_1145, %c0_1146, %c0_1147] : memref<2x9x8x128xf32, #tpu.memory_space<vmem>>, vector<1x1x8x128xf32>
    %1661 = vector.shape_cast %1660 : vector<1x1x8x128xf32> to vector<8x128xf32>
    %c0_1148 = arith.constant 0 : index
    %c8_1149 = arith.constant 8 : index
    %c0_1150 = arith.constant 0 : index
    %c0_1151 = arith.constant 0 : index
    %1662 = vector.load %arg1[%c0_1148, %c8_1149, %c0_1150, %c0_1151] : memref<2x9x8x128xf32, #tpu.memory_space<vmem>>, vector<1x1x8x128xf32>
    %1663 = vector.shape_cast %1662 : vector<1x1x8x128xf32> to vector<8x128xf32>
    %c0_1152 = arith.constant 0 : index
    %c8_1153 = arith.constant 8 : index
    %c0_1154 = arith.constant 0 : index
    %c0_1155 = arith.constant 0 : index
    %1664 = vector.load %arg2[%c0_1152, %c8_1153, %c0_1154, %c0_1155] : memref<2x9x8x128xf32, #tpu.memory_space<vmem>>, vector<1x1x8x128xf32>
    %1665 = vector.shape_cast %1664 : vector<1x1x8x128xf32> to vector<8x128xf32>
    %1666 = arith.mulf %1659, %1663 : vector<8x128xf32>
    %1667 = arith.mulf %1661, %1665 : vector<8x128xf32>
    %1668 = arith.addf %1666, %1667 : vector<8x128xf32>
    %1669 = arith.addf %1, %1668 : vector<8x128xf32>
    %1670 = arith.mulf %1661, %1663 : vector<8x128xf32>
    %1671 = arith.mulf %1659, %1665 : vector<8x128xf32>
    %1672 = arith.subf %1670, %1671 : vector<8x128xf32>
    %1673 = arith.addf %1, %1672 : vector<8x128xf32>
    %c0_1156 = arith.constant 0 : index
    %c5_1157 = arith.constant 5 : index
    %c0_1158 = arith.constant 0 : index
    %c0_1159 = arith.constant 0 : index
    %1674 = vector.load %arg1[%c0_1156, %c5_1157, %c0_1158, %c0_1159] : memref<2x9x8x128xf32, #tpu.memory_space<vmem>>, vector<1x1x8x128xf32>
    %1675 = vector.shape_cast %1674 : vector<1x1x8x128xf32> to vector<8x128xf32>
    %c0_1160 = arith.constant 0 : index
    %c5_1161 = arith.constant 5 : index
    %c0_1162 = arith.constant 0 : index
    %c0_1163 = arith.constant 0 : index
    %1676 = vector.load %arg2[%c0_1160, %c5_1161, %c0_1162, %c0_1163] : memref<2x9x8x128xf32, #tpu.memory_space<vmem>>, vector<1x1x8x128xf32>
    %1677 = vector.shape_cast %1676 : vector<1x1x8x128xf32> to vector<8x128xf32>
    %1678 = arith.mulf %1675, %1663 : vector<8x128xf32>
    %1679 = arith.mulf %1677, %1665 : vector<8x128xf32>
    %1680 = arith.addf %1678, %1679 : vector<8x128xf32>
    %1681 = arith.addf %1, %1680 : vector<8x128xf32>
    %1682 = arith.mulf %1677, %1663 : vector<8x128xf32>
    %1683 = arith.mulf %1675, %1665 : vector<8x128xf32>
    %1684 = arith.subf %1682, %1683 : vector<8x128xf32>
    %1685 = arith.addf %1, %1684 : vector<8x128xf32>
    %c1_1164 = arith.constant 1 : index
    %c7_1165 = arith.constant 7 : index
    %c0_1166 = arith.constant 0 : index
    %c0_1167 = arith.constant 0 : index
    %1686 = vector.load %arg1[%c1_1164, %c7_1165, %c0_1166, %c0_1167] : memref<2x9x8x128xf32, #tpu.memory_space<vmem>>, vector<1x1x8x128xf32>
    %1687 = vector.shape_cast %1686 : vector<1x1x8x128xf32> to vector<8x128xf32>
    %c1_1168 = arith.constant 1 : index
    %c7_1169 = arith.constant 7 : index
    %c0_1170 = arith.constant 0 : index
    %c0_1171 = arith.constant 0 : index
    %1688 = vector.load %arg2[%c1_1168, %c7_1169, %c0_1170, %c0_1171] : memref<2x9x8x128xf32, #tpu.memory_space<vmem>>, vector<1x1x8x128xf32>
    %1689 = vector.shape_cast %1688 : vector<1x1x8x128xf32> to vector<8x128xf32>
    %c1_1172 = arith.constant 1 : index
    %c8_1173 = arith.constant 8 : index
    %c0_1174 = arith.constant 0 : index
    %c0_1175 = arith.constant 0 : index
    %1690 = vector.load %arg1[%c1_1172, %c8_1173, %c0_1174, %c0_1175] : memref<2x9x8x128xf32, #tpu.memory_space<vmem>>, vector<1x1x8x128xf32>
    %1691 = vector.shape_cast %1690 : vector<1x1x8x128xf32> to vector<8x128xf32>
    %c1_1176 = arith.constant 1 : index
    %c8_1177 = arith.constant 8 : index
    %c0_1178 = arith.constant 0 : index
    %c0_1179 = arith.constant 0 : index
    %1692 = vector.load %arg2[%c1_1176, %c8_1177, %c0_1178, %c0_1179] : memref<2x9x8x128xf32, #tpu.memory_space<vmem>>, vector<1x1x8x128xf32>
    %1693 = vector.shape_cast %1692 : vector<1x1x8x128xf32> to vector<8x128xf32>
    %1694 = arith.mulf %1687, %1691 : vector<8x128xf32>
    %1695 = arith.mulf %1689, %1693 : vector<8x128xf32>
    %1696 = arith.addf %1694, %1695 : vector<8x128xf32>
    %1697 = arith.addf %1669, %1696 : vector<8x128xf32>
    %1698 = arith.mulf %1689, %1691 : vector<8x128xf32>
    %1699 = arith.mulf %1687, %1693 : vector<8x128xf32>
    %1700 = arith.subf %1698, %1699 : vector<8x128xf32>
    %1701 = arith.addf %1673, %1700 : vector<8x128xf32>
    %c1_1180 = arith.constant 1 : index
    %c5_1181 = arith.constant 5 : index
    %c0_1182 = arith.constant 0 : index
    %c0_1183 = arith.constant 0 : index
    %1702 = vector.load %arg1[%c1_1180, %c5_1181, %c0_1182, %c0_1183] : memref<2x9x8x128xf32, #tpu.memory_space<vmem>>, vector<1x1x8x128xf32>
    %1703 = vector.shape_cast %1702 : vector<1x1x8x128xf32> to vector<8x128xf32>
    %c1_1184 = arith.constant 1 : index
    %c5_1185 = arith.constant 5 : index
    %c0_1186 = arith.constant 0 : index
    %c0_1187 = arith.constant 0 : index
    %1704 = vector.load %arg2[%c1_1184, %c5_1185, %c0_1186, %c0_1187] : memref<2x9x8x128xf32, #tpu.memory_space<vmem>>, vector<1x1x8x128xf32>
    %1705 = vector.shape_cast %1704 : vector<1x1x8x128xf32> to vector<8x128xf32>
    %1706 = arith.mulf %1703, %1691 : vector<8x128xf32>
    %1707 = arith.mulf %1705, %1693 : vector<8x128xf32>
    %1708 = arith.addf %1706, %1707 : vector<8x128xf32>
    %1709 = arith.addf %1681, %1708 : vector<8x128xf32>
    %1710 = arith.mulf %1705, %1691 : vector<8x128xf32>
    %1711 = arith.mulf %1703, %1693 : vector<8x128xf32>
    %1712 = arith.subf %1710, %1711 : vector<8x128xf32>
    %1713 = arith.addf %1685, %1712 : vector<8x128xf32>
    %c0_1188 = arith.constant 0 : index
    %c5_1189 = arith.constant 5 : index
    %c0_1190 = arith.constant 0 : index
    %c0_1191 = arith.constant 0 : index
    %1714 = vector.load %arg1[%c0_1188, %c5_1189, %c0_1190, %c0_1191] : memref<2x9x8x128xf32, #tpu.memory_space<vmem>>, vector<1x1x8x128xf32>
    %1715 = vector.shape_cast %1714 : vector<1x1x8x128xf32> to vector<8x128xf32>
    %c0_1192 = arith.constant 0 : index
    %c5_1193 = arith.constant 5 : index
    %c0_1194 = arith.constant 0 : index
    %c0_1195 = arith.constant 0 : index
    %1716 = vector.load %arg2[%c0_1192, %c5_1193, %c0_1194, %c0_1195] : memref<2x9x8x128xf32, #tpu.memory_space<vmem>>, vector<1x1x8x128xf32>
    %1717 = vector.shape_cast %1716 : vector<1x1x8x128xf32> to vector<8x128xf32>
    %1718 = arith.mulf %1697, %1715 : vector<8x128xf32>
    %1719 = arith.mulf %1701, %1717 : vector<8x128xf32>
    %1720 = arith.subf %1718, %1719 : vector<8x128xf32>
    %1721 = arith.mulf %1697, %1717 : vector<8x128xf32>
    %1722 = arith.mulf %1701, %1715 : vector<8x128xf32>
    %1723 = arith.addf %1721, %1722 : vector<8x128xf32>
    %c0_1196 = arith.constant 0 : index
    %c7_1197 = arith.constant 7 : index
    %c0_1198 = arith.constant 0 : index
    %c0_1199 = arith.constant 0 : index
    %1724 = vector.load %arg1[%c0_1196, %c7_1197, %c0_1198, %c0_1199] : memref<2x9x8x128xf32, #tpu.memory_space<vmem>>, vector<1x1x8x128xf32>
    %1725 = vector.shape_cast %1724 : vector<1x1x8x128xf32> to vector<8x128xf32>
    %c0_1200 = arith.constant 0 : index
    %c7_1201 = arith.constant 7 : index
    %c0_1202 = arith.constant 0 : index
    %c0_1203 = arith.constant 0 : index
    %1726 = vector.load %arg2[%c0_1200, %c7_1201, %c0_1202, %c0_1203] : memref<2x9x8x128xf32, #tpu.memory_space<vmem>>, vector<1x1x8x128xf32>
    %1727 = vector.shape_cast %1726 : vector<1x1x8x128xf32> to vector<8x128xf32>
    %1728 = arith.mulf %1709, %1725 : vector<8x128xf32>
    %1729 = arith.mulf %1713, %1727 : vector<8x128xf32>
    %1730 = arith.subf %1728, %1729 : vector<8x128xf32>
    %1731 = arith.addf %1720, %1730 : vector<8x128xf32>
    %1732 = arith.mulf %1709, %1727 : vector<8x128xf32>
    %1733 = arith.mulf %1713, %1725 : vector<8x128xf32>
    %1734 = arith.addf %1732, %1733 : vector<8x128xf32>
    %1735 = arith.addf %1723, %1734 : vector<8x128xf32>
    %c0_1204 = arith.constant 0 : index
    %c14 = arith.constant 14 : index
    %1736 = memref.load %arg4[%c0_1204, %c14] : memref<2x16xf32, #tpu.memory_space<smem>>
    %c0_1205 = arith.constant 0 : index
    %c14_1206 = arith.constant 14 : index
    %1737 = memref.load %arg5[%c0_1205, %c14_1206] : memref<2x16xf32, #tpu.memory_space<smem>>
    %1738 = vector.broadcast %1736 : f32 to vector<8x128xf32>
    %1739 = arith.mulf %1738, %1731 : vector<8x128xf32>
    %1740 = vector.broadcast %1737 : f32 to vector<8x128xf32>
    %1741 = arith.mulf %1740, %1735 : vector<8x128xf32>
    %1742 = arith.subf %1739, %1741 : vector<8x128xf32>
    %1743 = arith.addf %1615, %1742 : vector<8x128xf32>
    %1744 = vector.broadcast %1736 : f32 to vector<8x128xf32>
    %1745 = arith.mulf %1744, %1735 : vector<8x128xf32>
    %1746 = vector.broadcast %1737 : f32 to vector<8x128xf32>
    %1747 = arith.mulf %1746, %1731 : vector<8x128xf32>
    %1748 = arith.addf %1745, %1747 : vector<8x128xf32>
    %1749 = arith.addf %1621, %1748 : vector<8x128xf32>
    %c1_1207 = arith.constant 1 : index
    %c5_1208 = arith.constant 5 : index
    %c0_1209 = arith.constant 0 : index
    %c0_1210 = arith.constant 0 : index
    %1750 = vector.load %arg1[%c1_1207, %c5_1208, %c0_1209, %c0_1210] : memref<2x9x8x128xf32, #tpu.memory_space<vmem>>, vector<1x1x8x128xf32>
    %1751 = vector.shape_cast %1750 : vector<1x1x8x128xf32> to vector<8x128xf32>
    %c1_1211 = arith.constant 1 : index
    %c5_1212 = arith.constant 5 : index
    %c0_1213 = arith.constant 0 : index
    %c0_1214 = arith.constant 0 : index
    %1752 = vector.load %arg2[%c1_1211, %c5_1212, %c0_1213, %c0_1214] : memref<2x9x8x128xf32, #tpu.memory_space<vmem>>, vector<1x1x8x128xf32>
    %1753 = vector.shape_cast %1752 : vector<1x1x8x128xf32> to vector<8x128xf32>
    %1754 = arith.mulf %1697, %1751 : vector<8x128xf32>
    %1755 = arith.mulf %1701, %1753 : vector<8x128xf32>
    %1756 = arith.subf %1754, %1755 : vector<8x128xf32>
    %1757 = arith.mulf %1697, %1753 : vector<8x128xf32>
    %1758 = arith.mulf %1701, %1751 : vector<8x128xf32>
    %1759 = arith.addf %1757, %1758 : vector<8x128xf32>
    %c1_1215 = arith.constant 1 : index
    %c7_1216 = arith.constant 7 : index
    %c0_1217 = arith.constant 0 : index
    %c0_1218 = arith.constant 0 : index
    %1760 = vector.load %arg1[%c1_1215, %c7_1216, %c0_1217, %c0_1218] : memref<2x9x8x128xf32, #tpu.memory_space<vmem>>, vector<1x1x8x128xf32>
    %1761 = vector.shape_cast %1760 : vector<1x1x8x128xf32> to vector<8x128xf32>
    %c1_1219 = arith.constant 1 : index
    %c7_1220 = arith.constant 7 : index
    %c0_1221 = arith.constant 0 : index
    %c0_1222 = arith.constant 0 : index
    %1762 = vector.load %arg2[%c1_1219, %c7_1220, %c0_1221, %c0_1222] : memref<2x9x8x128xf32, #tpu.memory_space<vmem>>, vector<1x1x8x128xf32>
    %1763 = vector.shape_cast %1762 : vector<1x1x8x128xf32> to vector<8x128xf32>
    %1764 = arith.mulf %1709, %1761 : vector<8x128xf32>
    %1765 = arith.mulf %1713, %1763 : vector<8x128xf32>
    %1766 = arith.subf %1764, %1765 : vector<8x128xf32>
    %1767 = arith.addf %1756, %1766 : vector<8x128xf32>
    %1768 = arith.mulf %1709, %1763 : vector<8x128xf32>
    %1769 = arith.mulf %1713, %1761 : vector<8x128xf32>
    %1770 = arith.addf %1768, %1769 : vector<8x128xf32>
    %1771 = arith.addf %1759, %1770 : vector<8x128xf32>
    %c1_1223 = arith.constant 1 : index
    %c14_1224 = arith.constant 14 : index
    %1772 = memref.load %arg4[%c1_1223, %c14_1224] : memref<2x16xf32, #tpu.memory_space<smem>>
    %c1_1225 = arith.constant 1 : index
    %c14_1226 = arith.constant 14 : index
    %1773 = memref.load %arg5[%c1_1225, %c14_1226] : memref<2x16xf32, #tpu.memory_space<smem>>
    %1774 = vector.broadcast %1772 : f32 to vector<8x128xf32>
    %1775 = arith.mulf %1774, %1767 : vector<8x128xf32>
    %1776 = vector.broadcast %1773 : f32 to vector<8x128xf32>
    %1777 = arith.mulf %1776, %1771 : vector<8x128xf32>
    %1778 = arith.subf %1775, %1777 : vector<8x128xf32>
    %1779 = arith.addf %1651, %1778 : vector<8x128xf32>
    %1780 = vector.broadcast %1772 : f32 to vector<8x128xf32>
    %1781 = arith.mulf %1780, %1771 : vector<8x128xf32>
    %1782 = vector.broadcast %1773 : f32 to vector<8x128xf32>
    %1783 = arith.mulf %1782, %1767 : vector<8x128xf32>
    %1784 = arith.addf %1781, %1783 : vector<8x128xf32>
    %1785 = arith.addf %1657, %1784 : vector<8x128xf32>
    %c0_1227 = arith.constant 0 : index
    %c6_1228 = arith.constant 6 : index
    %c0_1229 = arith.constant 0 : index
    %c0_1230 = arith.constant 0 : index
    %1786 = vector.load %arg1[%c0_1227, %c6_1228, %c0_1229, %c0_1230] : memref<2x9x8x128xf32, #tpu.memory_space<vmem>>, vector<1x1x8x128xf32>
    %1787 = vector.shape_cast %1786 : vector<1x1x8x128xf32> to vector<8x128xf32>
    %c0_1231 = arith.constant 0 : index
    %c6_1232 = arith.constant 6 : index
    %c0_1233 = arith.constant 0 : index
    %c0_1234 = arith.constant 0 : index
    %1788 = vector.load %arg2[%c0_1231, %c6_1232, %c0_1233, %c0_1234] : memref<2x9x8x128xf32, #tpu.memory_space<vmem>>, vector<1x1x8x128xf32>
    %1789 = vector.shape_cast %1788 : vector<1x1x8x128xf32> to vector<8x128xf32>
    %c0_1235 = arith.constant 0 : index
    %c8_1236 = arith.constant 8 : index
    %c0_1237 = arith.constant 0 : index
    %c0_1238 = arith.constant 0 : index
    %1790 = vector.load %arg1[%c0_1235, %c8_1236, %c0_1237, %c0_1238] : memref<2x9x8x128xf32, #tpu.memory_space<vmem>>, vector<1x1x8x128xf32>
    %1791 = vector.shape_cast %1790 : vector<1x1x8x128xf32> to vector<8x128xf32>
    %c0_1239 = arith.constant 0 : index
    %c8_1240 = arith.constant 8 : index
    %c0_1241 = arith.constant 0 : index
    %c0_1242 = arith.constant 0 : index
    %1792 = vector.load %arg2[%c0_1239, %c8_1240, %c0_1241, %c0_1242] : memref<2x9x8x128xf32, #tpu.memory_space<vmem>>, vector<1x1x8x128xf32>
    %1793 = vector.shape_cast %1792 : vector<1x1x8x128xf32> to vector<8x128xf32>
    %1794 = arith.mulf %1787, %1791 : vector<8x128xf32>
    %1795 = arith.mulf %1789, %1793 : vector<8x128xf32>
    %1796 = arith.addf %1794, %1795 : vector<8x128xf32>
    %1797 = arith.addf %1, %1796 : vector<8x128xf32>
    %1798 = arith.mulf %1789, %1791 : vector<8x128xf32>
    %1799 = arith.mulf %1787, %1793 : vector<8x128xf32>
    %1800 = arith.subf %1798, %1799 : vector<8x128xf32>
    %1801 = arith.addf %1, %1800 : vector<8x128xf32>
    %c1_1243 = arith.constant 1 : index
    %c6_1244 = arith.constant 6 : index
    %c0_1245 = arith.constant 0 : index
    %c0_1246 = arith.constant 0 : index
    %1802 = vector.load %arg1[%c1_1243, %c6_1244, %c0_1245, %c0_1246] : memref<2x9x8x128xf32, #tpu.memory_space<vmem>>, vector<1x1x8x128xf32>
    %1803 = vector.shape_cast %1802 : vector<1x1x8x128xf32> to vector<8x128xf32>
    %c1_1247 = arith.constant 1 : index
    %c6_1248 = arith.constant 6 : index
    %c0_1249 = arith.constant 0 : index
    %c0_1250 = arith.constant 0 : index
    %1804 = vector.load %arg2[%c1_1247, %c6_1248, %c0_1249, %c0_1250] : memref<2x9x8x128xf32, #tpu.memory_space<vmem>>, vector<1x1x8x128xf32>
    %1805 = vector.shape_cast %1804 : vector<1x1x8x128xf32> to vector<8x128xf32>
    %c1_1251 = arith.constant 1 : index
    %c8_1252 = arith.constant 8 : index
    %c0_1253 = arith.constant 0 : index
    %c0_1254 = arith.constant 0 : index
    %1806 = vector.load %arg1[%c1_1251, %c8_1252, %c0_1253, %c0_1254] : memref<2x9x8x128xf32, #tpu.memory_space<vmem>>, vector<1x1x8x128xf32>
    %1807 = vector.shape_cast %1806 : vector<1x1x8x128xf32> to vector<8x128xf32>
    %c1_1255 = arith.constant 1 : index
    %c8_1256 = arith.constant 8 : index
    %c0_1257 = arith.constant 0 : index
    %c0_1258 = arith.constant 0 : index
    %1808 = vector.load %arg2[%c1_1255, %c8_1256, %c0_1257, %c0_1258] : memref<2x9x8x128xf32, #tpu.memory_space<vmem>>, vector<1x1x8x128xf32>
    %1809 = vector.shape_cast %1808 : vector<1x1x8x128xf32> to vector<8x128xf32>
    %1810 = arith.mulf %1803, %1807 : vector<8x128xf32>
    %1811 = arith.mulf %1805, %1809 : vector<8x128xf32>
    %1812 = arith.addf %1810, %1811 : vector<8x128xf32>
    %1813 = arith.addf %1797, %1812 : vector<8x128xf32>
    %1814 = arith.mulf %1805, %1807 : vector<8x128xf32>
    %1815 = arith.mulf %1803, %1809 : vector<8x128xf32>
    %1816 = arith.subf %1814, %1815 : vector<8x128xf32>
    %1817 = arith.addf %1801, %1816 : vector<8x128xf32>
    %c0_1259 = arith.constant 0 : index
    %c6_1260 = arith.constant 6 : index
    %c0_1261 = arith.constant 0 : index
    %c0_1262 = arith.constant 0 : index
    %1818 = vector.load %arg1[%c0_1259, %c6_1260, %c0_1261, %c0_1262] : memref<2x9x8x128xf32, #tpu.memory_space<vmem>>, vector<1x1x8x128xf32>
    %1819 = vector.shape_cast %1818 : vector<1x1x8x128xf32> to vector<8x128xf32>
    %c0_1263 = arith.constant 0 : index
    %c6_1264 = arith.constant 6 : index
    %c0_1265 = arith.constant 0 : index
    %c0_1266 = arith.constant 0 : index
    %1820 = vector.load %arg2[%c0_1263, %c6_1264, %c0_1265, %c0_1266] : memref<2x9x8x128xf32, #tpu.memory_space<vmem>>, vector<1x1x8x128xf32>
    %1821 = vector.shape_cast %1820 : vector<1x1x8x128xf32> to vector<8x128xf32>
    %1822 = arith.mulf %1813, %1819 : vector<8x128xf32>
    %1823 = arith.mulf %1817, %1821 : vector<8x128xf32>
    %1824 = arith.subf %1822, %1823 : vector<8x128xf32>
    %1825 = arith.mulf %1813, %1821 : vector<8x128xf32>
    %1826 = arith.mulf %1817, %1819 : vector<8x128xf32>
    %1827 = arith.addf %1825, %1826 : vector<8x128xf32>
    %c0_1267 = arith.constant 0 : index
    %c15 = arith.constant 15 : index
    %1828 = memref.load %arg4[%c0_1267, %c15] : memref<2x16xf32, #tpu.memory_space<smem>>
    %c0_1268 = arith.constant 0 : index
    %c15_1269 = arith.constant 15 : index
    %1829 = memref.load %arg5[%c0_1268, %c15_1269] : memref<2x16xf32, #tpu.memory_space<smem>>
    %1830 = vector.broadcast %1828 : f32 to vector<8x128xf32>
    %1831 = arith.mulf %1830, %1824 : vector<8x128xf32>
    %1832 = vector.broadcast %1829 : f32 to vector<8x128xf32>
    %1833 = arith.mulf %1832, %1827 : vector<8x128xf32>
    %1834 = arith.subf %1831, %1833 : vector<8x128xf32>
    %1835 = arith.addf %1743, %1834 : vector<8x128xf32>
    %1836 = vector.broadcast %1828 : f32 to vector<8x128xf32>
    %1837 = arith.mulf %1836, %1827 : vector<8x128xf32>
    %1838 = vector.broadcast %1829 : f32 to vector<8x128xf32>
    %1839 = arith.mulf %1838, %1824 : vector<8x128xf32>
    %1840 = arith.addf %1837, %1839 : vector<8x128xf32>
    %1841 = arith.addf %1749, %1840 : vector<8x128xf32>
    %c1_1270 = arith.constant 1 : index
    %c6_1271 = arith.constant 6 : index
    %c0_1272 = arith.constant 0 : index
    %c0_1273 = arith.constant 0 : index
    %1842 = vector.load %arg1[%c1_1270, %c6_1271, %c0_1272, %c0_1273] : memref<2x9x8x128xf32, #tpu.memory_space<vmem>>, vector<1x1x8x128xf32>
    %1843 = vector.shape_cast %1842 : vector<1x1x8x128xf32> to vector<8x128xf32>
    %c1_1274 = arith.constant 1 : index
    %c6_1275 = arith.constant 6 : index
    %c0_1276 = arith.constant 0 : index
    %c0_1277 = arith.constant 0 : index
    %1844 = vector.load %arg2[%c1_1274, %c6_1275, %c0_1276, %c0_1277] : memref<2x9x8x128xf32, #tpu.memory_space<vmem>>, vector<1x1x8x128xf32>
    %1845 = vector.shape_cast %1844 : vector<1x1x8x128xf32> to vector<8x128xf32>
    %1846 = arith.mulf %1813, %1843 : vector<8x128xf32>
    %1847 = arith.mulf %1817, %1845 : vector<8x128xf32>
    %1848 = arith.subf %1846, %1847 : vector<8x128xf32>
    %1849 = arith.mulf %1813, %1845 : vector<8x128xf32>
    %1850 = arith.mulf %1817, %1843 : vector<8x128xf32>
    %1851 = arith.addf %1849, %1850 : vector<8x128xf32>
    %c1_1278 = arith.constant 1 : index
    %c15_1279 = arith.constant 15 : index
    %1852 = memref.load %arg4[%c1_1278, %c15_1279] : memref<2x16xf32, #tpu.memory_space<smem>>
    %c1_1280 = arith.constant 1 : index
    %c15_1281 = arith.constant 15 : index
    %1853 = memref.load %arg5[%c1_1280, %c15_1281] : memref<2x16xf32, #tpu.memory_space<smem>>
    %1854 = vector.broadcast %1852 : f32 to vector<8x128xf32>
    %1855 = arith.mulf %1854, %1848 : vector<8x128xf32>
    %1856 = vector.broadcast %1853 : f32 to vector<8x128xf32>
    %1857 = arith.mulf %1856, %1851 : vector<8x128xf32>
    %1858 = arith.subf %1855, %1857 : vector<8x128xf32>
    %1859 = arith.addf %1779, %1858 : vector<8x128xf32>
    %1860 = vector.broadcast %1852 : f32 to vector<8x128xf32>
    %1861 = arith.mulf %1860, %1851 : vector<8x128xf32>
    %1862 = vector.broadcast %1853 : f32 to vector<8x128xf32>
    %1863 = arith.mulf %1862, %1848 : vector<8x128xf32>
    %1864 = arith.addf %1861, %1863 : vector<8x128xf32>
    %1865 = arith.addf %1785, %1864 : vector<8x128xf32>
    %c0_1282 = arith.constant 0 : index
    %1866 = memref.load %arg6[%c0_1282] : memref<9xf32, #tpu.memory_space<smem>>
    %c0_1283 = arith.constant 0 : index
    %1867 = memref.load %arg7[%c0_1283] : memref<9xf32, #tpu.memory_space<smem>>
    %c0_1284 = arith.constant 0 : index
    %c0_1285 = arith.constant 0 : index
    %c0_1286 = arith.constant 0 : index
    %c0_1287 = arith.constant 0 : index
    %1868 = vector.load %arg1[%c0_1284, %c0_1285, %c0_1286, %c0_1287] : memref<2x9x8x128xf32, #tpu.memory_space<vmem>>, vector<1x1x8x128xf32>
    %1869 = vector.shape_cast %1868 : vector<1x1x8x128xf32> to vector<8x128xf32>
    %c0_1288 = arith.constant 0 : index
    %c0_1289 = arith.constant 0 : index
    %c0_1290 = arith.constant 0 : index
    %c0_1291 = arith.constant 0 : index
    %1870 = vector.load %arg2[%c0_1288, %c0_1289, %c0_1290, %c0_1291] : memref<2x9x8x128xf32, #tpu.memory_space<vmem>>, vector<1x1x8x128xf32>
    %1871 = vector.shape_cast %1870 : vector<1x1x8x128xf32> to vector<8x128xf32>
    %1872 = arith.mulf %1869, %1869 : vector<8x128xf32>
    %1873 = arith.mulf %1871, %1871 : vector<8x128xf32>
    %1874 = arith.addf %1872, %1873 : vector<8x128xf32>
    %c1_1292 = arith.constant 1 : index
    %c0_1293 = arith.constant 0 : index
    %c0_1294 = arith.constant 0 : index
    %c0_1295 = arith.constant 0 : index
    %1875 = vector.load %arg1[%c1_1292, %c0_1293, %c0_1294, %c0_1295] : memref<2x9x8x128xf32, #tpu.memory_space<vmem>>, vector<1x1x8x128xf32>
    %1876 = vector.shape_cast %1875 : vector<1x1x8x128xf32> to vector<8x128xf32>
    %c1_1296 = arith.constant 1 : index
    %c0_1297 = arith.constant 0 : index
    %c0_1298 = arith.constant 0 : index
    %c0_1299 = arith.constant 0 : index
    %1877 = vector.load %arg2[%c1_1296, %c0_1297, %c0_1298, %c0_1299] : memref<2x9x8x128xf32, #tpu.memory_space<vmem>>, vector<1x1x8x128xf32>
    %1878 = vector.shape_cast %1877 : vector<1x1x8x128xf32> to vector<8x128xf32>
    %1879 = arith.mulf %1876, %1876 : vector<8x128xf32>
    %1880 = arith.mulf %1878, %1878 : vector<8x128xf32>
    %1881 = arith.addf %1879, %1880 : vector<8x128xf32>
    %cst_1300 = arith.constant 2.000000e+00 : f32
    %1882 = vector.broadcast %cst_1300 : f32 to vector<8x128xf32>
    %1883 = arith.mulf %1882, %1874 : vector<8x128xf32>
    %1884 = arith.addf %1883, %1881 : vector<8x128xf32>
    %1885 = vector.broadcast %1866 : f32 to vector<8x128xf32>
    %1886 = arith.mulf %1885, %1884 : vector<8x128xf32>
    %1887 = arith.addf %1, %1886 : vector<8x128xf32>
    %1888 = arith.mulf %1869, %1876 : vector<8x128xf32>
    %1889 = arith.mulf %1871, %1878 : vector<8x128xf32>
    %1890 = arith.addf %1888, %1889 : vector<8x128xf32>
    %1891 = arith.mulf %1871, %1876 : vector<8x128xf32>
    %1892 = arith.mulf %1869, %1878 : vector<8x128xf32>
    %1893 = arith.subf %1891, %1892 : vector<8x128xf32>
    %1894 = vector.broadcast %1867 : f32 to vector<8x128xf32>
    %1895 = arith.mulf %1894, %1890 : vector<8x128xf32>
    %1896 = arith.addf %1, %1895 : vector<8x128xf32>
    %1897 = vector.broadcast %1867 : f32 to vector<8x128xf32>
    %1898 = arith.mulf %1897, %1893 : vector<8x128xf32>
    %1899 = arith.addf %1, %1898 : vector<8x128xf32>
    %cst_1301 = arith.constant 2.000000e+00 : f32
    %1900 = vector.broadcast %cst_1301 : f32 to vector<8x128xf32>
    %1901 = arith.mulf %1900, %1881 : vector<8x128xf32>
    %1902 = arith.addf %1901, %1874 : vector<8x128xf32>
    %1903 = vector.broadcast %1866 : f32 to vector<8x128xf32>
    %1904 = arith.mulf %1903, %1902 : vector<8x128xf32>
    %1905 = arith.addf %1, %1904 : vector<8x128xf32>
    %1906 = arith.mulf %1876, %1869 : vector<8x128xf32>
    %1907 = arith.mulf %1878, %1871 : vector<8x128xf32>
    %1908 = arith.addf %1906, %1907 : vector<8x128xf32>
    %1909 = arith.mulf %1878, %1869 : vector<8x128xf32>
    %1910 = arith.mulf %1876, %1871 : vector<8x128xf32>
    %1911 = arith.subf %1909, %1910 : vector<8x128xf32>
    %1912 = vector.broadcast %1867 : f32 to vector<8x128xf32>
    %1913 = arith.mulf %1912, %1908 : vector<8x128xf32>
    %1914 = arith.addf %1, %1913 : vector<8x128xf32>
    %1915 = vector.broadcast %1867 : f32 to vector<8x128xf32>
    %1916 = arith.mulf %1915, %1911 : vector<8x128xf32>
    %1917 = arith.addf %1, %1916 : vector<8x128xf32>
    %c1_1302 = arith.constant 1 : index
    %1918 = memref.load %arg6[%c1_1302] : memref<9xf32, #tpu.memory_space<smem>>
    %c1_1303 = arith.constant 1 : index
    %1919 = memref.load %arg7[%c1_1303] : memref<9xf32, #tpu.memory_space<smem>>
    %c0_1304 = arith.constant 0 : index
    %c1_1305 = arith.constant 1 : index
    %c0_1306 = arith.constant 0 : index
    %c0_1307 = arith.constant 0 : index
    %1920 = vector.load %arg1[%c0_1304, %c1_1305, %c0_1306, %c0_1307] : memref<2x9x8x128xf32, #tpu.memory_space<vmem>>, vector<1x1x8x128xf32>
    %1921 = vector.shape_cast %1920 : vector<1x1x8x128xf32> to vector<8x128xf32>
    %c0_1308 = arith.constant 0 : index
    %c1_1309 = arith.constant 1 : index
    %c0_1310 = arith.constant 0 : index
    %c0_1311 = arith.constant 0 : index
    %1922 = vector.load %arg2[%c0_1308, %c1_1309, %c0_1310, %c0_1311] : memref<2x9x8x128xf32, #tpu.memory_space<vmem>>, vector<1x1x8x128xf32>
    %1923 = vector.shape_cast %1922 : vector<1x1x8x128xf32> to vector<8x128xf32>
    %1924 = arith.mulf %1921, %1921 : vector<8x128xf32>
    %1925 = arith.mulf %1923, %1923 : vector<8x128xf32>
    %1926 = arith.addf %1924, %1925 : vector<8x128xf32>
    %c1_1312 = arith.constant 1 : index
    %c1_1313 = arith.constant 1 : index
    %c0_1314 = arith.constant 0 : index
    %c0_1315 = arith.constant 0 : index
    %1927 = vector.load %arg1[%c1_1312, %c1_1313, %c0_1314, %c0_1315] : memref<2x9x8x128xf32, #tpu.memory_space<vmem>>, vector<1x1x8x128xf32>
    %1928 = vector.shape_cast %1927 : vector<1x1x8x128xf32> to vector<8x128xf32>
    %c1_1316 = arith.constant 1 : index
    %c1_1317 = arith.constant 1 : index
    %c0_1318 = arith.constant 0 : index
    %c0_1319 = arith.constant 0 : index
    %1929 = vector.load %arg2[%c1_1316, %c1_1317, %c0_1318, %c0_1319] : memref<2x9x8x128xf32, #tpu.memory_space<vmem>>, vector<1x1x8x128xf32>
    %1930 = vector.shape_cast %1929 : vector<1x1x8x128xf32> to vector<8x128xf32>
    %1931 = arith.mulf %1928, %1928 : vector<8x128xf32>
    %1932 = arith.mulf %1930, %1930 : vector<8x128xf32>
    %1933 = arith.addf %1931, %1932 : vector<8x128xf32>
    %cst_1320 = arith.constant 2.000000e+00 : f32
    %1934 = vector.broadcast %cst_1320 : f32 to vector<8x128xf32>
    %1935 = arith.mulf %1934, %1926 : vector<8x128xf32>
    %1936 = arith.addf %1935, %1933 : vector<8x128xf32>
    %1937 = vector.broadcast %1918 : f32 to vector<8x128xf32>
    %1938 = arith.mulf %1937, %1936 : vector<8x128xf32>
    %1939 = arith.addf %1887, %1938 : vector<8x128xf32>
    %1940 = arith.mulf %1921, %1928 : vector<8x128xf32>
    %1941 = arith.mulf %1923, %1930 : vector<8x128xf32>
    %1942 = arith.addf %1940, %1941 : vector<8x128xf32>
    %1943 = arith.mulf %1923, %1928 : vector<8x128xf32>
    %1944 = arith.mulf %1921, %1930 : vector<8x128xf32>
    %1945 = arith.subf %1943, %1944 : vector<8x128xf32>
    %1946 = vector.broadcast %1919 : f32 to vector<8x128xf32>
    %1947 = arith.mulf %1946, %1942 : vector<8x128xf32>
    %1948 = arith.addf %1896, %1947 : vector<8x128xf32>
    %1949 = vector.broadcast %1919 : f32 to vector<8x128xf32>
    %1950 = arith.mulf %1949, %1945 : vector<8x128xf32>
    %1951 = arith.addf %1899, %1950 : vector<8x128xf32>
    %cst_1321 = arith.constant 2.000000e+00 : f32
    %1952 = vector.broadcast %cst_1321 : f32 to vector<8x128xf32>
    %1953 = arith.mulf %1952, %1933 : vector<8x128xf32>
    %1954 = arith.addf %1953, %1926 : vector<8x128xf32>
    %1955 = vector.broadcast %1918 : f32 to vector<8x128xf32>
    %1956 = arith.mulf %1955, %1954 : vector<8x128xf32>
    %1957 = arith.addf %1905, %1956 : vector<8x128xf32>
    %1958 = arith.mulf %1928, %1921 : vector<8x128xf32>
    %1959 = arith.mulf %1930, %1923 : vector<8x128xf32>
    %1960 = arith.addf %1958, %1959 : vector<8x128xf32>
    %1961 = arith.mulf %1930, %1921 : vector<8x128xf32>
    %1962 = arith.mulf %1928, %1923 : vector<8x128xf32>
    %1963 = arith.subf %1961, %1962 : vector<8x128xf32>
    %1964 = vector.broadcast %1919 : f32 to vector<8x128xf32>
    %1965 = arith.mulf %1964, %1960 : vector<8x128xf32>
    %1966 = arith.addf %1914, %1965 : vector<8x128xf32>
    %1967 = vector.broadcast %1919 : f32 to vector<8x128xf32>
    %1968 = arith.mulf %1967, %1963 : vector<8x128xf32>
    %1969 = arith.addf %1917, %1968 : vector<8x128xf32>
    %c2_1322 = arith.constant 2 : index
    %1970 = memref.load %arg6[%c2_1322] : memref<9xf32, #tpu.memory_space<smem>>
    %c2_1323 = arith.constant 2 : index
    %1971 = memref.load %arg7[%c2_1323] : memref<9xf32, #tpu.memory_space<smem>>
    %c0_1324 = arith.constant 0 : index
    %c2_1325 = arith.constant 2 : index
    %c0_1326 = arith.constant 0 : index
    %c0_1327 = arith.constant 0 : index
    %1972 = vector.load %arg1[%c0_1324, %c2_1325, %c0_1326, %c0_1327] : memref<2x9x8x128xf32, #tpu.memory_space<vmem>>, vector<1x1x8x128xf32>
    %1973 = vector.shape_cast %1972 : vector<1x1x8x128xf32> to vector<8x128xf32>
    %c0_1328 = arith.constant 0 : index
    %c2_1329 = arith.constant 2 : index
    %c0_1330 = arith.constant 0 : index
    %c0_1331 = arith.constant 0 : index
    %1974 = vector.load %arg2[%c0_1328, %c2_1329, %c0_1330, %c0_1331] : memref<2x9x8x128xf32, #tpu.memory_space<vmem>>, vector<1x1x8x128xf32>
    %1975 = vector.shape_cast %1974 : vector<1x1x8x128xf32> to vector<8x128xf32>
    %1976 = arith.mulf %1973, %1973 : vector<8x128xf32>
    %1977 = arith.mulf %1975, %1975 : vector<8x128xf32>
    %1978 = arith.addf %1976, %1977 : vector<8x128xf32>
    %c1_1332 = arith.constant 1 : index
    %c2_1333 = arith.constant 2 : index
    %c0_1334 = arith.constant 0 : index
    %c0_1335 = arith.constant 0 : index
    %1979 = vector.load %arg1[%c1_1332, %c2_1333, %c0_1334, %c0_1335] : memref<2x9x8x128xf32, #tpu.memory_space<vmem>>, vector<1x1x8x128xf32>
    %1980 = vector.shape_cast %1979 : vector<1x1x8x128xf32> to vector<8x128xf32>
    %c1_1336 = arith.constant 1 : index
    %c2_1337 = arith.constant 2 : index
    %c0_1338 = arith.constant 0 : index
    %c0_1339 = arith.constant 0 : index
    %1981 = vector.load %arg2[%c1_1336, %c2_1337, %c0_1338, %c0_1339] : memref<2x9x8x128xf32, #tpu.memory_space<vmem>>, vector<1x1x8x128xf32>
    %1982 = vector.shape_cast %1981 : vector<1x1x8x128xf32> to vector<8x128xf32>
    %1983 = arith.mulf %1980, %1980 : vector<8x128xf32>
    %1984 = arith.mulf %1982, %1982 : vector<8x128xf32>
    %1985 = arith.addf %1983, %1984 : vector<8x128xf32>
    %cst_1340 = arith.constant 2.000000e+00 : f32
    %1986 = vector.broadcast %cst_1340 : f32 to vector<8x128xf32>
    %1987 = arith.mulf %1986, %1978 : vector<8x128xf32>
    %1988 = arith.addf %1987, %1985 : vector<8x128xf32>
    %1989 = vector.broadcast %1970 : f32 to vector<8x128xf32>
    %1990 = arith.mulf %1989, %1988 : vector<8x128xf32>
    %1991 = arith.addf %1939, %1990 : vector<8x128xf32>
    %1992 = arith.mulf %1973, %1980 : vector<8x128xf32>
    %1993 = arith.mulf %1975, %1982 : vector<8x128xf32>
    %1994 = arith.addf %1992, %1993 : vector<8x128xf32>
    %1995 = arith.mulf %1975, %1980 : vector<8x128xf32>
    %1996 = arith.mulf %1973, %1982 : vector<8x128xf32>
    %1997 = arith.subf %1995, %1996 : vector<8x128xf32>
    %1998 = vector.broadcast %1971 : f32 to vector<8x128xf32>
    %1999 = arith.mulf %1998, %1994 : vector<8x128xf32>
    %2000 = arith.addf %1948, %1999 : vector<8x128xf32>
    %2001 = vector.broadcast %1971 : f32 to vector<8x128xf32>
    %2002 = arith.mulf %2001, %1997 : vector<8x128xf32>
    %2003 = arith.addf %1951, %2002 : vector<8x128xf32>
    %cst_1341 = arith.constant 2.000000e+00 : f32
    %2004 = vector.broadcast %cst_1341 : f32 to vector<8x128xf32>
    %2005 = arith.mulf %2004, %1985 : vector<8x128xf32>
    %2006 = arith.addf %2005, %1978 : vector<8x128xf32>
    %2007 = vector.broadcast %1970 : f32 to vector<8x128xf32>
    %2008 = arith.mulf %2007, %2006 : vector<8x128xf32>
    %2009 = arith.addf %1957, %2008 : vector<8x128xf32>
    %2010 = arith.mulf %1980, %1973 : vector<8x128xf32>
    %2011 = arith.mulf %1982, %1975 : vector<8x128xf32>
    %2012 = arith.addf %2010, %2011 : vector<8x128xf32>
    %2013 = arith.mulf %1982, %1973 : vector<8x128xf32>
    %2014 = arith.mulf %1980, %1975 : vector<8x128xf32>
    %2015 = arith.subf %2013, %2014 : vector<8x128xf32>
    %2016 = vector.broadcast %1971 : f32 to vector<8x128xf32>
    %2017 = arith.mulf %2016, %2012 : vector<8x128xf32>
    %2018 = arith.addf %1966, %2017 : vector<8x128xf32>
    %2019 = vector.broadcast %1971 : f32 to vector<8x128xf32>
    %2020 = arith.mulf %2019, %2015 : vector<8x128xf32>
    %2021 = arith.addf %1969, %2020 : vector<8x128xf32>
    %c3_1342 = arith.constant 3 : index
    %2022 = memref.load %arg6[%c3_1342] : memref<9xf32, #tpu.memory_space<smem>>
    %c3_1343 = arith.constant 3 : index
    %2023 = memref.load %arg7[%c3_1343] : memref<9xf32, #tpu.memory_space<smem>>
    %c0_1344 = arith.constant 0 : index
    %c3_1345 = arith.constant 3 : index
    %c0_1346 = arith.constant 0 : index
    %c0_1347 = arith.constant 0 : index
    %2024 = vector.load %arg1[%c0_1344, %c3_1345, %c0_1346, %c0_1347] : memref<2x9x8x128xf32, #tpu.memory_space<vmem>>, vector<1x1x8x128xf32>
    %2025 = vector.shape_cast %2024 : vector<1x1x8x128xf32> to vector<8x128xf32>
    %c0_1348 = arith.constant 0 : index
    %c3_1349 = arith.constant 3 : index
    %c0_1350 = arith.constant 0 : index
    %c0_1351 = arith.constant 0 : index
    %2026 = vector.load %arg2[%c0_1348, %c3_1349, %c0_1350, %c0_1351] : memref<2x9x8x128xf32, #tpu.memory_space<vmem>>, vector<1x1x8x128xf32>
    %2027 = vector.shape_cast %2026 : vector<1x1x8x128xf32> to vector<8x128xf32>
    %2028 = arith.mulf %2025, %2025 : vector<8x128xf32>
    %2029 = arith.mulf %2027, %2027 : vector<8x128xf32>
    %2030 = arith.addf %2028, %2029 : vector<8x128xf32>
    %c1_1352 = arith.constant 1 : index
    %c3_1353 = arith.constant 3 : index
    %c0_1354 = arith.constant 0 : index
    %c0_1355 = arith.constant 0 : index
    %2031 = vector.load %arg1[%c1_1352, %c3_1353, %c0_1354, %c0_1355] : memref<2x9x8x128xf32, #tpu.memory_space<vmem>>, vector<1x1x8x128xf32>
    %2032 = vector.shape_cast %2031 : vector<1x1x8x128xf32> to vector<8x128xf32>
    %c1_1356 = arith.constant 1 : index
    %c3_1357 = arith.constant 3 : index
    %c0_1358 = arith.constant 0 : index
    %c0_1359 = arith.constant 0 : index
    %2033 = vector.load %arg2[%c1_1356, %c3_1357, %c0_1358, %c0_1359] : memref<2x9x8x128xf32, #tpu.memory_space<vmem>>, vector<1x1x8x128xf32>
    %2034 = vector.shape_cast %2033 : vector<1x1x8x128xf32> to vector<8x128xf32>
    %2035 = arith.mulf %2032, %2032 : vector<8x128xf32>
    %2036 = arith.mulf %2034, %2034 : vector<8x128xf32>
    %2037 = arith.addf %2035, %2036 : vector<8x128xf32>
    %cst_1360 = arith.constant 2.000000e+00 : f32
    %2038 = vector.broadcast %cst_1360 : f32 to vector<8x128xf32>
    %2039 = arith.mulf %2038, %2030 : vector<8x128xf32>
    %2040 = arith.addf %2039, %2037 : vector<8x128xf32>
    %2041 = vector.broadcast %2022 : f32 to vector<8x128xf32>
    %2042 = arith.mulf %2041, %2040 : vector<8x128xf32>
    %2043 = arith.addf %1991, %2042 : vector<8x128xf32>
    %2044 = arith.mulf %2025, %2032 : vector<8x128xf32>
    %2045 = arith.mulf %2027, %2034 : vector<8x128xf32>
    %2046 = arith.addf %2044, %2045 : vector<8x128xf32>
    %2047 = arith.mulf %2027, %2032 : vector<8x128xf32>
    %2048 = arith.mulf %2025, %2034 : vector<8x128xf32>
    %2049 = arith.subf %2047, %2048 : vector<8x128xf32>
    %2050 = vector.broadcast %2023 : f32 to vector<8x128xf32>
    %2051 = arith.mulf %2050, %2046 : vector<8x128xf32>
    %2052 = arith.addf %2000, %2051 : vector<8x128xf32>
    %2053 = vector.broadcast %2023 : f32 to vector<8x128xf32>
    %2054 = arith.mulf %2053, %2049 : vector<8x128xf32>
    %2055 = arith.addf %2003, %2054 : vector<8x128xf32>
    %cst_1361 = arith.constant 2.000000e+00 : f32
    %2056 = vector.broadcast %cst_1361 : f32 to vector<8x128xf32>
    %2057 = arith.mulf %2056, %2037 : vector<8x128xf32>
    %2058 = arith.addf %2057, %2030 : vector<8x128xf32>
    %2059 = vector.broadcast %2022 : f32 to vector<8x128xf32>
    %2060 = arith.mulf %2059, %2058 : vector<8x128xf32>
    %2061 = arith.addf %2009, %2060 : vector<8x128xf32>
    %2062 = arith.mulf %2032, %2025 : vector<8x128xf32>
    %2063 = arith.mulf %2034, %2027 : vector<8x128xf32>
    %2064 = arith.addf %2062, %2063 : vector<8x128xf32>
    %2065 = arith.mulf %2034, %2025 : vector<8x128xf32>
    %2066 = arith.mulf %2032, %2027 : vector<8x128xf32>
    %2067 = arith.subf %2065, %2066 : vector<8x128xf32>
    %2068 = vector.broadcast %2023 : f32 to vector<8x128xf32>
    %2069 = arith.mulf %2068, %2064 : vector<8x128xf32>
    %2070 = arith.addf %2018, %2069 : vector<8x128xf32>
    %2071 = vector.broadcast %2023 : f32 to vector<8x128xf32>
    %2072 = arith.mulf %2071, %2067 : vector<8x128xf32>
    %2073 = arith.addf %2021, %2072 : vector<8x128xf32>
    %c5_1362 = arith.constant 5 : index
    %2074 = memref.load %arg6[%c5_1362] : memref<9xf32, #tpu.memory_space<smem>>
    %c5_1363 = arith.constant 5 : index
    %2075 = memref.load %arg7[%c5_1363] : memref<9xf32, #tpu.memory_space<smem>>
    %c0_1364 = arith.constant 0 : index
    %c5_1365 = arith.constant 5 : index
    %c0_1366 = arith.constant 0 : index
    %c0_1367 = arith.constant 0 : index
    %2076 = vector.load %arg1[%c0_1364, %c5_1365, %c0_1366, %c0_1367] : memref<2x9x8x128xf32, #tpu.memory_space<vmem>>, vector<1x1x8x128xf32>
    %2077 = vector.shape_cast %2076 : vector<1x1x8x128xf32> to vector<8x128xf32>
    %c0_1368 = arith.constant 0 : index
    %c5_1369 = arith.constant 5 : index
    %c0_1370 = arith.constant 0 : index
    %c0_1371 = arith.constant 0 : index
    %2078 = vector.load %arg2[%c0_1368, %c5_1369, %c0_1370, %c0_1371] : memref<2x9x8x128xf32, #tpu.memory_space<vmem>>, vector<1x1x8x128xf32>
    %2079 = vector.shape_cast %2078 : vector<1x1x8x128xf32> to vector<8x128xf32>
    %2080 = arith.mulf %2077, %2077 : vector<8x128xf32>
    %2081 = arith.mulf %2079, %2079 : vector<8x128xf32>
    %2082 = arith.addf %2080, %2081 : vector<8x128xf32>
    %c1_1372 = arith.constant 1 : index
    %c5_1373 = arith.constant 5 : index
    %c0_1374 = arith.constant 0 : index
    %c0_1375 = arith.constant 0 : index
    %2083 = vector.load %arg1[%c1_1372, %c5_1373, %c0_1374, %c0_1375] : memref<2x9x8x128xf32, #tpu.memory_space<vmem>>, vector<1x1x8x128xf32>
    %2084 = vector.shape_cast %2083 : vector<1x1x8x128xf32> to vector<8x128xf32>
    %c1_1376 = arith.constant 1 : index
    %c5_1377 = arith.constant 5 : index
    %c0_1378 = arith.constant 0 : index
    %c0_1379 = arith.constant 0 : index
    %2085 = vector.load %arg2[%c1_1376, %c5_1377, %c0_1378, %c0_1379] : memref<2x9x8x128xf32, #tpu.memory_space<vmem>>, vector<1x1x8x128xf32>
    %2086 = vector.shape_cast %2085 : vector<1x1x8x128xf32> to vector<8x128xf32>
    %2087 = arith.mulf %2084, %2084 : vector<8x128xf32>
    %2088 = arith.mulf %2086, %2086 : vector<8x128xf32>
    %2089 = arith.addf %2087, %2088 : vector<8x128xf32>
    %cst_1380 = arith.constant 2.000000e+00 : f32
    %2090 = vector.broadcast %cst_1380 : f32 to vector<8x128xf32>
    %2091 = arith.mulf %2090, %2082 : vector<8x128xf32>
    %2092 = arith.addf %2091, %2089 : vector<8x128xf32>
    %2093 = vector.broadcast %2074 : f32 to vector<8x128xf32>
    %2094 = arith.mulf %2093, %2092 : vector<8x128xf32>
    %2095 = arith.addf %2043, %2094 : vector<8x128xf32>
    %2096 = arith.mulf %2077, %2084 : vector<8x128xf32>
    %2097 = arith.mulf %2079, %2086 : vector<8x128xf32>
    %2098 = arith.addf %2096, %2097 : vector<8x128xf32>
    %2099 = arith.mulf %2079, %2084 : vector<8x128xf32>
    %2100 = arith.mulf %2077, %2086 : vector<8x128xf32>
    %2101 = arith.subf %2099, %2100 : vector<8x128xf32>
    %2102 = vector.broadcast %2075 : f32 to vector<8x128xf32>
    %2103 = arith.mulf %2102, %2098 : vector<8x128xf32>
    %2104 = arith.addf %2052, %2103 : vector<8x128xf32>
    %2105 = vector.broadcast %2075 : f32 to vector<8x128xf32>
    %2106 = arith.mulf %2105, %2101 : vector<8x128xf32>
    %2107 = arith.addf %2055, %2106 : vector<8x128xf32>
    %cst_1381 = arith.constant 2.000000e+00 : f32
    %2108 = vector.broadcast %cst_1381 : f32 to vector<8x128xf32>
    %2109 = arith.mulf %2108, %2089 : vector<8x128xf32>
    %2110 = arith.addf %2109, %2082 : vector<8x128xf32>
    %2111 = vector.broadcast %2074 : f32 to vector<8x128xf32>
    %2112 = arith.mulf %2111, %2110 : vector<8x128xf32>
    %2113 = arith.addf %2061, %2112 : vector<8x128xf32>
    %2114 = arith.mulf %2084, %2077 : vector<8x128xf32>
    %2115 = arith.mulf %2086, %2079 : vector<8x128xf32>
    %2116 = arith.addf %2114, %2115 : vector<8x128xf32>
    %2117 = arith.mulf %2086, %2077 : vector<8x128xf32>
    %2118 = arith.mulf %2084, %2079 : vector<8x128xf32>
    %2119 = arith.subf %2117, %2118 : vector<8x128xf32>
    %2120 = vector.broadcast %2075 : f32 to vector<8x128xf32>
    %2121 = arith.mulf %2120, %2116 : vector<8x128xf32>
    %2122 = arith.addf %2070, %2121 : vector<8x128xf32>
    %2123 = vector.broadcast %2075 : f32 to vector<8x128xf32>
    %2124 = arith.mulf %2123, %2119 : vector<8x128xf32>
    %2125 = arith.addf %2073, %2124 : vector<8x128xf32>
    %c6_1382 = arith.constant 6 : index
    %2126 = memref.load %arg6[%c6_1382] : memref<9xf32, #tpu.memory_space<smem>>
    %c6_1383 = arith.constant 6 : index
    %2127 = memref.load %arg7[%c6_1383] : memref<9xf32, #tpu.memory_space<smem>>
    %c0_1384 = arith.constant 0 : index
    %c6_1385 = arith.constant 6 : index
    %c0_1386 = arith.constant 0 : index
    %c0_1387 = arith.constant 0 : index
    %2128 = vector.load %arg1[%c0_1384, %c6_1385, %c0_1386, %c0_1387] : memref<2x9x8x128xf32, #tpu.memory_space<vmem>>, vector<1x1x8x128xf32>
    %2129 = vector.shape_cast %2128 : vector<1x1x8x128xf32> to vector<8x128xf32>
    %c0_1388 = arith.constant 0 : index
    %c6_1389 = arith.constant 6 : index
    %c0_1390 = arith.constant 0 : index
    %c0_1391 = arith.constant 0 : index
    %2130 = vector.load %arg2[%c0_1388, %c6_1389, %c0_1390, %c0_1391] : memref<2x9x8x128xf32, #tpu.memory_space<vmem>>, vector<1x1x8x128xf32>
    %2131 = vector.shape_cast %2130 : vector<1x1x8x128xf32> to vector<8x128xf32>
    %2132 = arith.mulf %2129, %2129 : vector<8x128xf32>
    %2133 = arith.mulf %2131, %2131 : vector<8x128xf32>
    %2134 = arith.addf %2132, %2133 : vector<8x128xf32>
    %c1_1392 = arith.constant 1 : index
    %c6_1393 = arith.constant 6 : index
    %c0_1394 = arith.constant 0 : index
    %c0_1395 = arith.constant 0 : index
    %2135 = vector.load %arg1[%c1_1392, %c6_1393, %c0_1394, %c0_1395] : memref<2x9x8x128xf32, #tpu.memory_space<vmem>>, vector<1x1x8x128xf32>
    %2136 = vector.shape_cast %2135 : vector<1x1x8x128xf32> to vector<8x128xf32>
    %c1_1396 = arith.constant 1 : index
    %c6_1397 = arith.constant 6 : index
    %c0_1398 = arith.constant 0 : index
    %c0_1399 = arith.constant 0 : index
    %2137 = vector.load %arg2[%c1_1396, %c6_1397, %c0_1398, %c0_1399] : memref<2x9x8x128xf32, #tpu.memory_space<vmem>>, vector<1x1x8x128xf32>
    %2138 = vector.shape_cast %2137 : vector<1x1x8x128xf32> to vector<8x128xf32>
    %2139 = arith.mulf %2136, %2136 : vector<8x128xf32>
    %2140 = arith.mulf %2138, %2138 : vector<8x128xf32>
    %2141 = arith.addf %2139, %2140 : vector<8x128xf32>
    %cst_1400 = arith.constant 2.000000e+00 : f32
    %2142 = vector.broadcast %cst_1400 : f32 to vector<8x128xf32>
    %2143 = arith.mulf %2142, %2134 : vector<8x128xf32>
    %2144 = arith.addf %2143, %2141 : vector<8x128xf32>
    %2145 = vector.broadcast %2126 : f32 to vector<8x128xf32>
    %2146 = arith.mulf %2145, %2144 : vector<8x128xf32>
    %2147 = arith.addf %2095, %2146 : vector<8x128xf32>
    %2148 = arith.mulf %2129, %2136 : vector<8x128xf32>
    %2149 = arith.mulf %2131, %2138 : vector<8x128xf32>
    %2150 = arith.addf %2148, %2149 : vector<8x128xf32>
    %2151 = arith.mulf %2131, %2136 : vector<8x128xf32>
    %2152 = arith.mulf %2129, %2138 : vector<8x128xf32>
    %2153 = arith.subf %2151, %2152 : vector<8x128xf32>
    %2154 = vector.broadcast %2127 : f32 to vector<8x128xf32>
    %2155 = arith.mulf %2154, %2150 : vector<8x128xf32>
    %2156 = arith.addf %2104, %2155 : vector<8x128xf32>
    %2157 = vector.broadcast %2127 : f32 to vector<8x128xf32>
    %2158 = arith.mulf %2157, %2153 : vector<8x128xf32>
    %2159 = arith.addf %2107, %2158 : vector<8x128xf32>
    %cst_1401 = arith.constant 2.000000e+00 : f32
    %2160 = vector.broadcast %cst_1401 : f32 to vector<8x128xf32>
    %2161 = arith.mulf %2160, %2141 : vector<8x128xf32>
    %2162 = arith.addf %2161, %2134 : vector<8x128xf32>
    %2163 = vector.broadcast %2126 : f32 to vector<8x128xf32>
    %2164 = arith.mulf %2163, %2162 : vector<8x128xf32>
    %2165 = arith.addf %2113, %2164 : vector<8x128xf32>
    %2166 = arith.mulf %2136, %2129 : vector<8x128xf32>
    %2167 = arith.mulf %2138, %2131 : vector<8x128xf32>
    %2168 = arith.addf %2166, %2167 : vector<8x128xf32>
    %2169 = arith.mulf %2138, %2129 : vector<8x128xf32>
    %2170 = arith.mulf %2136, %2131 : vector<8x128xf32>
    %2171 = arith.subf %2169, %2170 : vector<8x128xf32>
    %2172 = vector.broadcast %2127 : f32 to vector<8x128xf32>
    %2173 = arith.mulf %2172, %2168 : vector<8x128xf32>
    %2174 = arith.addf %2122, %2173 : vector<8x128xf32>
    %2175 = vector.broadcast %2127 : f32 to vector<8x128xf32>
    %2176 = arith.mulf %2175, %2171 : vector<8x128xf32>
    %2177 = arith.addf %2125, %2176 : vector<8x128xf32>
    %c7_1402 = arith.constant 7 : index
    %2178 = memref.load %arg6[%c7_1402] : memref<9xf32, #tpu.memory_space<smem>>
    %c7_1403 = arith.constant 7 : index
    %2179 = memref.load %arg7[%c7_1403] : memref<9xf32, #tpu.memory_space<smem>>
    %c0_1404 = arith.constant 0 : index
    %c7_1405 = arith.constant 7 : index
    %c0_1406 = arith.constant 0 : index
    %c0_1407 = arith.constant 0 : index
    %2180 = vector.load %arg1[%c0_1404, %c7_1405, %c0_1406, %c0_1407] : memref<2x9x8x128xf32, #tpu.memory_space<vmem>>, vector<1x1x8x128xf32>
    %2181 = vector.shape_cast %2180 : vector<1x1x8x128xf32> to vector<8x128xf32>
    %c0_1408 = arith.constant 0 : index
    %c7_1409 = arith.constant 7 : index
    %c0_1410 = arith.constant 0 : index
    %c0_1411 = arith.constant 0 : index
    %2182 = vector.load %arg2[%c0_1408, %c7_1409, %c0_1410, %c0_1411] : memref<2x9x8x128xf32, #tpu.memory_space<vmem>>, vector<1x1x8x128xf32>
    %2183 = vector.shape_cast %2182 : vector<1x1x8x128xf32> to vector<8x128xf32>
    %2184 = arith.mulf %2181, %2181 : vector<8x128xf32>
    %2185 = arith.mulf %2183, %2183 : vector<8x128xf32>
    %2186 = arith.addf %2184, %2185 : vector<8x128xf32>
    %c1_1412 = arith.constant 1 : index
    %c7_1413 = arith.constant 7 : index
    %c0_1414 = arith.constant 0 : index
    %c0_1415 = arith.constant 0 : index
    %2187 = vector.load %arg1[%c1_1412, %c7_1413, %c0_1414, %c0_1415] : memref<2x9x8x128xf32, #tpu.memory_space<vmem>>, vector<1x1x8x128xf32>
    %2188 = vector.shape_cast %2187 : vector<1x1x8x128xf32> to vector<8x128xf32>
    %c1_1416 = arith.constant 1 : index
    %c7_1417 = arith.constant 7 : index
    %c0_1418 = arith.constant 0 : index
    %c0_1419 = arith.constant 0 : index
    %2189 = vector.load %arg2[%c1_1416, %c7_1417, %c0_1418, %c0_1419] : memref<2x9x8x128xf32, #tpu.memory_space<vmem>>, vector<1x1x8x128xf32>
    %2190 = vector.shape_cast %2189 : vector<1x1x8x128xf32> to vector<8x128xf32>
    %2191 = arith.mulf %2188, %2188 : vector<8x128xf32>
    %2192 = arith.mulf %2190, %2190 : vector<8x128xf32>
    %2193 = arith.addf %2191, %2192 : vector<8x128xf32>
    %cst_1420 = arith.constant 2.000000e+00 : f32
    %2194 = vector.broadcast %cst_1420 : f32 to vector<8x128xf32>
    %2195 = arith.mulf %2194, %2186 : vector<8x128xf32>
    %2196 = arith.addf %2195, %2193 : vector<8x128xf32>
    %2197 = vector.broadcast %2178 : f32 to vector<8x128xf32>
    %2198 = arith.mulf %2197, %2196 : vector<8x128xf32>
    %2199 = arith.addf %2147, %2198 : vector<8x128xf32>
    %2200 = arith.mulf %2181, %2188 : vector<8x128xf32>
    %2201 = arith.mulf %2183, %2190 : vector<8x128xf32>
    %2202 = arith.addf %2200, %2201 : vector<8x128xf32>
    %2203 = arith.mulf %2183, %2188 : vector<8x128xf32>
    %2204 = arith.mulf %2181, %2190 : vector<8x128xf32>
    %2205 = arith.subf %2203, %2204 : vector<8x128xf32>
    %2206 = vector.broadcast %2179 : f32 to vector<8x128xf32>
    %2207 = arith.mulf %2206, %2202 : vector<8x128xf32>
    %2208 = arith.addf %2156, %2207 : vector<8x128xf32>
    %2209 = vector.broadcast %2179 : f32 to vector<8x128xf32>
    %2210 = arith.mulf %2209, %2205 : vector<8x128xf32>
    %2211 = arith.addf %2159, %2210 : vector<8x128xf32>
    %cst_1421 = arith.constant 2.000000e+00 : f32
    %2212 = vector.broadcast %cst_1421 : f32 to vector<8x128xf32>
    %2213 = arith.mulf %2212, %2193 : vector<8x128xf32>
    %2214 = arith.addf %2213, %2186 : vector<8x128xf32>
    %2215 = vector.broadcast %2178 : f32 to vector<8x128xf32>
    %2216 = arith.mulf %2215, %2214 : vector<8x128xf32>
    %2217 = arith.addf %2165, %2216 : vector<8x128xf32>
    %2218 = arith.mulf %2188, %2181 : vector<8x128xf32>
    %2219 = arith.mulf %2190, %2183 : vector<8x128xf32>
    %2220 = arith.addf %2218, %2219 : vector<8x128xf32>
    %2221 = arith.mulf %2190, %2181 : vector<8x128xf32>
    %2222 = arith.mulf %2188, %2183 : vector<8x128xf32>
    %2223 = arith.subf %2221, %2222 : vector<8x128xf32>
    %2224 = vector.broadcast %2179 : f32 to vector<8x128xf32>
    %2225 = arith.mulf %2224, %2220 : vector<8x128xf32>
    %2226 = arith.addf %2174, %2225 : vector<8x128xf32>
    %2227 = vector.broadcast %2179 : f32 to vector<8x128xf32>
    %2228 = arith.mulf %2227, %2223 : vector<8x128xf32>
    %2229 = arith.addf %2177, %2228 : vector<8x128xf32>
    %c8_1422 = arith.constant 8 : index
    %2230 = memref.load %arg6[%c8_1422] : memref<9xf32, #tpu.memory_space<smem>>
    %c8_1423 = arith.constant 8 : index
    %2231 = memref.load %arg7[%c8_1423] : memref<9xf32, #tpu.memory_space<smem>>
    %c0_1424 = arith.constant 0 : index
    %c8_1425 = arith.constant 8 : index
    %c0_1426 = arith.constant 0 : index
    %c0_1427 = arith.constant 0 : index
    %2232 = vector.load %arg1[%c0_1424, %c8_1425, %c0_1426, %c0_1427] : memref<2x9x8x128xf32, #tpu.memory_space<vmem>>, vector<1x1x8x128xf32>
    %2233 = vector.shape_cast %2232 : vector<1x1x8x128xf32> to vector<8x128xf32>
    %c0_1428 = arith.constant 0 : index
    %c8_1429 = arith.constant 8 : index
    %c0_1430 = arith.constant 0 : index
    %c0_1431 = arith.constant 0 : index
    %2234 = vector.load %arg2[%c0_1428, %c8_1429, %c0_1430, %c0_1431] : memref<2x9x8x128xf32, #tpu.memory_space<vmem>>, vector<1x1x8x128xf32>
    %2235 = vector.shape_cast %2234 : vector<1x1x8x128xf32> to vector<8x128xf32>
    %2236 = arith.mulf %2233, %2233 : vector<8x128xf32>
    %2237 = arith.mulf %2235, %2235 : vector<8x128xf32>
    %2238 = arith.addf %2236, %2237 : vector<8x128xf32>
    %c1_1432 = arith.constant 1 : index
    %c8_1433 = arith.constant 8 : index
    %c0_1434 = arith.constant 0 : index
    %c0_1435 = arith.constant 0 : index
    %2239 = vector.load %arg1[%c1_1432, %c8_1433, %c0_1434, %c0_1435] : memref<2x9x8x128xf32, #tpu.memory_space<vmem>>, vector<1x1x8x128xf32>
    %2240 = vector.shape_cast %2239 : vector<1x1x8x128xf32> to vector<8x128xf32>
    %c1_1436 = arith.constant 1 : index
    %c8_1437 = arith.constant 8 : index
    %c0_1438 = arith.constant 0 : index
    %c0_1439 = arith.constant 0 : index
    %2241 = vector.load %arg2[%c1_1436, %c8_1437, %c0_1438, %c0_1439] : memref<2x9x8x128xf32, #tpu.memory_space<vmem>>, vector<1x1x8x128xf32>
    %2242 = vector.shape_cast %2241 : vector<1x1x8x128xf32> to vector<8x128xf32>
    %2243 = arith.mulf %2240, %2240 : vector<8x128xf32>
    %2244 = arith.mulf %2242, %2242 : vector<8x128xf32>
    %2245 = arith.addf %2243, %2244 : vector<8x128xf32>
    %cst_1440 = arith.constant 2.000000e+00 : f32
    %2246 = vector.broadcast %cst_1440 : f32 to vector<8x128xf32>
    %2247 = arith.mulf %2246, %2238 : vector<8x128xf32>
    %2248 = arith.addf %2247, %2245 : vector<8x128xf32>
    %2249 = vector.broadcast %2230 : f32 to vector<8x128xf32>
    %2250 = arith.mulf %2249, %2248 : vector<8x128xf32>
    %2251 = arith.addf %2199, %2250 : vector<8x128xf32>
    %2252 = arith.mulf %2233, %2240 : vector<8x128xf32>
    %2253 = arith.mulf %2235, %2242 : vector<8x128xf32>
    %2254 = arith.addf %2252, %2253 : vector<8x128xf32>
    %2255 = arith.mulf %2235, %2240 : vector<8x128xf32>
    %2256 = arith.mulf %2233, %2242 : vector<8x128xf32>
    %2257 = arith.subf %2255, %2256 : vector<8x128xf32>
    %2258 = vector.broadcast %2231 : f32 to vector<8x128xf32>
    %2259 = arith.mulf %2258, %2254 : vector<8x128xf32>
    %2260 = arith.addf %2208, %2259 : vector<8x128xf32>
    %2261 = vector.broadcast %2231 : f32 to vector<8x128xf32>
    %2262 = arith.mulf %2261, %2257 : vector<8x128xf32>
    %2263 = arith.addf %2211, %2262 : vector<8x128xf32>
    %cst_1441 = arith.constant 2.000000e+00 : f32
    %2264 = vector.broadcast %cst_1441 : f32 to vector<8x128xf32>
    %2265 = arith.mulf %2264, %2245 : vector<8x128xf32>
    %2266 = arith.addf %2265, %2238 : vector<8x128xf32>
    %2267 = vector.broadcast %2230 : f32 to vector<8x128xf32>
    %2268 = arith.mulf %2267, %2266 : vector<8x128xf32>
    %2269 = arith.addf %2217, %2268 : vector<8x128xf32>
    %2270 = arith.mulf %2240, %2233 : vector<8x128xf32>
    %2271 = arith.mulf %2242, %2235 : vector<8x128xf32>
    %2272 = arith.addf %2270, %2271 : vector<8x128xf32>
    %2273 = arith.mulf %2242, %2233 : vector<8x128xf32>
    %2274 = arith.mulf %2240, %2235 : vector<8x128xf32>
    %2275 = arith.subf %2273, %2274 : vector<8x128xf32>
    %2276 = vector.broadcast %2231 : f32 to vector<8x128xf32>
    %2277 = arith.mulf %2276, %2272 : vector<8x128xf32>
    %2278 = arith.addf %2226, %2277 : vector<8x128xf32>
    %2279 = vector.broadcast %2231 : f32 to vector<8x128xf32>
    %2280 = arith.mulf %2279, %2275 : vector<8x128xf32>
    %2281 = arith.addf %2229, %2280 : vector<8x128xf32>
    %2282 = arith.mulf %3, %3 : vector<8x128xf32>
    %2283 = arith.mulf %5, %5 : vector<8x128xf32>
    %2284 = arith.addf %2282, %2283 : vector<8x128xf32>
    %2285 = arith.addf %1, %2284 : vector<8x128xf32>
    %2286 = arith.mulf %7, %7 : vector<8x128xf32>
    %2287 = arith.mulf %9, %9 : vector<8x128xf32>
    %2288 = arith.addf %2286, %2287 : vector<8x128xf32>
    %2289 = arith.addf %2285, %2288 : vector<8x128xf32>
    %c0_1442 = arith.constant 0 : index
    %2290 = memref.load %arg8[%c0_1442] : memref<1xf32, #tpu.memory_space<smem>>
    %2291 = vector.broadcast %2290 : f32 to vector<8x128xf32>
    %2292 = arith.mulf %2291, %2289 : vector<8x128xf32>
    %cst_1443 = arith.constant 2.000000e+00 : f32
    %2293 = vector.broadcast %cst_1443 : f32 to vector<8x128xf32>
    %2294 = arith.mulf %2293, %2251 : vector<8x128xf32>
    %2295 = arith.addf %2292, %2294 : vector<8x128xf32>
    %2296 = arith.mulf %0, %2295 : vector<8x128xf32>
    %2297 = math.cos %2296 : vector<8x128xf32>
    %2298 = math.sin %2296 : vector<8x128xf32>
    %2299 = arith.mulf %7, %2263 : vector<8x128xf32>
    %2300 = arith.mulf %9, %2260 : vector<8x128xf32>
    %2301 = arith.addf %2299, %2300 : vector<8x128xf32>
    %cst_1444 = arith.constant 0.000000e+00 : f32
    %2302 = vector.broadcast %cst_1444 : f32 to vector<8x128xf32>
    %2303 = arith.subf %2302, %2301 : vector<8x128xf32>
    %2304 = arith.mulf %7, %2260 : vector<8x128xf32>
    %2305 = arith.mulf %9, %2263 : vector<8x128xf32>
    %2306 = arith.subf %2304, %2305 : vector<8x128xf32>
    %2307 = arith.mulf %3, %2297 : vector<8x128xf32>
    %2308 = arith.mulf %5, %2298 : vector<8x128xf32>
    %2309 = arith.subf %2307, %2308 : vector<8x128xf32>
    %2310 = arith.addf %1835, %2303 : vector<8x128xf32>
    %2311 = arith.mulf %0, %2310 : vector<8x128xf32>
    %2312 = arith.addf %2309, %2311 : vector<8x128xf32>
    %c0_1445 = arith.constant 0 : index
    %c0_1446 = arith.constant 0 : index
    %c0_1447 = arith.constant 0 : index
    %2313 = vector.load %arg9[%c0_1445, %c0_1446, %c0_1447] : memref<2x8x128xf32, #tpu.memory_space<vmem>>, vector<1x8x128xf32>
    %2314 = vector.shape_cast %2313 : vector<1x8x128xf32> to vector<8x128xf32>
    %2315 = vector.shape_cast %2312 : vector<8x128xf32> to vector<1x8x128xf32>
    tpu.vector_store %arg9[%c0_1445, %c0_1446, %c0_1447], %2315 {strides = array<i32>} : memref<2x8x128xf32, #tpu.memory_space<vmem>>, vector<1x8x128xf32>,
    %2316 = arith.mulf %3, %2298 : vector<8x128xf32>
    %2317 = arith.mulf %5, %2297 : vector<8x128xf32>
    %2318 = arith.addf %2316, %2317 : vector<8x128xf32>
    %2319 = arith.addf %1841, %2306 : vector<8x128xf32>
    %2320 = arith.mulf %0, %2319 : vector<8x128xf32>
    %2321 = arith.addf %2318, %2320 : vector<8x128xf32>
    %c0_1448 = arith.constant 0 : index
    %c0_1449 = arith.constant 0 : index
    %c0_1450 = arith.constant 0 : index
    %2322 = vector.load %arg10[%c0_1448, %c0_1449, %c0_1450] : memref<2x8x128xf32, #tpu.memory_space<vmem>>, vector<1x8x128xf32>
    %2323 = vector.shape_cast %2322 : vector<1x8x128xf32> to vector<8x128xf32>
    %2324 = vector.shape_cast %2321 : vector<8x128xf32> to vector<1x8x128xf32>
    tpu.vector_store %arg10[%c0_1448, %c0_1449, %c0_1450], %2324 {strides = array<i32>} : memref<2x8x128xf32, #tpu.memory_space<vmem>>, vector<1x8x128xf32>,
    %2325 = vector.broadcast %2290 : f32 to vector<8x128xf32>
    %2326 = arith.mulf %2325, %2289 : vector<8x128xf32>
    %cst_1451 = arith.constant 2.000000e+00 : f32
    %2327 = vector.broadcast %cst_1451 : f32 to vector<8x128xf32>
    %2328 = arith.mulf %2327, %2269 : vector<8x128xf32>
    %2329 = arith.addf %2326, %2328 : vector<8x128xf32>
    %2330 = arith.mulf %0, %2329 : vector<8x128xf32>
    %2331 = math.cos %2330 : vector<8x128xf32>
    %2332 = math.sin %2330 : vector<8x128xf32>
    %2333 = arith.mulf %3, %2281 : vector<8x128xf32>
    %2334 = arith.mulf %5, %2278 : vector<8x128xf32>
    %2335 = arith.addf %2333, %2334 : vector<8x128xf32>
    %cst_1452 = arith.constant 0.000000e+00 : f32
    %2336 = vector.broadcast %cst_1452 : f32 to vector<8x128xf32>
    %2337 = arith.subf %2336, %2335 : vector<8x128xf32>
    %2338 = arith.mulf %3, %2278 : vector<8x128xf32>
    %2339 = arith.mulf %5, %2281 : vector<8x128xf32>
    %2340 = arith.subf %2338, %2339 : vector<8x128xf32>
    %2341 = arith.mulf %7, %2331 : vector<8x128xf32>
    %2342 = arith.mulf %9, %2332 : vector<8x128xf32>
    %2343 = arith.subf %2341, %2342 : vector<8x128xf32>
    %2344 = arith.addf %1859, %2337 : vector<8x128xf32>
    %2345 = arith.mulf %0, %2344 : vector<8x128xf32>
    %2346 = arith.addf %2343, %2345 : vector<8x128xf32>
    %c1_1453 = arith.constant 1 : index
    %c0_1454 = arith.constant 0 : index
    %c0_1455 = arith.constant 0 : index
    %2347 = vector.load %arg9[%c1_1453, %c0_1454, %c0_1455] : memref<2x8x128xf32, #tpu.memory_space<vmem>>, vector<1x8x128xf32>
    %2348 = vector.shape_cast %2347 : vector<1x8x128xf32> to vector<8x128xf32>
    %2349 = vector.shape_cast %2346 : vector<8x128xf32> to vector<1x8x128xf32>
    tpu.vector_store %arg9[%c1_1453, %c0_1454, %c0_1455], %2349 {strides = array<i32>} : memref<2x8x128xf32, #tpu.memory_space<vmem>>, vector<1x8x128xf32>,
    %2350 = arith.mulf %7, %2332 : vector<8x128xf32>
    %2351 = arith.mulf %9, %2331 : vector<8x128xf32>
    %2352 = arith.addf %2350, %2351 : vector<8x128xf32>
    %2353 = arith.addf %1865, %2340 : vector<8x128xf32>
    %2354 = arith.mulf %0, %2353 : vector<8x128xf32>
    %2355 = arith.addf %2352, %2354 : vector<8x128xf32>
    %c1_1456 = arith.constant 1 : index
    %c0_1457 = arith.constant 0 : index
    %c0_1458 = arith.constant 0 : index
    %2356 = vector.load %arg10[%c1_1456, %c0_1457, %c0_1458] : memref<2x8x128xf32, #tpu.memory_space<vmem>>, vector<1x8x128xf32>
    %2357 = vector.shape_cast %2356 : vector<1x8x128xf32> to vector<8x128xf32>
    %2358 = vector.shape_cast %2355 : vector<8x128xf32> to vector<1x8x128xf32>
    tpu.vector_store %arg10[%c1_1456, %c0_1457, %c0_1458], %2358 {strides = array<i32>} : memref<2x8x128xf32, #tpu.memory_space<vmem>>, vector<1x8x128xf32>,
    return
  }
  func.func @transform_0(%arg0: i32) -> (i32, i32, i32, i32) {
    %c0_i32 = arith.constant 0 : i32
    %c0_i32_0 = arith.constant 0 : i32
    %c0_i32_1 = arith.constant 0 : i32
    %c0_i32_2 = arith.constant 0 : i32
    return %c0_i32, %c0_i32_0, %arg0, %c0_i32_1 : i32, i32, i32, i32
  }
  func.func @transform_1(%arg0: i32) -> (i32, i32, i32, i32) {
    %c0_i32 = arith.constant 0 : i32
    %c0_i32_0 = arith.constant 0 : i32
    %c0_i32_1 = arith.constant 0 : i32
    %c0_i32_2 = arith.constant 0 : i32
    return %c0_i32, %c0_i32_0, %arg0, %c0_i32_1 : i32, i32, i32, i32
  }
  func.func @transform_2(%arg0: i32) -> (i32, i32) {
    %c0_i32 = arith.constant 0 : i32
    %c0_i32_0 = arith.constant 0 : i32
    return %arg0, %c0_i32 : i32, i32
  }
  func.func @transform_3(%arg0: i32) -> (i32, i32) {
    %c0_i32 = arith.constant 0 : i32
    %c0_i32_0 = arith.constant 0 : i32
    %c0_i32_1 = arith.constant 0 : i32
    return %c0_i32, %c0_i32_0 : i32, i32
  }
  func.func @transform_4(%arg0: i32) -> (i32, i32) {
    %c0_i32 = arith.constant 0 : i32
    %c0_i32_0 = arith.constant 0 : i32
    %c0_i32_1 = arith.constant 0 : i32
    return %c0_i32, %c0_i32_0 : i32, i32
  }
  func.func @transform_5(%arg0: i32) -> i32 {
    %c0_i32 = arith.constant 0 : i32
    %c0_i32_0 = arith.constant 0 : i32
    return %c0_i32 : i32
  }
  func.func @transform_6(%arg0: i32) -> i32 {
    %c0_i32 = arith.constant 0 : i32
    %c0_i32_0 = arith.constant 0 : i32
    return %c0_i32 : i32
  }
  func.func @transform_7(%arg0: i32) -> i32 {
    %c0_i32 = arith.constant 0 : i32
    %c0_i32_0 = arith.constant 0 : i32
    return %c0_i32 : i32
  }
  func.func @transform_8(%arg0: i32) -> (i32, i32, i32) {
    %c0_i32 = arith.constant 0 : i32
    %c0_i32_0 = arith.constant 0 : i32
    %c0_i32_1 = arith.constant 0 : i32
    return %c0_i32, %arg0, %c0_i32_0 : i32, i32, i32
  }
  func.func @transform_9(%arg0: i32) -> (i32, i32, i32) {
    %c0_i32 = arith.constant 0 : i32
    %c0_i32_0 = arith.constant 0 : i32
    %c0_i32_1 = arith.constant 0 : i32
    return %c0_i32, %arg0, %c0_i32_0 : i32, i32, i32
  }
}

</mosaic_0001>

<bundles_post_ra>
// kernel: tpu_custom_call.1
= control target key start
LH: loop header
LB: loop body
LE: loop exit
PB: predicated region body
PF: predicated region fallthrough
CT: control target
= control target key end

     0   :  { %16 = vsyncpa [#allocation4], 0  ;;  %s4448_s0 = inlined_call_operand.hbm [shape: f32[2,9,8,128], index: 0, kind: input, shape index: {}]   ;;  %s4449_s1 = inlined_call_operand.hbm [shape: f32[2,9,8,128], index: 1, kind: input, shape index: {}]   ;;  %s4450_s2 = inlined_call_operand.vmem [shape: f32[8,128], index: 2, kind: input, shape index: {}]   ;;  %s4451_s3 = inlined_call_operand.vmem [shape: f32[2,16], index: 3, kind: input, shape index: {}]   ;;  %s4452_s4 = inlined_call_operand.vmem [shape: f32[2,16], index: 4, kind: input, shape index: {}]   ;;  %s4453_s5 = inlined_call_operand.vmem [shape: f32[9], index: 5, kind: input, shape index: {}]   ;;  %s4454_s6 = inlined_call_operand.vmem [shape: f32[9], index: 6, kind: input, shape index: {}]   ;;  %s4455_s7 = inlined_call_operand.<no memory space> [shape: f32[1], index: 7, kind: input, shape index: {}]   ;;  %s4456_s8 = inlined_call_operand.hbm [shape: f32[2,8,128], index: 8, kind: output, shape index: {0}]   ;;  %s4457_s9 = inlined_call_operand.hbm [shape: f32[2,8,128], index: 9, kind: output, shape index: {1}]  }
   0x1   :  { %17 = vsyncpa [#allocation8], 0 }
   0x2   :  { %18 = vsyncpa [#allocation6], 0 }
   0x3   :  { %19 = vsyncpa [#allocation11], 0 }
   0x4   :  { %20 = vsyncpa [#allocation14], 0 }
   0x5   :  { %21 = vsyncpa [#allocation5], 0  ;;  %s65_s11 = sshll.u32 %s4452_s4, 4  ;;  %s66_s11 = int_to_ptr.vmem [resolvable:$true] %s65_s11 }
   0x6   :  { %22 = vsyncpa [#allocation17], 0  ;;  %s2241_s12 = scalar_lea.vmem %s66_s11, 32  ;;  %p2246_p1 = scmp.lt.s32.totalorder %s66_s11, %s66_s11 }
   0x7   :  { %p2242_p0 = scmp.ne.s32.totalorder %s66_s11, %s2241_s12  ;;  %p2247_p2 = scmp.lt.s32.totalorder %s2241_s12, %s2241_s12 }
   0x9   :  { %p2248_p3 = por %p2247_p2, %p2246_p1 }
   0xb   :  { %p2249_p4 = pnand %p2248_p3, %p2242_p0 }
   0xd   :  { %2252 = shalt.err (!%p2249_p4)
}
   0xe   :  { %s2391_s13 = smov [#allocation10]   ;;  %s2392_s14 = smov [#allocation3]  }
   0xf   :  { %68 = dma.vmem_to_smem %s66_s11, 32, %s2391_s13, [#allocation11]  }
  0x10   :  { %s28_s15 = sshll.u32 %s2392_s14, 4  ;;  %s2253_s18 = scalar_lea.hbm %s4448_s0, 2304  ;;  %s29_s15 = int_to_ptr.vmem [resolvable:$true] %s28_s15 }
  0x11   :  { %p2254_p5 = scmp.ne.s32.totalorder %s4448_s0, %s2253_s18  ;;  %p2257_p6 = scmp.lt.u32.totalorder %s2253_s18, %s4448_s0 }
  0x13   :  { %p2259_p7 = pnand %p2257_p6, %p2254_p5 }
  0x15   :  { %2262 = shalt.err (!%p2259_p7)
}
  0x16   :  { %s2263_s22 = scalar_lea.vmem %s29_s15, 2304  ;;  %p2268_p9 = scmp.lt.s32.totalorder %s29_s15, %s29_s15 }
  0x17   :  { %p2264_p8 = scmp.ne.s32.totalorder %s29_s15, %s2263_s22  ;;  %p2269_p10 = scmp.lt.s32.totalorder %s2263_s22, %s2263_s22 }
  0x19   :  { %p2270_p11 = por %p2269_p10, %p2268_p9 }
  0x1b   :  { %p2271_p12 = pnand %p2270_p11, %p2264_p8 }
  0x1d   :  { %2274 = shalt.err (!%p2271_p12)
}
  0x1e   :  { %s2393_s23 = smov 128   ;;  %s2394_s24 = smov 8  }
  0x1f   :  { %34 = dma.hbm_to_vmem [thread:$0]  %s4448_s0, 2304, %s29_s15, [#allocation4], %s2393_s23, %s2393_s23, %s2394_s24  }
  0x20   :  { %s55_s29 = sshll.u32 %s4451_s3, 4  ;;  %s2395_s30 = smov [#allocation7]   ;;  %s56_s29 = int_to_ptr.vmem [resolvable:$true] %s55_s29 }
  0x21   :  { %s40_s10 = sshll.u32 %s2395_s30, 4  ;;  %s2275_s13 = scalar_lea.hbm %s4449_s1, 2304  ;;  %s41_s10 = int_to_ptr.vmem [resolvable:$true] %s40_s10 }
  0x22   :  { %p2276_p13 = scmp.ne.s32.totalorder %s4449_s1, %s2275_s13  ;;  %p2279_p0 = scmp.lt.u32.totalorder %s2275_s13, %s4449_s1 }
  0x24   :  { %p2281_p1 = pnand %p2279_p0, %p2276_p13 }
  0x26   :  { %2284 = shalt.err (!%p2281_p1)
}
  0x27   :  { %s2285_s0 = scalar_lea.vmem %s41_s10, 2304  ;;  %p2290_p3 = scmp.lt.s32.totalorder %s41_s10, %s41_s10 }
  0x28   :  { %p2286_p2 = scmp.ne.s32.totalorder %s41_s10, %s2285_s0  ;;  %p2291_p4 = scmp.lt.s32.totalorder %s2285_s0, %s2285_s0 }
  0x2a   :  { %p2292_p5 = por %p2291_p4, %p2290_p3 }
  0x2c   :  { %p2293_p6 = pnand %p2292_p5, %p2286_p2 }
  0x2e   :  { %2296 = shalt.err (!%p2293_p6)
}
  0x2f   :  { %46 = dma.hbm_to_vmem [thread:$0]  %s4449_s1, 2304, %s41_s10, [#allocation8], %s2393_s23, %s2393_s23, %s2394_s24  }
  0x30   :  { %s2297_s19 = scalar_lea.vmem %s56_s29, 32  ;;  %p2302_p8 = scmp.lt.s32.totalorder %s56_s29, %s56_s29 }
  0x31   :  { %p2298_p7 = scmp.ne.s32.totalorder %s56_s29, %s2297_s19  ;;  %p2303_p9 = scmp.lt.s32.totalorder %s2297_s19, %s2297_s19 }
  0x33   :  { %p2304_p10 = por %p2303_p9, %p2302_p8 }
  0x35   :  { %p2305_p11 = pnand %p2304_p10, %p2298_p7 }
  0x37   :  { %2308 = shalt.err (!%p2305_p11)
}
  0x38   :  { %s2396_s4 = smov [#allocation9]   ;;  %s75_s22 = sshll.u32 %s4453_s5, 4  ;;  %s76_s22 = int_to_ptr.vmem [resolvable:$true] %s75_s22 }
  0x39   :  { %58 = dma.vmem_to_smem %s56_s29, 32, %s2396_s4, [#allocation6]  }
  0x3a   :  { %s85_s27 = sshll.u32 %s4454_s6, 4  ;;  %s2309_s28 = scalar_lea.vmem %s76_s22, 16  ;;  %s86_s27 = int_to_ptr.vmem [resolvable:$true] %s85_s27 }
  0x3b   :  { %p2310_p12 = scmp.ne.s32.totalorder %s76_s22, %s2309_s28  ;;  %p2314_p13 = scmp.lt.s32.totalorder %s76_s22, %s76_s22 }
  0x3c   :  { %p2315_p0 = scmp.lt.s32.totalorder %s2309_s28, %s2309_s28 }
  0x3e   :  { %p2316_p1 = por %p2315_p0, %p2314_p13 }
  0x40   :  { %p2317_p2 = pnand %p2316_p1, %p2310_p12 }
  0x42   :  { %2320 = shalt.err (!%p2317_p2)
}
  0x43   :  { %s2397_s1 = smov [#allocation12]   ;;  %s2321_s29 = scalar_lea.vmem %s86_s27, 16 }
  0x44   :  { %78 = dma.vmem_to_smem %s76_s22, 16, %s2397_s1, [#allocation11]  }
  0x45   :  { %p2322_p3 = scmp.ne.s32.totalorder %s86_s27, %s2321_s29  ;;  %p2326_p4 = scmp.lt.s32.totalorder %s86_s27, %s86_s27 }
  0x46   :  { %p2327_p5 = scmp.lt.s32.totalorder %s2321_s29, %s2321_s29 }
  0x48   :  { %p2328_p6 = por %p2327_p5, %p2326_p4 }
  0x4a   :  { %p2329_p7 = pnand %p2328_p6, %p2322_p3 }
  0x4c   :  { %2332 = shalt.err (!%p2329_p7)
}
  0x4d   :  { %s2398_s5 = smov [#allocation13]  }
  0x4e   :  { %88 = dma.vmem_to_smem %s86_s27, 16, %s2398_s5, [#allocation14]  }
  0x4f   :  { %2377 = dma.done.wait [#allocation4], 2304  }
  0x50   :  { %2378 = vsyncadd [#allocation4], 4294964992 }
  0x51   :  { %2379 = dma.done.wait [#allocation8], 2304  }
  0x52   :  { %2380 = vsyncadd [#allocation8], 4294964992 }
  0x53   :  { %2381 = dma.done.wait [#allocation6], 32  }
  0x54   :  { %2382 = vsyncadd [#allocation6], 4294967264 }
  0x55   :  { %2383 = dma.done.wait [#allocation11], 48  }
  0x56   :  { %2384 = vsyncadd [#allocation11], 4294967248 }
  0x57   :  { %2385 = dma.done.wait [#allocation14], 16  }
  0x58   :  { %2386 = vsyncadd [#allocation14], 4294967280 }
  0x59   :  { %109 = sfence }
  0x5a   :  { %v2499_v0 = vld [vmem:[#allocation3 + $0x28] sm:$0xff]  ;;  %v2501_v1 = vld [vmem:[#allocation7 + $0x28] sm:$0xff]  ;;  %v2515_v8 = vld [vmem:[#allocation3] sm:$0xff]  ;;  %s2588_s6 = sld [smem:[#allocation9]]  ;;  %s2677_s12 = sld [smem:[#allocation9 + $0x1]] }
  0x5b   :  { %4581 = vst [vmem:[#allocation25_spill] sm:$0xff] %v2499_v0  ;;  %4582 = vst [vmem:[#allocation26_spill] sm:$0xff] %v2501_v1  ;;  %v2503_v2 = vld [vmem:[#allocation3 + $0x8] sm:$0xff]  ;;  %v2505_v3 = vld [vmem:[#allocation7 + $0x8] sm:$0xff]  ;;  %s2595_s30 = sld [smem:[#allocation10]]  ;;  %s2704_s13 = sld [smem:[#allocation10 + $0x1]] }
  0x5c   :  { %v127_v4 = vmul.f32 %v2503_v2, %v2499_v0  ;;  %v128_v5 = vmul.f32 %v2505_v3, %v2501_v1  ;;  %v131_v6 = vmul.f32 %v2503_v2, %v2501_v1  ;;  %v132_v7 = vmul.f32 %v2505_v3, %v2499_v0  ;;  %v2517_v9 = vld [vmem:[#allocation7] sm:$0xff]  ;;  %v2533_v15 = vld [vmem:[#allocation7 + $0x70] sm:$0xff]  ;;  %v2547_v22 = vld [vmem:[#allocation3 + $0x48] sm:$0xff]  ;;  %s2614_s10 = sld [smem:[#allocation9 + $0x80]]  ;;  %s2708_s14 = sld [smem:[#allocation9 + $0x81]] }
  0x5d   :  { %v2519_v10 = vld [vmem:[#allocation3 + $0x70] sm:$0xff]  ;;  %v137_v11 = vmul.f32 %v2515_v8, %v2503_v2  ;;  %v138_v12 = vmul.f32 %v2517_v9, %v2505_v3  ;;  %v2527_v13 = vmul.f32 %v2517_v9, %v2503_v2  ;;  %v2531_v14 = vmul.f32 %v2515_v8, %v2505_v3  ;;  %4584 = vst [vmem:[#allocation28_spill] sm:$0xff] %v2533_v15  ;;  %v2537_v17 = vld [vmem:[#allocation7 + $0x50] sm:$0xff]  ;;  %v2549_v23 = vld [vmem:[#allocation7 + $0x48] sm:$0xff]  ;;  %s2616_s11 = sld [smem:[#allocation10 + $0x80]]  ;;  %s2710_s16 = sld [smem:[#allocation10 + $0x81]] }
  0x5e   :  { %4583 = vst [vmem:[#allocation27_spill] sm:$0xff] %v2519_v10  ;;  %v2535_v16 = vld [vmem:[#allocation3 + $0x50] sm:$0xff]  ;;  %v154_v19 = vmul.f32 %v2537_v17, %v2533_v15  ;;  %v158_v21 = vmul.f32 %v2537_v17, %v2519_v10  ;;  %4585 = vst [vmem:[#allocation29_spill] sm:$0xff] %v2547_v22  ;;  %v166_v25 = vmul.f32 %v2549_v23, %v2537_v17  ;;  %v2569_v40 = vld [vmem:[#allocation3 + $0x18] sm:$0xff]  ;;  %s2752_s17 = sld [smem:[#allocation9 + $0x2]]  ;;  %s2799_s15 = sld [smem:[#allocation9 + $0x3]] }
  0x5f   :  { %v153_v18 = vmul.f32 %v2535_v16, %v2519_v10  ;;  %v157_v20 = vmul.f32 %v2535_v16, %v2533_v15  ;;  %4586 = vst [vmem:[#allocation30_spill] sm:$0xff] %v2549_v23  ;;  %v165_v24 = vmul.f32 %v2547_v22, %v2535_v16  ;;  %v2557_v26 = vmul.f32 %v2549_v23, %v2535_v16  ;;  %v2571_v41 = vld [vmem:[#allocation7 + $0x18] sm:$0xff]  ;;  %v2591_v54 = vld [vmem:[#allocation3 + $0x60] sm:$0xff]  ;;  %v2593_v55 = vld [vmem:[#allocation7 + $0x60] sm:$0xff]  ;;  %s2754_s18 = sld [smem:[#allocation10 + $0x2]]  ;;  %s2801_s19 = sld [smem:[#allocation10 + $0x3]] }
  0x60   :  { %v2561_v27 = vmul.f32 %v2547_v22, %v2537_v17  ;;  %v129_v28 = vadd.f32 %v128_v5, %v127_v4  ;;  %v133_v29 = vsub.f32 %v131_v6, %v132_v7  ;;  %v139_v30 = vadd.f32 %v138_v12, %v137_v11  ;;  %4587 = vst [vmem:[#allocation31_spill] sm:$0xff] %v2569_v40  ;;  %s2761_s0 = sld [smem:[#allocation9 + $0x82]]  ;;  %s2803_s4 = sld [smem:[#allocation9 + $0x83]] }
  0x61   :  { %v155_v31 = vadd.f32 %v154_v19, %v153_v18  ;;  %v143_v32 = vsub.f32 %v2527_v13, %v2531_v14  ;;  %v159_v33 = vsub.f32 %v157_v20, %v158_v21  ;;  %v167_v34 = vadd.f32 %v166_v25, %v165_v24  ;;  %4588 = vst [vmem:[#allocation32_spill] sm:$0xff] %v2571_v41  ;;  %s2763_s3 = sld [smem:[#allocation10 + $0x82]]  ;;  %s2805_s20 = sld [smem:[#allocation10 + $0x83]] }
  0x62   :  { %v171_v35 = vsub.f32 %v2557_v26, %v2561_v27  ;;  %v229_v44 = vmul.f32 %v2569_v40, %v2515_v8  ;;  %v230_v45 = vmul.f32 %v2571_v41, %v2517_v9  ;;  %4589 = vst [vmem:[#allocation33_spill] sm:$0xff] %v2591_v54  ;;  %4590 = vst [vmem:[#allocation34_spill] sm:$0xff] %v2593_v55  ;;  %s2836_s21 = sld [smem:[#allocation9 + $0x4]]  ;;  %s3051_s27 = sld [smem:[#allocation9 + $0x5]] }
  0x63   :  { %v156_v36 = vadd.f32 %v155_v31, %v129_v28  ;;  %v160_v37 = vadd.f32 %v159_v33, %v133_v29  ;;  %v2567_v38 = vadd.f32 %v167_v34, %v139_v30  ;;  %v243_v58 = vmul.f32 %v2591_v54, %v2547_v22  ;;  %s2838_s22 = sld [smem:[#allocation10 + $0x4]]  ;;  %s3056_s28 = sld [smem:[#allocation10 + $0x5]] }
  0x64   :  { %v172_v39 = vadd.f32 %v171_v35, %v143_v32  ;;  %v244_v59 = vmul.f32 %v2593_v55, %v2549_v23  ;;  %v233_v60 = vmul.f32 %v2571_v41, %v2515_v8  ;;  %v234_v61 = vmul.f32 %v2569_v40, %v2517_v9  ;;  %s2887_s25 = sld [smem:[#allocation9 + $0x84]]  ;;  %s3061_s1 = sld [smem:[#allocation9 + $0x85]] }
  0x65   :  { %v173_v42 = vmul.f32 %v156_v36, %v2515_v8  ;;  %v176_v43 = vmul.f32 %v156_v36, %v2517_v9  ;;  %v174_v46 = vmul.f32 %v160_v37, %v2517_v9  ;;  %v179_v47 = vmul.f32 %v2567_v38, %v2499_v0  ;;  %s2889_s26 = sld [smem:[#allocation10 + $0x84]]  ;;  %s3073_s29 = sld [smem:[#allocation10 + $0x85]] }
  0x66   :  { %v180_v48 = vmul.f32 %v172_v39, %v2501_v1  ;;  %v199_v49 = vmul.f32 %v2547_v22, %v156_v36  ;;  %v177_v50 = vmul.f32 %v160_v37, %v2515_v8  ;;  %v183_v51 = vmul.f32 %v2567_v38, %v2501_v1  ;;  %s3101_s5 = sld [smem:[#allocation9 + $0x6]] }
  0x67   :  { %v184_v52 = vmul.f32 %v172_v39, %v2499_v0  ;;  %v200_v53 = vmul.f32 %v2549_v23, %v160_v37  ;;  %v202_v56 = vmul.f32 %v2549_v23, %v156_v36  ;;  %v203_v57 = vmul.f32 %v2547_v22, %v160_v37 }
  0x68   :  { %v247_v62 = vmul.f32 %v2593_v55, %v2547_v22  ;;  %v248_v63 = vmul.f32 %v2591_v54, %v2549_v23  ;;  %v175_v4 = vsub.f32 %v173_v42, %v174_v46  ;;  %v181_v5 = vsub.f32 %v179_v47, %v180_v48 }
  0x69   :  { %v205_v6 = vmul.f32 %v2567_v38, %v2519_v10  ;;  %v206_v7 = vmul.f32 %v172_v39, %v2533_v15  ;;  %v178_v11 = vadd.f32 %v177_v50, %v176_v43  ;;  %v185_v12 = vadd.f32 %v184_v52, %v183_v51 }
  0x6a   :  { %v209_v18 = vmul.f32 %v2567_v38, %v2533_v15  ;;  %v210_v19 = vmul.f32 %v172_v39, %v2519_v10  ;;  %v231_v20 = vadd.f32 %v230_v45, %v229_v44  ;;  %v245_v21 = vadd.f32 %v244_v59, %v243_v58  ;;  %v2649_v58 = vld [vmem:[#allocation3 + $0x10] sm:$0xff]  ;;  %v2651_v59 = vld [vmem:[#allocation7 + $0x10] sm:$0xff] }
  0x6b   :  { %v235_v24 = vsub.f32 %v233_v60, %v234_v61  ;;  %v237_v25 = vsub.f32 %v2531_v14, %v2527_v13  ;;  %v249_v28 = vsub.f32 %v247_v62, %v248_v63  ;;  %v251_v29 = vsub.f32 %v2561_v27, %v2557_v26 }
  0x6c   :  { %v182_v30 = vadd.f32 %v181_v5, %v175_v4  ;;  %v201_v31 = vsub.f32 %v199_v49, %v200_v53  ;;  %v207_v32 = vsub.f32 %v205_v6, %v206_v7  ;;  %v186_v33 = vadd.f32 %v185_v12, %v178_v11  ;;  %v2673_v11 = vld [vmem:[#allocation3 + $0x58] sm:$0xff]  ;;  %v2675_v12 = vld [vmem:[#allocation7 + $0x58] sm:$0xff] }
  0x6d   :  { %v189_v34 = vstv %s2588_s6  ;;  %v204_v35 = vadd.f32 %v203_v57, %v202_v56  ;;  %v211_v36 = vadd.f32 %v210_v19, %v209_v18  ;;  %v191_v37 = vstv %s2595_s30  ;;  %4591 = vst [vmem:[#allocation35_spill] sm:$0xff] %v2673_v11  ;;  %4592 = vst [vmem:[#allocation36_spill] sm:$0xff] %v2675_v12  ;;  %s3103_s6 = sld [smem:[#allocation10 + $0x6]] }
  0x6e   :  { %v246_v39 = vadd.f32 %v245_v21, %v231_v20  ;;  %v250_v42 = vadd.f32 %v249_v28, %v235_v24  ;;  %v252_v43 = vadd.f32 %v251_v29, %v237_v25  ;;  %v2627_v44 = vmul.f32 %v189_v34, %v182_v30  ;;  %s3110_s30 = sld [smem:[#allocation9 + $0x86]] }
  0x6f   :  { %v208_v13 = vadd.f32 %v207_v32, %v201_v31  ;;  %v215_v14 = vstv %s2614_s10  ;;  %v217_v45 = vstv %s2616_s11  ;;  %v2631_v46 = vmul.f32 %v191_v37, %v186_v33  ;;  %s3112_s10 = sld [smem:[#allocation10 + $0x86]]  ;;  %s3148_s11 = sld [smem:[#allocation9 + $0x7]] }
  0x70   :  { %v2633_v47 = vmul.f32 %v189_v34, %v186_v33  ;;  %v2635_v26 = vmul.f32 %v191_v37, %v182_v30  ;;  %v212_v27 = vadd.f32 %v211_v36, %v204_v35  ;;  %v253_v48 = vmul.f32 %v246_v39, %v2503_v2 }
  0x71   :  { %v256_v49 = vmul.f32 %v246_v39, %v2505_v3  ;;  %v259_v50 = vmul.f32 %v2569_v40, %v2567_v38  ;;  %v263_v51 = vmul.f32 %v2571_v41, %v2567_v38  ;;  %v254_v52 = vmul.f32 %v250_v42, %v2505_v3 }
  0x72   :  { %v260_v53 = vmul.f32 %v252_v43, %v2571_v41  ;;  %v264_v56 = vmul.f32 %v252_v43, %v2569_v40  ;;  %v2647_v57 = vmul.f32 %v246_v39, %v2535_v16  ;;  %v309_v60 = vmul.f32 %v2649_v58, %v2499_v0 }
  0x73   :  { %v310_v61 = vmul.f32 %v2651_v59, %v2501_v1  ;;  %v313_v62 = vmul.f32 %v2649_v58, %v2501_v1  ;;  %v314_v63 = vmul.f32 %v2651_v59, %v2499_v0  ;;  %v317_v4 = vmul.f32 %v2649_v58, %v2503_v2 }
  0x74   :  { %v318_v5 = vmul.f32 %v2651_v59, %v2505_v3  ;;  %v2667_v6 = vmul.f32 %v2649_v58, %v2505_v3  ;;  %v2671_v7 = vmul.f32 %v2651_v59, %v2503_v2  ;;  %v329_v18 = vmul.f32 %v2673_v11, %v2519_v10 }
  0x75   :  { %v330_v19 = vmul.f32 %v2675_v12, %v2533_v15  ;;  %v333_v20 = vmul.f32 %v2673_v11, %v2533_v15  ;;  %v334_v21 = vmul.f32 %v2675_v12, %v2519_v10  ;;  %v337_v24 = vmul.f32 %v2673_v11, %v2535_v16 }
  0x76   :  { %v338_v25 = vmul.f32 %v2675_v12, %v2537_v17  ;;  %v2693_v28 = vmul.f32 %v2673_v11, %v2537_v17  ;;  %v2697_v29 = vmul.f32 %v2675_v12, %v2535_v16  ;;  %v257_v30 = vmul.f32 %v250_v42, %v2503_v2 }
  0x77   :  { %v280_v31 = vmul.f32 %v250_v42, %v2537_v17  ;;  %v282_v32 = vmul.f32 %v246_v39, %v2537_v17  ;;  %v285_v33 = vmul.f32 %v2591_v54, %v2567_v38  ;;  %v255_v34 = vsub.f32 %v253_v48, %v254_v52 }
  0x78   :  { %v261_v35 = vsub.f32 %v259_v50, %v260_v53  ;;  %v283_v36 = vmul.f32 %v250_v42, %v2535_v16  ;;  %v286_v37 = vmul.f32 %v252_v43, %v2593_v55  ;;  %v311_v41 = vadd.f32 %v310_v61, %v309_v60 }
  0x79   :  { %v315_v40 = vsub.f32 %v313_v62, %v314_v63  ;;  %v319_v12 = vadd.f32 %v318_v5, %v317_v4  ;;  %v323_v39 = vsub.f32 %v2667_v6, %v2671_v7  ;;  %v331_v23 = vadd.f32 %v330_v19, %v329_v18 }
  0x7a   :  { %v335_v48 = vsub.f32 %v333_v20, %v334_v21  ;;  %v339_v50 = vadd.f32 %v338_v25, %v337_v24  ;;  %v343_v52 = vsub.f32 %v2693_v28, %v2697_v29  ;;  %v258_v42 = vadd.f32 %v257_v30, %v256_v49 }
  0x7b   :  { %v265_v53 = vadd.f32 %v264_v56, %v263_v51  ;;  %v289_v11 = vmul.f32 %v2593_v55, %v2567_v38  ;;  %v290_v22 = vmul.f32 %v252_v43, %v2591_v54  ;;  %v2719_v60 = vmul.f32 %v215_v14, %v208_v13 }
  0x7c   :  { %v2721_v61 = vmul.f32 %v217_v45, %v212_v27  ;;  %v221_v62 = vmul.f32 %v215_v14, %v212_v27  ;;  %v222_v63 = vmul.f32 %v217_v45, %v208_v13  ;;  %v262_v4 = vadd.f32 %v261_v35, %v255_v34 }
  0x7d   :  { %v269_v5 = vstv %s2677_s12  ;;  %v281_v18 = vsub.f32 %v2647_v57, %v280_v31  ;;  %v287_v19 = vsub.f32 %v285_v33, %v286_v37  ;;  %v332_v49 = vadd.f32 %v331_v23, %v311_v41  ;;  %s3150_s12 = sld [smem:[#allocation10 + $0x7]] }
  0x7e   :  { %v336_v51 = vadd.f32 %v335_v48, %v315_v40  ;;  %v2725_v56 = vadd.f32 %v339_v50, %v319_v12  ;;  %v344_v38 = vadd.f32 %v343_v52, %v323_v39  ;;  %v266_v20 = vadd.f32 %v265_v53, %v258_v42 }
  0x7f   :  { %v284_v21 = vadd.f32 %v283_v36, %v282_v32  ;;  %v291_v14 = vadd.f32 %v290_v22, %v289_v11  ;;  %v2731_v13 = vadd.f32 %v2635_v26, %v2633_v47  ;;  %v2735_v27 = vadd.f32 %v222_v63, %v221_v62 }
  0x80   :  { %4593 = vst [vmem:[#allocation37_spill] sm:$0xff] %v2725_v56  ;;  %v271_v23 = vstv %s2704_s13  ;;  %v2738_v40 = vmul.f32 %v269_v5, %v262_v4  ;;  %v288_v41 = vadd.f32 %v287_v19, %v281_v18  ;;  %v295_v57 = vstv %s2708_s14  ;;  %s3168_s13 = sld [smem:[#allocation9 + $0x87]] }
  0x81   :  { %v297_v12 = vstv %s2710_s16  ;;  %v345_v24 = vmul.f32 %v332_v49, %v2503_v2  ;;  %v346_v25 = vmul.f32 %v336_v51, %v2505_v3  ;;  %v351_v22 = vmul.f32 %v2725_v56, %v2499_v0  ;;  %s3170_s14 = sld [smem:[#allocation10 + $0x87]]  ;;  %s3232_s16 = sld [smem:[#allocation9 + $0x8]] }
  0x82   :  { %v352_v47 = vmul.f32 %v344_v38, %v2501_v1  ;;  %v272_v26 = vmul.f32 %v271_v23, %v266_v20  ;;  %v275_v11 = vmul.f32 %v269_v5, %v266_v20  ;;  %v276_v30 = vmul.f32 %v271_v23, %v262_v4 }
  0x83   :  { %v292_v31 = vadd.f32 %v291_v14, %v284_v21  ;;  %v348_v32 = vmul.f32 %v332_v49, %v2505_v3  ;;  %v349_v33 = vmul.f32 %v336_v51, %v2503_v2  ;;  %v355_v34 = vmul.f32 %v2725_v56, %v2501_v1 }
  0x84   :  { %v356_v35 = vmul.f32 %v344_v38, %v2499_v0  ;;  %v371_v36 = vmul.f32 %v332_v49, %v2535_v16  ;;  %v372_v37 = vmul.f32 %v336_v51, %v2537_v17  ;;  %v377_v39 = vmul.f32 %v2725_v56, %v2519_v10 }
  0x85   :  { %v378_v48 = vmul.f32 %v344_v38, %v2533_v15  ;;  %v296_v50 = vmul.f32 %v295_v57, %v288_v41  ;;  %v302_v52 = vmul.f32 %v297_v12, %v288_v41  ;;  %v347_v42 = vsub.f32 %v345_v24, %v346_v25 }
  0x86   :  { %v353_v53 = vsub.f32 %v351_v22, %v352_v47  ;;  %v273_v62 = vsub.f32 %v2738_v40, %v272_v26  ;;  %v298_v63 = vmul.f32 %v297_v12, %v292_v31  ;;  %v374_v4 = vmul.f32 %v332_v49, %v2537_v17  ;;  %v4596_v22 = vld [vmem:[#allocation30_spill] sm:$0xff]  ;;  %v4597_v47 = vld [vmem:[#allocation36_spill] sm:$0xff] }
  0x87   :  { %v375_v5 = vmul.f32 %v336_v51, %v2535_v16  ;;  %v350_v18 = vadd.f32 %v349_v33, %v348_v32  ;;  %v357_v19 = vadd.f32 %v356_v35, %v355_v34  ;;  %v381_v20 = vmul.f32 %v2725_v56, %v2533_v15 }
  0x88   :  { %v382_v21 = vmul.f32 %v344_v38, %v2519_v10  ;;  %v301_v14 = vmul.f32 %v295_v57, %v292_v31  ;;  %v373_v23 = vsub.f32 %v371_v36, %v372_v37  ;;  %v379_v41 = vsub.f32 %v377_v39, %v378_v48  ;;  %v4594_v38 = vld [vmem:[#allocation29_spill] sm:$0xff]  ;;  %v4595_v57 = vld [vmem:[#allocation35_spill] sm:$0xff] }
  0x89   :  { %v397_v24 = vmul.f32 %v2649_v58, %v2515_v8  ;;  %v354_v40 = vadd.f32 %v353_v53, %v347_v42  ;;  %v398_v49 = vmul.f32 %v2651_v59, %v2517_v9  ;;  %v401_v51 = vmul.f32 %v2651_v59, %v2515_v8 }
  0x8a   :  { %v402_v12 = vmul.f32 %v2649_v58, %v2517_v9  ;;  %v405_v25 = vmul.f32 %v4595_v57, %v4594_v38  ;;  %v406_v26 = vmul.f32 %v4597_v47, %v4596_v22  ;;  %v409_v31 = vmul.f32 %v4597_v47, %v4594_v38 }
  0x8b   :  { %v410_v32 = vmul.f32 %v4595_v57, %v4596_v22  ;;  %v358_v33 = vadd.f32 %v357_v19, %v350_v18  ;;  %v361_v34 = vstv %s2752_s17  ;;  %v376_v35 = vadd.f32 %v375_v5, %v374_v4  ;;  %s3234_s17 = sld [smem:[#allocation10 + $0x8]] }
  0x8c   :  { %v383_v8 = vadd.f32 %v382_v21, %v381_v20  ;;  %v277_v36 = vadd.f32 %v276_v30, %v275_v11  ;;  %v299_v37 = vsub.f32 %v296_v50, %v298_v63  ;;  %v303_v39 = vadd.f32 %v302_v52, %v301_v14 }
  0x8d   :  { %v363_v9 = vstv %s2754_s18  ;;  %v380_v48 = vadd.f32 %v379_v41, %v373_v23  ;;  %v387_v42 = vstv %s2761_s0  ;;  %v389_v53 = vstv %s2763_s3  ;;  %s3244_s18 = sld [smem:[#allocation9 + $0x88]]  ;;  %s3292_s3 = sld [smem:[#allocation9 + $0x9]] }
  0x8e   :  { %v399_v45 = vadd.f32 %v398_v49, %v397_v24  ;;  %v362_v43 = vmul.f32 %v361_v34, %v354_v40  ;;  %v403_v15 = vsub.f32 %v401_v51, %v402_v12  ;;  %v407_v10 = vadd.f32 %v406_v26, %v405_v25  ;;  %s3270_s0 = sld [smem:[#allocation10 + $0x88]] }
  0x8f   :  { %v411_v1 = vsub.f32 %v409_v31, %v410_v32  ;;  %v364_v38 = vmul.f32 %v363_v9, %v358_v33  ;;  %v367_v0 = vmul.f32 %v361_v34, %v358_v33  ;;  %v368_v56 = vmul.f32 %v363_v9, %v354_v40 }
  0x90   :  { %v384_v22 = vadd.f32 %v383_v8, %v376_v35  ;;  %v4598_v4 = vsub.f32 %v2627_v44, %v2631_v46  ;;  %v278_v11 = vadd.f32 %v277_v36, %v2731_v13  ;;  %v4599_v30 = vsub.f32 %v2719_v60, %v2721_v61  ;;  %v4600_v44 = vld [vmem:[#allocation31_spill] sm:$0xff]  ;;  %v4601_v60 = vld [vmem:[#allocation32_spill] sm:$0xff] }
  0x91   :  { %v304_v52 = vadd.f32 %v303_v39, %v2735_v27  ;;  %v388_v63 = vmul.f32 %v387_v42, %v380_v48  ;;  %v394_v18 = vmul.f32 %v389_v53, %v380_v48  ;;  %v408_v19 = vadd.f32 %v407_v10, %v399_v45 }
  0x92   :  { %v274_v5 = vadd.f32 %v273_v62, %v4598_v4  ;;  %v300_v50 = vadd.f32 %v299_v37, %v4599_v30  ;;  %v412_v20 = vadd.f32 %v411_v1, %v403_v15  ;;  %v365_v21 = vsub.f32 %v362_v43, %v364_v38 }
  0x93   :  { %v369_v14 = vadd.f32 %v368_v56, %v367_v0  ;;  %v390_v23 = vmul.f32 %v389_v53, %v384_v22  ;;  %v393_v41 = vmul.f32 %v387_v42, %v384_v22  ;;  %v449_v46 = vmul.f32 %v4600_v44, %v2503_v2 }
  0x94   :  { %v450_v61 = vmul.f32 %v4601_v60, %v2505_v3  ;;  %v453_v1 = vmul.f32 %v4601_v60, %v2503_v2  ;;  %v454_v0 = vmul.f32 %v4600_v44, %v2505_v3  ;;  %v459_v10 = vmul.f32 %v2591_v54, %v2535_v16 }
  0x95   :  { %v460_v15 = vmul.f32 %v2593_v55, %v2537_v17  ;;  %v463_v56 = vmul.f32 %v2593_v55, %v2535_v16  ;;  %v464_v43 = vmul.f32 %v2591_v54, %v2537_v17  ;;  %v413_v13 = vmul.f32 %v408_v19, %v2649_v58 }
  0x96   :  { %v414_v45 = vmul.f32 %v412_v20, %v2651_v59  ;;  %v416_v2 = vmul.f32 %v408_v19, %v2651_v59  ;;  %v417_v3 = vmul.f32 %v412_v20, %v2649_v58  ;;  %v431_v27 = vmul.f32 %v408_v19, %v4595_v57 }
  0x97   :  { %v432_v62 = vmul.f32 %v412_v20, %v4597_v47  ;;  %v434_v24 = vmul.f32 %v408_v19, %v4597_v47  ;;  %v435_v16 = vmul.f32 %v412_v20, %v4595_v57  ;;  %v391_v40 = vsub.f32 %v388_v63, %v390_v23 }
  0x98   :  { %v395_v17 = vadd.f32 %v394_v18, %v393_v41  ;;  %v457_v49 = vsub.f32 %v2671_v7, %v2667_v6  ;;  %v467_v51 = vsub.f32 %v2697_v29, %v2693_v28  ;;  %v451_v12 = vadd.f32 %v450_v61, %v449_v46 }
  0x99   :  { %v455_v25 = vsub.f32 %v453_v1, %v454_v0  ;;  %v461_v26 = vadd.f32 %v460_v15, %v459_v10  ;;  %v465_v31 = vsub.f32 %v463_v56, %v464_v43  ;;  %v415_v32 = vsub.f32 %v413_v13, %v414_v45 }
  0x9a   :  { %v418_v33 = vadd.f32 %v417_v3, %v416_v2  ;;  %v421_v34 = vstv %s2799_s15  ;;  %v2840_v35 = vadd.f32 %v365_v21, %v274_v5  ;;  %v423_v8 = vstv %s2801_s19  ;;  %s3294_s15 = sld [smem:[#allocation10 + $0x9]] }
  0x9b   :  { %v433_v6 = vsub.f32 %v431_v27, %v432_v62  ;;  %v436_v7 = vadd.f32 %v435_v16, %v434_v24  ;;  %v2843_v36 = vadd.f32 %v369_v14, %v278_v11  ;;  %v439_v28 = vstv %s2803_s4  ;;  %s3382_s19 = sld [smem:[#allocation9 + $0x89]] }
  0x9c   :  { %v441_v29 = vstv %s2805_s20  ;;  %v468_v37 = vadd.f32 %v467_v51, %v457_v49  ;;  %v2847_v39 = vadd.f32 %v391_v40, %v300_v50  ;;  %v2849_v9 = vadd.f32 %v395_v17, %v304_v52  ;;  %v4602_v52 = vld [vmem:[#allocation37_spill] sm:$0xff]  ;;  %v4604_v49 = vld [vmem:[#allocation26_spill] sm:$0xff]  ;;  %s3384_s4 = sld [smem:[#allocation10 + $0x89]]  ;;  %s3486_s20 = sld [smem:[#allocation9 + $0xa]] }
  0x9d   :  { %v462_v48 = vadd.f32 %v461_v26, %v451_v12  ;;  %v466_v42 = vadd.f32 %v465_v31, %v455_v25  ;;  %v2851_v53 = vmul.f32 %v421_v34, %v415_v32  ;;  %v2853_v38 = vmul.f32 %v423_v8, %v418_v33  ;;  %v4603_v40 = vld [vmem:[#allocation25_spill] sm:$0xff] }
  0x9e   :  { %v427_v22 = vmul.f32 %v421_v34, %v418_v33  ;;  %v428_v4 = vmul.f32 %v423_v8, %v415_v32  ;;  %v2855_v5 = vmul.f32 %v439_v28, %v433_v6  ;;  %v2857_v11 = vmul.f32 %v441_v29, %v436_v7  ;;  %v4607_v32 = vld [vmem:[#allocation27_spill] sm:$0xff]  ;;  %v4608_v34 = vld [vmem:[#allocation28_spill] sm:$0xff] }
  0x9f   :  { %v2859_v30 = vmul.f32 %v439_v28, %v436_v7  ;;  %v2861_v50 = vmul.f32 %v441_v29, %v433_v6  ;;  %v475_v63 = vmul.f32 %v4602_v52, %v4600_v44  ;;  %v476_v18 = vmul.f32 %v468_v37, %v4601_v60 }
  0xa0   :  { %v479_v19 = vmul.f32 %v4602_v52, %v4601_v60  ;;  %v480_v20 = vmul.f32 %v468_v37, %v4600_v44  ;;  %v469_v21 = vmul.f32 %v462_v48, %v2649_v58  ;;  %v470_v14 = vmul.f32 %v466_v42, %v2651_v59 }
  0xa1   :  { %v472_v23 = vmul.f32 %v462_v48, %v2651_v59  ;;  %v473_v41 = vmul.f32 %v466_v42, %v2649_v58  ;;  %v425_v46 = vsub.f32 %v2851_v53, %v2853_v38  ;;  %v429_v61 = vadd.f32 %v428_v4, %v427_v22 }
  0xa2   :  { %v485_v1 = vstv %s2836_s21  ;;  %v487_v0 = vstv %s2838_s22  ;;  %v495_v10 = vmul.f32 %v462_v48, %v4595_v57  ;;  %v498_v15 = vmul.f32 %v462_v48, %v4597_v47  ;;  %s3488_s21 = sld [smem:[#allocation10 + $0xa]] }
  0xa3   :  { %v501_v56 = vmul.f32 %v4602_v52, %v2591_v54  ;;  %v502_v43 = vmul.f32 %v468_v37, %v2593_v55  ;;  %v477_v13 = vsub.f32 %v475_v63, %v476_v18  ;;  %v481_v45 = vadd.f32 %v480_v20, %v479_v19  ;;  %s3526_s22 = sld [smem:[#allocation9 + $0x8a]] }
  0xa4   :  { %v496_v2 = vmul.f32 %v466_v42, %v4597_v47  ;;  %v499_v3 = vmul.f32 %v466_v42, %v4595_v57  ;;  %v471_v27 = vsub.f32 %v469_v21, %v470_v14  ;;  %v474_v62 = vadd.f32 %v473_v41, %v472_v23 }
  0xa5   :  { %v505_v24 = vmul.f32 %v4602_v52, %v2593_v55  ;;  %v506_v16 = vmul.f32 %v468_v37, %v2591_v54  ;;  %v521_v17 = vmul.f32 %v4600_v44, %v4603_v40  ;;  %v522_v51 = vmul.f32 %v4601_v60, %v4604_v49 }
  0xa6   :  { %v2897_v12 = vmul.f32 %v4600_v44, %v4604_v49  ;;  %v2901_v25 = vmul.f32 %v4601_v60, %v4603_v40  ;;  %v529_v26 = vmul.f32 %v2649_v58, %v4600_v44  ;;  %v530_v31 = vmul.f32 %v2651_v59, %v4601_v60 }
  0xa7   :  { %v537_v33 = vmul.f32 %v2591_v54, %v4607_v32  ;;  %v538_v8 = vmul.f32 %v2593_v55, %v4608_v34  ;;  %v2913_v6 = vmul.f32 %v2591_v54, %v4608_v34  ;;  %v2917_v7 = vmul.f32 %v2593_v55, %v4607_v32 }
  0xa8   :  { %4605 = vst [vmem:[#allocation29_spill] sm:$0xff] %v2897_v12  ;;  %4606 = vst [vmem:[#allocation30_spill] sm:$0xff] %v2901_v25  ;;  %v545_v28 = vmul.f32 %v4595_v57, %v2591_v54  ;;  %v546_v29 = vmul.f32 %v4597_v47, %v2593_v55  ;;  %v478_v37 = vadd.f32 %v477_v13, %v471_v27 }
  0xa9   :  { %4609 = vst [vmem:[#allocation37_spill] sm:$0xff] %v2913_v6  ;;  %4610 = vst [vmem:[#allocation26_spill] sm:$0xff] %v2917_v7  ;;  %v482_v48 = vadd.f32 %v481_v45, %v474_v62  ;;  %v497_v42 = vsub.f32 %v495_v10, %v496_v2  ;;  %v503_v53 = vsub.f32 %v501_v56, %v502_v43  ;;  %v511_v43 = vstv %s2887_s25  ;;  %s3528_s25 = sld [smem:[#allocation10 + $0x8a]] }
  0xaa   :  { %v500_v38 = vadd.f32 %v499_v3, %v498_v15  ;;  %v507_v22 = vadd.f32 %v506_v16, %v505_v24  ;;  %v523_v4 = vadd.f32 %v522_v51, %v521_v17  ;;  %v527_v52 = vsub.f32 %v2897_v12, %v2901_v25 }
  0xab   :  { %v531_v63 = vadd.f32 %v530_v31, %v529_v26  ;;  %v2927_v18 = vmul.f32 %v2651_v59, %v4600_v44  ;;  %v2931_v19 = vmul.f32 %v2649_v58, %v4601_v60  ;;  %v539_v20 = vadd.f32 %v538_v8, %v537_v33  ;;  %v2977_v31 = vld [vmem:[#allocation3 + $0x30] sm:$0xff] }
  0xac   :  { %v543_v21 = vsub.f32 %v2913_v6, %v2917_v7  ;;  %v547_v14 = vadd.f32 %v546_v29, %v545_v28  ;;  %v2937_v23 = vmul.f32 %v4597_v47, %v2591_v54  ;;  %v2941_v41 = vmul.f32 %v4595_v57, %v2593_v55 }
  0xad   :  { %4611 = vst [vmem:[#allocation27_spill] sm:$0xff] %v2927_v18  ;;  %4612 = vst [vmem:[#allocation28_spill] sm:$0xff] %v2931_v19  ;;  %v2943_v10 = vmul.f32 %v485_v1, %v478_v37  ;;  %v2945_v15 = vmul.f32 %v487_v0, %v482_v48  ;;  %v504_v56 = vadd.f32 %v503_v53, %v497_v42  ;;  %v513_v3 = vstv %s2889_s26  ;;  %v3001_v42 = vld [vmem:[#allocation7 + $0x20] sm:$0xff]  ;;  %s3558_s26 = sld [smem:[#allocation9 + $0xb]] }
  0xae   :  { %4613 = vst [vmem:[#allocation38_spill] sm:$0xff] %v2937_v23  ;;  %4614 = vst [vmem:[#allocation39_spill] sm:$0xff] %v2941_v41  ;;  %v491_v13 = vmul.f32 %v485_v1, %v482_v48  ;;  %v492_v45 = vmul.f32 %v487_v0, %v478_v37  ;;  %v508_v2 = vadd.f32 %v507_v22, %v500_v38 }
  0xaf   :  { %v2950_v27 = vadd.f32 %v425_v46, %v2840_v35  ;;  %v2956_v24 = vadd.f32 %v2861_v50, %v2859_v30  ;;  %v2958_v16 = vadd.f32 %v539_v20, %v523_v4  ;;  %v535_v17 = vsub.f32 %v2927_v18, %v2931_v19  ;;  %v2966_v35 = vld [vmem:[#allocation3 + $0x20] sm:$0xff]  ;;  %4617 = vst [vmem:[#allocation42_spill] sm:$0xff] %v3001_v42 }
  0xb0   :  { %v544_v51 = vadd.f32 %v543_v21, %v527_v52  ;;  %v2962_v1 = vadd.f32 %v547_v14, %v531_v63  ;;  %v551_v0 = vsub.f32 %v2937_v23, %v2941_v41  ;;  %4616 = vst [vmem:[#allocation41_spill] sm:$0xff] %v2966_v35  ;;  %v2969_v46 = vadd.f32 %v429_v61, %v2843_v36  ;;  %v3007_v52 = vld [vmem:[#allocation7 + $0x30] sm:$0xff]  ;;  %v3009_v63 = vld [vmem:[#allocation3 + $0x68] sm:$0xff] }
  0xb1   :  { %4615 = vst [vmem:[#allocation40_spill] sm:$0xff] %v2958_v16  ;;  %v2973_v50 = vmul.f32 %v511_v43, %v504_v56  ;;  %v2975_v26 = vmul.f32 %v513_v3, %v504_v56  ;;  %v2979_v33 = vadd.f32 %v492_v45, %v491_v13  ;;  %v2981_v8 = vmul.f32 %v513_v3, %v508_v2 }
  0xb2   :  { %v2983_v28 = vmul.f32 %v511_v43, %v508_v2  ;;  %v609_v29 = vmul.f32 %v2977_v31, %v2966_v35  ;;  %v2989_v36 = vmul.f32 %v2958_v16, %v2649_v58  ;;  %v556_v61 = vmul.f32 %v2958_v16, %v2651_v59  ;;  %4618 = vst [vmem:[#allocation43_spill] sm:$0xff] %v3009_v63  ;;  %v3019_v43 = vld [vmem:[#allocation7 + $0x68] sm:$0xff] }
  0xb3   :  { %v2995_v37 = vmul.f32 %v2958_v16, %v4595_v57  ;;  %v2999_v48 = vmul.f32 %v2958_v16, %v4597_v47  ;;  %v552_v53 = vadd.f32 %v551_v0, %v535_v17  ;;  %v554_v38 = vmul.f32 %v544_v51, %v2651_v59  ;;  %4619 = vst [vmem:[#allocation44_spill] sm:$0xff] %v3019_v43  ;;  %v3029_v17 = vld [vmem:[#allocation3 + $0x78] sm:$0xff]  ;;  %v3031_v0 = vld [vmem:[#allocation7 + $0x78] sm:$0xff] }
  0xb4   :  { %v557_v22 = vmul.f32 %v544_v51, %v2649_v58  ;;  %v559_v4 = vmul.f32 %v2962_v1, %v4603_v40  ;;  %v563_v20 = vmul.f32 %v2962_v1, %v4604_v49  ;;  %v610_v21 = vmul.f32 %v3007_v52, %v3001_v42  ;;  %4620 = vst [vmem:[#allocation45_spill] sm:$0xff] %v3029_v17 }
  0xb5   :  { %v613_v14 = vmul.f32 %v3007_v52, %v2966_v35  ;;  %v614_v56 = vmul.f32 %v2977_v31, %v3001_v42  ;;  %v617_v13 = vmul.f32 %v2649_v58, %v2966_v35  ;;  %v618_v45 = vmul.f32 %v2651_v59, %v3001_v42  ;;  %4621 = vst [vmem:[#allocation46_spill] sm:$0xff] %v3031_v0 }
  0xb6   :  { %v621_v2 = vmul.f32 %v2651_v59, %v2966_v35  ;;  %v622_v3 = vmul.f32 %v2649_v58, %v3001_v42  ;;  %v629_v30 = vmul.f32 %v3029_v17, %v3009_v63  ;;  %v630_v62 = vmul.f32 %v3031_v0, %v3019_v43 }
  0xb7   :  { %v633_v16 = vmul.f32 %v3031_v0, %v3009_v63  ;;  %v634_v7 = vmul.f32 %v3029_v17, %v3019_v43  ;;  %v637_v6 = vmul.f32 %v4595_v57, %v3009_v63  ;;  %v638_v25 = vmul.f32 %v4597_v47, %v3019_v43 }
  0xb8   :  { %v641_v12 = vmul.f32 %v4597_v47, %v3009_v63  ;;  %v642_v55 = vmul.f32 %v4595_v57, %v3019_v43  ;;  %v560_v54 = vmul.f32 %v552_v53, %v4604_v49  ;;  %v564_v60 = vmul.f32 %v552_v53, %v4603_v40 }
  0xb9   :  { %v580_v44 = vmul.f32 %v544_v51, %v4597_v47  ;;  %v583_v42 = vmul.f32 %v544_v51, %v4595_v57  ;;  %v555_v35 = vsub.f32 %v2989_v36, %v554_v38  ;;  %v558_v41 = vadd.f32 %v557_v22, %v556_v61 }
  0xba   :  { %v585_v63 = vmul.f32 %v2962_v1, %v4607_v32  ;;  %v586_v43 = vmul.f32 %v552_v53, %v4608_v34  ;;  %v611_v49 = vadd.f32 %v610_v21, %v609_v29  ;;  %v615_v40 = vsub.f32 %v613_v14, %v614_v56  ;;  %v4624_v29 = vld [vmem:[#allocation35_spill] sm:$0xff] }
  0xbb   :  { %v631_v23 = vadd.f32 %v630_v62, %v629_v30  ;;  %v635_v19 = vsub.f32 %v633_v16, %v634_v7  ;;  %v619_v18 = vadd.f32 %v618_v45, %v617_v13  ;;  %v623_v0 = vsub.f32 %v621_v2, %v622_v3 }
  0xbc   :  { %v639_v17 = vadd.f32 %v638_v25, %v637_v6  ;;  %v643_v51 = vsub.f32 %v641_v12, %v642_v55  ;;  %v561_v47 = vsub.f32 %v559_v4, %v560_v54  ;;  %v565_v36 = vadd.f32 %v564_v60, %v563_v20 }
  0xbd   :  { %v589_v61 = vmul.f32 %v2962_v1, %v4608_v34  ;;  %v590_v38 = vmul.f32 %v552_v53, %v4607_v32  ;;  %v4622_v22 = vsub.f32 %v2855_v5, %v2857_v11  ;;  %v448_v62 = vadd.f32 %v2956_v24, %v2849_v9  ;;  %v4626_v53 = vld [vmem:[#allocation45_spill] sm:$0xff] }
  0xbe   :  { %v581_v7 = vsub.f32 %v2995_v37, %v580_v44  ;;  %v587_v55 = vsub.f32 %v585_v63, %v586_v43  ;;  %v4623_v54 = vsub.f32 %v2943_v10, %v2945_v15  ;;  %v632_v5 = vadd.f32 %v631_v23, %v611_v49  ;;  %v4627_v63 = vld [vmem:[#allocation46_spill] sm:$0xff] }
  0xbf   :  { %v444_v57 = vadd.f32 %v4622_v22, %v2847_v39  ;;  %v3083_v39 = vadd.f32 %v2979_v33, %v2969_v46  ;;  %v636_v9 = vadd.f32 %v635_v19, %v615_v40  ;;  %v515_v44 = vsub.f32 %v2973_v50, %v2981_v8 }
  0xc0   :  { %v3079_v60 = vadd.f32 %v4623_v54, %v2950_v27  ;;  %v519_v11 = vadd.f32 %v2975_v26, %v2983_v28  ;;  %v640_v12 = vadd.f32 %v639_v17, %v619_v18  ;;  %v644_v25 = vadd.f32 %v643_v51, %v623_v0 }
  0xc1   :  { %v562_v32 = vadd.f32 %v561_v47, %v555_v35  ;;  %v566_v34 = vadd.f32 %v565_v36, %v558_v41  ;;  %v584_v6 = vadd.f32 %v583_v42, %v2999_v48  ;;  %v591_v10 = vadd.f32 %v590_v38, %v589_v61  ;;  %v4625_v48 = vld [vmem:[#allocation36_spill] sm:$0xff]  ;;  %v4628_v61 = vld [vmem:[#allocation27_spill] sm:$0xff] }
  0xc2   :  { %v569_v15 = vstv %s3051_s27  ;;  %v571_v27 = vstv %s3056_s28  ;;  %v588_v24 = vadd.f32 %v587_v55, %v581_v7  ;;  %v595_v16 = vstv %s3061_s1  ;;  %v4629_v38 = vld [vmem:[#allocation28_spill] sm:$0xff]  ;;  %v4630_v7 = vld [vmem:[#allocation38_spill] sm:$0xff]  ;;  %v4631_v55 = vld [vmem:[#allocation39_spill] sm:$0xff]  ;;  %s3560_s27 = sld [smem:[#allocation10 + $0xb]] }
  0xc3   :  { %v645_v23 = vmul.f32 %v632_v5, %v2649_v58  ;;  %v646_v40 = vmul.f32 %v636_v9, %v2651_v59  ;;  %v648_v19 = vmul.f32 %v632_v5, %v2651_v59  ;;  %v649_v46 = vmul.f32 %v636_v9, %v2649_v58  ;;  %s3581_s28 = sld [smem:[#allocation9 + $0x8b]] }
  0xc4   :  { %v651_v18 = vmul.f32 %v640_v12, %v2977_v31  ;;  %v652_v47 = vmul.f32 %v644_v25, %v3007_v52  ;;  %v655_v41 = vmul.f32 %v640_v12, %v3007_v52  ;;  %v656_v35 = vmul.f32 %v644_v25, %v2977_v31  ;;  %s3583_s1 = sld [smem:[#allocation10 + $0x8b]] }
  0xc5   :  { %v516_v30 = vadd.f32 %v515_v44, %v444_v57  ;;  %v570_v50 = vmul.f32 %v569_v15, %v562_v32  ;;  %v572_v26 = vmul.f32 %v571_v27, %v566_v34  ;;  %v592_v33 = vadd.f32 %v591_v10, %v584_v6 }
  0xc6   :  { %v575_v8 = vmul.f32 %v569_v15, %v566_v34  ;;  %v576_v59 = vmul.f32 %v571_v27, %v562_v32  ;;  %v596_v28 = vmul.f32 %v595_v16, %v588_v24  ;;  %v597_v58 = vstv %s3073_s29  ;;  %v4632_v27 = vld [vmem:[#allocation41_spill] sm:$0xff]  ;;  %s3602_s29 = sld [smem:[#allocation9 + $0xc]] }
  0xc7   :  { %v671_v37 = vmul.f32 %v632_v5, %v4624_v29  ;;  %v672_v42 = vmul.f32 %v636_v9, %v4625_v48  ;;  %v677_v4 = vmul.f32 %v640_v12, %v4626_v53  ;;  %v678_v20 = vmul.f32 %v644_v25, %v4627_v63 }
  0xc8   :  { %v647_v57 = vsub.f32 %v645_v23, %v646_v40  ;;  %v650_v21 = vadd.f32 %v649_v46, %v648_v19  ;;  %v653_v14 = vsub.f32 %v651_v18, %v652_v47  ;;  %v657_v56 = vadd.f32 %v656_v35, %v655_v41 }
  0xc9   :  { %v573_v43 = vsub.f32 %v570_v50, %v572_v26  ;;  %v598_v13 = vmul.f32 %v597_v58, %v592_v33  ;;  %v601_v45 = vmul.f32 %v595_v16, %v592_v33  ;;  %v602_v2 = vmul.f32 %v597_v58, %v588_v24  ;;  %v4633_v24 = vld [vmem:[#allocation25_spill] sm:$0xff] }
  0xca   :  { %v674_v3 = vmul.f32 %v632_v5, %v4625_v48  ;;  %v675_v17 = vmul.f32 %v636_v9, %v4624_v29  ;;  %v681_v0 = vmul.f32 %v640_v12, %v4627_v63  ;;  %v682_v49 = vmul.f32 %v644_v25, %v4626_v53  ;;  %v4637_v29 = vld [vmem:[#allocation32_spill] sm:$0xff] }
  0xcb   :  { %v673_v51 = vsub.f32 %v671_v37, %v672_v42  ;;  %v679_v36 = vsub.f32 %v677_v4, %v678_v20  ;;  %v697_v22 = vsub.f32 %v4629_v38, %v4628_v61  ;;  %v699_v54 = vsub.f32 %v4631_v55, %v4630_v7  ;;  %v4644_v7 = vld [vmem:[#allocation34_spill] sm:$0xff] }
  0xcc   :  { %v520_v44 = vadd.f32 %v519_v11, %v448_v62  ;;  %v577_v32 = vadd.f32 %v576_v59, %v575_v8  ;;  %v654_v34 = vadd.f32 %v653_v14, %v647_v57  ;;  %v658_v6 = vadd.f32 %v657_v56, %v650_v21  ;;  %v3129_v62 = vld [vmem:[#allocation3 + $0x28] sm:$0xff]  ;;  %v3154_v21 = vld [vmem:[#allocation7 + $0x28] sm:$0xff] }
  0xcd   :  { %v599_v5 = vsub.f32 %v596_v28, %v598_v13  ;;  %v603_v9 = vadd.f32 %v602_v2, %v601_v45  ;;  %v661_v10 = vstv %s3101_s5  ;;  %v663_v12 = vstv %s3103_s6  ;;  %4634 = vst [vmem:[#allocation35_spill] sm:$0xff] %v3129_v62  ;;  %v4635_v11 = vld [vmem:[#allocation42_spill] sm:$0xff]  ;;  %4639 = vst [vmem:[#allocation36_spill] sm:$0xff] %v3154_v21  ;;  %s3604_s5 = sld [smem:[#allocation10 + $0xc]] }
  0xce   :  { %v676_v15 = vadd.f32 %v675_v17, %v674_v3  ;;  %v683_v25 = vadd.f32 %v682_v49, %v681_v0  ;;  %v737_v16 = vmul.f32 %v4633_v24, %v4632_v27  ;;  %v3127_v23 = vadd.f32 %v573_v43, %v3079_v60  ;;  %v4636_v60 = vld [vmem:[#allocation31_spill] sm:$0xff]  ;;  %v3176_v49 = vld [vmem:[#allocation7 + $0x70] sm:$0xff]  ;;  %s3654_s6 = sld [smem:[#allocation9 + $0x8c]] }
  0xcf   :  { %v680_v40 = vadd.f32 %v679_v36, %v673_v51  ;;  %v700_v19 = vadd.f32 %v699_v54, %v697_v22  ;;  %v3133_v46 = vmul.f32 %v3129_v62, %v4635_v11  ;;  %v662_v18 = vmul.f32 %v661_v10, %v654_v34  ;;  %v3172_v3 = vld [vmem:[#allocation3 + $0x70] sm:$0xff]  ;;  %4642 = vst [vmem:[#allocation46_spill] sm:$0xff] %v3176_v49  ;;  %v4643_v51 = vld [vmem:[#allocation44_spill] sm:$0xff] }
  0xd0   :  { %v664_v47 = vmul.f32 %v663_v12, %v658_v6  ;;  %v687_v41 = vstv %s3110_s30  ;;  %v689_v35 = vstv %s3112_s10  ;;  %v578_v50 = vadd.f32 %v577_v32, %v3083_v39  ;;  %4640 = vst [vmem:[#allocation45_spill] sm:$0xff] %v3172_v3  ;;  %v4641_v17 = vld [vmem:[#allocation43_spill] sm:$0xff]  ;;  %s3656_s30 = sld [smem:[#allocation10 + $0x8c]]  ;;  %s3678_s10 = sld [smem:[#allocation9 + $0xd]] }
  0xd1   :  { %v3138_v26 = vadd.f32 %v599_v5, %v516_v30  ;;  %v3140_v33 = vadd.f32 %v603_v9, %v520_v44  ;;  %v701_v8 = vmul.f32 %v2962_v1, %v4636_v60  ;;  %v667_v59 = vmul.f32 %v661_v10, %v658_v6  ;;  %v4638_v30 = vld [vmem:[#allocation33_spill] sm:$0xff] }
  0xd2   :  { %v668_v28 = vmul.f32 %v663_v12, %v654_v34  ;;  %v684_v58 = vadd.f32 %v683_v25, %v676_v15  ;;  %v704_v37 = vmul.f32 %v2962_v1, %v4637_v29  ;;  %v688_v48 = vmul.f32 %v687_v41, %v680_v40 }
  0xd3   :  { %v694_v42 = vmul.f32 %v689_v35, %v680_v40  ;;  %v702_v4 = vmul.f32 %v700_v19, %v4637_v29  ;;  %v705_v20 = vmul.f32 %v700_v19, %v4636_v60  ;;  %v665_v39 = vsub.f32 %v662_v18, %v664_v47 }
  0xd4   :  { %v719_v57 = vmul.f32 %v2962_v1, %v4638_v30  ;;  %v738_v14 = vmul.f32 %v3154_v21, %v4635_v11  ;;  %v741_v56 = vmul.f32 %v3154_v21, %v4632_v27  ;;  %v745_v43 = vmul.f32 %v4636_v60, %v4632_v27 }
  0xd5   :  { %v746_v13 = vmul.f32 %v4637_v29, %v4635_v11  ;;  %v749_v45 = vmul.f32 %v4637_v29, %v4632_v27  ;;  %v750_v2 = vmul.f32 %v4636_v60, %v4635_v11  ;;  %v753_v0 = vmul.f32 %v3172_v3, %v4641_v17 }
  0xd6   :  { %v754_v36 = vmul.f32 %v3176_v49, %v4643_v51  ;;  %v757_v61 = vmul.f32 %v3176_v49, %v4641_v17  ;;  %v758_v38 = vmul.f32 %v3172_v3, %v4643_v51  ;;  %v761_v22 = vmul.f32 %v4638_v30, %v4641_v17 }
  0xd7   :  { %v762_v55 = vmul.f32 %v4644_v7, %v4643_v51  ;;  %v765_v54 = vmul.f32 %v4644_v7, %v4641_v17  ;;  %v766_v44 = vmul.f32 %v4638_v30, %v4643_v51  ;;  %v669_v32 = vadd.f32 %v668_v28, %v667_v59 }
  0xd8   :  { %v690_v34 = vmul.f32 %v689_v35, %v684_v58  ;;  %v693_v6 = vmul.f32 %v687_v41, %v684_v58  ;;  %v703_v5 = vsub.f32 %v701_v8, %v702_v4  ;;  %v706_v9 = vadd.f32 %v705_v20, %v704_v37 }
  0xd9   :  { %v720_v10 = vmul.f32 %v700_v19, %v4644_v7  ;;  %v722_v12 = vmul.f32 %v2962_v1, %v4644_v7  ;;  %v723_v15 = vmul.f32 %v700_v19, %v4638_v30  ;;  %v739_v25 = vadd.f32 %v738_v14, %v737_v16 }
  0xda   :  { %v743_v27 = vsub.f32 %v741_v56, %v3133_v46  ;;  %v755_v24 = vadd.f32 %v754_v36, %v753_v0  ;;  %v759_v40 = vsub.f32 %v757_v61, %v758_v38  ;;  %v747_v11 = vadd.f32 %v746_v13, %v745_v43  ;;  %v3220_v13 = vld [vmem:[#allocation3 + $0x18] sm:$0xff] }
  0xdb   :  { %v751_v18 = vsub.f32 %v749_v45, %v750_v2  ;;  %v763_v47 = vadd.f32 %v762_v55, %v761_v22  ;;  %v767_v41 = vsub.f32 %v765_v54, %v766_v44  ;;  %v691_v35 = vsub.f32 %v688_v48, %v690_v34  ;;  %v3223_v2 = vld [vmem:[#allocation7 + $0x18] sm:$0xff] }
  0xdc   :  { %v695_v60 = vadd.f32 %v694_v42, %v693_v6  ;;  %v709_v8 = vstv %s3148_s11  ;;  %v711_v59 = vstv %s3150_s12  ;;  %v3200_v28 = vadd.f32 %v665_v39, %v3127_v23  ;;  %v3262_v6 = vld [vmem:[#allocation3 + $0x60] sm:$0xff]  ;;  %s3680_s11 = sld [smem:[#allocation10 + $0xd]] }
  0xdd   :  { %v3202_v1 = vadd.f32 %v669_v32, %v578_v50  ;;  %v721_v16 = vsub.f32 %v719_v57, %v720_v10  ;;  %v724_v19 = vadd.f32 %v723_v15, %v722_v12  ;;  %v727_v58 = vstv %s3168_s13  ;;  %s3696_s12 = sld [smem:[#allocation9 + $0x8d]] }
  0xde   :  { %v729_v46 = vstv %s3170_s14  ;;  %v756_v29 = vadd.f32 %v755_v24, %v739_v25  ;;  %v760_v37 = vadd.f32 %v759_v40, %v743_v27  ;;  %v3206_v4 = vmul.f32 %v709_v8, %v703_v5  ;;  %s3699_s13 = sld [smem:[#allocation10 + $0x8d]]  ;;  %s3734_s14 = sld [smem:[#allocation9 + $0xe]] }
  0xdf   :  { %v3208_v20 = vmul.f32 %v711_v59, %v706_v9  ;;  %v764_v30 = vadd.f32 %v763_v47, %v747_v11  ;;  %v768_v48 = vadd.f32 %v767_v41, %v751_v18  ;;  %v3211_v42 = vadd.f32 %v691_v35, %v3138_v26 }
  0xe0   :  { %v3214_v23 = vadd.f32 %v695_v60, %v3140_v33  ;;  %v715_v50 = vmul.f32 %v709_v8, %v706_v9  ;;  %v716_v39 = vmul.f32 %v711_v59, %v703_v5  ;;  %v3216_v57 = vmul.f32 %v727_v58, %v721_v16  ;;  %v3265_v9 = vld [vmem:[#allocation7 + $0x60] sm:$0xff]  ;;  %v4650_v60 = vld [vmem:[#allocation29_spill] sm:$0xff]  ;;  %v4651_v8 = vld [vmem:[#allocation30_spill] sm:$0xff] }
  0xe1   :  { %v3218_v14 = vmul.f32 %v729_v46, %v724_v19  ;;  %v733_v56 = vmul.f32 %v727_v58, %v724_v19  ;;  %v734_v43 = vmul.f32 %v729_v46, %v721_v16  ;;  %v769_v45 = vmul.f32 %v3220_v13, %v756_v29  ;;  %4649 = vst [vmem:[#allocation41_spill] sm:$0xff] %v3265_v9  ;;  %v4652_v19 = vld [vmem:[#allocation37_spill] sm:$0xff]  ;;  %v4653_v58 = vld [vmem:[#allocation26_spill] sm:$0xff] }
  0xe2   :  { %v770_v26 = vmul.f32 %v3223_v2, %v760_v37  ;;  %v772_v17 = vmul.f32 %v3223_v2, %v756_v29  ;;  %v773_v33 = vmul.f32 %v3220_v13, %v760_v37  ;;  %v775_v0 = vmul.f32 %v3129_v62, %v764_v30 }
  0xe3   :  { %v776_v51 = vmul.f32 %v3154_v21, %v768_v48  ;;  %v779_v36 = vmul.f32 %v3154_v21, %v764_v30  ;;  %v780_v61 = vmul.f32 %v3129_v62, %v768_v48  ;;  %v821_v38 = vmul.f32 %v3129_v62, %v2977_v31 }
  0xe4   :  { %v822_v22 = vmul.f32 %v3154_v21, %v3007_v52  ;;  %v831_v7 = vmul.f32 %v3172_v3, %v4626_v53  ;;  %v832_v55 = vmul.f32 %v3176_v49, %v4627_v63  ;;  %v3248_v54 = vmul.f32 %v3129_v62, %v3007_v52 }
  0xe5   :  { %v3252_v44 = vmul.f32 %v3154_v21, %v2977_v31  ;;  %v3256_v32 = vmul.f32 %v3172_v3, %v4627_v63  ;;  %v3260_v34 = vmul.f32 %v3176_v49, %v4626_v53  ;;  %v795_v5 = vmul.f32 %v3262_v6, %v756_v29 }
  0xe6   :  { %4645 = vst [vmem:[#allocation27_spill] sm:$0xff] %v3248_v54  ;;  %v796_v10 = vmul.f32 %v3265_v9, %v760_v37  ;;  %v801_v12 = vmul.f32 %v3172_v3, %v764_v30  ;;  %v802_v15 = vmul.f32 %v3176_v49, %v768_v48  ;;  %v771_v25 = vsub.f32 %v769_v45, %v770_v26 }
  0xe7   :  { %4646 = vst [vmem:[#allocation28_spill] sm:$0xff] %v3252_v44  ;;  %4647 = vst [vmem:[#allocation38_spill] sm:$0xff] %v3256_v32  ;;  %v774_v27 = vadd.f32 %v773_v33, %v772_v17  ;;  %v777_v24 = vsub.f32 %v775_v0, %v776_v51  ;;  %v781_v40 = vadd.f32 %v780_v61, %v779_v36  ;;  %v785_v61 = vstv %s3232_s16  ;;  %s3736_s16 = sld [smem:[#allocation10 + $0xe]] }
  0xe8   :  { %4648 = vst [vmem:[#allocation39_spill] sm:$0xff] %v3260_v34  ;;  %v798_v11 = vmul.f32 %v3265_v9, %v756_v29  ;;  %v799_v18 = vmul.f32 %v3262_v6, %v760_v37  ;;  %v823_v47 = vadd.f32 %v822_v22, %v821_v38  ;;  %v833_v41 = vadd.f32 %v832_v55, %v831_v7 }
  0xe9   :  { %v827_v35 = vsub.f32 %v3248_v54, %v3252_v44  ;;  %v829_v59 = vsub.f32 %v4651_v8, %v4650_v60  ;;  %v837_v16 = vsub.f32 %v3256_v32, %v3260_v34  ;;  %v839_v46 = vsub.f32 %v4653_v58, %v4652_v19 }
  0xea   :  { %v797_v29 = vsub.f32 %v795_v5, %v796_v10  ;;  %v803_v45 = vsub.f32 %v801_v12, %v802_v15  ;;  %v805_v37 = vmul.f32 %v3176_v49, %v764_v30  ;;  %v806_v26 = vmul.f32 %v3172_v3, %v768_v48 }
  0xeb   :  { %v713_v17 = vsub.f32 %v3206_v4, %v3208_v20  ;;  %v717_v33 = vadd.f32 %v716_v39, %v715_v50  ;;  %v778_v0 = vadd.f32 %v777_v24, %v771_v25  ;;  %v782_v51 = vadd.f32 %v781_v40, %v774_v27 }
  0xec   :  { %v731_v36 = vsub.f32 %v3216_v57, %v3218_v14  ;;  %v787_v38 = vstv %s3234_s17  ;;  %v3290_v22 = vadd.f32 %v833_v41, %v823_v47  ;;  %v735_v30 = vadd.f32 %v734_v43, %v733_v56  ;;  %v4655_v43 = vld [vmem:[#allocation40_spill] sm:$0xff]  ;;  %s3770_s17 = sld [smem:[#allocation9 + $0x8e]] }
  0xed   :  { %v4511_v48 = vstv %s3244_s18  ;;  %v838_v7 = vadd.f32 %v837_v16, %v827_v35  ;;  %v3297_v55 = vadd.f32 %v839_v46, %v829_v59  ;;  %v800_v4 = vadd.f32 %v799_v18, %v798_v11 }
  0xee   :  { %4654 = vst [vmem:[#allocation25_spill] sm:$0xff] %v3290_v22  ;;  %v804_v20 = vadd.f32 %v803_v45, %v797_v29  ;;  %v807_v50 = vadd.f32 %v806_v26, %v805_v37  ;;  %v813_v39 = vstv %s3270_s0  ;;  %v3300_v5 = vmul.f32 %v785_v61, %v778_v0  ;;  %v3340_v45 = vld [vmem:[#allocation3 + $0x38] sm:$0xff]  ;;  %s3809_s0 = sld [smem:[#allocation12 + $0x1]] }
  0xef   :  { %v3302_v57 = vmul.f32 %v787_v38, %v782_v51  ;;  %v791_v14 = vmul.f32 %v785_v61, %v782_v51  ;;  %v792_v10 = vmul.f32 %v787_v38, %v778_v0  ;;  %v841_v12 = vmul.f32 %v3220_v13, %v3290_v22  ;;  %4656 = vst [vmem:[#allocation42_spill] sm:$0xff] %v3340_v45  ;;  %v3356_v0 = vld [vmem:[#allocation3 + $0x80] sm:$0xff]  ;;  %v3358_v51 = vld [vmem:[#allocation7 + $0x80] sm:$0xff] }
  0xf0   :  { %v844_v56 = vmul.f32 %v3223_v2, %v3290_v22  ;;  %v847_v15 = vmul.f32 %v2977_v31, %v4655_v43  ;;  %v851_v25 = vmul.f32 %v3007_v52, %v4655_v43  ;;  %v842_v27 = vmul.f32 %v3223_v2, %v838_v7  ;;  %4660 = vst [vmem:[#allocation43_spill] sm:$0xff] %v3356_v0 }
  0xf1   :  { %v845_v24 = vmul.f32 %v3220_v13, %v838_v7  ;;  %v848_v40 = vmul.f32 %v3297_v55, %v3007_v52  ;;  %v852_v11 = vmul.f32 %v3297_v55, %v2977_v31  ;;  %v714_v18 = vadd.f32 %v713_v17, %v3200_v28  ;;  %4661 = vst [vmem:[#allocation44_spill] sm:$0xff] %v3358_v51 }
  0xf2   :  { %v3320_v47 = vadd.f32 %v717_v33, %v3202_v1  ;;  %v3323_v41 = vadd.f32 %v731_v36, %v3211_v42  ;;  %v3326_v35 = vadd.f32 %v735_v30, %v3214_v23  ;;  %v808_v60 = vadd.f32 %v807_v50, %v800_v4  ;;  %v3342_v23 = vld [vmem:[#allocation7 + $0x38] sm:$0xff] }
  0xf3   :  { %v3330_v8 = vmul.f32 %v4511_v48, %v804_v20  ;;  %v3334_v59 = vmul.f32 %v813_v39, %v804_v20  ;;  %v789_v16 = vsub.f32 %v3300_v5, %v3302_v57  ;;  %v793_v28 = vadd.f32 %v792_v10, %v791_v14  ;;  %4657 = vst [vmem:[#allocation31_spill] sm:$0xff] %v3342_v23 }
  0xf4   :  { %v857_v19 = vstv %s3292_s3  ;;  %v859_v1 = vstv %s3294_s15  ;;  %v843_v58 = vsub.f32 %v841_v12, %v842_v27  ;;  %v846_v46 = vadd.f32 %v845_v24, %v844_v56  ;;  %s3824_s3 = sld [smem:[#allocation12 + $0x2]]  ;;  %s3853_s15 = sld [smem:[#allocation10 + $0x8e]] }
  0xf5   :  { %v849_v42 = vsub.f32 %v847_v15, %v848_v40  ;;  %v853_v29 = vadd.f32 %v852_v11, %v851_v25  ;;  %v897_v37 = vmul.f32 %v3340_v45, %v2977_v31  ;;  %v898_v26 = vmul.f32 %v3342_v23, %v3007_v52 }
  0xf6   :  { %v3350_v17 = vmul.f32 %v3342_v23, %v2977_v31  ;;  %v3354_v33 = vmul.f32 %v3340_v45, %v3007_v52  ;;  %v917_v36 = vmul.f32 %v3356_v0, %v4626_v53  ;;  %v918_v61 = vmul.f32 %v3358_v51, %v4627_v63 }
  0xf7   :  { %v3366_v38 = vmul.f32 %v3358_v51, %v4626_v53  ;;  %v3370_v30 = vmul.f32 %v3356_v0, %v4627_v63  ;;  %v867_v4 = vmul.f32 %v3262_v6, %v3290_v22  ;;  %v868_v20 = vmul.f32 %v3265_v9, %v838_v7 }
  0xf8   :  { %4658 = vst [vmem:[#allocation32_spill] sm:$0xff] %v3350_v17  ;;  %4659 = vst [vmem:[#allocation33_spill] sm:$0xff] %v3354_v33  ;;  %v870_v50 = vmul.f32 %v3265_v9, %v3290_v22  ;;  %v871_v5 = vmul.f32 %v3262_v6, %v838_v7  ;;  %v850_v57 = vadd.f32 %v849_v42, %v843_v58 }
  0xf9   :  { %4662 = vst [vmem:[#allocation34_spill] sm:$0xff] %v3366_v38  ;;  %4663 = vst [vmem:[#allocation29_spill] sm:$0xff] %v3370_v30  ;;  %v854_v14 = vadd.f32 %v853_v29, %v846_v46  ;;  %v873_v10 = vmul.f32 %v4626_v53, %v4655_v43  ;;  %v874_v12 = vmul.f32 %v3297_v55, %v4627_v63 }
  0xfa   :  { %v905_v56 = vmul.f32 %v3220_v13, %v2977_v31  ;;  %v906_v15 = vmul.f32 %v3223_v2, %v3007_v52  ;;  %v925_v7 = vmul.f32 %v3262_v6, %v4626_v53  ;;  %v926_v25 = vmul.f32 %v3265_v9, %v4627_v63 }
  0xfb   :  { %v899_v27 = vadd.f32 %v898_v26, %v897_v37  ;;  %v903_v24 = vsub.f32 %v3350_v17, %v3354_v33  ;;  %v919_v40 = vadd.f32 %v918_v61, %v917_v36  ;;  %v923_v11 = vsub.f32 %v3366_v38, %v3370_v30 }
  0xfc   :  { %v909_v58 = vmul.f32 %v3223_v2, %v2977_v31  ;;  %v910_v46 = vmul.f32 %v3220_v13, %v3007_v52  ;;  %v929_v42 = vmul.f32 %v3265_v9, %v4626_v53  ;;  %v930_v29 = vmul.f32 %v3262_v6, %v4627_v63 }
  0xfd   :  { %v869_v37 = vsub.f32 %v867_v4, %v868_v20  ;;  %v875_v26 = vsub.f32 %v873_v10, %v874_v12  ;;  %v877_v36 = vmul.f32 %v4627_v63, %v4655_v43  ;;  %v878_v61 = vmul.f32 %v3297_v55, %v4626_v53 }
  0xfe   :  { %v3412_v48 = vmul.f32 %v813_v39, %v808_v60  ;;  %v4664_v31 = vstv %s3244_s18  ;;  %v907_v52 = vadd.f32 %v906_v15, %v905_v56  ;;  %v927_v38 = vadd.f32 %v926_v25, %v925_v7  ;;  %s3786_s18 = sld [smem:[#allocation12]] }
  0xff   :  { %v817_v30 = vmul.f32 %v4664_v31, %v808_v60  ;;  %v3416_v33 = vadd.f32 %v789_v16, %v714_v18  ;;  %v872_v17 = vadd.f32 %v871_v5, %v870_v50  ;;  %v3418_v4 = vadd.f32 %v919_v40, %v899_v27 }
 0x100   :  { %v924_v20 = vadd.f32 %v923_v11, %v903_v24  ;;  %v3420_v10 = vmul.f32 %v857_v19, %v850_v57  ;;  %v3422_v63 = vmul.f32 %v859_v1, %v854_v14  ;;  %v911_v53 = vsub.f32 %v909_v58, %v910_v46 }
 0x101   :  { %4665 = vst [vmem:[#allocation30_spill] sm:$0xff] %v3418_v4  ;;  %v931_v55 = vsub.f32 %v929_v42, %v930_v29  ;;  %v863_v39 = vmul.f32 %v857_v19, %v854_v14  ;;  %v864_v43 = vmul.f32 %v859_v1, %v850_v57  ;;  %v876_v12 = vadd.f32 %v875_v26, %v869_v37 }
 0x102   :  { %v879_v60 = vadd.f32 %v878_v61, %v877_v36  ;;  %v3425_v56 = vadd.f32 %v793_v28, %v3320_v47  ;;  %v883_v15 = vstv %s3382_s19  ;;  %v885_v18 = vstv %s3384_s4  ;;  %v3470_v36 = vld [vmem:[#allocation3 + $0x40] sm:$0xff]  ;;  %v3472_v61 = vld [vmem:[#allocation7 + $0x40] sm:$0xff]  ;;  %s3859_s19 = sld [smem:[#allocation12 + $0x3]]  ;;  %s3888_s4 = sld [smem:[#allocation12 + $0x5]] }
 0x103   :  { %v928_v16 = vadd.f32 %v927_v38, %v907_v52  ;;  %v3431_v50 = vmul.f32 %v3220_v13, %v3418_v4  ;;  %v3434_v5 = vmul.f32 %v3223_v2, %v924_v20  ;;  %v936_v7 = vmul.f32 %v3223_v2, %v3418_v4 }
 0x104   :  { %v937_v19 = vmul.f32 %v3220_v13, %v924_v20  ;;  %v3442_v47 = vadd.f32 %v3334_v59, %v817_v30  ;;  %v932_v38 = vadd.f32 %v931_v55, %v911_v53  ;;  %v3446_v57 = vadd.f32 %v864_v43, %v863_v39 }
 0x105   :  { %v880_v14 = vadd.f32 %v879_v60, %v872_v17  ;;  %v3448_v25 = vmul.f32 %v883_v15, %v876_v12  ;;  %v3450_v27 = vmul.f32 %v885_v18, %v876_v12  ;;  %v939_v24 = vmul.f32 %v928_v16, %v3340_v45  ;;  %v3498_v60 = vld [vmem:[#allocation3 + $0x88] sm:$0xff] }
 0x106   :  { %v943_v40 = vmul.f32 %v928_v16, %v3342_v23  ;;  %v3456_v11 = vmul.f32 %v3262_v6, %v3418_v4  ;;  %v3459_v59 = vmul.f32 %v3265_v9, %v924_v20  ;;  %v935_v30 = vsub.f32 %v3431_v50, %v3434_v5  ;;  %v3500_v50 = vld [vmem:[#allocation7 + $0x88] sm:$0xff] }
 0x107   :  { %v938_v58 = vadd.f32 %v937_v19, %v936_v7  ;;  %v962_v17 = vmul.f32 %v3265_v9, %v3418_v4  ;;  %v963_v46 = vmul.f32 %v3262_v6, %v924_v20  ;;  %v940_v42 = vmul.f32 %v932_v38, %v3342_v23 }
 0x108   :  { %v944_v29 = vmul.f32 %v932_v38, %v3340_v45  ;;  %v965_v37 = vmul.f32 %v928_v16, %v3356_v0  ;;  %v966_v26 = vmul.f32 %v932_v38, %v3358_v51  ;;  %v989_v31 = vmul.f32 %v3470_v36, %v3340_v45 }
 0x109   :  { %v990_v52 = vmul.f32 %v3472_v61, %v3342_v23  ;;  %v3480_v20 = vmul.f32 %v3472_v61, %v3340_v45  ;;  %v3484_v53 = vmul.f32 %v3470_v36, %v3342_v23  ;;  %v997_v55 = vmul.f32 %v3220_v13, %v3340_v45 }
 0x10a   :  { %v998_v39 = vmul.f32 %v3223_v2, %v3342_v23  ;;  %v1001_v43 = vmul.f32 %v3223_v2, %v3340_v45  ;;  %v1002_v12 = vmul.f32 %v3220_v13, %v3342_v23  ;;  %v1009_v5 = vmul.f32 %v3498_v60, %v3356_v0 }
 0x10b   :  { %v1010_v7 = vmul.f32 %v3500_v50, %v3358_v51  ;;  %v3508_v19 = vmul.f32 %v3500_v50, %v3356_v0  ;;  %v3512_v28 = vmul.f32 %v3498_v60, %v3358_v51  ;;  %v1017_v1 = vmul.f32 %v3262_v6, %v3356_v0 }
 0x10c   :  { %v1018_v4 = vmul.f32 %v3265_v9, %v3358_v51  ;;  %v1021_v22 = vmul.f32 %v3265_v9, %v3356_v0  ;;  %v1022_v49 = vmul.f32 %v3262_v6, %v3358_v51  ;;  %v941_v3 = vsub.f32 %v939_v24, %v940_v42 }
 0x10d   :  { %v945_v21 = vadd.f32 %v944_v29, %v943_v40  ;;  %v969_v23 = vmul.f32 %v928_v16, %v3358_v51  ;;  %v970_v62 = vmul.f32 %v932_v38, %v3356_v0  ;;  %v886_v45 = vmul.f32 %v885_v18, %v880_v14 }
 0x10e   :  { %v889_v34 = vmul.f32 %v883_v15, %v880_v14  ;;  %v961_v32 = vsub.f32 %v3456_v11, %v3459_v59  ;;  %v964_v44 = vadd.f32 %v963_v46, %v962_v17  ;;  %v991_v54 = vadd.f32 %v990_v52, %v989_v31 }
 0x10f   :  { %v995_v24 = vsub.f32 %v3480_v20, %v3484_v53  ;;  %v1011_v40 = vadd.f32 %v1010_v7, %v1009_v5  ;;  %v1015_v16 = vsub.f32 %v3508_v19, %v3512_v28  ;;  %v999_v18 = vadd.f32 %v998_v39, %v997_v55 }
 0x110   :  { %v1003_v15 = vsub.f32 %v1001_v43, %v1002_v12  ;;  %v1019_v38 = vadd.f32 %v1018_v4, %v1017_v1  ;;  %v1023_v14 = vsub.f32 %v1021_v22, %v1022_v49  ;;  %v942_v11 = vadd.f32 %v941_v3, %v935_v30 }
 0x111   :  { %v946_v59 = vadd.f32 %v945_v21, %v938_v58  ;;  %v967_v17 = vsub.f32 %v965_v37, %v966_v26  ;;  %v971_v46 = vadd.f32 %v970_v62, %v969_v23  ;;  %v4666_v42 = vsub.f32 %v3330_v8, %v3412_v48 }
 0x112   :  { %v887_v31 = vsub.f32 %v3448_v25, %v886_v45  ;;  %v949_v52 = vstv %s3486_s20  ;;  %v951_v5 = vstv %s3488_s21  ;;  %v820_v55 = vadd.f32 %v3442_v47, %v3326_v35  ;;  %s3899_s20 = sld [smem:[#allocation12 + $0x6]]  ;;  %s3924_s21 = sld [smem:[#allocation12 + $0x7]] }
 0x113   :  { %v816_v29 = vadd.f32 %v4666_v42, %v3323_v41  ;;  %v4667_v21 = vsub.f32 %v3420_v10, %v3422_v63  ;;  %v3547_v62 = vadd.f32 %v1011_v40, %v991_v54  ;;  %v1016_v49 = vadd.f32 %v1015_v16, %v995_v24 }
 0x114   :  { %v3551_v22 = vadd.f32 %v3446_v57, %v3425_v56  ;;  %v891_v48 = vadd.f32 %v3450_v27, %v889_v34  ;;  %v1020_v41 = vadd.f32 %v1019_v38, %v999_v18  ;;  %v1024_v8 = vadd.f32 %v1023_v14, %v1003_v15  ;;  %v4668_v38 = vld [vmem:[#allocation27_spill] sm:$0xff]  ;;  %v4669_v14 = vld [vmem:[#allocation28_spill] sm:$0xff] }
 0x115   :  { %v862_v3 = vadd.f32 %v4667_v21, %v3416_v33  ;;  %v950_v45 = vmul.f32 %v949_v52, %v942_v11  ;;  %v952_v23 = vmul.f32 %v951_v5, %v946_v59  ;;  %v968_v4 = vadd.f32 %v967_v17, %v961_v32  ;;  %v4671_v17 = vld [vmem:[#allocation39_spill] sm:$0xff] }
 0x116   :  { %v972_v35 = vadd.f32 %v971_v46, %v964_v44  ;;  %v3554_v1 = vadd.f32 %v887_v31, %v816_v29  ;;  %v955_v47 = vmul.f32 %v949_v52, %v946_v59  ;;  %v975_v10 = vstv %s3526_s22  ;;  %v4670_v59 = vld [vmem:[#allocation38_spill] sm:$0xff]  ;;  %s3944_s22 = sld [smem:[#allocation9 + $0xf]] }
 0x117   :  { %v977_v33 = vstv %s3528_s25  ;;  %v1025_v54 = vmul.f32 %v3220_v13, %v3547_v62  ;;  %v1026_v34 = vmul.f32 %v3223_v2, %v1016_v49  ;;  %v1028_v63 = vmul.f32 %v3223_v2, %v3547_v62  ;;  %s3946_s25 = sld [smem:[#allocation10 + $0xf]] }
 0x118   :  { %v1029_v32 = vmul.f32 %v3220_v13, %v1016_v49  ;;  %v1031_v44 = vmul.f32 %v1020_v41, %v3470_v36  ;;  %v1032_v56 = vmul.f32 %v1024_v8, %v3472_v61  ;;  %v1035_v57 = vmul.f32 %v1020_v41, %v3472_v61 }
 0x119   :  { %v1036_v25 = vmul.f32 %v1024_v8, %v3470_v36  ;;  %v953_v27 = vsub.f32 %v950_v45, %v952_v23  ;;  %v956_v30 = vmul.f32 %v951_v5, %v942_v11  ;;  %v3572_v58 = vmul.f32 %v975_v10, %v968_v4 }
 0x11a   :  { %v3574_v37 = vmul.f32 %v977_v33, %v972_v35  ;;  %v981_v26 = vmul.f32 %v975_v10, %v972_v35  ;;  %v982_v39 = vmul.f32 %v977_v33, %v968_v4  ;;  %v1051_v43 = vmul.f32 %v3262_v6, %v3547_v62 }
 0x11b   :  { %v1052_v12 = vmul.f32 %v3265_v9, %v1016_v49  ;;  %v1027_v7 = vsub.f32 %v1025_v54, %v1026_v34  ;;  %v1030_v24 = vadd.f32 %v1029_v32, %v1028_v63  ;;  %v1057_v40 = vmul.f32 %v1020_v41, %v3498_v60  ;;  %v4672_v54 = vld [vmem:[#allocation42_spill] sm:$0xff]  ;;  %v4673_v34 = vld [vmem:[#allocation35_spill] sm:$0xff] }
 0x11c   :  { %v1058_v16 = vmul.f32 %v1024_v8, %v3500_v50  ;;  %v1033_v18 = vsub.f32 %v1031_v44, %v1032_v56  ;;  %v1037_v15 = vadd.f32 %v1036_v25, %v1035_v57  ;;  %v1077_v11 = vsub.f32 %v4669_v14, %v4668_v38  ;;  %v4674_v32 = vld [vmem:[#allocation31_spill] sm:$0xff]  ;;  %v4676_v56 = vld [vmem:[#allocation45_spill] sm:$0xff]  ;;  %v4677_v25 = vld [vmem:[#allocation46_spill] sm:$0xff] }
 0x11d   :  { %v1079_v46 = vsub.f32 %v4671_v17, %v4670_v59  ;;  %v892_v42 = vadd.f32 %v891_v48, %v820_v55  ;;  %v3589_v29 = vadd.f32 %v953_v27, %v862_v3  ;;  %v957_v31 = vadd.f32 %v956_v30, %v955_v47  ;;  %v4682_v38 = vld [vmem:[#allocation29_spill] sm:$0xff] }
 0x11e   :  { %v979_v52 = vsub.f32 %v3572_v58, %v3574_v37  ;;  %v983_v5 = vadd.f32 %v982_v39, %v981_v26  ;;  %v1041_v21 = vstv %s3558_s26  ;;  %v1043_v45 = vstv %s3560_s27  ;;  %s3948_s26 = sld [smem:[#allocation12 + $0x8]] }
 0x11f   :  { %v1054_v23 = vmul.f32 %v3265_v9, %v3547_v62  ;;  %v1053_v4 = vsub.f32 %v1051_v43, %v1052_v12  ;;  %v1055_v35 = vmul.f32 %v3262_v6, %v1016_v49  ;;  %v1061_v10 = vmul.f32 %v1020_v41, %v3500_v50  ;;  %v4675_v49 = vld [vmem:[#allocation36_spill] sm:$0xff]  ;;  %v4678_v12 = vld [vmem:[#allocation25_spill] sm:$0xff]  ;;  %s3988_s27 = sld [smem:[#allocation13]] }
 0x120   :  { %v1062_v33 = vmul.f32 %v1024_v8, %v3498_v60  ;;  %v1034_v55 = vadd.f32 %v1033_v18, %v1027_v7  ;;  %v1038_v3 = vadd.f32 %v1037_v15, %v1030_v24  ;;  %v1059_v48 = vsub.f32 %v1057_v40, %v1058_v16  ;;  %v4679_v40 = vld [vmem:[#allocation32_spill] sm:$0xff]  ;;  %v4680_v16 = vld [vmem:[#allocation33_spill] sm:$0xff]  ;;  %v4681_v15 = vld [vmem:[#allocation34_spill] sm:$0xff] }
 0x121   :  { %v3600_v47 = vadd.f32 %v1079_v46, %v1077_v11  ;;  %v1119_v63 = vmul.f32 %v4673_v34, %v4672_v54  ;;  %v1120_v44 = vmul.f32 %v4675_v49, %v4674_v32  ;;  %v1123_v41 = vmul.f32 %v4675_v49, %v4672_v54 }
 0x122   :  { %v1124_v8 = vmul.f32 %v4673_v34, %v4674_v32  ;;  %v1129_v57 = vmul.f32 %v4676_v56, %v3356_v0  ;;  %v1130_v27 = vmul.f32 %v4677_v25, %v3358_v51  ;;  %v1133_v30 = vmul.f32 %v4677_v25, %v3356_v0 }
 0x123   :  { %v1134_v58 = vmul.f32 %v4676_v56, %v3358_v51  ;;  %v1056_v37 = vadd.f32 %v1055_v35, %v1054_v23  ;;  %v1063_v26 = vadd.f32 %v1062_v33, %v1061_v10  ;;  %v1067_v39 = vstv %s3581_s28  ;;  %s3995_s28 = sld [smem:[#allocation13 + $0x1]] }
 0x124   :  { %v1069_v43 = vstv %s3583_s1  ;;  %v1081_v7 = vmul.f32 %v4673_v34, %v4678_v12  ;;  %v1084_v24 = vmul.f32 %v4675_v49, %v4678_v12  ;;  %v1117_v18 = vsub.f32 %v4680_v16, %v4679_v40  ;;  %s3997_s1 = sld [smem:[#allocation9 + $0x8f]] }
 0x125   :  { %v1127_v14 = vsub.f32 %v4682_v38, %v4681_v15  ;;  %v3632_v11 = vmul.f32 %v1041_v21, %v1034_v55  ;;  %v3634_v59 = vmul.f32 %v1043_v45, %v1038_v3  ;;  %v1060_v17 = vadd.f32 %v1059_v48, %v1053_v4 }
 0x126   :  { %v1082_v46 = vmul.f32 %v4675_v49, %v3600_v47  ;;  %v1121_v23 = vadd.f32 %v1120_v44, %v1119_v63  ;;  %v1125_v35 = vsub.f32 %v1123_v41, %v1124_v8  ;;  %v1131_v10 = vadd.f32 %v1130_v27, %v1129_v57 }
 0x127   :  { %v1135_v33 = vsub.f32 %v1133_v30, %v1134_v58  ;;  %v1047_v51 = vmul.f32 %v1041_v21, %v1038_v3  ;;  %v1048_v0 = vmul.f32 %v1043_v45, %v1034_v55  ;;  %v1064_v40 = vadd.f32 %v1063_v26, %v1056_v37  ;;  %v3668_v37 = vld [vmem:[#allocation3 + $0x30] sm:$0xff] }
 0x128   :  { %v1085_v16 = vmul.f32 %v4673_v34, %v3600_v47  ;;  %v958_v15 = vadd.f32 %v957_v31, %v3551_v22  ;;  %v3642_v38 = vadd.f32 %v979_v52, %v3554_v1  ;;  %v3644_v4 = vadd.f32 %v983_v5, %v892_v42  ;;  %v4683_v42 = vld [vmem:[#allocation30_spill] sm:$0xff] }
 0x129   :  { %v1128_v48 = vadd.f32 %v1127_v14, %v1117_v18  ;;  %v3646_v9 = vmul.f32 %v1067_v39, %v1060_v17  ;;  %v1083_v63 = vsub.f32 %v1081_v7, %v1082_v46  ;;  %v1089_v44 = vstv %s3602_s29  ;;  %s3999_s29 = sld [smem:[#allocation10 + $0x8f]] }
 0x12a   :  { %v1091_v41 = vstv %s3604_s5  ;;  %v1045_v21 = vsub.f32 %v3632_v11, %v3634_v59  ;;  %v1074_v45 = vmul.f32 %v1069_v43, %v1060_v17  ;;  %v1132_v55 = vadd.f32 %v1131_v10, %v1121_v23  ;;  %s4034_s5 = sld [smem:[#allocation13 + $0x2]] }
 0x12b   :  { %v1136_v3 = vadd.f32 %v1135_v33, %v1125_v35  ;;  %v1049_v8 = vadd.f32 %v1048_v0, %v1047_v51  ;;  %v1070_v57 = vmul.f32 %v1069_v43, %v1064_v40  ;;  %v1086_v22 = vadd.f32 %v1085_v16, %v1084_v24  ;;  %v3671_v43 = vld [vmem:[#allocation7 + $0x30] sm:$0xff]  ;;  %v3688_v33 = vld [vmem:[#allocation3 + $0x78] sm:$0xff] }
 0x12c   :  { %v1099_v1 = vmul.f32 %v4676_v56, %v4678_v12  ;;  %v1137_v31 = vmul.f32 %v4673_v34, %v4683_v42  ;;  %v1138_v52 = vmul.f32 %v4675_v49, %v1128_v48  ;;  %v1140_v5 = vmul.f32 %v4675_v49, %v4683_v42  ;;  %4684 = vst [vmem:[#allocation37_spill] sm:$0xff] %v3671_v43 }
 0x12d   :  { %v1141_v27 = vmul.f32 %v4673_v34, %v1128_v48  ;;  %v1073_v0 = vmul.f32 %v1067_v39, %v1064_v40  ;;  %v1090_v51 = vmul.f32 %v1089_v44, %v1083_v63  ;;  %v1100_v30 = vmul.f32 %v4677_v25, %v3600_v47  ;;  %4685 = vst [vmem:[#allocation26_spill] sm:$0xff] %v3688_v33  ;;  %v3691_v40 = vld [vmem:[#allocation7 + $0x78] sm:$0xff] }
 0x12e   :  { %v1102_v58 = vmul.f32 %v4677_v25, %v4678_v12  ;;  %v1143_v26 = vmul.f32 %v3668_v37, %v1132_v55  ;;  %v1144_v7 = vmul.f32 %v3671_v43, %v1136_v3  ;;  %v1147_v24 = vmul.f32 %v3671_v43, %v1132_v55  ;;  %4686 = vst [vmem:[#allocation40_spill] sm:$0xff] %v3691_v40 }
 0x12f   :  { %v1148_v18 = vmul.f32 %v3668_v37, %v1136_v3  ;;  %v1092_v39 = vmul.f32 %v1091_v41, %v1086_v22  ;;  %v1095_v14 = vmul.f32 %v1089_v44, %v1086_v22  ;;  %v1096_v11 = vmul.f32 %v1091_v41, %v1083_v63 }
 0x130   :  { %v1103_v59 = vmul.f32 %v4676_v56, %v3600_v47  ;;  %v1139_v12 = vsub.f32 %v1137_v31, %v1138_v52  ;;  %v1142_v17 = vadd.f32 %v1141_v27, %v1140_v5  ;;  %v1163_v46 = vmul.f32 %v4676_v56, %v4683_v42 }
 0x131   :  { %v1164_v23 = vmul.f32 %v4677_v25, %v1128_v48  ;;  %v1166_v35 = vmul.f32 %v4677_v25, %v4683_v42  ;;  %v1167_v10 = vmul.f32 %v4676_v56, %v1128_v48  ;;  %v1169_v47 = vmul.f32 %v3688_v33, %v1132_v55 }
 0x132   :  { %v1170_v16 = vmul.f32 %v3691_v40, %v1136_v3  ;;  %v1145_v63 = vsub.f32 %v1143_v26, %v1144_v7  ;;  %v1149_v44 = vadd.f32 %v1148_v18, %v1147_v24  ;;  %v1173_v41 = vmul.f32 %v3691_v40, %v1132_v55 }
 0x133   :  { %v1174_v22 = vmul.f32 %v3688_v33, %v1136_v3  ;;  %v1046_v48 = vadd.f32 %v1045_v21, %v3589_v29  ;;  %v1050_v42 = vadd.f32 %v1049_v8, %v958_v15  ;;  %v1101_v31 = vsub.f32 %v1099_v1, %v1100_v30 }
 0x134   :  { %v1104_v52 = vadd.f32 %v1103_v59, %v1102_v58  ;;  %v1071_v5 = vsub.f32 %v3646_v9, %v1070_v57  ;;  %v1075_v27 = vadd.f32 %v1074_v45, %v1073_v0  ;;  %v1107_v26 = vstv %s3654_s6 }
 0x135   :  { %v1109_v7 = vstv %s3656_s30  ;;  %v1093_v24 = vsub.f32 %v1090_v51, %v1092_v39  ;;  %v1097_v55 = vadd.f32 %v1096_v11, %v1095_v14  ;;  %v1165_v18 = vsub.f32 %v1163_v46, %v1164_v23 }
 0x136   :  { %v1171_v3 = vsub.f32 %v1169_v47, %v1170_v16  ;;  %v1146_v40 = vadd.f32 %v1145_v63, %v1139_v12  ;;  %v1150_v33 = vadd.f32 %v1149_v44, %v1142_v17  ;;  %v1168_v43 = vadd.f32 %v1167_v10, %v1166_v35 }
 0x137   :  { %v1175_v29 = vadd.f32 %v1174_v22, %v1173_v41  ;;  %v1108_v15 = vmul.f32 %v1107_v26, %v1101_v31  ;;  %v1110_v21 = vmul.f32 %v1109_v7, %v1104_v52  ;;  %v1153_v8 = vstv %s3678_s10 }
 0x138   :  { %v1155_v1 = vstv %s3680_s11  ;;  %v1072_v30 = vadd.f32 %v1071_v5, %v3642_v38  ;;  %v1113_v9 = vmul.f32 %v1107_v26, %v1104_v52  ;;  %v1114_v45 = vmul.f32 %v1109_v7, %v1101_v31  ;;  %v3742_v52 = vld [vmem:[#allocation7] sm:$0xff]  ;;  %v3748_v7 = vld [vmem:[#allocation3 + $0x8] sm:$0xff]  ;;  %s4186_s11 = sld [smem:[#allocation13 + $0x5]] }
 0x139   :  { %v1076_v57 = vadd.f32 %v1075_v27, %v3644_v4  ;;  %v1094_v0 = vadd.f32 %v1093_v24, %v1046_v48  ;;  %v3708_v51 = vadd.f32 %v1097_v55, %v1050_v42  ;;  %v1172_v58 = vadd.f32 %v1171_v3, %v1165_v18  ;;  %v3738_v42 = vld [vmem:[#allocation3] sm:$0xff]  ;;  %v3752_v55 = vld [vmem:[#allocation7 + $0x8] sm:$0xff] }
 0x13a   :  { %v1154_v39 = vmul.f32 %v1153_v8, %v1146_v40  ;;  %v1156_v14 = vmul.f32 %v1155_v1, %v1150_v33  ;;  %v1176_v11 = vadd.f32 %v1175_v29, %v1168_v43  ;;  %v1179_v59 = vstv %s3696_s12  ;;  %s4219_s12 = sld [smem:[#allocation13 + $0x6]] }
 0x13b   :  { %v1111_v12 = vsub.f32 %v1108_v15, %v1110_v21  ;;  %v1181_v17 = vstv %s3699_s13  ;;  %v1189_v46 = vsub.f32 %v3484_v53, %v3480_v20  ;;  %v1199_v38 = vsub.f32 %v3512_v28, %v3508_v19  ;;  %s4260_s13 = sld [smem:[#allocation13 + $0x7]] }
 0x13c   :  { %v1115_v23 = vadd.f32 %v1114_v45, %v1113_v9  ;;  %v1159_v35 = vmul.f32 %v1153_v8, %v1150_v33  ;;  %v1160_v10 = vmul.f32 %v1155_v1, %v1146_v40  ;;  %v1191_v4 = vmul.f32 %v4673_v34, %v3470_v36 }
 0x13d   :  { %v1180_v47 = vmul.f32 %v1179_v59, %v1172_v58  ;;  %v1192_v16 = vmul.f32 %v4675_v49, %v3472_v61  ;;  %v3722_v43 = vmul.f32 %v4675_v49, %v3470_v36  ;;  %v3726_v20 = vmul.f32 %v4673_v34, %v3472_v61 }
 0x13e   :  { %v1157_v53 = vsub.f32 %v1154_v39, %v1156_v14  ;;  %v1182_v28 = vmul.f32 %v1181_v17, %v1176_v11  ;;  %v1185_v19 = vmul.f32 %v1179_v59, %v1176_v11  ;;  %v1186_v33 = vmul.f32 %v1181_v17, %v1172_v58  ;;  %v3778_v58 = vld [vmem:[#allocation7 + $0x48] sm:$0xff]  ;;  %v3788_v59 = vld [vmem:[#allocation7 + $0x50] sm:$0xff]  ;;  %v3792_v17 = vld [vmem:[#allocation3 + $0x10] sm:$0xff] }
 0x13f   :  { %v1112_v40 = vadd.f32 %v1111_v12, %v1072_v30  ;;  %v3728_v63 = vadd.f32 %v1199_v38, %v1189_v46  ;;  %v1201_v44 = vmul.f32 %v4676_v56, %v3498_v60  ;;  %v1202_v41 = vmul.f32 %v4677_v25, %v3500_v50  ;;  %4687 = vst [vmem:[#allocation27_spill] sm:$0xff] %v3788_v59  ;;  %v3796_v38 = vld [vmem:[#allocation7 + $0x10] sm:$0xff] }
 0x140   :  { %v1116_v22 = vadd.f32 %v1115_v23, %v1076_v57  ;;  %v1161_v48 = vadd.f32 %v1160_v10, %v1159_v35  ;;  %v1315_v31 = vmul.f32 %v3738_v42, %v3738_v42  ;;  %v1316_v5 = vmul.f32 %v3742_v52, %v3742_v52  ;;  %v3774_v57 = vld [vmem:[#allocation3 + $0x48] sm:$0xff]  ;;  %4688 = vst [vmem:[#allocation28_spill] sm:$0xff] %v3792_v17 }
 0x141   :  { %v1193_v27 = vadd.f32 %v1192_v16, %v1191_v4  ;;  %v1197_v26 = vsub.f32 %v3722_v43, %v3726_v20  ;;  %v1346_v24 = vmul.f32 %v3748_v7, %v3748_v7  ;;  %v1347_v18 = vmul.f32 %v3752_v55, %v3752_v55  ;;  %4689 = vst [vmem:[#allocation38_spill] sm:$0xff] %v3796_v38  ;;  %v3811_v43 = vld [vmem:[#allocation3 + $0x28] sm:$0xff] }
 0x142   :  { %v3756_v3 = vadd.f32 %v1157_v53, %v1094_v0  ;;  %v1183_v29 = vsub.f32 %v1180_v47, %v1182_v28  ;;  %v1187_v15 = vadd.f32 %v1186_v33, %v1185_v19  ;;  %v1205_v21 = vmul.f32 %v4677_v25, %v3498_v60  ;;  %4693 = vst [vmem:[#allocation31_spill] sm:$0xff] %v3811_v43 }
 0x143   :  { %v1203_v8 = vadd.f32 %v1202_v41, %v1201_v44  ;;  %v1206_v1 = vmul.f32 %v4676_v56, %v3500_v50  ;;  %v3764_v30 = vmul.f32 %v4673_v34, %v3547_v62  ;;  %v3768_v9 = vmul.f32 %v4675_v49, %v3728_v63  ;;  %v3782_v34 = vld [vmem:[#allocation3 + $0x50] sm:$0xff] }
 0x144   :  { %v3772_v45 = vadd.f32 %v1316_v5, %v1315_v31  ;;  %v1318_v0 = vmul.f32 %v3774_v57, %v3774_v57  ;;  %v1319_v39 = vmul.f32 %v3778_v58, %v3778_v58  ;;  %v1349_v14 = vmul.f32 %v3782_v34, %v3782_v34  ;;  %v3830_v5 = vld [vmem:[#allocation7 + $0x58] sm:$0xff] }
 0x145   :  { %v1348_v11 = vadd.f32 %v1347_v18, %v1346_v24  ;;  %v1350_v12 = vmul.f32 %v3788_v59, %v3788_v59  ;;  %v1377_v46 = vmul.f32 %v3792_v17, %v3792_v17  ;;  %v1378_v23 = vmul.f32 %v3796_v38, %v3796_v38  ;;  %4695 = vst [vmem:[#allocation45_spill] sm:$0xff] %v3830_v5 }
 0x146   :  { %v3801_v35 = vadd.f32 %v1161_v48, %v3708_v51  ;;  %v3803_v10 = vadd.f32 %v1183_v29, %v1112_v40  ;;  %v3805_v4 = vadd.f32 %v1187_v15, %v1116_v22  ;;  %v1212_v47 = vmul.f32 %v4675_v49, %v3547_v62  ;;  %v3826_v48 = vld [vmem:[#allocation3 + $0x58] sm:$0xff] }
 0x147   :  { %v1207_v16 = vsub.f32 %v1205_v21, %v1206_v1  ;;  %v1213_v20 = vmul.f32 %v3811_v43, %v3728_v63  ;;  %v1204_v19 = vadd.f32 %v1203_v8, %v1193_v27  ;;  %v3819_v51 = vmul.f32 %v4676_v56, %v3547_v62  ;;  %4694 = vst [vmem:[#allocation36_spill] sm:$0xff] %v3826_v48 }
 0x148   :  { %4690 = vst [vmem:[#allocation39_spill] sm:$0xff] %v3801_v35  ;;  %4691 = vst [vmem:[#allocation42_spill] sm:$0xff] %v3803_v10  ;;  %v1320_v33 = vadd.f32 %v1319_v39, %v1318_v0  ;;  %v1321_v40 = vmul.f32 2.0, %v3772_v45  ;;  %v1351_v44 = vadd.f32 %v1350_v12, %v1349_v14  ;;  %v1352_v41 = vmul.f32 2.0, %v1348_v11 }
 0x149   :  { %4692 = vst [vmem:[#allocation35_spill] sm:$0xff] %v3805_v4  ;;  %v1379_v22 = vadd.f32 %v1378_v23, %v1377_v46  ;;  %v1380_v31 = vmul.f32 %v3826_v48, %v3826_v48  ;;  %v1381_v27 = vmul.f32 %v3830_v5, %v3830_v5  ;;  %v1408_v24 = vmul.f32 %v3220_v13, %v3220_v13  ;;  %v3878_v4 = vld [vmem:[#allocation3 + $0x70] sm:$0xff] }
 0x14a   :  { %v1409_v18 = vmul.f32 %v3223_v2, %v3223_v2  ;;  %v1208_v29 = vadd.f32 %v1207_v16, %v1197_v26  ;;  %v3838_v15 = vadd.f32 %v1213_v20, %v1212_v47  ;;  %v3842_v21 = vmul.f32 %v4677_v25, %v3728_v63  ;;  %4699 = vst [vmem:[#allocation25_spill] sm:$0xff] %v3878_v4 }
 0x14b   :  { %v1238_v8 = vmul.f32 %v4677_v25, %v3547_v62  ;;  %v1239_v1 = vmul.f32 %v4676_v56, %v3728_v63  ;;  %v1322_v39 = vadd.f32 %v1321_v40, %v1320_v33  ;;  %v1337_v13 = vmul.f32 2.0, %v1320_v33  ;;  %v4696_v63 = vld [vmem:[#allocation41_spill] sm:$0xff]  ;;  %v4697_v40 = vld [vmem:[#allocation43_spill] sm:$0xff]  ;;  %v3873_v56 = vld [vmem:[#allocation7 + $0x28] sm:$0xff] }
 0x14c   :  { %v1323_v14 = vstv %s3786_s18  ;;  %v1353_v12 = vadd.f32 %v1352_v41, %v1351_v44  ;;  %v1368_v46 = vmul.f32 2.0, %v1351_v44  ;;  %v1383_v2 = vmul.f32 2.0, %v1379_v22  ;;  %4698 = vst [vmem:[#allocation46_spill] sm:$0xff] %v3873_v56  ;;  %s2406_s18 = smov [#allocation16]  }
 0x14d   :  { %v3851_v26 = vmul.f32 %v1204_v19, %v4672_v54  ;;  %v1354_v23 = vstv %s3809_s0  ;;  %v1382_v47 = vadd.f32 %v1381_v27, %v1380_v31  ;;  %v1410_v16 = vadd.f32 %v1409_v18, %v1408_v24  ;;  %s2053_s0 = sshll.u32 %s2406_s18, 4  ;;  %s4411_s0 = int_to_ptr.vmem [resolvable:$true] %s2053_s0 }
 0x14e   :  { %v1219_v62 = vmul.f32 %v1204_v19, %v4674_v32  ;;  %v1411_v25 = vmul.f32 %v3262_v6, %v3262_v6  ;;  %v1412_v20 = vmul.f32 %v4696_v63, %v4696_v63  ;;  %v1216_v33 = vmul.f32 %v1208_v29, %v4674_v32 }
 0x14f   :  { %v3867_v44 = vmul.f32 %v1204_v19, %v4697_v40  ;;  %v1324_v41 = vmul.f32 %v1323_v14, %v1322_v39  ;;  %v1338_v31 = vadd.f32 %v1337_v13, %v3772_v45  ;;  %v1355_v27 = vmul.f32 %v1354_v23, %v1353_v12 }
 0x150   :  { %v1369_v24 = vadd.f32 %v1368_v46, %v1348_v11  ;;  %v1384_v18 = vadd.f32 %v1383_v2, %v1382_v47  ;;  %v1439_v0 = vmul.f32 %v3811_v43, %v3811_v43  ;;  %v1385_v28 = vstv %s3824_s3  ;;  %v3882_v11 = vld [vmem:[#allocation7 + $0x70] sm:$0xff]  ;;  %v4701_v46 = vld [vmem:[#allocation44_spill] sm:$0xff] }
 0x151   :  { %v1399_v53 = vmul.f32 2.0, %v1382_v47  ;;  %v1414_v6 = vmul.f32 2.0, %v1410_v16  ;;  %v1440_v63 = vmul.f32 %v3873_v56, %v3873_v56  ;;  %v1220_v49 = vmul.f32 %v1208_v29, %v4672_v54  ;;  %4700 = vst [vmem:[#allocation32_spill] sm:$0xff] %v3882_v11 }
 0x152   :  { %v1413_v39 = vadd.f32 %v1412_v20, %v1411_v25  ;;  %v1442_v45 = vmul.f32 %v3878_v4, %v3878_v4  ;;  %v1443_v13 = vmul.f32 %v3882_v11, %v3882_v11  ;;  %v1240_v12 = vadd.f32 %v1239_v1, %v1238_v8 }
 0x153   :  { %v1242_v2 = vmul.f32 %v1208_v29, %v4701_v46  ;;  %v1245_v47 = vmul.f32 %v1204_v19, %v4701_v46  ;;  %v1441_v10 = vadd.f32 %v1440_v63, %v1439_v0  ;;  %v1339_v25 = vmul.f32 %v1338_v31, %v1323_v14 }
 0x154   :  { %v1356_v20 = vadd.f32 %v1355_v27, %v1324_v41  ;;  %v1370_v56 = vmul.f32 %v1369_v24, %v1354_v23  ;;  %v1386_v43 = vmul.f32 %v1385_v28, %v1384_v18  ;;  %v1246_v4 = vmul.f32 %v1208_v29, %v4697_v40 }
 0x155   :  { %v1253_v5 = vstv %s3853_s15  ;;  %v1400_v38 = vadd.f32 %v1399_v53, %v1379_v22  ;;  %v1415_v48 = vadd.f32 %v1414_v6, %v1413_v39  ;;  %v1416_v17 = vstv %s3859_s19  ;;  %v4702_v53 = vld [vmem:[#allocation37_spill] sm:$0xff] }
 0x156   :  { %v1430_v35 = vmul.f32 2.0, %v1413_v39  ;;  %v1444_v11 = vadd.f32 %v1443_v13, %v1442_v45  ;;  %v1445_v8 = vmul.f32 2.0, %v1441_v10  ;;  %v1217_v1 = vsub.f32 %v3851_v26, %v1216_v33  ;;  %v4703_v26 = vld [vmem:[#allocation26_spill] sm:$0xff] }
 0x157   :  { %v1221_v59 = vadd.f32 %v1220_v49, %v1219_v62  ;;  %v1261_v19 = vmul.f32 %v3668_v37, %v3470_v36  ;;  %v1470_v0 = vmul.f32 %v3668_v37, %v3668_v37  ;;  %v1243_v14 = vsub.f32 %v3867_v44, %v1242_v2  ;;  %v4704_v62 = vld [vmem:[#allocation40_spill] sm:$0xff] }
 0x158   :  { %v1371_v29 = vadd.f32 %v1370_v56, %v1339_v25  ;;  %v1387_v23 = vadd.f32 %v1386_v43, %v1356_v20  ;;  %v1471_v22 = vmul.f32 %v4702_v53, %v4702_v53  ;;  %v1401_v41 = vmul.f32 %v1400_v38, %v1385_v28 }
 0x159   :  { %v1417_v31 = vmul.f32 %v1416_v17, %v1415_v48  ;;  %v1473_v49 = vmul.f32 %v4703_v26, %v4703_v26  ;;  %v1474_v33 = vmul.f32 %v4704_v62, %v4704_v62  ;;  %v1431_v27 = vadd.f32 %v1430_v35, %v1410_v16 }
 0x15a   :  { %v1446_v24 = vadd.f32 %v1445_v8, %v1444_v11  ;;  %v1461_v18 = vmul.f32 2.0, %v1444_v11  ;;  %v1472_v6 = vadd.f32 %v1471_v22, %v1470_v0  ;;  %v1247_v44 = vadd.f32 %v1246_v4, %v1245_v47 }
 0x15b   :  { %v1262_v43 = vmul.f32 %v4702_v53, %v3472_v61  ;;  %v1447_v56 = vstv %s3888_s4  ;;  %v1475_v63 = vadd.f32 %v1474_v33, %v1473_v49  ;;  %v3912_v38 = vmul.f32 %v4702_v53, %v3470_v36 }
 0x15c   :  { %v3916_v28 = vmul.f32 %v3668_v37, %v3472_v61  ;;  %v1269_v35 = vmul.f32 %v4703_v26, %v3498_v60  ;;  %v1476_v48 = vmul.f32 2.0, %v1472_v6  ;;  %v4705_v4 = vsub.f32 %v3764_v30, %v3768_v9 }
 0x15d   :  { %v1222_v39 = vadd.f32 %v1221_v59, %v3838_v15  ;;  %v1402_v45 = vadd.f32 %v1401_v41, %v1371_v29  ;;  %v1418_v11 = vadd.f32 %v1417_v31, %v1387_v23  ;;  %v1432_v13 = vmul.f32 %v1431_v27, %v1416_v17 }
 0x15e   :  { %v1218_v16 = vadd.f32 %v1217_v1, %v4705_v4  ;;  %v1448_v2 = vmul.f32 %v1447_v56, %v1446_v24  ;;  %v1462_v47 = vadd.f32 %v1461_v18, %v1441_v10  ;;  %v1477_v25 = vadd.f32 %v1476_v48, %v1475_v63 }
 0x15f   :  { %v1492_v20 = vmul.f32 2.0, %v1475_v63  ;;  %v1501_v8 = vmul.f32 %v4672_v54, %v4672_v54  ;;  %v1502_v30 = vmul.f32 %v4674_v32, %v4674_v32  ;;  %v1504_v9 = vmul.f32 %v4697_v40, %v4697_v40 }
 0x160   :  { %v4706_v59 = vsub.f32 %v3819_v51, %v3842_v21  ;;  %v1248_v1 = vadd.f32 %v1247_v44, %v1240_v12  ;;  %v1263_v0 = vadd.f32 %v1262_v43, %v1261_v19  ;;  %v1478_v17 = vstv %s3899_s20 }
 0x161   :  { %v4707_v29 = vstv %s3734_s14  ;;  %v4708_v23 = vstv %s3736_s16  ;;  %v1503_v54 = vadd.f32 %v1502_v30, %v1501_v8  ;;  %v1505_v32 = vmul.f32 %v4701_v46, %v4701_v46  ;;  %s4295_s14 = sld [smem:[#allocation13 + $0x8]]  ;;  %s2405_s16 = smov [#allocation15]  }
 0x162   :  { %v1244_v15 = vadd.f32 %v1243_v14, %v4706_v59  ;;  %v1226_v10 = vmul.f32 %v4707_v29, %v1218_v16  ;;  %v1228_v22 = vmul.f32 %v4708_v23, %v1222_v39  ;;  %v1270_v40 = vmul.f32 %v4704_v62, %v3500_v50 }
 0x163   :  { %v1433_v51 = vadd.f32 %v1432_v13, %v1402_v45  ;;  %v1449_v21 = vadd.f32 %v1448_v2, %v1418_v11  ;;  %v1463_v12 = vmul.f32 %v1462_v47, %v1447_v56  ;;  %v1479_v19 = vmul.f32 %v1478_v17, %v1477_v25 }
 0x164   :  { %v1493_v14 = vadd.f32 %v1492_v20, %v1472_v6  ;;  %v1506_v41 = vadd.f32 %v1505_v32, %v1504_v9  ;;  %v1507_v31 = vmul.f32 2.0, %v1503_v54  ;;  %v4709_v49 = vmov %v4707_v29 }
 0x165   :  { %v1231_v46 = vmul.f32 %v4709_v49, %v1222_v39  ;;  %v4710_v33 = vmov %v4708_v23  ;;  %v1267_v24 = vsub.f32 %v3912_v38, %v3916_v28  ;;  %v3958_v18 = vmul.f32 %v4704_v62, %v3498_v60 }
 0x166   :  { %v1232_v27 = vmul.f32 %v4710_v33, %v1218_v16  ;;  %v1229_v44 = vsub.f32 %v1226_v10, %v1228_v22  ;;  %v4711_v43 = vstv %s3770_s17  ;;  %v1508_v6 = vadd.f32 %v1507_v31, %v1506_v41  ;;  %v4017_v33 = vld [vmem:[#allocation3 + $0x68] sm:$0xff]  ;;  %s2041_s17 = sshll.u32 %s2405_s16, 4  ;;  %s2042_s17 = int_to_ptr.vmem [resolvable:$true] %s2041_s17 }
 0x167   :  { %v3962_v56 = vmul.f32 %v4711_v43, %v1244_v15  ;;  %v1509_v63 = vstv %s3924_s21  ;;  %v1271_v48 = vadd.f32 %v1270_v40, %v1269_v35  ;;  %v1523_v4 = vmul.f32 2.0, %v1506_v41  ;;  %v4013_v41 = vld [vmem:[#allocation7 + $0x20] sm:$0xff]  ;;  %4721 = vst [vmem:[#allocation37_spill] sm:$0xff] %v4017_v33  ;;  %s2333_s3 = scalar_lea.vmem %s2042_s17, 256  ;;  %p2338_p9 = scmp.lt.s32.totalorder %s2042_s17, %s2042_s17 }
 0x168   :  { %v1532_v16 = vmul.f32 %v3470_v36, %v3470_v36  ;;  %v1533_v39 = vmul.f32 %v3472_v61, %v3472_v61  ;;  %v1464_v45 = vadd.f32 %v1463_v12, %v1433_v51  ;;  %v1480_v11 = vadd.f32 %v1479_v19, %v1449_v21  ;;  %v4005_v21 = vld [vmem:[#allocation3 + $0x20] sm:$0xff]  ;;  %v4719_v12 = vld [vmem:[#allocation27_spill] sm:$0xff]  ;;  %4720 = vst [vmem:[#allocation44_spill] sm:$0xff] %v4013_v41  ;;  %p2334_p8 = scmp.ne.s32.totalorder %s2042_s17, %s2333_s3  ;;  %p2339_p10 = scmp.lt.s32.totalorder %s2333_s3, %s2333_s3 }
 0x169   :  { %4712 = vst [vmem:[#allocation33_spill] sm:$0xff] %v3962_v56  ;;  %v1494_v13 = vmul.f32 %v1493_v14, %v1478_v17  ;;  %v1535_v2 = vmul.f32 %v3498_v60, %v3498_v60  ;;  %v1510_v47 = vmul.f32 %v1509_v63, %v1508_v6  ;;  %v1524_v25 = vadd.f32 %v1523_v4, %v1503_v54 }
 0x16a   :  { %v1534_v20 = vadd.f32 %v1533_v39, %v1532_v16  ;;  %v1536_v35 = vmul.f32 %v3500_v50, %v3500_v50  ;;  %v1233_v8 = vadd.f32 %v1232_v27, %v1231_v46  ;;  %v3975_v36 = vmul.f32 %v1253_v5, %v1248_v1  ;;  %4718 = vst [vmem:[#allocation43_spill] sm:$0xff] %v4005_v21  ;;  %p2340_p11 = por %p2339_p10, %p2338_p9 }
 0x16b   :  { %v4714_v30 = vmov %v4711_v43  ;;  %v3983_v9 = vmul.f32 %v1253_v5, %v1244_v15  ;;  %v1274_v60 = vmul.f32 %v4703_v26, %v3500_v50  ;;  %v1495_v23 = vadd.f32 %v1494_v13, %v1464_v45 }
 0x16c   :  { %4713 = vst [vmem:[#allocation34_spill] sm:$0xff] %v3975_v36  ;;  %v3979_v61 = vmul.f32 %v4714_v30, %v1248_v1  ;;  %v1537_v17 = vadd.f32 %v1536_v35, %v1535_v2  ;;  %v1538_v29 = vmul.f32 2.0, %v1534_v20  ;;  %v1525_v22 = vmul.f32 %v1524_v25, %v1509_v63  ;;  %v4723_v25 = vld [vmem:[#allocation39_spill] sm:$0xff]  ;;  %v4725_v30 = vld [vmem:[#allocation28_spill] sm:$0xff]  ;;  %p2341_p12 = pnand %p2340_p11, %p2334_p8 }
 0x16d   :  { %4716 = vst [vmem:[#allocation30_spill] sm:$0xff] %v3983_v9  ;;  %v1540_v54 = vstv %s3948_s26  ;;  %v3993_v32 = vadd.f32 %v1229_v44, %v3756_v3  ;;  %v1272_v1 = vadd.f32 %v1271_v48, %v1263_v0  ;;  %v1511_v5 = vadd.f32 %v1510_v47, %v1480_v11  ;;  %v4021_v44 = vld [vmem:[#allocation7 + $0x68] sm:$0xff] }
 0x16e   :  { %4715 = vst [vmem:[#allocation29_spill] sm:$0xff] %v3979_v61  ;;  %v1539_v15 = vadd.f32 %v1538_v29, %v1537_v17  ;;  %v1326_v50 = vmul.f32 %v3774_v57, %v3738_v42  ;;  %v1327_v40 = vmul.f32 %v3778_v58, %v3742_v52  ;;  %v1554_v51 = vmul.f32 2.0, %v1537_v17  ;;  %4722 = vst [vmem:[#allocation26_spill] sm:$0xff] %v4021_v44 }
 0x16f   :  { %4717 = vst [vmem:[#allocation41_spill] sm:$0xff] %v3993_v32  ;;  %v1561_v3 = vmul.f32 %v4005_v21, %v4005_v21  ;;  %v1357_v0 = vmul.f32 %v3782_v34, %v3748_v7  ;;  %v1358_v19 = vmul.f32 %v4719_v12, %v3752_v55  ;;  %v1562_v31 = vmul.f32 %v4013_v41, %v4013_v41 }
 0x170   :  { %v1541_v14 = vmul.f32 %v1540_v54, %v1539_v15  ;;  %v1526_v49 = vadd.f32 %v1525_v22, %v1495_v23  ;;  %v1555_v46 = vadd.f32 %v1554_v51, %v1534_v20  ;;  %v1565_v27 = vmul.f32 %v4017_v33, %v4017_v33 }
 0x171   :  { %v1566_v43 = vmul.f32 %v4021_v44, %v4021_v44  ;;  %v1275_v6 = vsub.f32 %v3958_v18, %v1274_v60  ;;  %v4028_v63 = vmul.f32 %v3774_v57, %v3742_v52  ;;  %v1563_v4 = vadd.f32 %v1562_v31, %v1561_v3  ;;  %v4726_v60 = vld [vmem:[#allocation36_spill] sm:$0xff] }
 0x172   :  { %v1542_v48 = vadd.f32 %v1541_v14, %v1511_v5  ;;  %v1328_v16 = vadd.f32 %v1327_v40, %v1326_v50  ;;  %v4032_v39 = vmul.f32 %v3778_v58, %v3738_v42  ;;  %v1556_v45 = vmul.f32 %v1555_v46, %v1540_v54 }
 0x173   :  { %v1567_v11 = vadd.f32 %v1566_v43, %v1565_v27  ;;  %v1332_v13 = vstv %s3988_s27  ;;  %v4039_v18 = vmul.f32 %v3782_v34, %v3752_v55  ;;  %v1361_v52 = vmul.f32 %v4719_v12, %v3748_v7  ;;  %v4727_v55 = vld [vmem:[#allocation38_spill] sm:$0xff]  ;;  %v4728_v34 = vld [vmem:[#allocation45_spill] sm:$0xff] }
 0x174   :  { %v1570_v57 = vstv %s4455_s7  ;;  %v1359_v42 = vadd.f32 %v1358_v19, %v1357_v0  ;;  %v1557_v58 = vadd.f32 %v1556_v45, %v1526_v49  ;;  %v1572_v47 = vmul.f32 2.0, %v1542_v48 }
 0x175   :  { %v1568_v2 = vadd.f32 %v1567_v11, %v1563_v4  ;;  %v4047_v20 = vadd.f32 %v1233_v8, %v4723_v25  ;;  %v1363_v35 = vstv %s3995_s28  ;;  %v1388_v17 = vmul.f32 %v4726_v60, %v4725_v30  ;;  %v4064_v8 = vld [vmem:[%s4450_s2] sm:$0xff]  ;;  %s4105_s2 = sld [smem:[#allocation13 + $0x3]]  ;;  %v2232_v25 = vld [vmem:[#allocation7 + $0x60] sm:$0xff] }
 0x176   :  { %v1389_v29 = vmul.f32 %v4728_v34, %v4727_v55  ;;  %v4057_v7 = vadd.f32 %v1275_v6, %v1267_v24  ;;  %4729 = vst [vmem:[#allocation27_spill] sm:$0xff] %v4064_v8  ;;  %v4067_v5 = vmul.f32 %v3668_v37, %v1272_v1  ;;  %v4070_v15 = vmul.f32 %v4702_v53, %v1272_v1 }
 0x177   :  { %4724 = vst [vmem:[#allocation40_spill] sm:$0xff] %v4047_v20  ;;  %v1571_v54 = vmul.f32 %v1570_v57, %v1568_v2  ;;  %v1333_v50 = vmul.f32 %v1332_v13, %v1328_v16  ;;  %v1803_v40 = vmul.f32 2.0, %v1557_v58  ;;  %v1331_v38 = vsub.f32 %v4028_v63, %v4032_v39 }
 0x178   :  { %v1362_v28 = vsub.f32 %v4039_v18, %v1361_v52  ;;  %v1364_v24 = vmul.f32 %v1363_v35, %v1359_v42  ;;  %v1390_v3 = vadd.f32 %v1389_v29, %v1388_v17  ;;  %v4077_v0 = vmul.f32 %v4726_v60, %v4727_v55 }
 0x179   :  { %v1573_v51 = vadd.f32 %v1572_v47, %v1571_v54  ;;  %v4081_v12 = vmul.f32 %v4728_v34, %v4725_v30  ;;  %v1804_v19 = vadd.f32 %v1803_v40, %v1571_v54  ;;  %v4084_v14 = vmul.f32 %v4703_v26, %v1272_v1  ;;  %v2231_v47 = vld [vmem:[#allocation7 + $0x18] sm:$0xff] }
 0x17a   :  { %v4087_v31 = vmul.f32 %v4704_v62, %v1272_v1  ;;  %v4090_v49 = vstv %s4034_s5  ;;  %v4097_v27 = vmul.f32 %v4702_v53, %v4057_v7  ;;  %v4101_v43 = vmul.f32 %v3668_v37, %v4057_v7 }
 0x17b   :  { %v4093_v46 = vmul.f32 %v1573_v51, %v4064_v8  ;;  %v1341_v6 = vsub.f32 %v4032_v39, %v4028_v63  ;;  %v4108_v1 = vmul.f32 %v1804_v19, %v4064_v8  ;;  %v1335_v48 = vmul.f32 %v1332_v13, %v1331_v38  ;;  %v2229_v63 = vld [vmem:[#allocation3 + $0x18] sm:$0xff]  ;;  %v2230_v39 = vld [vmem:[#allocation3 + $0x60] sm:$0xff] }
 0x17c   :  { %4730 = vst [vmem:[#allocation39_spill] sm:$0xff] %v4087_v31  ;;  %v1372_v4 = vsub.f32 %v1361_v52, %v4039_v18  ;;  %v1365_v11 = vadd.f32 %v1364_v24, %v1333_v50  ;;  %v1366_v57 = vmul.f32 %v1363_v35, %v1362_v28  ;;  %v1393_v42 = vsub.f32 %v4077_v0, %v4081_v12 }
 0x17d   :  { %4731 = vst [vmem:[#allocation28_spill] sm:$0xff] %v4093_v46  ;;  %4732 = vst [vmem:[#allocation36_spill] sm:$0xff] %v4108_v1  ;;  %v4566_v16 = vand.u32 2147483647, %v4093_v46  ;;  %v1578_v45 = vand.u32 2139095040, %v4093_v46  ;;  %v1395_v58 = vmul.f32 %v4090_v49, %v1390_v3  ;;  %v1419_v2 = vmul.f32 %v2230_v39, %v2229_v63 }
 0x17e   :  { %v1420_v30 = vmul.f32 %v2232_v25, %v2231_v47  ;;  %v1809_v18 = vand.u32 2139095040, %v4108_v1  ;;  %v4117_v52 = vmul.f32 %v2231_v47, %v2230_v39  ;;  %v4119_v17 = vmul.f32 %v2232_v25, %v2229_v63  ;;  %v4735_v47 = vld [vmem:[#allocation46_spill] sm:$0xff]  ;;  %v4736_v25 = vld [vmem:[#allocation32_spill] sm:$0xff] }
 0x17f   :  { %v1579_v60 = vshrl.u32 %v1578_v45, 23  ;;  %v1582_v55 = vand.u32 8388607, %v4566_v16  ;;  %v4565_v34 = vand.u32 2147483647, %v4108_v1  ;;  %v4126_v29 = vmul.f32 %v4704_v62, %v4057_v7 }
 0x180   :  { %v4128_v54 = vmul.f32 %v1341_v6, %v1332_v13  ;;  %v1810_v40 = vshrl.u32 %v1809_v18, 23  ;;  %v4130_v38 = vadd.f32 %v1366_v57, %v1335_v48  ;;  %v4132_v28 = vmul.f32 %v1372_v4, %v1363_v35  ;;  %v4733_v57 = vld [vmem:[#allocation31_spill] sm:$0xff] }
 0x181   :  { %v2149_v50 = vadd.s32 4294967169, %v1579_v60  ;;  %v4135_v24 = vmul.f32 %v4090_v49, %v1393_v42  ;;  %v4139_v3 = vadd.f32 %v1395_v58, %v1365_v11  ;;  %v4141_v19 = vadd.f32 %v1420_v30, %v1419_v2  ;;  %v4734_v42 = vld [vmem:[#allocation25_spill] sm:$0xff] }
 0x182   :  { %v2157_v63 = vadd.s32 4294967169, %v1810_v40  ;;  %v4146_v6 = vstv %s4105_s2  ;;  %v1583_v48 = vor.u32 8388608, %v1582_v55  ;;  %v4150_v35 = vand.u32 8388607, %v4565_v34 }
 0x183   :  { %v1585_v45 = vadd.s32 1, %v2149_v50  ;;  %v4154_v11 = vmul.f32 %v4734_v42, %v4733_v57  ;;  %v4158_v30 = vmul.f32 %v4736_v25, %v4735_v47  ;;  %v2399_v50 = vmov 683565275  }
 0x184   :  { %v1816_v4 = vadd.s32 1, %v2157_v63  ;;  %v4160_v60 = vshll.u32 %v1583_v48, 8  ;;  %v2400_v63 = vmov 2475754826   ;;  %v2401_v22 = vmov 2131351028  }
 0x185   :  { %vm1586_vm0 = vcmp.gt.s32.totalorder %v1585_v45, 0  ;;  %v2402_v16 = vmov 2102212464   ;;  %v2403_v10 = vmov 920167782  }
 0x186   :  { %v1587_v58 = vsel %vm1586_vm0, %v1585_v45, 0  ;;  %vm1817_vm1 = vcmp.gt.s32.totalorder %v1816_v4, 0  ;;  %v2404_v18 = vmov 1326507024  }
 0x187   :  { %v1588_v39 = vshrl.u32 %v1587_v58, 5  ;;  %v1589_v2 = vand.u32 31, %v1587_v58  ;;  %v1818_v59 = vsel %vm1817_vm1, %v1816_v4, 0 }
 0x188   :  { %v4164_v56 = vshrl.u32 %v1818_v59, 5 }
 0x189   :  { %v1590_v55 = vsub.s32 32, %v1589_v2  ;;  %v1592_v40 = vshll.u32 %v2399_v50, %v1589_v2  ;;  %v1595_v34 = vshll.u32 %v2400_v63, %v1589_v2  ;;  %v1598_v23 = vshll.u32 %v2401_v22, %v1589_v2 }
 0x18a   :  { %v1601_v45 = vshll.u32 %v2402_v16, %v1589_v2  ;;  %v1604_v58 = vshll.u32 %v2403_v10, %v1589_v2  ;;  %vm1607_vm2 = vcmp.lt.s32.totalorder %v1588_v39, 1  ;;  %vm1608_vm3 = vcmp.lt.s32.totalorder %v1588_v39, 2 }
 0x18b   :  { %v1591_v51 = vshrl.u32 %v2399_v50, %v1590_v55  ;;  %v1593_v13 = vshrl.u32 %v2400_v63, %v1590_v55  ;;  %v1596_v48 = vshrl.u32 %v2401_v22, %v1590_v55  ;;  %v1599_v8 = vshrl.u32 %v2402_v16, %v1590_v55 }
 0x18c   :  { %v1602_v41 = vshrl.u32 %v2403_v10, %v1590_v55  ;;  %v1605_v21 = vshrl.u32 %v2404_v18, %v1590_v55  ;;  %vm1609_vm4 = vcmp.lt.s32.totalorder %v1588_v39, 3  ;;  %vm1610_vm5 = vcmp.lt.s32.totalorder %v1588_v39, 4 }
 0x18d   :  { %v1594_v1 = vor.u32 %v1593_v13, %v1592_v40  ;;  %v1597_v20 = vor.u32 %v1596_v48, %v1595_v34  ;;  %v1600_v32 = vor.u32 %v1599_v8, %v1598_v23  ;;  %v1820_v2 = vand.u32 31, %v1818_v59 }
 0x18e   :  { %v1603_v9 = vor.u32 %v1602_v41, %v1601_v45  ;;  %v1606_v61 = vor.u32 %v1605_v21, %v1604_v58  ;;  %vm1838_vm6 = vcmp.lt.s32.totalorder %v4164_v56, 1  ;;  %vm1839_vm8 = vcmp.lt.s32.totalorder %v4164_v56, 2 }
 0x18f   :  { %v1611_v4 = vsel %vm1607_vm2, %v1591_v51, %v1594_v1  ;;  %v1612_v36 = vsel %vm1610_vm5, %v1600_v32, 2102212464  ;;  %v1615_v44 = vsel %vm1607_vm2, %v1594_v1, %v1597_v20  ;;  %v1619_v33 = vsel %vm1607_vm2, %v1597_v20, %v1600_v32 }
 0x190   :  { %v1613_v55 = vsel %vm1609_vm4, %v1597_v20, %v1612_v36  ;;  %v1616_v46 = vsel %vm1610_vm5, %v1603_v9, 920167782  ;;  %v1620_v31 = vsel %vm1610_vm5, %v1606_v61, 1326507024  ;;  %v1821_v13 = vsub.s32 32, %v1820_v2 }
 0x191   :  { %v1614_v23 = vsel %vm1608_vm3, %v1611_v4, %v1613_v55  ;;  %v1617_v41 = vsel %vm1609_vm4, %v1600_v32, %v1616_v46  ;;  %v1621_v21 = vsel %vm1609_vm4, %v1603_v9, %v1620_v31  ;;  %v1823_v8 = vshll.u32 %v2399_v50, %v1820_v2 }
 0x192   :  { %v1618_v59 = vsel %vm1608_vm3, %v1615_v44, %v1617_v41  ;;  %v1622_v34 = vsel %vm1608_vm3, %v1619_v33, %v1621_v21  ;;  %v1630_v1 = vmul.u32 %v4160_v60, %v1614_v23  ;;  %v1822_v51 = vshrl.u32 %v2399_v50, %v1821_v13 }
 0x193   :  { %v4177_v40 = vmul.u32.u64.low %v4160_v60, %v1622_v34  ;;  %v4178_v36 = vmul.u32.u64.high %v4160_v60, %v1622_v34, %v4177_v40  ;;  %v4181_v61 = vmul.u32.u64.low %v4160_v60, %v1618_v59  ;;  %v4182_v20 = vmul.u32.u64.high %v4160_v60, %v1618_v59, %v4181_v61 }
 0x194   :  { %v1824_v32 = vshrl.u32 %v2400_v63, %v1821_v13  ;;  %v1826_v46 = vshll.u32 %v2400_v63, %v1820_v2  ;;  %v1827_v9 = vshrl.u32 %v2401_v22, %v1821_v13  ;;  %v1829_v31 = vshll.u32 %v2401_v22, %v1820_v2 }
 0x195   :  { %v1830_v45 = vshrl.u32 %v2402_v16, %v1821_v13  ;;  %v1832_v44 = vshll.u32 %v2402_v16, %v1820_v2  ;;  %v1833_v39 = vshrl.u32 %v2403_v10, %v1821_v13  ;;  %v1835_v33 = vshll.u32 %v2403_v10, %v1820_v2 }
 0x196   :  { %v1825_v58 = vor.u32 %v1824_v32, %v1823_v8  ;;  %v1828_v48 = vor.u32 %v1827_v9, %v1826_v46  ;;  %v1836_v50 = vshrl.u32 %v2404_v18, %v1821_v13  ;;  %vm1632_vm7 = vc.u32 %v4178_v36, %v4181_v61 }
 0x197   :  { %v1633_v60 = vadd.s32 1, %v4182_v20  ;;  %v1831_v4 = vor.u32 %v1830_v45, %v1829_v31  ;;  %v4737_v63 = vor.u32 8388608, %v4150_v35  ;;  %v1834_v55 = vor.u32 %v1833_v39, %v1832_v44 }
 0x198   :  { %v1837_v16 = vor.u32 %v1836_v50, %v1835_v33  ;;  %vm1840_vm9 = vcmp.lt.s32.totalorder %v4164_v56, 3  ;;  %vm1841_vm10 = vcmp.lt.s32.totalorder %v4164_v56, 4  ;;  %v1842_v18 = vsel %vm1838_vm6, %v1822_v51, %v1825_v58 }
 0x199   :  { %v1854_v22 = vshll.u32 %v4737_v63, 8  ;;  %v1634_v10 = vsel %vm1632_vm7, %v1633_v60, %v4182_v20  ;;  %v1846_v2 = vsel %vm1838_vm6, %v1825_v58, %v1828_v48  ;;  %v1843_v23 = vsel %vm1841_vm10, %v1831_v4, 2102212464 }
 0x19a   :  { %v1635_v13 = vadd.s32 %v1634_v10, %v1630_v1  ;;  %v1847_v35 = vsel %vm1841_vm10, %v1834_v55, 920167782  ;;  %v1850_v41 = vsel %vm1838_vm6, %v1828_v48, %v1831_v4  ;;  %v4205_v21 = vmul.f32 %v4734_v42, %v4735_v47 }
 0x19b   :  { %v1844_v8 = vsel %vm1840_vm9, %v1828_v48, %v1843_v23  ;;  %v1848_v59 = vsel %vm1840_vm9, %v1831_v4, %v1847_v35  ;;  %v1851_v34 = vsel %vm1841_vm10, %v1837_v16, 1326507024  ;;  %v4213_v1 = vmul.f32 %v4736_v25, %v4733_v57  ;;  %v2236_v23 = vld [vmem:[#allocation7 + $0x80] sm:$0xff] }
 0x19c   :  { %v1636_v51 = vadd.s32 536870912, %v1635_v13  ;;  %v1849_v40 = vsel %vm1839_vm8, %v1846_v2, %v1848_v59  ;;  %v1852_v42 = vsel %vm1840_vm9, %v1834_v55, %v1851_v34  ;;  %v1845_v47 = vsel %vm1839_vm8, %v1842_v18, %v1844_v8  ;;  %v2233_v18 = vld [vmem:[#allocation3 + $0x38] sm:$0xff]  ;;  %v2234_v2 = vld [vmem:[#allocation3 + $0x80] sm:$0xff] }
 0x19d   :  { %v1853_v20 = vsel %vm1839_vm8, %v1850_v41, %v1852_v42  ;;  %v4225_v32 = vmul.u32.u64.low %v1854_v22, %v1849_v40  ;;  %v4226_v46 = vmul.u32.u64.high %v1854_v22, %v1849_v40, %v4225_v32  ;;  %v1398_v57 = vadd.f32 %v4135_v24, %v4130_v38 }
 0x19e   :  { %v4231_v25 = vshrl.u32 %v1636_v51, 30  ;;  %v4233_v9 = vmul.u32.u64.low %v1854_v22, %v1853_v20  ;;  %v4234_v31 = vmul.u32.u64.high %v1854_v22, %v1853_v20, %v4233_v9  ;;  %v1426_v45 = vmul.f32 %v4146_v6, %v4141_v19 }
 0x19f   :  { %v4738_v44 = vsub.f32 %v4117_v52, %v4119_v17  ;;  %v1452_v39 = vadd.f32 %v4158_v30, %v4154_v11  ;;  %v1456_v33 = vstv %s4186_s11  ;;  %v1455_v38 = vsub.f32 %v4205_v21, %v4213_v1 }
 0x1a0   :  { %v1481_v24 = vmul.f32 %v4703_v26, %v3668_v37  ;;  %v1638_v58 = vshll.u32 %v4231_v25, 30  ;;  %v1861_v48 = vmul.u32 %v1854_v22, %v1845_v47  ;;  %v1482_v19 = vmul.f32 %v4704_v62, %v4702_v53 }
 0x1a1   :  { %v1428_v56 = vmul.f32 %v4146_v6, %v4738_v44  ;;  %v4254_v50 = vmul.f32 %v4703_v26, %v4702_v53  ;;  %v4258_v11 = vmul.f32 %v4704_v62, %v3668_v37  ;;  %v1864_v30 = vadd.s32 1, %v4226_v46  ;;  %v2238_v44 = vld [vmem:[#allocation3 + $0x88] sm:$0xff] }
 0x1a2   :  { %v1374_v60 = vadd.f32 %v4132_v28, %v4128_v54  ;;  %v4739_v4 = vsub.f32 %v4081_v12, %v4077_v0  ;;  %v4269_v22 = vsub.s32 %v1635_v13, %v1638_v58  ;;  %vm1863_vm11 = vc.u32 %v4234_v31, %v4225_v32  ;;  %v2235_v13 = vld [vmem:[#allocation7 + $0x38] sm:$0xff] }
 0x1a3   :  { %v1427_v37 = vadd.f32 %v1426_v45, %v4139_v3  ;;  %v1429_v53 = vadd.f32 %v1428_v56, %v1398_v57  ;;  %v1434_v62 = vsub.f32 %v4119_v17, %v4117_v52  ;;  %v1865_v55 = vsel %vm1863_vm11, %v1864_v30, %v4226_v46  ;;  %v2237_v45 = vld [vmem:[#allocation3 + $0x40] sm:$0xff] }
 0x1a4   :  { %v1404_v63 = vmul.f32 %v4739_v4, %v4090_v49  ;;  %v1457_v16 = vmul.f32 %v1456_v33, %v1452_v39  ;;  %v1459_v54 = vmul.f32 %v1456_v33, %v1455_v38  ;;  %v1641_v28 = vsub.s32 0, %v4269_v22 }
 0x1a5   :  { %v1866_v10 = vadd.s32 %v1865_v55, %v1861_v48  ;;  %v1483_v0 = vadd.f32 %v1482_v19, %v1481_v24  ;;  %v1486_v12 = vsub.f32 %v4254_v50, %v4258_v11  ;;  %v4281_v49 = vstv %s4219_s12 }
 0x1a6   :  { %v1512_v3 = vmul.f32 %v2234_v2, %v2233_v18  ;;  %v1513_v52 = vmul.f32 %v2236_v23, %v2235_v13  ;;  %v4283_v17 = vmul.f32 %v2235_v13, %v2234_v2  ;;  %v4285_v35 = vmul.f32 %v2236_v23, %v2233_v18 }
 0x1a7   :  { %v2150_v41 = vmin.u32 %v1641_v28, %v4269_v22  ;;  %v4290_v8 = vmul.f32 %v4703_v26, %v4057_v7  ;;  %v1405_v59 = vadd.f32 %v1404_v63, %v1374_v60  ;;  %v1435_v34 = vmul.f32 %v1434_v62, %v4146_v6 }
 0x1a8   :  { %v1867_v51 = vadd.s32 536870912, %v1866_v10  ;;  %v1458_v40 = vadd.f32 %v1457_v16, %v1427_v37  ;;  %v1460_v42 = vadd.f32 %v1459_v54, %v1429_v53  ;;  %v1465_v47 = vsub.f32 %v4213_v1, %v4205_v21  ;;  %v2239_v21 = vld [vmem:[#allocation7 + $0x40] sm:$0xff]  ;;  %v2240_v1 = vld [vmem:[#allocation7 + $0x88] sm:$0xff] }
 0x1a9   :  { %v1643_v20 = vclz %v2150_v41  ;;  %v1488_v46 = vmul.f32 %v4281_v49, %v1483_v0  ;;  %v1490_v57 = vmul.f32 %v4281_v49, %v1486_v12  ;;  %v4300_v9 = vstv %s4260_s13 }
 0x1aa   :  { %v4302_v26 = vshrl.u32 %v1867_v51, 30  ;;  %v1514_v7 = vadd.f32 %v1513_v52, %v1512_v3  ;;  %v1517_v6 = vsub.f32 %v4283_v17, %v4285_v35  ;;  %v1543_v56 = vmul.f32 %v2238_v44, %v2237_v45 }
 0x1ab   :  { %v2151_v39 = vadd.s32 4294967294, %v1643_v20  ;;  %v1544_v38 = vmul.f32 %v2240_v1, %v2239_v21  ;;  %v4306_v24 = vmul.f32 %v2239_v21, %v2238_v44  ;;  %v4308_v58 = vmul.f32 %v2240_v1, %v2237_v45 }
 0x1ac   :  { %v1869_v48 = vshll.u32 %v4302_v26, 30  ;;  %v1436_v19 = vadd.f32 %v1435_v34, %v1405_v59  ;;  %v1466_v30 = vmul.f32 %v1465_v47, %v1456_v33  ;;  %v1631_v60 = vadd.s32 %v4181_v61, %v4178_v36  ;;  %v4742_v47 = vld [vmem:[#allocation39_spill] sm:$0xff] }
 0x1ad   :  { %vm2152_vm12 = vcmp.lt.s32.totalorder %v2151_v39, 0  ;;  %v1489_v4 = vadd.f32 %v1488_v46, %v1458_v40  ;;  %v1491_v63 = vadd.f32 %v1490_v57, %v1460_v42  ;;  %v1519_v62 = vmul.f32 %v4300_v9, %v1514_v7 }
 0x1ae   :  { %v1646_v37 = vsel %vm2152_vm12, 0, %v2151_v39  ;;  %v4313_v53 = vsub.s32 %v1866_v10, %v1869_v48  ;;  %v1521_v28 = vmul.f32 %v4300_v9, %v1517_v6  ;;  %v1545_v0 = vadd.f32 %v1544_v38, %v1543_v56  ;;  %v4745_v38 = vld [vmem:[#allocation28_spill] sm:$0xff] }
 0x1af   :  { %v1647_v55 = vsub.s32 32, %v1646_v37  ;;  %v1648_v16 = vshll.u32 %v4269_v22, %v1646_v37  ;;  %v1651_v54 = vsub.s32 4294967266, %v1646_v37  ;;  %v1548_v33 = vsub.f32 %v4306_v24, %v4308_v58 }
 0x1b0   :  { %v1872_v36 = vsub.s32 0, %v4313_v53  ;;  %v1496_v61 = vsub.f32 %v4258_v11, %v4254_v50  ;;  %v1549_v12 = vstv %s4295_s14  ;;  %v1279_v2 = vsub.f32 %v4067_v5, %v4097_v27 }
 0x1b1   :  { %v1649_v10 = vshrl.u32 %v1631_v60, %v1647_v55  ;;  %v1652_v18 = vadd.s32 127, %v1651_v54  ;;  %v1282_v22 = vadd.f32 %v4101_v43, %v4070_v15  ;;  %v4330_v3 = vsub.f32 %v4084_v14, %v4126_v29 }
 0x1b2   :  { %v2158_v13 = vmin.u32 %v1872_v36, %v4313_v53  ;;  %v1467_v23 = vadd.f32 %v1466_v30, %v1436_v19  ;;  %v1520_v50 = vadd.f32 %v1519_v62, %v1489_v4  ;;  %v1522_v41 = vadd.f32 %v1521_v28, %v1491_v63 }
 0x1b3   :  { %v1650_v11 = vor.u32 %v1649_v10, %v1648_v16  ;;  %v1653_v52 = vshll.u32 %v1652_v18, 23  ;;  %v1550_v59 = vmul.f32 %v1549_v12, %v1545_v0  ;;  %v1552_v5 = vmul.f32 %v1549_v12, %v1548_v33 }
 0x1b4   :  { %v1874_v27 = vclz %v2158_v13  ;;  %v1497_v34 = vmul.f32 %v1496_v61, %v4281_v49  ;;  %v1527_v15 = vsub.f32 %v4285_v35, %v4283_v17  ;;  %v4740_v29 = vstv %s3944_s22  ;;  %v4749_v13 = vld [vmem:[#allocation34_spill] sm:$0xff] }
 0x1b5   :  { %v1654_v43 = vor.u32 4788187, %v1653_v52  ;;  %v1657_v14 = vcvt.s32.f32 %v1650_v11  ;;  %v1286_v51 = vmul.f32 %v4740_v29, %v1279_v2  ;;  %v4741_v40 = vstv %s3946_s25  ;;  %v4751_v11 = vld [vmem:[#allocation29_spill] sm:$0xff]  ;;  %v4752_v52 = vld [vmem:[#allocation30_spill] sm:$0xff] }
 0x1b6   :  { %v1288_v42 = vmul.f32 %v4741_v40, %v1282_v22  ;;  %v1300_v20 = vadd.f32 %v4290_v8, %v4742_v47  ;;  %v2159_v46 = vadd.s32 4294967294, %v1874_v27  ;;  %v4743_v57 = vmov %v4740_v29 }
 0x1b7   :  { %v1291_v7 = vmul.f32 %v4743_v57, %v1282_v22  ;;  %v4744_v6 = vmov %v4741_v40  ;;  %v1655_v44 = vand.u32 2147483647, %v1654_v43  ;;  %v1661_v49 = vsub.s32 4, %v4231_v25 }
 0x1b8   :  { %v1292_v45 = vmul.f32 %v4744_v6, %v1279_v2  ;;  %v4347_v56 = vadd.f32 %v1550_v59, %v1520_v50  ;;  %v1553_v17 = vadd.f32 %v1552_v5, %v1522_v41  ;;  %v1862_v35 = vadd.s32 %v4225_v32, %v4234_v31  ;;  %v4747_v31 = vld [vmem:[#allocation37_spill] sm:$0xff] }
 0x1b9   :  { %vm2160_vm13 = vcmp.lt.s32.totalorder %v2159_v46, 0  ;;  %v1498_v39 = vadd.f32 %v1497_v34, %v1467_v23  ;;  %v1528_v21 = vmul.f32 %v1527_v15, %v4300_v9  ;;  %v1658_v1 = vmul.f32 %v1657_v14, %v1655_v44  ;;  %v4748_v9 = vld [vmem:[#allocation26_spill] sm:$0xff]  ;;  %v4750_v23 = vld [vmem:[#allocation33_spill] sm:$0xff]  ;;  %v4759_v44 = vld [vmem:[#allocation36_spill] sm:$0xff] }
 0x1ba   :  { %v1877_v8 = vsel %vm2160_vm13, 0, %v2159_v46  ;;  %vm1577_vm14 = vcmp.lt.s32.totalorder %v4745_v38, 0  ;;  %v1558_v60 = vsub.f32 %v4308_v58, %v4306_v24  ;;  %v4746_v4 = vand.u32 2147483647, %v4745_v38 }
 0x1bb   :  { %v1878_v48 = vsub.s32 32, %v1877_v8  ;;  %v1879_v19 = vshll.u32 %v4313_v53, %v1877_v8  ;;  %v1882_v30 = vsub.s32 4294967266, %v1877_v8  ;;  %v1659_v63 = vxor.u32 2147483648, %v1658_v1 }
 0x1bc   :  { %vm1576_vm15 = vcmp.le.f32.partialorder %v4746_v4, 0.7853982  ;;  %v1662_v32 = vsel %vm1577_vm14, %v1661_v49, %v4231_v25  ;;  %v1782_v37 = vmul.f32 %v4747_v31, %v1553_v17  ;;  %v1783_v62 = vmul.f32 %v4748_v9, %v4347_v56 }
 0x1bd   :  { %v1880_v55 = vshrl.u32 %v1862_v35, %v1878_v48  ;;  %v1883_v16 = vadd.s32 127, %v1882_v30  ;;  %v1289_v54 = vsub.f32 %v1286_v51, %v1288_v42  ;;  %v1293_v28 = vadd.f32 %v1292_v45, %v1291_v7  ;;  %v4756_v51 = vld [vmem:[#allocation41_spill] sm:$0xff]  ;;  %v4757_v42 = vld [vmem:[#allocation40_spill] sm:$0xff] }
 0x1be   :  { %v1529_v53 = vadd.f32 %v1528_v21, %v1498_v39  ;;  %v1660_v0 = vsel %vm1577_vm14, %v1659_v63, %v1658_v1  ;;  %v1664_v24 = vsel %vm1576_vm15, 0, %v1662_v32  ;;  %v1559_v25 = vmul.f32 %v1558_v60, %v1549_v12  ;;  %v4760_v21 = vld [vmem:[#allocation42_spill] sm:$0xff]  ;;  %v4761_v1 = vld [vmem:[#allocation35_spill] sm:$0xff]  ;;  %v4764_v63 = vld [vmem:[#allocation44_spill] sm:$0xff] }
 0x1bf   :  { %v1663_v33 = vsel %vm1576_vm15, %v4745_v38, %v1660_v0  ;;  %v1881_v58 = vor.u32 %v1880_v55, %v1879_v19  ;;  %v1884_v36 = vshll.u32 %v1883_v16, 23  ;;  %v1786_v61 = vmul.f32 %v4747_v31, %v4347_v56  ;;  %v4763_v60 = vld [vmem:[#allocation43_spill] sm:$0xff] }
 0x1c0   :  { %2189 = vcosq.f32 %v1663_v33  ;;  %v1787_v10 = vmul.f32 %v4748_v9, %v1553_v17  ;;  %v1784_v18 = vadd.f32 %v1783_v62, %v1782_v37  ;;  %v1255_v50 = vsub.f32 %v4750_v23, %v4749_v13  ;;  %v4765_v13 = vld [vmem:[#allocation27_spill] sm:$0xff] }
 0x1c1   :  { %2191 = vsinq.f32 %v1663_v33  ;;  %v1885_v2 = vor.u32 4788187, %v1884_v36  ;;  %v1888_v22 = vcvt.s32.f32 %v1881_v58  ;;  %v1259_v41 = vadd.f32 %v4752_v52, %v4751_v11 }
 0x1c2   :  { %v1771_v59 = vadd.s32 3, %v1664_v24  ;;  %v1892_v12 = vsub.s32 4, %v4302_v26  ;;  %v4753_v5 = vstv %s3997_s1  ;;  %v4754_v34 = vstv %s3999_s29 }
 0x1c3   :  { %v1304_v27 = vmul.f32 %v4753_v5, %v4330_v3  ;;  %v1306_v15 = vmul.f32 %v4754_v34, %v1300_v20  ;;  %v4755_v43 = vmov %v4753_v5  ;;  %v1886_v29 = vand.u32 2147483647, %v1885_v2 }
 0x1c4   :  { %v1309_v14 = vmul.f32 %v4755_v43, %v1300_v20  ;;  %v1290_v40 = vadd.f32 %v1289_v54, %v4756_v51  ;;  %v1294_v47 = vadd.f32 %v1293_v28, %v4757_v42  ;;  %v4758_v46 = vmov %v4754_v34 }
 0x1c5   :  { %v1310_v57 = vmul.f32 %v4758_v46, %v4330_v3  ;;  %v1560_v7 = vadd.f32 %v1559_v25, %v1529_v53  ;;  %v1785_v6 = vsub.f32 0.0, %v1784_v18  ;;  %v1788_v45 = vsub.f32 %v1786_v61, %v1787_v10 }
 0x1c6   :  { %vm1808_vm0 = vcmp.lt.s32.totalorder %v4759_v44, 0  ;;  %v1889_v49 = vmul.f32 %v1888_v22, %v1886_v29  ;;  %v1668_v17 = vand.u32 3, %v1664_v24  ;;  %v1772_v35 = vand.u32 3, %v1771_v59 }
 0x1c7   :  { %v1893_v39 = vsel %vm1808_vm0, %v1892_v12, %v4302_v26  ;;  %v1256_v20 = vadd.f32 %v1255_v50, %v4760_v21  ;;  %v1260_v8 = vadd.f32 %v1259_v41, %v4761_v1  ;;  %v4762_v48 = vand.u32 2147483647, %v4759_v44 }
 0x1c8   :  { %v1890_v19 = vxor.u32 2147483648, %v1889_v49  ;;  %v1307_v30 = vsub.f32 %v1304_v27, %v1306_v15  ;;  %v1311_v3 = vadd.f32 %v1310_v57, %v1309_v14  ;;  %v2013_v4 = vmul.f32 %v4763_v60, %v1560_v7 }
 0x1c9   :  { %vm1807_vm1 = vcmp.le.f32.partialorder %v4762_v48, 0.7853982  ;;  %v2014_v32 = vmul.f32 %v4764_v63, %v4347_v56  ;;  %v1792_v37 = vadd.f32 %v1785_v6, %v1290_v40  ;;  %v1799_v62 = vadd.f32 %v1788_v45, %v1294_v47 }
 0x1ca   :  { %v1891_v55 = vsel %vm1808_vm0, %v1890_v19, %v1889_v49  ;;  %v1895_v16 = vsel %vm1807_vm1, 0, %v1893_v39  ;;  %v2190_v26 = vpop.eup %2189  ;;  %vm1669_vm2 = vcmp.lt.s32.totalorder %v1668_v17, 2  ;;  %vm1673_vm3 = vcmp.eq.s32.totalorder %v1668_v17, 2 }
 0x1cb   :  { %vm1777_vm4 = vcmp.eq.s32.totalorder %v1772_v35, 2  ;;  %v1894_v54 = vsel %vm1807_vm1, %v4759_v44, %v1891_v55  ;;  %v2192_v28 = vpop.eup %2191  ;;  %vm1670_vm5 = vcmp.eq.s32.totalorder %v1668_v17, 0  ;;  %v1674_v53 = vxor.u32 2147483648, %v2190_v26 }
 0x1cc   :  { %vm1774_vm6 = vcmp.eq.s32.totalorder %v1772_v35, 0  ;;  %2193 = vcosq.f32 %v1894_v54  ;;  %v1671_v0 = vxor.u32 2147483648, %v2192_v28  ;;  %vm1773_vm7 = vcmp.lt.s32.totalorder %v1772_v35, 2 }
 0x1cd   :  { %2195 = vsinq.f32 %v1894_v54  ;;  %v2002_v33 = vadd.s32 3, %v1895_v16  ;;  %vm1667_vm8 = vweird.f32 %v4745_v38  ;;  %v1675_v24 = vsel %vm1673_vm3, %v1674_v53, %v2192_v28 }
 0x1ce   :  { %v1779_v58 = vsel %vm1777_vm4, %v1674_v53, %v2192_v28  ;;  %v2017_v36 = vmul.f32 %v4763_v60, %v4347_v56  ;;  %v1672_v25 = vsel %vm1670_vm5, %v2190_v26, %v1671_v0  ;;  %v1776_v61 = vsel %vm1774_vm6, %v2190_v26, %v1671_v0 }
 0x1cf   :  { %v2015_v10 = vadd.f32 %v2014_v32, %v2013_v4  ;;  %v2018_v18 = vmul.f32 %v4764_v63, %v1560_v7  ;;  %v1676_v2 = vsel %vm1669_vm2, %v1672_v25, %v1675_v24  ;;  %v1780_v22 = vsel %vm1773_vm7, %v1776_v61, %v1779_v58 }
 0x1d0   :  { %v1793_v23 = vmul.f32 %v1792_v37, %v4765_v13  ;;  %v1800_v50 = vmul.f32 %v1799_v62, %v4765_v13  ;;  %v1677_v11 = vsel %vm1667_vm8, nan, %v1676_v2  ;;  %v1781_v52 = vsel %vm1667_vm8, nan, %v1780_v22 }
 0x1d1   :  { %v1899_v38 = vand.u32 3, %v1895_v16  ;;  %v2003_v41 = vand.u32 3, %v2002_v33  ;;  %v1789_v59 = vmul.f32 %v4763_v60, %v1677_v11  ;;  %v1790_v56 = vmul.f32 %v4764_v63, %v1781_v52 }
 0x1d2   :  { %v1796_v12 = vmul.f32 %v4763_v60, %v1781_v52  ;;  %v1797_v5 = vmul.f32 %v4764_v63, %v1677_v11  ;;  %v1308_v27 = vadd.f32 %v1307_v30, %v1256_v20  ;;  %v2016_v34 = vsub.f32 0.0, %v2015_v10 }
 0x1d3   :  { %v1312_v15 = vadd.f32 %v1311_v3, %v1260_v8  ;;  %v1791_v43 = vsub.f32 %v1789_v59, %v1790_v56  ;;  %v2019_v29 = vsub.f32 %v2017_v36, %v2018_v18  ;;  %vm1904_vm9 = vcmp.eq.s32.totalorder %v1899_v38, 2 }
 0x1d4   :  { %v1798_v14 = vadd.f32 %v1797_v5, %v1796_v12  ;;  %vm2008_vm10 = vcmp.eq.s32.totalorder %v2003_v41, 2  ;;  %vm1901_vm11 = vcmp.eq.s32.totalorder %v1899_v38, 0  ;;  %vm2005_vm12 = vcmp.eq.s32.totalorder %v2003_v41, 0 }
 0x1d5   :  { %v1794_v40 = vadd.f32 %v1793_v23, %v1791_v43  ;;  %v2023_v57 = vadd.f32 %v2016_v34, %v1308_v27  ;;  %vm1900_vm13 = vcmp.lt.s32.totalorder %v1899_v38, 2  ;;  %vm2004_vm14 = vcmp.lt.s32.totalorder %v2003_v41, 2 }
 0x1d6   :  { %v2194_v51 = vpop.eup %2193  ;;  %v1801_v42 = vadd.f32 %v1800_v50, %v1798_v14  ;;  %v2031_v6 = vadd.f32 %v2019_v29, %v1312_v15  ;;  %vm1898_vm15 = vweird.f32 %v4759_v44 }
 0x1d7   :  { %v2196_v47 = vpop.eup %2195  ;;  %v1905_v46 = vxor.u32 2147483648, %v2194_v51  ;;  %1795 = vst [vmem:[#allocation15] sm:$0xff] %v1794_v40  ;;  %v2024_v8 = vmul.f32 %v2023_v57, %v4765_v13 }
 0x1d8   :  { %1802 = vst [vmem:[#allocation16] sm:$0xff] %v1801_v42  ;;  %v1902_v7 = vxor.u32 2147483648, %v2196_v47  ;;  %v2032_v48 = vmul.f32 %v2031_v6, %v4765_v13 }
 0x1d9   :  { %v1906_v45 = vsel %vm1904_vm9, %v1905_v46, %v2196_v47  ;;  %v2010_v49 = vsel %vm2008_vm10, %v1905_v46, %v2196_v47 }
 0x1da   :  { %v1903_v17 = vsel %vm1901_vm11, %v2194_v51, %v1902_v7  ;;  %v2007_v35 = vsel %vm2005_vm12, %v2194_v51, %v1902_v7 }
 0x1db   :  { %v1907_v39 = vsel %vm1900_vm13, %v1903_v17, %v1906_v45  ;;  %v2011_v21 = vsel %vm2004_vm14, %v2007_v35, %v2010_v49 }
 0x1dc   :  { %v1908_v20 = vsel %vm1898_vm15, nan, %v1907_v39  ;;  %v2012_v1 = vsel %vm1898_vm15, nan, %v2011_v21 }
 0x1dd   :  { %v2020_v19 = vmul.f32 %v4747_v31, %v1908_v20  ;;  %v2021_v30 = vmul.f32 %v4748_v9, %v2012_v1  ;;  %v2028_v3 = vmul.f32 %v4747_v31, %v2012_v1  ;;  %v2029_v44 = vmul.f32 %v4748_v9, %v1908_v20 }
 0x1df   :  { %v2022_v60 = vsub.f32 %v2020_v19, %v2021_v30  ;;  %v2030_v4 = vadd.f32 %v2029_v44, %v2028_v3 }
 0x1e1   :  { %v2025_v63 = vadd.f32 %v2024_v8, %v2022_v60  ;;  %v2033_v32 = vadd.f32 %v2032_v48, %v2030_v4 }
 0x1e3   :  { %2027 = vst [vmem:[#allocation15 + $0x8] sm:$0xff] %v2025_v63  ;;  %2035 = vst [vmem:[#allocation16 + $0x8] sm:$0xff] %v2033_v32 }
 0x1e4   :  { %2344 = shalt.err (!%p2341_p12)
}
 0x1e5   :  { %s2345_s4 = scalar_lea.hbm %s4456_s8, 256 }
 0x1e6   :  { %p2346_p13 = scmp.ne.s32.totalorder %s4456_s8, %s2345_s4  ;;  %p2349_p0 = scmp.lt.u32.totalorder %s2345_s4, %s4456_s8 }
 0x1e8   :  { %p2351_p1 = pnand %p2349_p0, %p2346_p13 }
 0x1ea   :  { %2354 = shalt.err (!%p2351_p1)
}
 0x1eb   :  { %2047 = dma.vmem_to_hbm [thread:$0]  %s2042_s17, 256, %s4456_s8, [#allocation5], %s2393_s23, %s2393_s23, %s2394_s24  }
 0x1ec   :  { %s2355_s28 = scalar_lea.vmem %s4411_s0, 256  ;;  %p2360_p3 = scmp.lt.s32.totalorder %s4411_s0, %s4411_s0 }
 0x1ed   :  { %p2356_p2 = scmp.ne.s32.totalorder %s4411_s0, %s2355_s28  ;;  %p2361_p4 = scmp.lt.s32.totalorder %s2355_s28, %s2355_s28 }
 0x1ef   :  { %p2362_p5 = por %p2361_p4, %p2360_p3 }
 0x1f1   :  { %p2363_p6 = pnand %p2362_p5, %p2356_p2 }
 0x1f3   :  { %2366 = shalt.err (!%p2363_p6)
}
 0x1f4   :  { %s2367_s5 = scalar_lea.hbm %s4457_s9, 256 }
 0x1f5   :  { %p2368_p7 = scmp.ne.s32.totalorder %s4457_s9, %s2367_s5  ;;  %p2371_p8 = scmp.lt.u32.totalorder %s2367_s5, %s4457_s9 }
 0x1f7   :  { %p2373_p9 = pnand %p2371_p8, %p2368_p7 }
 0x1f9   :  { %2376 = shalt.err (!%p2373_p9)
}
 0x1fa   :  { %2059 = dma.vmem_to_hbm [thread:$0]  %s4411_s0, 256, %s4457_s9, [#allocation17], %s2393_s23, %s2393_s23, %s2394_s24  }
 0x1fb   :  { %2387 = dma.done.wait [#allocation5], 256  }
 0x1fc   :  { %2388 = vsyncadd [#allocation5], 4294967040 }
 0x1fd   :  { %2389 = dma.done.wait [#allocation17], 256  }
 0x1fe   :  { %2390 = vsyncadd [#allocation17], 4294967040 }
 0x1ff   :  { %2066 = vsyncpa [#allocation4], 1 }
 0x200   :  { %2067 = vsyncpa [#allocation8], 1 }
 0x201   :  { %2068 = vsyncpa [#allocation5], 1 }
 0x202   :  { %2069 = vsyncpa [#allocation17], 1 }
 0x203   :  { %2070 = vsyncpa [#allocation6], 1 }
 0x204   :  { %2071 = vsyncpa [#allocation11], 1 }
 0x205   :  { %2072 = vsyncpa [#allocation14], 1 }

</bundles_post_ra>
